<compile_context>
chip_gen: v5e
topology: v5e:2x2
jax: 0.10.0
libtpu: 0.0.40
codegen_flags: <defaults>
</compile_context>

<pallas_src>
import functools
import math

import jax
import jax.numpy as jnp
from jax.experimental import pallas as pl
from jax.experimental.pallas import tpu as pltpu


def _full_spec(shape):
    nd = len(shape)
    return pl.BlockSpec(shape, lambda i, _nd=nd: (0,) * _nd)


def _pick_row_tile(n):
    for c in (512, 256, 128, 64, 32, 16, 8):
        if n % c == 0:
            return c
    return n


# ---------------------------------------------------------------------------
# Kernel 1: fused conv3x3 (as matmul) + bias + ReLU + global average pool.
# grid = (image, row_tile); row_tile is a reduction axis -> VMEM accumulator.
# ---------------------------------------------------------------------------
def _conv_pool_kernel(cols_ref, w_ref, b_ref, o_ref, acc_ref, *, inv_hw):
    r = pl.program_id(1)

    @pl.when(r == 0)
    def _init():
        acc_ref[...] = jnp.zeros_like(acc_ref)

    x = cols_ref[0]                                               # (TM, Kpad) bf16
    y = jnp.dot(x, w_ref[...], preferred_element_type=jnp.float32)
    y = jnp.maximum(y + b_ref[...], 0.0)                          # bias + ReLU (f32)
    acc_ref[...] += jnp.sum(y, axis=0, keepdims=True)

    @pl.when(r == pl.num_programs(1) - 1)
    def _finalize():
        o_ref[0] = acc_ref[...] * inv_hw


def _im2col_same_3x3(x_nchw):
    B, C, H, W = x_nchw.shape
    xp = jnp.pad(x_nchw, ((0, 0), (0, 0), (1, 1), (1, 1)))
    patches = [xp[:, :, i:i + H, j:j + W] for i in range(3) for j in range(3)]
    p = jnp.stack(patches, axis=2)                                # (B, C, 9, H, W)
    return p.transpose(0, 3, 4, 1, 2).reshape(B, H * W, C * 9)    # (B, HW, C*9)


def image_features(x_nchw, conv_w, conv_b):
    """Synthetic baseModel minus last child: Conv3x3(pad=1) -> ReLU -> global avg pool."""
    B, C, H, W = x_nchw.shape
    Cout = conv_w.shape[0]
    K = C * 9
    Kpad = ((K + 31) // 32) * 32          # pad ragged K=27 -> 32 (tile friendly)
    HW = H * W

    cols = _im2col_same_3x3(x_nchw)                               # small JAX glue
    cols = jnp.pad(cols, ((0, 0), (0, 0), (0, Kpad - K))).astype(jnp.bfloat16)
    w2d = jnp.pad(conv_w.reshape(Cout, K).T,
                  ((0, Kpad - K), (0, 0))).astype(jnp.bfloat16)   # (Kpad, Cout)
    bias = conv_b.reshape(1, Cout).astype(jnp.float32)

    TM = _pick_row_tile(HW)
    grid = (B, HW // TM)
    cost = pl.CostEstimate(
        flops=int(2 * B * HW * Kpad * Cout),
        transcendentals=0,
        bytes_accessed=int(B * HW * Kpad * 2 + Kpad * Cout * 2 + B * Cout * 4),
    )
    out = pl.pallas_call(
        functools.partial(_conv_pool_kernel, inv_hw=1.0 / float(HW)),
        grid=grid,
        in_specs=[
            pl.BlockSpec((1, TM, Kpad), lambda b, r: (b, r, 0)),
            pl.BlockSpec((Kpad, Cout), lambda b, r: (0, 0)),
            pl.BlockSpec((1, Cout), lambda b, r: (0, 0)),
        ],
        out_specs=pl.BlockSpec((1, 1, Cout), lambda b, r: (b, 0, 0)),
        out_shape=jax.ShapeDtypeStruct((B, 1, Cout), jnp.float32),
        scratch_shapes=[pltpu.VMEM((1, Cout), jnp.float32)],
        compiler_params=pltpu.CompilerParams(
            dimension_semantics=("parallel", "arbitrary"),
            vmem_limit_bytes=32 * 1024 * 1024,
        ),
        cost_estimate=cost,
    )(cols, w2d, bias)
    return out.reshape(B, Cout)


# ---------------------------------------------------------------------------
# Kernel 2: the whole TransformerEncoder (all layers) fused into ONE
# pallas_call.  grid = (num_layers,); layer weights are streamed per grid step
# while the activation stays resident in the VMEM output block.
# ---------------------------------------------------------------------------
def _encoder_stack_kernel(x_ref, wq_ref, bq_ref, wk_ref, bk_ref, wv_ref, bv_ref,
                          msel_ref, mexp_ref, wo_ref, bo_ref,
                          g1_ref, be1_ref, w1_ref, b1_ref, w2_ref, b2_ref,
                          g2_ref, be2_ref, o_ref, attn_ref, *, S, N, scale):
    @pl.when(pl.program_id(0) == 0)
    def _seed():
        o_ref[...] = x_ref[...]                                   # layer-0 input

    x = o_ref[...]                                                # (S*N, H) f32
    H = x.shape[-1]
    xb = x.astype(jnp.bfloat16)
    q = jnp.dot(xb, wq_ref[0], preferred_element_type=jnp.float32) + bq_ref[0]
    k = jnp.dot(xb, wk_ref[0], preferred_element_type=jnp.float32) + bk_ref[0]
    v = jnp.dot(xb, wv_ref[0], preferred_element_type=jnp.float32) + bv_ref[0]
    msel = msel_ref[...]                                          # (H, nhead) 0/1 selector
    mexp = mexp_ref[...]                                          # (nhead, H) expander

    # Head-batched attention over the S "sequence" positions (S == batch of the
    # outer model; PyTorch batch_first=False quirk).  Everything stays
    # lane-dense with last dim == H.
    for s in range(S):
        q_s = q[s * N:(s + 1) * N, :]                             # (N, H)
        logits = []
        for t in range(S):
            k_t = k[t * N:(t + 1) * N, :]
            logits.append(scale * jnp.dot(q_s * k_t, msel,
                                          preferred_element_type=jnp.float32))
        m = logits[0]
        for t in range(1, S):
            m = jnp.maximum(m, logits[t])
        exps = [jnp.exp(lg - m) for lg in logits]                 # each (N, nhead)
        denom = exps[0]
        for t in range(1, S):
            denom = denom + exps[t]
        inv = pl.reciprocal(denom, approx=True)
        out_s = jnp.zeros((N, H), jnp.float32)
        for t in range(S):
            p_full = jnp.dot(exps[t] * inv, mexp,
                             preferred_element_type=jnp.float32)  # (N, H)
            out_s = out_s + p_full * v[t * N:(t + 1) * N, :]
        attn_ref[s * N:(s + 1) * N, :] = out_s

    o = jnp.dot(attn_ref[...].astype(jnp.bfloat16), wo_ref[0],
                preferred_element_type=jnp.float32) + bo_ref[0]

    # residual + LayerNorm1 (f32)
    h1 = x + o
    mu = jnp.mean(h1, axis=-1, keepdims=True)
    d = h1 - mu
    var = jnp.mean(d * d, axis=-1, keepdims=True)
    h1 = d * jax.lax.rsqrt(var + 1e-5) * g1_ref[0] + be1_ref[0]

    # feed-forward (bf16 matmuls, f32 accumulate)
    f = jnp.dot(h1.astype(jnp.bfloat16), w1_ref[0],
                preferred_element_type=jnp.float32) + b1_ref[0]
    f = jnp.maximum(f, 0.0)
    f = jnp.dot(f.astype(jnp.bfloat16), w2_ref[0],
                preferred_element_type=jnp.float32) + b2_ref[0]

    # residual + LayerNorm2
    h2 = h1 + f
    mu2 = jnp.mean(h2, axis=-1, keepdims=True)
    d2 = h2 - mu2
    var2 = jnp.mean(d2 * d2, axis=-1, keepdims=True)
    o_ref[...] = d2 * jax.lax.rsqrt(var2 + 1e-5) * g2_ref[0] + be2_ref[0]


def motif_encoder(x2, layers, *, S, N, nhead):
    """Run all TransformerEncoderLayers in a single fused pallas_call."""
    R, H = x2.shape
    nl = len(layers)
    F = layers[0]['w_ff1'].shape[1]
    dh = H // nhead
    scale = 1.0 / math.sqrt(dh)
    msel = (jnp.arange(H)[:, None] // dh ==
            jnp.arange(nhead)[None, :]).astype(jnp.float32)       # (H, nhead)
    mexp = msel.T                                                 # (nhead, H)

    def stack_w(name):
        return jnp.stack([lp[name] for lp in layers], 0).astype(jnp.bfloat16)

    def stack_row(name):
        return jnp.stack([lp[name].reshape(1, -1) for lp in layers],
                         0).astype(jnp.float32)

    ins = [x2,
           stack_w('w_q'), stack_row('b_q'),
           stack_w('w_k'), stack_row('b_k'),
           stack_w('w_v'), stack_row('b_v'),
           msel, mexp,
           stack_w('w_out'), stack_row('b_out'),
           stack_row('ln1_g'), stack_row('ln1_b'),
           stack_w('w_ff1'), stack_row('b_ff1'),
           stack_w('w_ff2'), stack_row('b_ff2'),
           stack_row('ln2_g'), stack_row('ln2_b')]

    def spec_for(a):
        if a.ndim == 3:       # stacked per-layer tensor -> stream layer l
            _, d0, d1 = a.shape
            return pl.BlockSpec((1, d0, d1), lambda l: (l, 0, 0))
        return pl.BlockSpec(a.shape, lambda l: (0, 0))            # shared / input

    cost = pl.CostEstimate(
        flops=int(nl * (2 * R * H * H * 4 + 4 * R * H * F + 4 * S * S * N * H)),
        transcendentals=int(nl * (S * S * N * nhead + 2 * R)),
        bytes_accessed=int(2 * R * H * 4 + nl * (4 * H * H * 2 + 2 * H * F * 2)),
    )
    return pl.pallas_call(
        functools.partial(_encoder_stack_kernel, S=S, N=N, scale=scale),
        grid=(nl,),
        in_specs=[spec_for(a) for a in ins],
        out_specs=pl.BlockSpec((R, H), lambda l: (0, 0)),
        out_shape=jax.ShapeDtypeStruct((R, H), jnp.float32),
        scratch_shapes=[pltpu.VMEM((R, H), jnp.float32)],
        compiler_params=pltpu.CompilerParams(
            dimension_semantics=("arbitrary",),
            vmem_limit_bytes=32 * 1024 * 1024,
        ),
        cost_estimate=cost,
    )(*ins)


# ---------------------------------------------------------------------------
# Kernel 3: fused head = means + (concat via row-split weights) + ResidualLayer
#           (relu(fc) + adjust_dim) + fc2.
# ---------------------------------------------------------------------------
def _head_kernel(x1_ref, x2_ref, motif_ref, dist_ref,
                 wf1_ref, wf2_ref, wfm_ref, wfd_ref, bf_ref,
                 wa1_ref, wa2_ref, wam_ref, wad_ref, ba_ref,
                 w2_ref, b2_ref, o_ref):
    mm = jnp.mean(motif_ref[...], axis=1).astype(jnp.bfloat16)    # (B, H)
    dm = jnp.mean(dist_ref[...], axis=1).astype(jnp.bfloat16)     # (B, H)
    a1 = x1_ref[...].astype(jnp.bfloat16)                         # (B, 512)
    a2 = x2_ref[...].astype(jnp.bfloat16)                         # (B, 512)

    def fused_linear(wa, wb, wm, wd, b):
        acc = jnp.dot(a1, wa[...], preferred_element_type=jnp.float32)
        acc = acc + jnp.dot(a2, wb[...], preferred_element_type=jnp.float32)
        acc = acc + jnp.dot(mm, wm[...], preferred_element_type=jnp.float32)
        acc = acc + jnp.dot(dm, wd[...], preferred_element_type=jnp.float32)
        return acc + b[...]

    fc = jnp.maximum(fused_linear(wf1_ref, wf2_ref, wfm_ref, wfd_ref, bf_ref), 0.0)
    adj = fused_linear(wa1_ref, wa2_ref, wam_ref, wad_ref, ba_ref)
    h = (fc + adj).astype(jnp.bfloat16)                           # (B, 512)
    o_ref[...] = jnp.dot(h, w2_ref[...],
                         preferred_element_type=jnp.float32) + b2_ref[...]


def fused_head(x1f, x2f, motif3d, dist3d, params):
    B, img = x1f.shape
    H = motif3d.shape[-1]
    NC = params['fc2_w'].shape[1]
    split_idx = [img, 2 * img, 2 * img + H]
    bf16 = lambda a: a.astype(jnp.bfloat16)
    row = lambda a: a.reshape(1, -1).astype(jnp.float32)

    wf1, wf2, wfm, wfd = [bf16(w) for w in
                          jnp.split(params['res_fc_w'], split_idx, axis=0)]
    wa1, wa2, wam, wad = [bf16(w) for w in
                          jnp.split(params['res_adj_w'], split_idx, axis=0)]

    ins = [x1f, x2f, motif3d, dist3d,
           wf1, wf2, wfm, wfd, row(params['res_fc_b']),
           wa1, wa2, wam, wad, row(params['res_adj_b']),
           bf16(params['fc2_w']), row(params['fc2_b'])]

    return pl.pallas_call(
        _head_kernel,
        grid=(1,),
        in_specs=[_full_spec(a.shape) for a in ins],
        out_specs=_full_spec((B, NC)),
        out_shape=jax.ShapeDtypeStruct((B, NC), jnp.float32),
    )(*ins)


# ---------------------------------------------------------------------------
# Forward
# ---------------------------------------------------------------------------
def mol_ddi_forward(params, x1, x2, motif_seq, distance_matrix, nhead=4):
    B = x1.shape[0]

    # Both images share the conv weights -> one fused conv+relu+pool call.
    feats = image_features(jnp.concatenate([x1, x2], axis=0),
                           params['conv_w'], params['conv_b'])    # (2B, 512)
    x1f, x2f = feats[:B], feats[B:]

    motif_embed = params['motif_emb'][motif_seq]                  # (B, L, H) gather
    _, L, H = motif_embed.shape
    # (S, N, H) -> (S*N, H) with S=B, N=L (PyTorch batch_first=False quirk).
    xm = motif_embed.reshape(B * L, H)
    xm = motif_encoder(xm, params['motif_layers'], S=B, N=L, nhead=nhead)
    motif3d = xm.reshape(B, L, H)

    dist_embed = params['dist_emb'][distance_matrix]              # (B, D, D, H) gather
    D = dist_embed.shape[1]
    # mean(dim=1) twice == mean over the flattened D*D axis.
    dist3d = dist_embed.reshape(B, D * D, H)

    return fused_head(x1f, x2f, motif3d, dist3d, params)          # (B, num_classes)


# ---------------------------------------------------------------------------
# Deterministic parameter init
# ---------------------------------------------------------------------------
def init_params(key, hidden_dim, num_classes, vacb_size,
                max_distance_dim, img_feat=512, ff_dim=2048, num_layers=4):
    keys = iter(jax.random.split(key, 128))

    def w(shape, scale=0.02):
        return (scale * jax.random.normal(next(keys), shape)).astype(jnp.float32)

    zeros = lambda s: jnp.zeros(s, jnp.float32)
    ones = lambda s: jnp.ones(s, jnp.float32)

    params = {
        'conv_w': w((img_feat, 3, 3, 3)),
        'conv_b': zeros((img_feat,)),
        'motif_emb': w((vacb_size + 1, hidden_dim)),
        'dist_emb': w((max_distance_dim * max_distance_dim, hidden_dim)),
    }
    layers = []
    for _ in range(num_layers):
        layers.append(dict(
            w_q=w((hidden_dim, hidden_dim)), b_q=zeros((hidden_dim,)),
            w_k=w((hidden_dim, hidden_dim)), b_k=zeros((hidden_dim,)),
            w_v=w((hidden_dim, hidden_dim)), b_v=zeros((hidden_dim,)),
            w_out=w((hidden_dim, hidden_dim)), b_out=zeros((hidden_dim,)),
            w_ff1=w((hidden_dim, ff_dim)), b_ff1=zeros((ff_dim,)),
            w_ff2=w((ff_dim, hidden_dim)), b_ff2=zeros((hidden_dim,)),
            ln1_g=ones((hidden_dim,)), ln1_b=zeros((hidden_dim,)),
            ln2_g=ones((hidden_dim,)), ln2_b=zeros((hidden_dim,)),
        ))
    params['motif_layers'] = layers

    fused_dim = 2 * img_feat + 2 * hidden_dim                     # 1024 + 2*hidden_dim
    params['res_fc_w'] = w((fused_dim, 512)); params['res_fc_b'] = zeros((512,))
    params['res_adj_w'] = w((fused_dim, 512)); params['res_adj_b'] = zeros((512,))
    params['fc2_w'] = w((512, num_classes)); params['fc2_b'] = zeros((num_classes,))
    return params


if __name__ == "__main__":
    B = 2
    hidden_dim = 32
    num_classes = 5
    vacb_size = 100
    max_motif_len = 8
    max_distance_dim = 4

    key = jax.random.PRNGKey(0)
    kp, k1, k2, k3, k4 = jax.random.split(key, 5)
    params = init_params(kp, hidden_dim, num_classes, vacb_size, max_distance_dim)

    x1 = jax.random.normal(k1, (B, 3, 16, 16), jnp.float32)
    x2 = jax.random.normal(k2, (B, 3, 16, 16), jnp.float32)
    motif_seq = jax.random.randint(k3, (B, max_motif_len), 0, vacb_size + 1)
    distance_matrix = jax.random.randint(
        k4, (B, max_distance_dim, max_distance_dim), 0,
        max_distance_dim * max_distance_dim)

    out = jax.jit(mol_ddi_forward)(params, x1, x2, motif_seq, distance_matrix)
    jax.block_until_ready(out)
    assert out.shape == (B, num_classes) and out.dtype == jnp.float32
    print("KERNEL_OK")
</pallas_src>

<mosaic_0001>
module attributes {stable_mosaic.version = 11 : i64} {
  func.func @_conv_pool_kernel(%arg0: i32, %arg1: i32, %arg2: memref<1x256x32xbf16, #tpu.memory_space<vmem>>, %arg3: memref<32x512xbf16, #tpu.memory_space<vmem>>, %arg4: memref<1x512xf32, #tpu.memory_space<vmem>>, %arg5: memref<1x1x512xf32, #tpu.memory_space<vmem>>, %arg6: memref<1x512xf32, #tpu.memory_space<vmem>>) attributes {dimension_semantics = [#tpu.dimension_semantics<parallel>, #tpu.dimension_semantics<arbitrary>], iteration_bounds = array<i64: 4, 1>, scalar_prefetch = 0 : i64, scratch_operands = 1 : i64, tpu.core_type = #tpu.core_type<tc>, window_params = [{transform_indices = @transform_0, window_bounds = array<i64: 1, 256, 32>}, {pipeline_mode = #tpu.pipeline_mode<synchronous>, transform_indices = @transform_1, window_bounds = array<i64: 32, 512>}, {pipeline_mode = #tpu.pipeline_mode<synchronous>, transform_indices = @transform_2, window_bounds = array<i64: 1, 512>}, {transform_indices = @transform_3, window_bounds = array<i64: 1, 1, 512>}]} {
    %c0_i32 = arith.constant 0 : i32
    %0 = arith.cmpi eq, %arg1, %c0_i32 : i32
    %1 = arith.extui %0 : i1 to i32
    %c0_i32_0 = arith.constant 0 : i32
    %2 = arith.cmpi ne, %1, %c0_i32_0 : i32
    scf.if %2 {
      %cst_15 = arith.constant 0.000000e+00 : f32
      %20 = vector.broadcast %cst_15 : f32 to vector<1x512xf32>
      %c0_16 = arith.constant 0 : index
      %c0_17 = arith.constant 0 : index
      %21 = vector.load %arg6[%c0_16, %c0_17] : memref<1x512xf32, #tpu.memory_space<vmem>>, vector<1x512xf32>
      tpu.vector_store %arg6[%c0_16, %c0_17], %20 {strides = array<i32>} : memref<1x512xf32, #tpu.memory_space<vmem>>, vector<1x512xf32>,
    } else {
    }
    %c0 = arith.constant 0 : index
    %c0_1 = arith.constant 0 : index
    %c0_2 = arith.constant 0 : index
    %3 = vector.load %arg2[%c0, %c0_1, %c0_2] : memref<1x256x32xbf16, #tpu.memory_space<vmem>>, vector<1x256x32xbf16>
    %4 = vector.shape_cast %3 : vector<1x256x32xbf16> to vector<256x32xbf16>
    %c0_3 = arith.constant 0 : index
    %c0_4 = arith.constant 0 : index
    %5 = vector.load %arg3[%c0_3, %c0_4] : memref<32x512xbf16, #tpu.memory_space<vmem>>, vector<32x512xbf16>
    %cst = arith.constant dense<0.000000e+00> : vector<256x512xf32>
    %6 = tpu.matmul %4, %5, %cst {dimension_numbers = #tpu.dot_dimension_numbers<[1], [0], [0], [1], [0, 0, 1, 1], [], []>} : vector<256x32xbf16>, vector<32x512xbf16>, vector<256x512xf32> -> vector<256x512xf32>
    %c0_5 = arith.constant 0 : index
    %c0_6 = arith.constant 0 : index
    %7 = vector.load %arg4[%c0_5, %c0_6] : memref<1x512xf32, #tpu.memory_space<vmem>>, vector<1x512xf32>
    %8 = vector.broadcast %7 : vector<1x512xf32> to vector<256x512xf32>
    %9 = arith.addf %6, %8 : vector<256x512xf32>
    %cst_7 = arith.constant 0.000000e+00 : f32
    %10 = vector.broadcast %cst_7 : f32 to vector<256x512xf32>
    %11 = arith.maximumf %9, %10 : vector<256x512xf32>
    %c0_8 = arith.constant 0 : index
    %c0_9 = arith.constant 0 : index
    %12 = vector.load %arg6[%c0_8, %c0_9] : memref<1x512xf32, #tpu.memory_space<vmem>>, vector<1x512xf32>
    %cst_10 = arith.constant dense<0.000000e+00> : vector<512xf32>
    %13 = vector.multi_reduction <add>, %11, %cst_10 [0] : vector<256x512xf32> to vector<512xf32>
    %14 = vector.shape_cast %13 : vector<512xf32> to vector<1x512xf32>
    %15 = arith.addf %12, %14 : vector<1x512xf32>
    %c0_11 = arith.constant 0 : index
    %c0_12 = arith.constant 0 : index
    %16 = vector.load %arg6[%c0_11, %c0_12] : memref<1x512xf32, #tpu.memory_space<vmem>>, vector<1x512xf32>
    tpu.vector_store %arg6[%c0_11, %c0_12], %15 {strides = array<i32>} : memref<1x512xf32, #tpu.memory_space<vmem>>, vector<1x512xf32>,
    %c0_i32_13 = arith.constant 0 : i32
    %17 = arith.cmpi eq, %arg1, %c0_i32_13 : i32
    %18 = arith.extui %17 : i1 to i32
    %c0_i32_14 = arith.constant 0 : i32
    %19 = arith.cmpi ne, %18, %c0_i32_14 : i32
    scf.if %19 {
      %c0_15 = arith.constant 0 : index
      %c0_16 = arith.constant 0 : index
      %20 = vector.load %arg6[%c0_15, %c0_16] : memref<1x512xf32, #tpu.memory_space<vmem>>, vector<1x512xf32>
      %cst_17 = arith.constant 3.906250e-03 : f32
      %21 = vector.broadcast %cst_17 : f32 to vector<1x512xf32>
      %22 = arith.mulf %20, %21 : vector<1x512xf32>
      %c0_18 = arith.constant 0 : index
      %c0_19 = arith.constant 0 : index
      %c0_20 = arith.constant 0 : index
      %23 = vector.load %arg5[%c0_18, %c0_19, %c0_20] : memref<1x1x512xf32, #tpu.memory_space<vmem>>, vector<1x1x512xf32>
      %24 = vector.shape_cast %23 : vector<1x1x512xf32> to vector<1x512xf32>
      %25 = vector.shape_cast %22 : vector<1x512xf32> to vector<1x1x512xf32>
      tpu.vector_store %arg5[%c0_18, %c0_19, %c0_20], %25 {strides = array<i32>} : memref<1x1x512xf32, #tpu.memory_space<vmem>>, vector<1x1x512xf32>,
    } else {
    }
    return
  }
  func.func @transform_0(%arg0: i32, %arg1: i32) -> (i32, i32, i32) {
    %c0_i32 = arith.constant 0 : i32
    %c0_i32_0 = arith.constant 0 : i32
    return %arg0, %arg1, %c0_i32 : i32, i32, i32
  }
  func.func @transform_1(%arg0: i32, %arg1: i32) -> (i32, i32) {
    %c0_i32 = arith.constant 0 : i32
    %c0_i32_0 = arith.constant 0 : i32
    %c0_i32_1 = arith.constant 0 : i32
    return %c0_i32, %c0_i32_0 : i32, i32
  }
  func.func @transform_2(%arg0: i32, %arg1: i32) -> (i32, i32) {
    %c0_i32 = arith.constant 0 : i32
    %c0_i32_0 = arith.constant 0 : i32
    %c0_i32_1 = arith.constant 0 : i32
    return %c0_i32, %c0_i32_0 : i32, i32
  }
  func.func @transform_3(%arg0: i32, %arg1: i32) -> (i32, i32, i32) {
    %c0_i32 = arith.constant 0 : i32
    %c0_i32_0 = arith.constant 0 : i32
    %c0_i32_1 = arith.constant 0 : i32
    return %arg0, %c0_i32, %c0_i32_0 : i32, i32, i32
  }
}

module attributes {stable_mosaic.version = 11 : i64} {
  func.func @_encoder_stack_kernel(%arg0: i32, %arg1: memref<16x32xf32, #tpu.memory_space<vmem>>, %arg2: memref<1x32x32xbf16, #tpu.memory_space<vmem>>, %arg3: memref<1x1x32xf32, #tpu.memory_space<vmem>>, %arg4: memref<1x32x32xbf16, #tpu.memory_space<vmem>>, %arg5: memref<1x1x32xf32, #tpu.memory_space<vmem>>, %arg6: memref<1x32x32xbf16, #tpu.memory_space<vmem>>, %arg7: memref<1x1x32xf32, #tpu.memory_space<vmem>>, %arg8: memref<32x4xf32, #tpu.memory_space<vmem>>, %arg9: memref<4x32xf32, #tpu.memory_space<vmem>>, %arg10: memref<1x32x32xbf16, #tpu.memory_space<vmem>>, %arg11: memref<1x1x32xf32, #tpu.memory_space<vmem>>, %arg12: memref<1x1x32xf32, #tpu.memory_space<vmem>>, %arg13: memref<1x1x32xf32, #tpu.memory_space<vmem>>, %arg14: memref<1x32x2048xbf16, #tpu.memory_space<vmem>>, %arg15: memref<1x1x2048xf32, #tpu.memory_space<vmem>>, %arg16: memref<1x2048x32xbf16, #tpu.memory_space<vmem>>, %arg17: memref<1x1x32xf32, #tpu.memory_space<vmem>>, %arg18: memref<1x1x32xf32, #tpu.memory_space<vmem>>, %arg19: memref<1x1x32xf32, #tpu.memory_space<vmem>>, %arg20: memref<16x32xf32, #tpu.memory_space<vmem>>, %arg21: memref<16x32xf32, #tpu.memory_space<vmem>>) attributes {dimension_semantics = [#tpu.dimension_semantics<arbitrary>], iteration_bounds = array<i64: 4>, scalar_prefetch = 0 : i64, scratch_operands = 1 : i64, tpu.core_type = #tpu.core_type<tc>, window_params = [{pipeline_mode = #tpu.pipeline_mode<synchronous>, transform_indices = @transform_0, window_bounds = array<i64: 16, 32>}, {transform_indices = @transform_1, window_bounds = array<i64: 1, 32, 32>}, {transform_indices = @transform_2, window_bounds = array<i64: 1, 1, 32>}, {transform_indices = @transform_3, window_bounds = array<i64: 1, 32, 32>}, {transform_indices = @transform_4, window_bounds = array<i64: 1, 1, 32>}, {transform_indices = @transform_5, window_bounds = array<i64: 1, 32, 32>}, {transform_indices = @transform_6, window_bounds = array<i64: 1, 1, 32>}, {pipeline_mode = #tpu.pipeline_mode<synchronous>, transform_indices = @transform_7, window_bounds = array<i64: 32, 4>}, {pipeline_mode = #tpu.pipeline_mode<synchronous>, transform_indices = @transform_8, window_bounds = array<i64: 4, 32>}, {transform_indices = @transform_9, window_bounds = array<i64: 1, 32, 32>}, {transform_indices = @transform_10, window_bounds = array<i64: 1, 1, 32>}, {transform_indices = @transform_11, window_bounds = array<i64: 1, 1, 32>}, {transform_indices = @transform_12, window_bounds = array<i64: 1, 1, 32>}, {transform_indices = @transform_13, window_bounds = array<i64: 1, 32, 2048>}, {transform_indices = @transform_14, window_bounds = array<i64: 1, 1, 2048>}, {transform_indices = @transform_15, window_bounds = array<i64: 1, 2048, 32>}, {transform_indices = @transform_16, window_bounds = array<i64: 1, 1, 32>}, {transform_indices = @transform_17, window_bounds = array<i64: 1, 1, 32>}, {transform_indices = @transform_18, window_bounds = array<i64: 1, 1, 32>}, {pipeline_mode = #tpu.pipeline_mode<synchronous>, transform_indices = @transform_19, window_bounds = array<i64: 16, 32>}]} {
    %c0_i32 = arith.constant 0 : i32
    %0 = arith.cmpi eq, %arg0, %c0_i32 : i32
    %1 = arith.extui %0 : i1 to i32
    %c0_i32_0 = arith.constant 0 : i32
    %2 = arith.cmpi ne, %1, %c0_i32_0 : i32
    scf.if %2 {
      %c0_91 = arith.constant 0 : index
      %c0_92 = arith.constant 0 : index
      %166 = vector.load %arg1[%c0_91, %c0_92] : memref<16x32xf32, #tpu.memory_space<vmem>>, vector<16x32xf32>
      %c0_93 = arith.constant 0 : index
      %c0_94 = arith.constant 0 : index
      %167 = vector.load %arg20[%c0_93, %c0_94] : memref<16x32xf32, #tpu.memory_space<vmem>>, vector<16x32xf32>
      tpu.vector_store %arg20[%c0_93, %c0_94], %166 {strides = array<i32>} : memref<16x32xf32, #tpu.memory_space<vmem>>, vector<16x32xf32>,
    } else {
    }
    %c0 = arith.constant 0 : index
    %c0_1 = arith.constant 0 : index
    %3 = vector.load %arg20[%c0, %c0_1] : memref<16x32xf32, #tpu.memory_space<vmem>>, vector<16x32xf32>
    %4 = arith.truncf %3 : vector<16x32xf32> to vector<16x32xbf16>
    %c0_2 = arith.constant 0 : index
    %c0_3 = arith.constant 0 : index
    %c0_4 = arith.constant 0 : index
    %5 = vector.load %arg2[%c0_2, %c0_3, %c0_4] : memref<1x32x32xbf16, #tpu.memory_space<vmem>>, vector<1x32x32xbf16>
    %6 = vector.shape_cast %5 : vector<1x32x32xbf16> to vector<32x32xbf16>
    %cst = arith.constant dense<0.000000e+00> : vector<16x32xf32>
    %7 = tpu.matmul %4, %6, %cst {dimension_numbers = #tpu.dot_dimension_numbers<[1], [0], [0], [1], [0, 0, 1, 1], [], []>} : vector<16x32xbf16>, vector<32x32xbf16>, vector<16x32xf32> -> vector<16x32xf32>
    %c0_5 = arith.constant 0 : index
    %c0_6 = arith.constant 0 : index
    %c0_7 = arith.constant 0 : index
    %8 = vector.load %arg3[%c0_5, %c0_6, %c0_7] : memref<1x1x32xf32, #tpu.memory_space<vmem>>, vector<1x1x32xf32>
    %9 = vector.shape_cast %8 : vector<1x1x32xf32> to vector<1x32xf32>
    %10 = vector.broadcast %9 : vector<1x32xf32> to vector<16x32xf32>
    %11 = arith.addf %7, %10 : vector<16x32xf32>
    %c0_8 = arith.constant 0 : index
    %c0_9 = arith.constant 0 : index
    %c0_10 = arith.constant 0 : index
    %12 = vector.load %arg4[%c0_8, %c0_9, %c0_10] : memref<1x32x32xbf16, #tpu.memory_space<vmem>>, vector<1x32x32xbf16>
    %13 = vector.shape_cast %12 : vector<1x32x32xbf16> to vector<32x32xbf16>
    %cst_11 = arith.constant dense<0.000000e+00> : vector<16x32xf32>
    %14 = tpu.matmul %4, %13, %cst_11 {dimension_numbers = #tpu.dot_dimension_numbers<[1], [0], [0], [1], [0, 0, 1, 1], [], []>} : vector<16x32xbf16>, vector<32x32xbf16>, vector<16x32xf32> -> vector<16x32xf32>
    %c0_12 = arith.constant 0 : index
    %c0_13 = arith.constant 0 : index
    %c0_14 = arith.constant 0 : index
    %15 = vector.load %arg5[%c0_12, %c0_13, %c0_14] : memref<1x1x32xf32, #tpu.memory_space<vmem>>, vector<1x1x32xf32>
    %16 = vector.shape_cast %15 : vector<1x1x32xf32> to vector<1x32xf32>
    %17 = vector.broadcast %16 : vector<1x32xf32> to vector<16x32xf32>
    %18 = arith.addf %14, %17 : vector<16x32xf32>
    %c0_15 = arith.constant 0 : index
    %c0_16 = arith.constant 0 : index
    %c0_17 = arith.constant 0 : index
    %19 = vector.load %arg6[%c0_15, %c0_16, %c0_17] : memref<1x32x32xbf16, #tpu.memory_space<vmem>>, vector<1x32x32xbf16>
    %20 = vector.shape_cast %19 : vector<1x32x32xbf16> to vector<32x32xbf16>
    %cst_18 = arith.constant dense<0.000000e+00> : vector<16x32xf32>
    %21 = tpu.matmul %4, %20, %cst_18 {dimension_numbers = #tpu.dot_dimension_numbers<[1], [0], [0], [1], [0, 0, 1, 1], [], []>} : vector<16x32xbf16>, vector<32x32xbf16>, vector<16x32xf32> -> vector<16x32xf32>
    %c0_19 = arith.constant 0 : index
    %c0_20 = arith.constant 0 : index
    %c0_21 = arith.constant 0 : index
    %22 = vector.load %arg7[%c0_19, %c0_20, %c0_21] : memref<1x1x32xf32, #tpu.memory_space<vmem>>, vector<1x1x32xf32>
    %23 = vector.shape_cast %22 : vector<1x1x32xf32> to vector<1x32xf32>
    %24 = vector.broadcast %23 : vector<1x32xf32> to vector<16x32xf32>
    %25 = arith.addf %21, %24 : vector<16x32xf32>
    %c0_22 = arith.constant 0 : index
    %c0_23 = arith.constant 0 : index
    %26 = vector.load %arg8[%c0_22, %c0_23] : memref<32x4xf32, #tpu.memory_space<vmem>>, vector<32x4xf32>
    %c0_24 = arith.constant 0 : index
    %c0_25 = arith.constant 0 : index
    %27 = vector.load %arg9[%c0_24, %c0_25] : memref<4x32xf32, #tpu.memory_space<vmem>>, vector<4x32xf32>
    %28 = vector.extract_strided_slice %11 {offsets = [0, 0], sizes = [8, 32], strides = [1, 1]} : vector<16x32xf32> to vector<8x32xf32>
    %29 = vector.extract_strided_slice %18 {offsets = [0, 0], sizes = [8, 32], strides = [1, 1]} : vector<16x32xf32> to vector<8x32xf32>
    %30 = arith.mulf %28, %29 : vector<8x32xf32>
    %cst_26 = arith.constant dense<0.000000e+00> : vector<8x4xf32>
    %31 = tpu.matmul %30, %26, %cst_26 {dimension_numbers = #tpu.dot_dimension_numbers<[1], [0], [0], [1], [0, 0, 1, 1], [], []>} : vector<8x32xf32>, vector<32x4xf32>, vector<8x4xf32> -> vector<8x4xf32>
    %cst_27 = arith.constant 0.353553385 : f32
    %32 = vector.broadcast %cst_27 : f32 to vector<8x4xf32>
    %33 = arith.mulf %32, %31 : vector<8x4xf32>
    %34 = vector.extract_strided_slice %18 {offsets = [8, 0], sizes = [8, 32], strides = [1, 1]} : vector<16x32xf32> to vector<8x32xf32>
    %35 = arith.mulf %28, %34 : vector<8x32xf32>
    %cst_28 = arith.constant dense<0.000000e+00> : vector<8x4xf32>
    %36 = tpu.matmul %35, %26, %cst_28 {dimension_numbers = #tpu.dot_dimension_numbers<[1], [0], [0], [1], [0, 0, 1, 1], [], []>} : vector<8x32xf32>, vector<32x4xf32>, vector<8x4xf32> -> vector<8x4xf32>
    %cst_29 = arith.constant 0.353553385 : f32
    %37 = vector.broadcast %cst_29 : f32 to vector<8x4xf32>
    %38 = arith.mulf %37, %36 : vector<8x4xf32>
    %39 = arith.maximumf %33, %38 : vector<8x4xf32>
    %40 = arith.subf %33, %39 : vector<8x4xf32>
    %41 = math.exp %40 : vector<8x4xf32>
    %42 = arith.subf %38, %39 : vector<8x4xf32>
    %43 = math.exp %42 : vector<8x4xf32>
    %44 = arith.addf %41, %43 : vector<8x4xf32>
    %45 = tpu.reciprocal %44 {approx = true} : vector<8x4xf32> -> vector<8x4xf32>
    %cst_30 = arith.constant 0.000000e+00 : f32
    %46 = vector.broadcast %cst_30 : f32 to vector<8x32xf32>
    %47 = arith.mulf %41, %45 : vector<8x4xf32>
    %cst_31 = arith.constant dense<0.000000e+00> : vector<8x32xf32>
    %48 = tpu.matmul %47, %27, %cst_31 {dimension_numbers = #tpu.dot_dimension_numbers<[1], [0], [0], [1], [0, 0, 1, 1], [], []>} : vector<8x4xf32>, vector<4x32xf32>, vector<8x32xf32> -> vector<8x32xf32>
    %49 = vector.extract_strided_slice %25 {offsets = [0, 0], sizes = [8, 32], strides = [1, 1]} : vector<16x32xf32> to vector<8x32xf32>
    %50 = arith.mulf %48, %49 : vector<8x32xf32>
    %51 = arith.addf %46, %50 : vector<8x32xf32>
    %52 = arith.mulf %43, %45 : vector<8x4xf32>
    %cst_32 = arith.constant dense<0.000000e+00> : vector<8x32xf32>
    %53 = tpu.matmul %52, %27, %cst_32 {dimension_numbers = #tpu.dot_dimension_numbers<[1], [0], [0], [1], [0, 0, 1, 1], [], []>} : vector<8x4xf32>, vector<4x32xf32>, vector<8x32xf32> -> vector<8x32xf32>
    %54 = vector.extract_strided_slice %25 {offsets = [8, 0], sizes = [8, 32], strides = [1, 1]} : vector<16x32xf32> to vector<8x32xf32>
    %55 = arith.mulf %53, %54 : vector<8x32xf32>
    %56 = arith.addf %51, %55 : vector<8x32xf32>
    %c0_33 = arith.constant 0 : index
    %c0_34 = arith.constant 0 : index
    %57 = vector.load %arg21[%c0_33, %c0_34] : memref<16x32xf32, #tpu.memory_space<vmem>>, vector<8x32xf32>
    tpu.vector_store %arg21[%c0_33, %c0_34], %56 {strides = array<i32>} : memref<16x32xf32, #tpu.memory_space<vmem>>, vector<8x32xf32>,
    %58 = vector.extract_strided_slice %11 {offsets = [8, 0], sizes = [8, 32], strides = [1, 1]} : vector<16x32xf32> to vector<8x32xf32>
    %59 = vector.extract_strided_slice %18 {offsets = [0, 0], sizes = [8, 32], strides = [1, 1]} : vector<16x32xf32> to vector<8x32xf32>
    %60 = arith.mulf %58, %59 : vector<8x32xf32>
    %cst_35 = arith.constant dense<0.000000e+00> : vector<8x4xf32>
    %61 = tpu.matmul %60, %26, %cst_35 {dimension_numbers = #tpu.dot_dimension_numbers<[1], [0], [0], [1], [0, 0, 1, 1], [], []>} : vector<8x32xf32>, vector<32x4xf32>, vector<8x4xf32> -> vector<8x4xf32>
    %cst_36 = arith.constant 0.353553385 : f32
    %62 = vector.broadcast %cst_36 : f32 to vector<8x4xf32>
    %63 = arith.mulf %62, %61 : vector<8x4xf32>
    %64 = vector.extract_strided_slice %18 {offsets = [8, 0], sizes = [8, 32], strides = [1, 1]} : vector<16x32xf32> to vector<8x32xf32>
    %65 = arith.mulf %58, %64 : vector<8x32xf32>
    %cst_37 = arith.constant dense<0.000000e+00> : vector<8x4xf32>
    %66 = tpu.matmul %65, %26, %cst_37 {dimension_numbers = #tpu.dot_dimension_numbers<[1], [0], [0], [1], [0, 0, 1, 1], [], []>} : vector<8x32xf32>, vector<32x4xf32>, vector<8x4xf32> -> vector<8x4xf32>
    %cst_38 = arith.constant 0.353553385 : f32
    %67 = vector.broadcast %cst_38 : f32 to vector<8x4xf32>
    %68 = arith.mulf %67, %66 : vector<8x4xf32>
    %69 = arith.maximumf %63, %68 : vector<8x4xf32>
    %70 = arith.subf %63, %69 : vector<8x4xf32>
    %71 = math.exp %70 : vector<8x4xf32>
    %72 = arith.subf %68, %69 : vector<8x4xf32>
    %73 = math.exp %72 : vector<8x4xf32>
    %74 = arith.addf %71, %73 : vector<8x4xf32>
    %75 = tpu.reciprocal %74 {approx = true} : vector<8x4xf32> -> vector<8x4xf32>
    %cst_39 = arith.constant 0.000000e+00 : f32
    %76 = vector.broadcast %cst_39 : f32 to vector<8x32xf32>
    %77 = arith.mulf %71, %75 : vector<8x4xf32>
    %cst_40 = arith.constant dense<0.000000e+00> : vector<8x32xf32>
    %78 = tpu.matmul %77, %27, %cst_40 {dimension_numbers = #tpu.dot_dimension_numbers<[1], [0], [0], [1], [0, 0, 1, 1], [], []>} : vector<8x4xf32>, vector<4x32xf32>, vector<8x32xf32> -> vector<8x32xf32>
    %79 = vector.extract_strided_slice %25 {offsets = [0, 0], sizes = [8, 32], strides = [1, 1]} : vector<16x32xf32> to vector<8x32xf32>
    %80 = arith.mulf %78, %79 : vector<8x32xf32>
    %81 = arith.addf %76, %80 : vector<8x32xf32>
    %82 = arith.mulf %73, %75 : vector<8x4xf32>
    %cst_41 = arith.constant dense<0.000000e+00> : vector<8x32xf32>
    %83 = tpu.matmul %82, %27, %cst_41 {dimension_numbers = #tpu.dot_dimension_numbers<[1], [0], [0], [1], [0, 0, 1, 1], [], []>} : vector<8x4xf32>, vector<4x32xf32>, vector<8x32xf32> -> vector<8x32xf32>
    %84 = vector.extract_strided_slice %25 {offsets = [8, 0], sizes = [8, 32], strides = [1, 1]} : vector<16x32xf32> to vector<8x32xf32>
    %85 = arith.mulf %83, %84 : vector<8x32xf32>
    %86 = arith.addf %81, %85 : vector<8x32xf32>
    %c8 = arith.constant 8 : index
    %c0_42 = arith.constant 0 : index
    %87 = vector.load %arg21[%c8, %c0_42] : memref<16x32xf32, #tpu.memory_space<vmem>>, vector<8x32xf32>
    tpu.vector_store %arg21[%c8, %c0_42], %86 {strides = array<i32>} : memref<16x32xf32, #tpu.memory_space<vmem>>, vector<8x32xf32>,
    %c0_43 = arith.constant 0 : index
    %c0_44 = arith.constant 0 : index
    %88 = vector.load %arg21[%c0_43, %c0_44] : memref<16x32xf32, #tpu.memory_space<vmem>>, vector<16x32xf32>
    %89 = arith.truncf %88 : vector<16x32xf32> to vector<16x32xbf16>
    %c0_45 = arith.constant 0 : index
    %c0_46 = arith.constant 0 : index
    %c0_47 = arith.constant 0 : index
    %90 = vector.load %arg10[%c0_45, %c0_46, %c0_47] : memref<1x32x32xbf16, #tpu.memory_space<vmem>>, vector<1x32x32xbf16>
    %91 = vector.shape_cast %90 : vector<1x32x32xbf16> to vector<32x32xbf16>
    %cst_48 = arith.constant dense<0.000000e+00> : vector<16x32xf32>
    %92 = tpu.matmul %89, %91, %cst_48 {dimension_numbers = #tpu.dot_dimension_numbers<[1], [0], [0], [1], [0, 0, 1, 1], [], []>} : vector<16x32xbf16>, vector<32x32xbf16>, vector<16x32xf32> -> vector<16x32xf32>
    %c0_49 = arith.constant 0 : index
    %c0_50 = arith.constant 0 : index
    %c0_51 = arith.constant 0 : index
    %93 = vector.load %arg11[%c0_49, %c0_50, %c0_51] : memref<1x1x32xf32, #tpu.memory_space<vmem>>, vector<1x1x32xf32>
    %94 = vector.shape_cast %93 : vector<1x1x32xf32> to vector<1x32xf32>
    %95 = vector.broadcast %94 : vector<1x32xf32> to vector<16x32xf32>
    %96 = arith.addf %92, %95 : vector<16x32xf32>
    %97 = arith.addf %3, %96 : vector<16x32xf32>
    %cst_52 = arith.constant dense<0.000000e+00> : vector<16xf32>
    %98 = vector.multi_reduction <add>, %97, %cst_52 [1] : vector<16x32xf32> to vector<16xf32>
    %99 = vector.shape_cast %98 : vector<16xf32> to vector<16x1xf32>
    %cst_53 = arith.constant 3.200000e+01 : f32
    %100 = vector.broadcast %cst_53 : f32 to vector<16x1xf32>
    %101 = arith.divf %99, %100 : vector<16x1xf32>
    %102 = vector.broadcast %101 : vector<16x1xf32> to vector<16x32xf32>
    %103 = arith.subf %97, %102 : vector<16x32xf32>
    %104 = arith.mulf %103, %103 : vector<16x32xf32>
    %cst_54 = arith.constant dense<0.000000e+00> : vector<16xf32>
    %105 = vector.multi_reduction <add>, %104, %cst_54 [1] : vector<16x32xf32> to vector<16xf32>
    %106 = vector.shape_cast %105 : vector<16xf32> to vector<16x1xf32>
    %cst_55 = arith.constant 3.200000e+01 : f32
    %107 = vector.broadcast %cst_55 : f32 to vector<16x1xf32>
    %108 = arith.divf %106, %107 : vector<16x1xf32>
    %cst_56 = arith.constant 9.99999974E-6 : f32
    %109 = vector.broadcast %cst_56 : f32 to vector<16x1xf32>
    %110 = arith.addf %108, %109 : vector<16x1xf32>
    %111 = math.rsqrt %110 : vector<16x1xf32>
    %112 = vector.broadcast %111 : vector<16x1xf32> to vector<16x32xf32>
    %113 = arith.mulf %103, %112 : vector<16x32xf32>
    %c0_57 = arith.constant 0 : index
    %c0_58 = arith.constant 0 : index
    %c0_59 = arith.constant 0 : index
    %114 = vector.load %arg12[%c0_57, %c0_58, %c0_59] : memref<1x1x32xf32, #tpu.memory_space<vmem>>, vector<1x1x32xf32>
    %115 = vector.shape_cast %114 : vector<1x1x32xf32> to vector<1x32xf32>
    %116 = vector.broadcast %115 : vector<1x32xf32> to vector<16x32xf32>
    %117 = arith.mulf %113, %116 : vector<16x32xf32>
    %c0_60 = arith.constant 0 : index
    %c0_61 = arith.constant 0 : index
    %c0_62 = arith.constant 0 : index
    %118 = vector.load %arg13[%c0_60, %c0_61, %c0_62] : memref<1x1x32xf32, #tpu.memory_space<vmem>>, vector<1x1x32xf32>
    %119 = vector.shape_cast %118 : vector<1x1x32xf32> to vector<1x32xf32>
    %120 = vector.broadcast %119 : vector<1x32xf32> to vector<16x32xf32>
    %121 = arith.addf %117, %120 : vector<16x32xf32>
    %122 = arith.truncf %121 : vector<16x32xf32> to vector<16x32xbf16>
    %c0_63 = arith.constant 0 : index
    %c0_64 = arith.constant 0 : index
    %c0_65 = arith.constant 0 : index
    %123 = vector.load %arg14[%c0_63, %c0_64, %c0_65] : memref<1x32x2048xbf16, #tpu.memory_space<vmem>>, vector<1x32x2048xbf16>
    %124 = vector.shape_cast %123 : vector<1x32x2048xbf16> to vector<32x2048xbf16>
    %cst_66 = arith.constant dense<0.000000e+00> : vector<16x2048xf32>
    %125 = tpu.matmul %122, %124, %cst_66 {dimension_numbers = #tpu.dot_dimension_numbers<[1], [0], [0], [1], [0, 0, 1, 1], [], []>} : vector<16x32xbf16>, vector<32x2048xbf16>, vector<16x2048xf32> -> vector<16x2048xf32>
    %c0_67 = arith.constant 0 : index
    %c0_68 = arith.constant 0 : index
    %c0_69 = arith.constant 0 : index
    %126 = vector.load %arg15[%c0_67, %c0_68, %c0_69] : memref<1x1x2048xf32, #tpu.memory_space<vmem>>, vector<1x1x2048xf32>
    %127 = vector.shape_cast %126 : vector<1x1x2048xf32> to vector<1x2048xf32>
    %128 = vector.broadcast %127 : vector<1x2048xf32> to vector<16x2048xf32>
    %129 = arith.addf %125, %128 : vector<16x2048xf32>
    %cst_70 = arith.constant 0.000000e+00 : f32
    %130 = vector.broadcast %cst_70 : f32 to vector<16x2048xf32>
    %131 = arith.maximumf %129, %130 : vector<16x2048xf32>
    %132 = arith.truncf %131 : vector<16x2048xf32> to vector<16x2048xbf16>
    %c0_71 = arith.constant 0 : index
    %c0_72 = arith.constant 0 : index
    %c0_73 = arith.constant 0 : index
    %133 = vector.load %arg16[%c0_71, %c0_72, %c0_73] : memref<1x2048x32xbf16, #tpu.memory_space<vmem>>, vector<1x2048x32xbf16>
    %134 = vector.shape_cast %133 : vector<1x2048x32xbf16> to vector<2048x32xbf16>
    %cst_74 = arith.constant dense<0.000000e+00> : vector<16x32xf32>
    %135 = tpu.matmul %132, %134, %cst_74 {dimension_numbers = #tpu.dot_dimension_numbers<[1], [0], [0], [1], [0, 0, 1, 1], [], []>} : vector<16x2048xbf16>, vector<2048x32xbf16>, vector<16x32xf32> -> vector<16x32xf32>
    %c0_75 = arith.constant 0 : index
    %c0_76 = arith.constant 0 : index
    %c0_77 = arith.constant 0 : index
    %136 = vector.load %arg17[%c0_75, %c0_76, %c0_77] : memref<1x1x32xf32, #tpu.memory_space<vmem>>, vector<1x1x32xf32>
    %137 = vector.shape_cast %136 : vector<1x1x32xf32> to vector<1x32xf32>
    %138 = vector.broadcast %137 : vector<1x32xf32> to vector<16x32xf32>
    %139 = arith.addf %135, %138 : vector<16x32xf32>
    %140 = arith.addf %121, %139 : vector<16x32xf32>
    %cst_78 = arith.constant dense<0.000000e+00> : vector<16xf32>
    %141 = vector.multi_reduction <add>, %140, %cst_78 [1] : vector<16x32xf32> to vector<16xf32>
    %142 = vector.shape_cast %141 : vector<16xf32> to vector<16x1xf32>
    %cst_79 = arith.constant 3.200000e+01 : f32
    %143 = vector.broadcast %cst_79 : f32 to vector<16x1xf32>
    %144 = arith.divf %142, %143 : vector<16x1xf32>
    %145 = vector.broadcast %144 : vector<16x1xf32> to vector<16x32xf32>
    %146 = arith.subf %140, %145 : vector<16x32xf32>
    %147 = arith.mulf %146, %146 : vector<16x32xf32>
    %cst_80 = arith.constant dense<0.000000e+00> : vector<16xf32>
    %148 = vector.multi_reduction <add>, %147, %cst_80 [1] : vector<16x32xf32> to vector<16xf32>
    %149 = vector.shape_cast %148 : vector<16xf32> to vector<16x1xf32>
    %cst_81 = arith.constant 3.200000e+01 : f32
    %150 = vector.broadcast %cst_81 : f32 to vector<16x1xf32>
    %151 = arith.divf %149, %150 : vector<16x1xf32>
    %cst_82 = arith.constant 9.99999974E-6 : f32
    %152 = vector.broadcast %cst_82 : f32 to vector<16x1xf32>
    %153 = arith.addf %151, %152 : vector<16x1xf32>
    %154 = math.rsqrt %153 : vector<16x1xf32>
    %155 = vector.broadcast %154 : vector<16x1xf32> to vector<16x32xf32>
    %156 = arith.mulf %146, %155 : vector<16x32xf32>
    %c0_83 = arith.constant 0 : index
    %c0_84 = arith.constant 0 : index
    %c0_85 = arith.constant 0 : index
    %157 = vector.load %arg18[%c0_83, %c0_84, %c0_85] : memref<1x1x32xf32, #tpu.memory_space<vmem>>, vector<1x1x32xf32>
    %158 = vector.shape_cast %157 : vector<1x1x32xf32> to vector<1x32xf32>
    %159 = vector.broadcast %158 : vector<1x32xf32> to vector<16x32xf32>
    %160 = arith.mulf %156, %159 : vector<16x32xf32>
    %c0_86 = arith.constant 0 : index
    %c0_87 = arith.constant 0 : index
    %c0_88 = arith.constant 0 : index
    %161 = vector.load %arg19[%c0_86, %c0_87, %c0_88] : memref<1x1x32xf32, #tpu.memory_space<vmem>>, vector<1x1x32xf32>
    %162 = vector.shape_cast %161 : vector<1x1x32xf32> to vector<1x32xf32>
    %163 = vector.broadcast %162 : vector<1x32xf32> to vector<16x32xf32>
    %164 = arith.addf %160, %163 : vector<16x32xf32>
    %c0_89 = arith.constant 0 : index
    %c0_90 = arith.constant 0 : index
    %165 = vector.load %arg20[%c0_89, %c0_90] : memref<16x32xf32, #tpu.memory_space<vmem>>, vector<16x32xf32>
    tpu.vector_store %arg20[%c0_89, %c0_90], %164 {strides = array<i32>} : memref<16x32xf32, #tpu.memory_space<vmem>>, vector<16x32xf32>,
    return
  }
  func.func @transform_0(%arg0: i32) -> (i32, i32) {
    %c0_i32 = arith.constant 0 : i32
    %c0_i32_0 = arith.constant 0 : i32
    %c0_i32_1 = arith.constant 0 : i32
    return %c0_i32, %c0_i32_0 : i32, i32
  }
  func.func @transform_1(%arg0: i32) -> (i32, i32, i32) {
    %c0_i32 = arith.constant 0 : i32
    %c0_i32_0 = arith.constant 0 : i32
    %c0_i32_1 = arith.constant 0 : i32
    return %arg0, %c0_i32, %c0_i32_0 : i32, i32, i32
  }
  func.func @transform_2(%arg0: i32) -> (i32, i32, i32) {
    %c0_i32 = arith.constant 0 : i32
    %c0_i32_0 = arith.constant 0 : i32
    %c0_i32_1 = arith.constant 0 : i32
    return %arg0, %c0_i32, %c0_i32_0 : i32, i32, i32
  }
  func.func @transform_3(%arg0: i32) -> (i32, i32, i32) {
    %c0_i32 = arith.constant 0 : i32
    %c0_i32_0 = arith.constant 0 : i32
    %c0_i32_1 = arith.constant 0 : i32
    return %arg0, %c0_i32, %c0_i32_0 : i32, i32, i32
  }
  func.func @transform_4(%arg0: i32) -> (i32, i32, i32) {
    %c0_i32 = arith.constant 0 : i32
    %c0_i32_0 = arith.constant 0 : i32
    %c0_i32_1 = arith.constant 0 : i32
    return %arg0, %c0_i32, %c0_i32_0 : i32, i32, i32
  }
  func.func @transform_5(%arg0: i32) -> (i32, i32, i32) {
    %c0_i32 = arith.constant 0 : i32
    %c0_i32_0 = arith.constant 0 : i32
    %c0_i32_1 = arith.constant 0 : i32
    return %arg0, %c0_i32, %c0_i32_0 : i32, i32, i32
  }
  func.func @transform_6(%arg0: i32) -> (i32, i32, i32) {
    %c0_i32 = arith.constant 0 : i32
    %c0_i32_0 = arith.constant 0 : i32
    %c0_i32_1 = arith.constant 0 : i32
    return %arg0, %c0_i32, %c0_i32_0 : i32, i32, i32
  }
  func.func @transform_7(%arg0: i32) -> (i32, i32) {
    %c0_i32 = arith.constant 0 : i32
    %c0_i32_0 = arith.constant 0 : i32
    %c0_i32_1 = arith.constant 0 : i32
    return %c0_i32, %c0_i32_0 : i32, i32
  }
  func.func @transform_8(%arg0: i32) -> (i32, i32) {
    %c0_i32 = arith.constant 0 : i32
    %c0_i32_0 = arith.constant 0 : i32
    %c0_i32_1 = arith.constant 0 : i32
    return %c0_i32, %c0_i32_0 : i32, i32
  }
  func.func @transform_9(%arg0: i32) -> (i32, i32, i32) {
    %c0_i32 = arith.constant 0 : i32
    %c0_i32_0 = arith.constant 0 : i32
    %c0_i32_1 = arith.constant 0 : i32
    return %arg0, %c0_i32, %c0_i32_0 : i32, i32, i32
  }
  func.func @transform_10(%arg0: i32) -> (i32, i32, i32) {
    %c0_i32 = arith.constant 0 : i32
    %c0_i32_0 = arith.constant 0 : i32
    %c0_i32_1 = arith.constant 0 : i32
    return %arg0, %c0_i32, %c0_i32_0 : i32, i32, i32
  }
  func.func @transform_11(%arg0: i32) -> (i32, i32, i32) {
    %c0_i32 = arith.constant 0 : i32
    %c0_i32_0 = arith.constant 0 : i32
    %c0_i32_1 = arith.constant 0 : i32
    return %arg0, %c0_i32, %c0_i32_0 : i32, i32, i32
  }
  func.func @transform_12(%arg0: i32) -> (i32, i32, i32) {
    %c0_i32 = arith.constant 0 : i32
    %c0_i32_0 = arith.constant 0 : i32
    %c0_i32_1 = arith.constant 0 : i32
    return %arg0, %c0_i32, %c0_i32_0 : i32, i32, i32
  }
  func.func @transform_13(%arg0: i32) -> (i32, i32, i32) {
    %c0_i32 = arith.constant 0 : i32
    %c0_i32_0 = arith.constant 0 : i32
    %c0_i32_1 = arith.constant 0 : i32
    return %arg0, %c0_i32, %c0_i32_0 : i32, i32, i32
  }
  func.func @transform_14(%arg0: i32) -> (i32, i32, i32) {
    %c0_i32 = arith.constant 0 : i32
    %c0_i32_0 = arith.constant 0 : i32
    %c0_i32_1 = arith.constant 0 : i32
    return %arg0, %c0_i32, %c0_i32_0 : i32, i32, i32
  }
  func.func @transform_15(%arg0: i32) -> (i32, i32, i32) {
    %c0_i32 = arith.constant 0 : i32
    %c0_i32_0 = arith.constant 0 : i32
    %c0_i32_1 = arith.constant 0 : i32
    return %arg0, %c0_i32, %c0_i32_0 : i32, i32, i32
  }
  func.func @transform_16(%arg0: i32) -> (i32, i32, i32) {
    %c0_i32 = arith.constant 0 : i32
    %c0_i32_0 = arith.constant 0 : i32
    %c0_i32_1 = arith.constant 0 : i32
    return %arg0, %c0_i32, %c0_i32_0 : i32, i32, i32
  }
  func.func @transform_17(%arg0: i32) -> (i32, i32, i32) {
    %c0_i32 = arith.constant 0 : i32
    %c0_i32_0 = arith.constant 0 : i32
    %c0_i32_1 = arith.constant 0 : i32
    return %arg0, %c0_i32, %c0_i32_0 : i32, i32, i32
  }
  func.func @transform_18(%arg0: i32) -> (i32, i32, i32) {
    %c0_i32 = arith.constant 0 : i32
    %c0_i32_0 = arith.constant 0 : i32
    %c0_i32_1 = arith.constant 0 : i32
    return %arg0, %c0_i32, %c0_i32_0 : i32, i32, i32
  }
  func.func @transform_19(%arg0: i32) -> (i32, i32) {
    %c0_i32 = arith.constant 0 : i32
    %c0_i32_0 = arith.constant 0 : i32
    %c0_i32_1 = arith.constant 0 : i32
    return %c0_i32, %c0_i32_0 : i32, i32
  }
}

module attributes {stable_mosaic.version = 11 : i64} {
  func.func @_head_kernel(%arg0: i32, %arg1: memref<2x512xf32, #tpu.memory_space<vmem>>, %arg2: memref<2x512xf32, #tpu.memory_space<vmem>>, %arg3: memref<2x8x32xf32, #tpu.memory_space<vmem>>, %arg4: memref<2x16x32xf32, #tpu.memory_space<vmem>>, %arg5: memref<512x512xbf16, #tpu.memory_space<vmem>>, %arg6: memref<512x512xbf16, #tpu.memory_space<vmem>>, %arg7: memref<32x512xbf16, #tpu.memory_space<vmem>>, %arg8: memref<32x512xbf16, #tpu.memory_space<vmem>>, %arg9: memref<1x512xf32, #tpu.memory_space<vmem>>, %arg10: memref<512x512xbf16, #tpu.memory_space<vmem>>, %arg11: memref<512x512xbf16, #tpu.memory_space<vmem>>, %arg12: memref<32x512xbf16, #tpu.memory_space<vmem>>, %arg13: memref<32x512xbf16, #tpu.memory_space<vmem>>, %arg14: memref<1x512xf32, #tpu.memory_space<vmem>>, %arg15: memref<512x5xbf16, #tpu.memory_space<vmem>>, %arg16: memref<1x5xf32, #tpu.memory_space<vmem>>, %arg17: memref<2x5xf32, #tpu.memory_space<vmem>>) attributes {dimension_semantics = [#tpu.dimension_semantics<arbitrary>], iteration_bounds = array<i64: 1>, scalar_prefetch = 0 : i64, scratch_operands = 0 : i64, tpu.core_type = #tpu.core_type<tc>, window_params = [{pipeline_mode = #tpu.pipeline_mode<synchronous>, transform_indices = @transform_0, window_bounds = array<i64: 2, 512>}, {pipeline_mode = #tpu.pipeline_mode<synchronous>, transform_indices = @transform_1, window_bounds = array<i64: 2, 512>}, {pipeline_mode = #tpu.pipeline_mode<synchronous>, transform_indices = @transform_2, window_bounds = array<i64: 2, 8, 32>}, {pipeline_mode = #tpu.pipeline_mode<synchronous>, transform_indices = @transform_3, window_bounds = array<i64: 2, 16, 32>}, {pipeline_mode = #tpu.pipeline_mode<synchronous>, transform_indices = @transform_4, window_bounds = array<i64: 512, 512>}, {pipeline_mode = #tpu.pipeline_mode<synchronous>, transform_indices = @transform_5, window_bounds = array<i64: 512, 512>}, {pipeline_mode = #tpu.pipeline_mode<synchronous>, transform_indices = @transform_6, window_bounds = array<i64: 32, 512>}, {pipeline_mode = #tpu.pipeline_mode<synchronous>, transform_indices = @transform_7, window_bounds = array<i64: 32, 512>}, {pipeline_mode = #tpu.pipeline_mode<synchronous>, transform_indices = @transform_8, window_bounds = array<i64: 1, 512>}, {pipeline_mode = #tpu.pipeline_mode<synchronous>, transform_indices = @transform_9, window_bounds = array<i64: 512, 512>}, {pipeline_mode = #tpu.pipeline_mode<synchronous>, transform_indices = @transform_10, window_bounds = array<i64: 512, 512>}, {pipeline_mode = #tpu.pipeline_mode<synchronous>, transform_indices = @transform_11, window_bounds = array<i64: 32, 512>}, {pipeline_mode = #tpu.pipeline_mode<synchronous>, transform_indices = @transform_12, window_bounds = array<i64: 32, 512>}, {pipeline_mode = #tpu.pipeline_mode<synchronous>, transform_indices = @transform_13, window_bounds = array<i64: 1, 512>}, {pipeline_mode = #tpu.pipeline_mode<synchronous>, transform_indices = @transform_14, window_bounds = array<i64: 512, 5>}, {pipeline_mode = #tpu.pipeline_mode<synchronous>, transform_indices = @transform_15, window_bounds = array<i64: 1, 5>}, {pipeline_mode = #tpu.pipeline_mode<synchronous>, transform_indices = @transform_16, window_bounds = array<i64: 2, 5>}]} {
    %c0 = arith.constant 0 : index
    %c0_0 = arith.constant 0 : index
    %c0_1 = arith.constant 0 : index
    %0 = vector.load %arg3[%c0, %c0_0, %c0_1] : memref<2x8x32xf32, #tpu.memory_space<vmem>>, vector<2x8x32xf32>
    %cst = arith.constant dense<0.000000e+00> : vector<2x32xf32>
    %1 = vector.multi_reduction <add>, %0, %cst [1] : vector<2x8x32xf32> to vector<2x32xf32>
    %cst_2 = arith.constant 8.000000e+00 : f32
    %2 = vector.broadcast %cst_2 : f32 to vector<2x32xf32>
    %3 = arith.divf %1, %2 : vector<2x32xf32>
    %4 = arith.truncf %3 : vector<2x32xf32> to vector<2x32xbf16>
    %c0_3 = arith.constant 0 : index
    %c0_4 = arith.constant 0 : index
    %c0_5 = arith.constant 0 : index
    %5 = vector.load %arg4[%c0_3, %c0_4, %c0_5] : memref<2x16x32xf32, #tpu.memory_space<vmem>>, vector<2x16x32xf32>
    %cst_6 = arith.constant dense<0.000000e+00> : vector<2x32xf32>
    %6 = vector.multi_reduction <add>, %5, %cst_6 [1] : vector<2x16x32xf32> to vector<2x32xf32>
    %cst_7 = arith.constant 1.600000e+01 : f32
    %7 = vector.broadcast %cst_7 : f32 to vector<2x32xf32>
    %8 = arith.divf %6, %7 : vector<2x32xf32>
    %9 = arith.truncf %8 : vector<2x32xf32> to vector<2x32xbf16>
    %c0_8 = arith.constant 0 : index
    %c0_9 = arith.constant 0 : index
    %10 = vector.load %arg1[%c0_8, %c0_9] : memref<2x512xf32, #tpu.memory_space<vmem>>, vector<2x512xf32>
    %11 = arith.truncf %10 : vector<2x512xf32> to vector<2x512xbf16>
    %c0_10 = arith.constant 0 : index
    %c0_11 = arith.constant 0 : index
    %12 = vector.load %arg2[%c0_10, %c0_11] : memref<2x512xf32, #tpu.memory_space<vmem>>, vector<2x512xf32>
    %13 = arith.truncf %12 : vector<2x512xf32> to vector<2x512xbf16>
    %c0_12 = arith.constant 0 : index
    %c0_13 = arith.constant 0 : index
    %14 = vector.load %arg5[%c0_12, %c0_13] : memref<512x512xbf16, #tpu.memory_space<vmem>>, vector<512x512xbf16>
    %cst_14 = arith.constant dense<0.000000e+00> : vector<2x512xf32>
    %15 = tpu.matmul %11, %14, %cst_14 {dimension_numbers = #tpu.dot_dimension_numbers<[1], [0], [0], [1], [0, 0, 1, 1], [], []>} : vector<2x512xbf16>, vector<512x512xbf16>, vector<2x512xf32> -> vector<2x512xf32>
    %c0_15 = arith.constant 0 : index
    %c0_16 = arith.constant 0 : index
    %16 = vector.load %arg6[%c0_15, %c0_16] : memref<512x512xbf16, #tpu.memory_space<vmem>>, vector<512x512xbf16>
    %cst_17 = arith.constant dense<0.000000e+00> : vector<2x512xf32>
    %17 = tpu.matmul %13, %16, %cst_17 {dimension_numbers = #tpu.dot_dimension_numbers<[1], [0], [0], [1], [0, 0, 1, 1], [], []>} : vector<2x512xbf16>, vector<512x512xbf16>, vector<2x512xf32> -> vector<2x512xf32>
    %18 = arith.addf %15, %17 : vector<2x512xf32>
    %c0_18 = arith.constant 0 : index
    %c0_19 = arith.constant 0 : index
    %19 = vector.load %arg7[%c0_18, %c0_19] : memref<32x512xbf16, #tpu.memory_space<vmem>>, vector<32x512xbf16>
    %cst_20 = arith.constant dense<0.000000e+00> : vector<2x512xf32>
    %20 = tpu.matmul %4, %19, %cst_20 {dimension_numbers = #tpu.dot_dimension_numbers<[1], [0], [0], [1], [0, 0, 1, 1], [], []>} : vector<2x32xbf16>, vector<32x512xbf16>, vector<2x512xf32> -> vector<2x512xf32>
    %21 = arith.addf %18, %20 : vector<2x512xf32>
    %c0_21 = arith.constant 0 : index
    %c0_22 = arith.constant 0 : index
    %22 = vector.load %arg8[%c0_21, %c0_22] : memref<32x512xbf16, #tpu.memory_space<vmem>>, vector<32x512xbf16>
    %cst_23 = arith.constant dense<0.000000e+00> : vector<2x512xf32>
    %23 = tpu.matmul %9, %22, %cst_23 {dimension_numbers = #tpu.dot_dimension_numbers<[1], [0], [0], [1], [0, 0, 1, 1], [], []>} : vector<2x32xbf16>, vector<32x512xbf16>, vector<2x512xf32> -> vector<2x512xf32>
    %24 = arith.addf %21, %23 : vector<2x512xf32>
    %c0_24 = arith.constant 0 : index
    %c0_25 = arith.constant 0 : index
    %25 = vector.load %arg9[%c0_24, %c0_25] : memref<1x512xf32, #tpu.memory_space<vmem>>, vector<1x512xf32>
    %26 = vector.broadcast %25 : vector<1x512xf32> to vector<2x512xf32>
    %27 = arith.addf %24, %26 : vector<2x512xf32>
    %cst_26 = arith.constant 0.000000e+00 : f32
    %28 = vector.broadcast %cst_26 : f32 to vector<2x512xf32>
    %29 = arith.maximumf %27, %28 : vector<2x512xf32>
    %c0_27 = arith.constant 0 : index
    %c0_28 = arith.constant 0 : index
    %30 = vector.load %arg10[%c0_27, %c0_28] : memref<512x512xbf16, #tpu.memory_space<vmem>>, vector<512x512xbf16>
    %cst_29 = arith.constant dense<0.000000e+00> : vector<2x512xf32>
    %31 = tpu.matmul %11, %30, %cst_29 {dimension_numbers = #tpu.dot_dimension_numbers<[1], [0], [0], [1], [0, 0, 1, 1], [], []>} : vector<2x512xbf16>, vector<512x512xbf16>, vector<2x512xf32> -> vector<2x512xf32>
    %c0_30 = arith.constant 0 : index
    %c0_31 = arith.constant 0 : index
    %32 = vector.load %arg11[%c0_30, %c0_31] : memref<512x512xbf16, #tpu.memory_space<vmem>>, vector<512x512xbf16>
    %cst_32 = arith.constant dense<0.000000e+00> : vector<2x512xf32>
    %33 = tpu.matmul %13, %32, %cst_32 {dimension_numbers = #tpu.dot_dimension_numbers<[1], [0], [0], [1], [0, 0, 1, 1], [], []>} : vector<2x512xbf16>, vector<512x512xbf16>, vector<2x512xf32> -> vector<2x512xf32>
    %34 = arith.addf %31, %33 : vector<2x512xf32>
    %c0_33 = arith.constant 0 : index
    %c0_34 = arith.constant 0 : index
    %35 = vector.load %arg12[%c0_33, %c0_34] : memref<32x512xbf16, #tpu.memory_space<vmem>>, vector<32x512xbf16>
    %cst_35 = arith.constant dense<0.000000e+00> : vector<2x512xf32>
    %36 = tpu.matmul %4, %35, %cst_35 {dimension_numbers = #tpu.dot_dimension_numbers<[1], [0], [0], [1], [0, 0, 1, 1], [], []>} : vector<2x32xbf16>, vector<32x512xbf16>, vector<2x512xf32> -> vector<2x512xf32>
    %37 = arith.addf %34, %36 : vector<2x512xf32>
    %c0_36 = arith.constant 0 : index
    %c0_37 = arith.constant 0 : index
    %38 = vector.load %arg13[%c0_36, %c0_37] : memref<32x512xbf16, #tpu.memory_space<vmem>>, vector<32x512xbf16>
    %cst_38 = arith.constant dense<0.000000e+00> : vector<2x512xf32>
    %39 = tpu.matmul %9, %38, %cst_38 {dimension_numbers = #tpu.dot_dimension_numbers<[1], [0], [0], [1], [0, 0, 1, 1], [], []>} : vector<2x32xbf16>, vector<32x512xbf16>, vector<2x512xf32> -> vector<2x512xf32>
    %40 = arith.addf %37, %39 : vector<2x512xf32>
    %c0_39 = arith.constant 0 : index
    %c0_40 = arith.constant 0 : index
    %41 = vector.load %arg14[%c0_39, %c0_40] : memref<1x512xf32, #tpu.memory_space<vmem>>, vector<1x512xf32>
    %42 = vector.broadcast %41 : vector<1x512xf32> to vector<2x512xf32>
    %43 = arith.addf %40, %42 : vector<2x512xf32>
    %44 = arith.addf %29, %43 : vector<2x512xf32>
    %45 = arith.truncf %44 : vector<2x512xf32> to vector<2x512xbf16>
    %c0_41 = arith.constant 0 : index
    %c0_42 = arith.constant 0 : index
    %46 = vector.load %arg15[%c0_41, %c0_42] : memref<512x5xbf16, #tpu.memory_space<vmem>>, vector<512x5xbf16>
    %cst_43 = arith.constant dense<0.000000e+00> : vector<2x5xf32>
    %47 = tpu.matmul %45, %46, %cst_43 {dimension_numbers = #tpu.dot_dimension_numbers<[1], [0], [0], [1], [0, 0, 1, 1], [], []>} : vector<2x512xbf16>, vector<512x5xbf16>, vector<2x5xf32> -> vector<2x5xf32>
    %c0_44 = arith.constant 0 : index
    %c0_45 = arith.constant 0 : index
    %48 = vector.load %arg16[%c0_44, %c0_45] : memref<1x5xf32, #tpu.memory_space<vmem>>, vector<1x5xf32>
    %49 = vector.broadcast %48 : vector<1x5xf32> to vector<2x5xf32>
    %50 = arith.addf %47, %49 : vector<2x5xf32>
    %c0_46 = arith.constant 0 : index
    %c0_47 = arith.constant 0 : index
    %51 = vector.load %arg17[%c0_46, %c0_47] : memref<2x5xf32, #tpu.memory_space<vmem>>, vector<2x5xf32>
    tpu.vector_store %arg17[%c0_46, %c0_47], %50 {strides = array<i32>} : memref<2x5xf32, #tpu.memory_space<vmem>>, vector<2x5xf32>,
    return
  }
  func.func @transform_0(%arg0: i32) -> (i32, i32) {
    %c0_i32 = arith.constant 0 : i32
    %c0_i32_0 = arith.constant 0 : i32
    %c0_i32_1 = arith.constant 0 : i32
    return %c0_i32, %c0_i32_0 : i32, i32
  }
  func.func @transform_1(%arg0: i32) -> (i32, i32) {
    %c0_i32 = arith.constant 0 : i32
    %c0_i32_0 = arith.constant 0 : i32
    %c0_i32_1 = arith.constant 0 : i32
    return %c0_i32, %c0_i32_0 : i32, i32
  }
  func.func @transform_2(%arg0: i32) -> (i32, i32, i32) {
    %c0_i32 = arith.constant 0 : i32
    %c0_i32_0 = arith.constant 0 : i32
    %c0_i32_1 = arith.constant 0 : i32
    %c0_i32_2 = arith.constant 0 : i32
    return %c0_i32, %c0_i32_0, %c0_i32_1 : i32, i32, i32
  }
  func.func @transform_3(%arg0: i32) -> (i32, i32, i32) {
    %c0_i32 = arith.constant 0 : i32
    %c0_i32_0 = arith.constant 0 : i32
    %c0_i32_1 = arith.constant 0 : i32
    %c0_i32_2 = arith.constant 0 : i32
    return %c0_i32, %c0_i32_0, %c0_i32_1 : i32, i32, i32
  }
  func.func @transform_4(%arg0: i32) -> (i32, i32) {
    %c0_i32 = arith.constant 0 : i32
    %c0_i32_0 = arith.constant 0 : i32
    %c0_i32_1 = arith.constant 0 : i32
    return %c0_i32, %c0_i32_0 : i32, i32
  }
  func.func @transform_5(%arg0: i32) -> (i32, i32) {
    %c0_i32 = arith.constant 0 : i32
    %c0_i32_0 = arith.constant 0 : i32
    %c0_i32_1 = arith.constant 0 : i32
    return %c0_i32, %c0_i32_0 : i32, i32
  }
  func.func @transform_6(%arg0: i32) -> (i32, i32) {
    %c0_i32 = arith.constant 0 : i32
    %c0_i32_0 = arith.constant 0 : i32
    %c0_i32_1 = arith.constant 0 : i32
    return %c0_i32, %c0_i32_0 : i32, i32
  }
  func.func @transform_7(%arg0: i32) -> (i32, i32) {
    %c0_i32 = arith.constant 0 : i32
    %c0_i32_0 = arith.constant 0 : i32
    %c0_i32_1 = arith.constant 0 : i32
    return %c0_i32, %c0_i32_0 : i32, i32
  }
  func.func @transform_8(%arg0: i32) -> (i32, i32) {
    %c0_i32 = arith.constant 0 : i32
    %c0_i32_0 = arith.constant 0 : i32
    %c0_i32_1 = arith.constant 0 : i32
    return %c0_i32, %c0_i32_0 : i32, i32
  }
  func.func @transform_9(%arg0: i32) -> (i32, i32) {
    %c0_i32 = arith.constant 0 : i32
    %c0_i32_0 = arith.constant 0 : i32
    %c0_i32_1 = arith.constant 0 : i32
    return %c0_i32, %c0_i32_0 : i32, i32
  }
  func.func @transform_10(%arg0: i32) -> (i32, i32) {
    %c0_i32 = arith.constant 0 : i32
    %c0_i32_0 = arith.constant 0 : i32
    %c0_i32_1 = arith.constant 0 : i32
    return %c0_i32, %c0_i32_0 : i32, i32
  }
  func.func @transform_11(%arg0: i32) -> (i32, i32) {
    %c0_i32 = arith.constant 0 : i32
    %c0_i32_0 = arith.constant 0 : i32
    %c0_i32_1 = arith.constant 0 : i32
    return %c0_i32, %c0_i32_0 : i32, i32
  }
  func.func @transform_12(%arg0: i32) -> (i32, i32) {
    %c0_i32 = arith.constant 0 : i32
    %c0_i32_0 = arith.constant 0 : i32
    %c0_i32_1 = arith.constant 0 : i32
    return %c0_i32, %c0_i32_0 : i32, i32
  }
  func.func @transform_13(%arg0: i32) -> (i32, i32) {
    %c0_i32 = arith.constant 0 : i32
    %c0_i32_0 = arith.constant 0 : i32
    %c0_i32_1 = arith.constant 0 : i32
    return %c0_i32, %c0_i32_0 : i32, i32
  }
  func.func @transform_14(%arg0: i32) -> (i32, i32) {
    %c0_i32 = arith.constant 0 : i32
    %c0_i32_0 = arith.constant 0 : i32
    %c0_i32_1 = arith.constant 0 : i32
    return %c0_i32, %c0_i32_0 : i32, i32
  }
  func.func @transform_15(%arg0: i32) -> (i32, i32) {
    %c0_i32 = arith.constant 0 : i32
    %c0_i32_0 = arith.constant 0 : i32
    %c0_i32_1 = arith.constant 0 : i32
    return %c0_i32, %c0_i32_0 : i32, i32
  }
  func.func @transform_16(%arg0: i32) -> (i32, i32) {
    %c0_i32 = arith.constant 0 : i32
    %c0_i32_0 = arith.constant 0 : i32
    %c0_i32_1 = arith.constant 0 : i32
    return %c0_i32, %c0_i32_0 : i32, i32
  }
}

</mosaic_0001>

<bundles_post_ra>
// kernel: mol_ddi_forward.3
= control target key start
LH: loop header
LB: loop body
LE: loop exit
PB: predicated region body
PF: predicated region fallthrough
CT: control target
= control target key end

     0   :  { %8 = vsyncpa [#allocation4], 0  ;;  %s1493_s12 = smov 0   ;;  %s1495_s13 = smov 0   ;;  %s1840_s0 = inlined_call_operand.vmem [shape: bf16[4,256,32], index: 0, kind: input, shape index: {}]   ;;  %s1841_s1 = inlined_call_operand.vmem [shape: bf16[32,512], index: 1, kind: input, shape index: {}]   ;;  %s1842_s2 = inlined_call_operand.hbm [shape: f32[1,512], index: 2, kind: input, shape index: {}]   ;;  %s1843_s3 = inlined_call_operand.vmem [shape: f32[4,1,512], index: 3, kind: output, shape index: {}]  }
   0x1   :  { %s1497_s14 = smov 0  }
   0x2 LB: > { %s1180_s15 = sadd.s32 4294967295, %s1469_s14   ;;  %s26_s16 = sadd.s32 1, %s1465_s13  ;;  %s1469_s14 = sphi %s1497_s14, %s14_s14   ;;  %s1465_s13 = sphi %s1495_s13, %s1847_s13   ;;  %s1461_s12 = sphi %s1493_s12, %s1846_s12  }
   0x3   : > { %p28_p0 = scmp.ge.s32.totalorder %s26_s16, 4  ;;  %p1182_p1 = scmp.ge.s32.totalorder %s1469_s14, 1 }
   0x4   : > { %p127_p2 = scmp.lt.s32.totalorder %s1469_s14, 5  ;;  %p1385_p4 = scmp.eq.s32.totalorder %s1180_s15, 0 }
   0x5   : > { %s1849_s16 = smov (%p28_p0, %s26_s16), 0  ;;  %s142_s19 = sshll.u32 %s1842_s2, 4  ;;  %s143_s19 = int_to_ptr.hbm [resolvable:$true] %s142_s19 }
   0x6   : > { %p128_p3 = pnand %p1182_p1, %p127_p2  ;;  %s1471_s20 = smov [#allocation3]  }
   0x7   : > { %s144_s21 = sshll.u32 %s1471_s20, 4  ;;  %s145_s21 = int_to_ptr.vmem [resolvable:$true] %s144_s21 }
   0x8   : > { %p1381_p5 = pneg %p128_p3  ;;  %170 = sbr.rel (%p128_p3) target bundleno = 442 (0x1ba), region = 32 }
   0xa   : > { %p1382_p6 = pnand %p1385_p4, %p1381_p5 }
   0xc   : > { %1384 = dma.hbm_to_vmem [thread:$0]  (!%p1382_p6), %s143_s19, 64, %s145_s21, [#allocation4]  }
   0xd   : > { %1456 = dma.done.wait (%p1385_p4), [#allocation4], 64  }
   0xe   : > { %1458 = vsyncadd (%p1385_p4), [#allocation4], 4294967232  ;;  %p199_p7 = scmp.lt.s32.totalorder %s1461_s12, 3  ;;  %v1272_v0 = vld [vmem:[%s1841_s1 + $0x20] sm:$0xf]  ;;  %vm392_vm0 = vcmask 261120  }
   0xf   : > { %v1375_v1 = vld [vmem:[%s1841_s1 + $0x2c] sm:$0xf0]  ;;  %v1373_v2 = vld [vmem:[%s1841_s1 + $0x24] sm:$0xf]  ;;  %v1274_v4 = vld [vmem:[%s1841_s1 + $0x30] sm:$0xf0] }
  0x10   : > { %s1851_s12 = smov (!%p199_p7, %s1461_s12), 3  ;;  %v1273_v3 = vor.u32 %v1375_v1, %v1272_v0  ;;  %v1280_v5 = vld [vmem:[%s1841_s1 + $0x28] sm:$0xf]  ;;  %v1376_v6 = vld [vmem:[%s1841_s1 + $0x34] sm:$0xf0]  ;;  %v1277_v7 = vor.u32 %v1373_v2, %v1274_v4  ;;  %vm1081_vm2 = vcmask 1040384  }
  0x11   : > { %s1352_s22 = sshll.u32 %s1851_s12, 7  ;;  %v1281_v8 = vor.u32 %v1376_v6, %v1280_v5  ;;  %v1374_v9 = vld [vmem:[%s1841_s1 + $0x2c] sm:$0xf]  ;;  %v1282_v10 = vld [vmem:[%s1841_s1 + $0x38] sm:$0xf0]  ;;  %vm1083_vm3 = vcmask 1042434  }
  0x12   : > { %v1256_v11 = vld [vmem:[%s1841_s1] sm:$0xf]  ;;  %447 = vmatpush.bf16.msra.mxu0 %v1273_v3  ;;  %v1285_v12 = vor.u32 %v1374_v9, %v1282_v10  ;;  %v1371_v13 = vld [vmem:[%s1841_s1 + $0xc] sm:$0xf0]  ;;  %v1369_v14 = vld [vmem:[%s1841_s1 + $0x4] sm:$0xf]  ;;  %s1557_s27 = scalar_lea.vmem %s1840_s0, %s1352_s22  ;;  %536 = vmatpush.bf16.msra.mxu1 %v1277_v7 }
  0x13   : > { %v1258_v15 = vld [vmem:[%s1841_s1 + $0x10] sm:$0xf0]  ;;  %625 = vmatpush.bf16.msra.mxu2 %v1281_v8  ;;  %v1257_v16 = vor.u32 %v1371_v13, %v1256_v11  ;;  %v1264_v18 = vld [vmem:[%s1841_s1 + $0x8] sm:$0xf]  ;;  %v1372_v19 = vld [vmem:[%s1841_s1 + $0x14] sm:$0xf0] }
  0x14   : > { %v1261_v17 = vor.u32 %v1369_v14, %v1258_v15  ;;  %v1370_v20 = vld [vmem:[%s1841_s1 + $0xc] sm:$0xf]  ;;  %714 = vmatpush.bf16.msra.mxu3 %v1285_v12  ;;  %v1265_v21 = vor.u32 %v1372_v19, %v1264_v18  ;;  %v1266_v22 = vld [vmem:[%s1841_s1 + $0x18] sm:$0xf0]  ;;  %v1353_v24 = vld [vmem:[%s1557_s27] sm:$0xff]  ;;  %vm1085_vm4 = vcmask 1041408  }
  0x15   : > { %v1269_v23 = vor.u32 %v1370_v20, %v1266_v22  ;;  %v1354_v25 = vld [vmem:[%s1557_s27 + $0x8] sm:$0xff]  ;;  %v1355_v26 = vld [vmem:[%s1557_s27 + $0x10] sm:$0xff]  ;;  %v1356_v27 = vld [vmem:[%s1557_s27 + $0x18] sm:$0xff]  ;;  %s1189_s8 = sshll.u32 %s1851_s12, 2 }
  0x16   : > { %448 = vmatpush.bf16.msra.mxu0 %v1257_v16  ;;  %537 = vmatpush.bf16.msra.mxu1 %v1261_v17  ;;  %v1357_v28 = vld [vmem:[%s1557_s27 + $0x20] sm:$0xff]  ;;  %v1358_v29 = vld [vmem:[%s1557_s27 + $0x28] sm:$0xff]  ;;  %v1359_v30 = vld [vmem:[%s1557_s27 + $0x30] sm:$0xff]  ;;  %s211_s11 = scalar_lea.vmem %s1843_s3, %s1189_s8 }
  0x17   : > { %626 = vmatpush.bf16.msra.mxu2 %v1265_v21  ;;  %v1360_v31 = vld [vmem:[%s1557_s27 + $0x38] sm:$0xff]  ;;  %v1361_v32 = vld [vmem:[%s1557_s27 + $0x40] sm:$0xff]  ;;  %v1362_v57 = vld [vmem:[%s1557_s27 + $0x48] sm:$0xff] }
  0x18   : > { %715 = vmatpush.bf16.msra.mxu3 %v1269_v23  ;;  %v262_v33 = vld [vmem:[#allocation3] sm:$0xf] }
  0x19   : > { %1286 = vmatmul.msk.bf16.vlgmr.msra.gmra.mxu0 %vm392_vm0, %v1353_v24  ;;  %1302 = vmatmul.msk.bf16.vlgmr.msra.gmra.mxu1 %vm392_vm0, %v1353_v24  ;;  %v1612_v35 = vperm.slane %v262_v33, 0  ;;  %v1615_v37 = vperm.slane %v262_v33, 1  ;;  %v1623_v46 = vperm.slane %v262_v33, 2  ;;  %v1626_v48 = vperm.slane %v262_v33, 3 }
  0x1a   : > { %1318 = vmatmul.msk.bf16.vlgmr.msra.gmra.mxu2 %vm392_vm0, %v1353_v24 }
  0x1b   : > { %1334 = vmatmul.msk.bf16.vlgmr.msra.gmra.mxu3 %vm392_vm0, %v1353_v24 }
  0x29   : > { %1287 = vmatmul.msk.bf16.gmra.mxu0 %vm392_vm0, %v1354_v25  ;;  %1303 = vmatmul.msk.bf16.gmra.mxu1 %vm392_vm0, %v1354_v25 }
  0x2a   : > { %1319 = vmatmul.msk.bf16.gmra.mxu2 %vm392_vm0, %v1354_v25 }
  0x2b   : > { %1335 = vmatmul.msk.bf16.gmra.mxu3 %vm392_vm0, %v1354_v25 }
  0x39   : > { %1288 = vmatmul.msk.bf16.gmra.mxu0 %vm392_vm0, %v1355_v26  ;;  %1304 = vmatmul.msk.bf16.gmra.mxu1 %vm392_vm0, %v1355_v26 }
  0x3a   : > { %1320 = vmatmul.msk.bf16.gmra.mxu2 %vm392_vm0, %v1355_v26 }
  0x3b   : > { %1336 = vmatmul.msk.bf16.gmra.mxu3 %vm392_vm0, %v1355_v26 }
  0x49   : > { %1289 = vmatmul.msk.bf16.gmra.mxu0 %vm392_vm0, %v1356_v27  ;;  %1305 = vmatmul.msk.bf16.gmra.mxu1 %vm392_vm0, %v1356_v27 }
  0x4a   : > { %1321 = vmatmul.msk.bf16.gmra.mxu2 %vm392_vm0, %v1356_v27 }
  0x4b   : > { %1337 = vmatmul.msk.bf16.gmra.mxu3 %vm392_vm0, %v1356_v27 }
  0x59   : > { %1290 = vmatmul.msk.bf16.gmra.mxu0 %vm392_vm0, %v1357_v28  ;;  %1306 = vmatmul.msk.bf16.gmra.mxu1 %vm392_vm0, %v1357_v28 }
  0x5a   : > { %1322 = vmatmul.msk.bf16.gmra.mxu2 %vm392_vm0, %v1357_v28 }
  0x5b   : > { %1338 = vmatmul.msk.bf16.gmra.mxu3 %vm392_vm0, %v1357_v28  ;;  %v1363_v28 = vld [vmem:[%s1557_s27 + $0x50] sm:$0xff] }
  0x69   : > { %1291 = vmatmul.msk.bf16.gmra.mxu0 %vm392_vm0, %v1358_v29  ;;  %1307 = vmatmul.msk.bf16.gmra.mxu1 %vm392_vm0, %v1358_v29 }
  0x6a   : > { %1323 = vmatmul.msk.bf16.gmra.mxu2 %vm392_vm0, %v1358_v29 }
  0x6b   : > { %1339 = vmatmul.msk.bf16.gmra.mxu3 %vm392_vm0, %v1358_v29 }
  0x79   : > { %1292 = vmatmul.msk.bf16.gmra.mxu0 %vm392_vm0, %v1359_v30  ;;  %1308 = vmatmul.msk.bf16.gmra.mxu1 %vm392_vm0, %v1359_v30 }
  0x7a   : > { %1324 = vmatmul.msk.bf16.gmra.mxu2 %vm392_vm0, %v1359_v30 }
  0x7b   : > { %1340 = vmatmul.msk.bf16.gmra.mxu3 %vm392_vm0, %v1359_v30 }
  0x89   : > { %1293 = vmatmul.msk.bf16.gmra.mxu0 %vm392_vm0, %v1360_v31  ;;  %1309 = vmatmul.msk.bf16.gmra.mxu1 %vm392_vm0, %v1360_v31 }
  0x8a   : > { %1325 = vmatmul.msk.bf16.gmra.mxu2 %vm392_vm0, %v1360_v31 }
  0x8b   : > { %1341 = vmatmul.msk.bf16.gmra.mxu3 %vm392_vm0, %v1360_v31 }
  0x96   : > { %v450_v34 = vpop.f32.mrf.mxu0  ;;  %v539_v36 = vpop.f32.mrf.mxu1 }
  0x97   : > { %v451_v38 = vadd.f32 %v450_v34, %v1612_v35  ;;  %v540_v40 = vadd.f32 %v539_v36, %v1615_v37 }
  0x99   : > { %1294 = vmatmul.msk.bf16.gmra.mxu0 %vm392_vm0, %v1361_v32  ;;  %1310 = vmatmul.msk.bf16.gmra.mxu1 %vm392_vm0, %v1361_v32  ;;  %v797_v43 = vmax.f32 %v451_v38, 0.0  ;;  %v798_v50 = vmax.f32 %v540_v40, 0.0 }
  0x9a   : > { %1326 = vmatmul.msk.bf16.gmra.mxu2 %vm392_vm0, %v1361_v32 }
  0x9b   : > { %1342 = vmatmul.msk.bf16.gmra.mxu3 %vm392_vm0, %v1361_v32 }
  0x9d   : > { %v628_v39 = vpop.f32.mrf.mxu2 }
  0x9e   : > { %v717_v41 = vpop.f32.mrf.mxu3  ;;  %v452_v42 = vpop.f32.mrf.mxu0  ;;  %v629_v53 = vadd.f32 %v628_v39, %v1623_v46 }
  0x9f   : > { %v453_v44 = vadd.f32 %v452_v42, %v1612_v35  ;;  %v541_v45 = vpop.f32.mrf.mxu1  ;;  %v718_v55 = vadd.f32 %v717_v41, %v1626_v48 }
  0xa0   : > { %v542_v47 = vadd.f32 %v541_v45, %v1615_v37  ;;  %v799_v0 = vmax.f32 %v629_v53, 0.0 }
  0xa1   : > { %v801_v49 = vmax.f32 %v453_v44, 0.0  ;;  %v800_v3 = vmax.f32 %v718_v55, 0.0 }
  0xa2   : > { %v802_v51 = vmax.f32 %v542_v47, 0.0 }
  0xa3   : > { %v926_v52 = vadd.f32 %v801_v49, %v797_v43 }
  0xa4   : > { %v963_v54 = vadd.f32 %v802_v51, %v798_v50 }
  0xa5   : > { %v630_v56 = vpop.f32.mrf.mxu2 }
  0xa6   : > { %v631_v58 = vadd.f32 %v630_v56, %v1623_v46  ;;  %v719_v59 = vpop.f32.mrf.mxu3  ;;  %v455_v60 = vpop.f32.mrf.mxu0 }
  0xa7   : > { %v720_v61 = vadd.f32 %v719_v59, %v1626_v48  ;;  %v456_v62 = vadd.f32 %v455_v60, %v1612_v35  ;;  %v544_v63 = vpop.f32.mrf.mxu1 }
  0xa8   : > { %v803_v1 = vmax.f32 %v631_v58, 0.0  ;;  %v545_v2 = vadd.f32 %v544_v63, %v1615_v37 }
  0xa9   : > { %v804_v4 = vmax.f32 %v720_v61, 0.0  ;;  %v805_v5 = vmax.f32 %v456_v62, 0.0  ;;  %1295 = vmatmul.msk.bf16.gmra.mxu0 %vm392_vm0, %v1362_v57  ;;  %1311 = vmatmul.msk.bf16.gmra.mxu1 %vm392_vm0, %v1362_v57 }
  0xaa   : > { %v1000_v6 = vadd.f32 %v803_v1, %v799_v0  ;;  %v806_v7 = vmax.f32 %v545_v2, 0.0  ;;  %1327 = vmatmul.msk.bf16.gmra.mxu2 %vm392_vm0, %v1362_v57  ;;  %v1364_v1 = vld [vmem:[%s1557_s27 + $0x58] sm:$0xff] }
  0xab   : > { %v1037_v8 = vadd.f32 %v804_v4, %v800_v3  ;;  %v927_v9 = vadd.f32 %v926_v52, %v805_v5  ;;  %1343 = vmatmul.msk.bf16.gmra.mxu3 %vm392_vm0, %v1362_v57 }
  0xac   : > { %v964_v10 = vadd.f32 %v963_v54, %v806_v7 }
  0xad   : > { %v633_v11 = vpop.f32.mrf.mxu2 }
  0xae   : > { %v634_v12 = vadd.f32 %v633_v11, %v1623_v46  ;;  %v722_v13 = vpop.f32.mrf.mxu3  ;;  %v457_v14 = vpop.f32.mrf.mxu0 }
  0xaf   : > { %v723_v15 = vadd.f32 %v722_v13, %v1626_v48  ;;  %v458_v16 = vadd.f32 %v457_v14, %v1612_v35  ;;  %v546_v17 = vpop.f32.mrf.mxu1 }
  0xb0   : > { %v807_v18 = vmax.f32 %v634_v12, 0.0  ;;  %v547_v19 = vadd.f32 %v546_v17, %v1615_v37 }
  0xb1   : > { %v808_v20 = vmax.f32 %v723_v15, 0.0  ;;  %v809_v21 = vmax.f32 %v458_v16, 0.0 }
  0xb2   : > { %v1001_v22 = vadd.f32 %v1000_v6, %v807_v18  ;;  %v810_v23 = vmax.f32 %v547_v19, 0.0 }
  0xb3   : > { %v1038_v24 = vadd.f32 %v1037_v8, %v808_v20  ;;  %v928_v25 = vadd.f32 %v927_v9, %v809_v21 }
  0xb4   : > { %v965_v26 = vadd.f32 %v964_v10, %v810_v23 }
  0xb5   : > { %v635_v27 = vpop.f32.mrf.mxu2 }
  0xb6   : > { %v636_v29 = vadd.f32 %v635_v27, %v1623_v46  ;;  %v724_v30 = vpop.f32.mrf.mxu3  ;;  %v460_v31 = vpop.f32.mrf.mxu0 }
  0xb7   : > { %v725_v32 = vadd.f32 %v724_v30, %v1626_v48  ;;  %v461_v33 = vadd.f32 %v460_v31, %v1612_v35  ;;  %v549_v34 = vpop.f32.mrf.mxu1 }
  0xb8   : > { %v811_v36 = vmax.f32 %v636_v29, 0.0  ;;  %v550_v38 = vadd.f32 %v549_v34, %v1615_v37  ;;  %v1365_v34 = vld [vmem:[%s1557_s27 + $0x60] sm:$0xff] }
  0xb9   : > { %v812_v39 = vmax.f32 %v725_v32, 0.0  ;;  %v813_v40 = vmax.f32 %v461_v33, 0.0  ;;  %1296 = vmatmul.msk.bf16.gmra.mxu0 %vm392_vm0, %v1363_v28  ;;  %1312 = vmatmul.msk.bf16.gmra.mxu1 %vm392_vm0, %v1363_v28 }
  0xba   : > { %v1002_v41 = vadd.f32 %v1001_v22, %v811_v36  ;;  %v814_v42 = vmax.f32 %v550_v38, 0.0  ;;  %1328 = vmatmul.msk.bf16.gmra.mxu2 %vm392_vm0, %v1363_v28 }
  0xbb   : > { %v1039_v43 = vadd.f32 %v1038_v24, %v812_v39  ;;  %v929_v44 = vadd.f32 %v928_v25, %v813_v40  ;;  %1344 = vmatmul.msk.bf16.gmra.mxu3 %vm392_vm0, %v1363_v28 }
  0xbc   : > { %v966_v45 = vadd.f32 %v965_v26, %v814_v42 }
  0xbd   : > { %v638_v47 = vpop.f32.mrf.mxu2 }
  0xbe   : > { %v639_v49 = vadd.f32 %v638_v47, %v1623_v46  ;;  %v727_v50 = vpop.f32.mrf.mxu3  ;;  %v462_v51 = vpop.f32.mrf.mxu0 }
  0xbf   : > { %v728_v52 = vadd.f32 %v727_v50, %v1626_v48  ;;  %v463_v53 = vadd.f32 %v462_v51, %v1612_v35  ;;  %v551_v54 = vpop.f32.mrf.mxu1 }
  0xc0   : > { %v815_v55 = vmax.f32 %v639_v49, 0.0  ;;  %v552_v56 = vadd.f32 %v551_v54, %v1615_v37 }
  0xc1   : > { %v816_v57 = vmax.f32 %v728_v52, 0.0  ;;  %v817_v58 = vmax.f32 %v463_v53, 0.0 }
  0xc2   : > { %v1003_v59 = vadd.f32 %v1002_v41, %v815_v55  ;;  %v818_v60 = vmax.f32 %v552_v56, 0.0 }
  0xc3   : > { %v1040_v61 = vadd.f32 %v1039_v43, %v816_v57  ;;  %v930_v62 = vadd.f32 %v929_v44, %v817_v58 }
  0xc4   : > { %v967_v63 = vadd.f32 %v966_v45, %v818_v60 }
  0xc5   : > { %v640_v0 = vpop.f32.mrf.mxu2 }
  0xc6   : > { %v641_v2 = vadd.f32 %v640_v0, %v1623_v46  ;;  %v729_v3 = vpop.f32.mrf.mxu3  ;;  %v465_v4 = vpop.f32.mrf.mxu0 }
  0xc7   : > { %v730_v5 = vadd.f32 %v729_v3, %v1626_v48  ;;  %v466_v6 = vadd.f32 %v465_v4, %v1612_v35  ;;  %v554_v7 = vpop.f32.mrf.mxu1 }
  0xc8   : > { %v819_v8 = vmax.f32 %v641_v2, 0.0  ;;  %v555_v9 = vadd.f32 %v554_v7, %v1615_v37  ;;  %v1366_v7 = vld [vmem:[%s1557_s27 + $0x68] sm:$0xff] }
  0xc9   : > { %v820_v10 = vmax.f32 %v730_v5, 0.0  ;;  %v821_v11 = vmax.f32 %v466_v6, 0.0  ;;  %1297 = vmatmul.msk.bf16.gmra.mxu0 %vm392_vm0, %v1364_v1  ;;  %1313 = vmatmul.msk.bf16.gmra.mxu1 %vm392_vm0, %v1364_v1 }
  0xca   : > { %v1004_v12 = vadd.f32 %v1003_v59, %v819_v8  ;;  %v822_v13 = vmax.f32 %v555_v9, 0.0  ;;  %1329 = vmatmul.msk.bf16.gmra.mxu2 %vm392_vm0, %v1364_v1 }
  0xcb   : > { %v1041_v14 = vadd.f32 %v1040_v61, %v820_v10  ;;  %v931_v15 = vadd.f32 %v930_v62, %v821_v11  ;;  %1345 = vmatmul.msk.bf16.gmra.mxu3 %vm392_vm0, %v1364_v1 }
  0xcc   : > { %v968_v16 = vadd.f32 %v967_v63, %v822_v13 }
  0xcd   : > { %v643_v17 = vpop.f32.mrf.mxu2 }
  0xce   : > { %v644_v18 = vadd.f32 %v643_v17, %v1623_v46  ;;  %v732_v19 = vpop.f32.mrf.mxu3  ;;  %v467_v20 = vpop.f32.mrf.mxu0 }
  0xcf   : > { %v733_v21 = vadd.f32 %v732_v19, %v1626_v48  ;;  %v468_v22 = vadd.f32 %v467_v20, %v1612_v35  ;;  %v556_v23 = vpop.f32.mrf.mxu1 }
  0xd0   : > { %v823_v24 = vmax.f32 %v644_v18, 0.0  ;;  %v557_v25 = vadd.f32 %v556_v23, %v1615_v37 }
  0xd1   : > { %v824_v26 = vmax.f32 %v733_v21, 0.0  ;;  %v825_v27 = vmax.f32 %v468_v22, 0.0 }
  0xd2   : > { %v1005_v28 = vadd.f32 %v1004_v12, %v823_v24  ;;  %v826_v29 = vmax.f32 %v557_v25, 0.0 }
  0xd3   : > { %v1042_v30 = vadd.f32 %v1041_v14, %v824_v26  ;;  %v932_v31 = vadd.f32 %v931_v15, %v825_v27 }
  0xd4   : > { %v969_v32 = vadd.f32 %v968_v16, %v826_v29 }
  0xd5   : > { %v645_v33 = vpop.f32.mrf.mxu2 }
  0xd6   : > { %v646_v36 = vadd.f32 %v645_v33, %v1623_v46  ;;  %v734_v38 = vpop.f32.mrf.mxu3  ;;  %v470_v39 = vpop.f32.mrf.mxu0 }
  0xd7   : > { %v735_v40 = vadd.f32 %v734_v38, %v1626_v48  ;;  %v471_v41 = vadd.f32 %v470_v39, %v1612_v35  ;;  %v559_v42 = vpop.f32.mrf.mxu1 }
  0xd8   : > { %v827_v43 = vmax.f32 %v646_v36, 0.0  ;;  %v560_v44 = vadd.f32 %v559_v42, %v1615_v37  ;;  %v1367_v42 = vld [vmem:[%s1557_s27 + $0x70] sm:$0xff] }
  0xd9   : > { %v828_v45 = vmax.f32 %v735_v40, 0.0  ;;  %v829_v47 = vmax.f32 %v471_v41, 0.0  ;;  %1298 = vmatmul.msk.bf16.gmra.mxu0 %vm392_vm0, %v1365_v34  ;;  %1314 = vmatmul.msk.bf16.gmra.mxu1 %vm392_vm0, %v1365_v34 }
  0xda   : > { %v1006_v49 = vadd.f32 %v1005_v28, %v827_v43  ;;  %v830_v50 = vmax.f32 %v560_v44, 0.0  ;;  %1330 = vmatmul.msk.bf16.gmra.mxu2 %vm392_vm0, %v1365_v34 }
  0xdb   : > { %v1043_v51 = vadd.f32 %v1042_v30, %v828_v45  ;;  %v933_v52 = vadd.f32 %v932_v31, %v829_v47  ;;  %1346 = vmatmul.msk.bf16.gmra.mxu3 %vm392_vm0, %v1365_v34 }
  0xdc   : > { %v970_v53 = vadd.f32 %v969_v32, %v830_v50 }
  0xdd   : > { %v648_v54 = vpop.f32.mrf.mxu2 }
  0xde   : > { %v649_v55 = vadd.f32 %v648_v54, %v1623_v46  ;;  %v737_v56 = vpop.f32.mrf.mxu3  ;;  %v472_v57 = vpop.f32.mrf.mxu0 }
  0xdf   : > { %v738_v58 = vadd.f32 %v737_v56, %v1626_v48  ;;  %v473_v59 = vadd.f32 %v472_v57, %v1612_v35  ;;  %v561_v60 = vpop.f32.mrf.mxu1 }
  0xe0   : > { %v831_v61 = vmax.f32 %v649_v55, 0.0  ;;  %v562_v62 = vadd.f32 %v561_v60, %v1615_v37 }
  0xe1   : > { %v832_v63 = vmax.f32 %v738_v58, 0.0  ;;  %v833_v0 = vmax.f32 %v473_v59, 0.0 }
  0xe2   : > { %v1007_v1 = vadd.f32 %v1006_v49, %v831_v61  ;;  %v834_v2 = vmax.f32 %v562_v62, 0.0 }
  0xe3   : > { %v1044_v3 = vadd.f32 %v1043_v51, %v832_v63  ;;  %v934_v4 = vadd.f32 %v933_v52, %v833_v0 }
  0xe4   : > { %v971_v5 = vadd.f32 %v970_v53, %v834_v2 }
  0xe5   : > { %v650_v6 = vpop.f32.mrf.mxu2 }
  0xe6   : > { %v651_v8 = vadd.f32 %v650_v6, %v1623_v46  ;;  %v739_v9 = vpop.f32.mrf.mxu3  ;;  %v475_v10 = vpop.f32.mrf.mxu0 }
  0xe7   : > { %v740_v11 = vadd.f32 %v739_v9, %v1626_v48  ;;  %v476_v12 = vadd.f32 %v475_v10, %v1612_v35  ;;  %v564_v13 = vpop.f32.mrf.mxu1 }
  0xe8   : > { %v835_v14 = vmax.f32 %v651_v8, 0.0  ;;  %v565_v15 = vadd.f32 %v564_v13, %v1615_v37  ;;  %v1368_v13 = vld [vmem:[%s1557_s27 + $0x78] sm:$0xff] }
  0xe9   : > { %v836_v16 = vmax.f32 %v740_v11, 0.0  ;;  %v837_v17 = vmax.f32 %v476_v12, 0.0  ;;  %1299 = vmatmul.msk.bf16.gmra.mxu0 %vm392_vm0, %v1366_v7  ;;  %1315 = vmatmul.msk.bf16.gmra.mxu1 %vm392_vm0, %v1366_v7 }
  0xea   : > { %v1008_v18 = vadd.f32 %v1007_v1, %v835_v14  ;;  %v838_v19 = vmax.f32 %v565_v15, 0.0  ;;  %1331 = vmatmul.msk.bf16.gmra.mxu2 %vm392_vm0, %v1366_v7 }
  0xeb   : > { %v1045_v20 = vadd.f32 %v1044_v3, %v836_v16  ;;  %v935_v21 = vadd.f32 %v934_v4, %v837_v17  ;;  %1347 = vmatmul.msk.bf16.gmra.mxu3 %vm392_vm0, %v1366_v7 }
  0xec   : > { %v972_v22 = vadd.f32 %v971_v5, %v838_v19 }
  0xed   : > { %v653_v23 = vpop.f32.mrf.mxu2 }
  0xee   : > { %v654_v24 = vadd.f32 %v653_v23, %v1623_v46  ;;  %v742_v25 = vpop.f32.mrf.mxu3  ;;  %v477_v26 = vpop.f32.mrf.mxu0 }
  0xef   : > { %v743_v27 = vadd.f32 %v742_v25, %v1626_v48  ;;  %v478_v28 = vadd.f32 %v477_v26, %v1612_v35  ;;  %v566_v29 = vpop.f32.mrf.mxu1 }
  0xf0   : > { %v839_v30 = vmax.f32 %v654_v24, 0.0  ;;  %v567_v31 = vadd.f32 %v566_v29, %v1615_v37 }
  0xf1   : > { %v840_v32 = vmax.f32 %v743_v27, 0.0  ;;  %v841_v33 = vmax.f32 %v478_v28, 0.0 }
  0xf2   : > { %v1009_v34 = vadd.f32 %v1008_v18, %v839_v30  ;;  %v842_v36 = vmax.f32 %v567_v31, 0.0 }
  0xf3   : > { %v1046_v38 = vadd.f32 %v1045_v20, %v840_v32  ;;  %v936_v39 = vadd.f32 %v935_v21, %v841_v33 }
  0xf4   : > { %v973_v40 = vadd.f32 %v972_v22, %v842_v36 }
  0xf5   : > { %v655_v41 = vpop.f32.mrf.mxu2 }
  0xf6   : > { %v656_v43 = vadd.f32 %v655_v41, %v1623_v46  ;;  %v744_v44 = vpop.f32.mrf.mxu3  ;;  %v480_v45 = vpop.f32.mrf.mxu0 }
  0xf7   : > { %v745_v47 = vadd.f32 %v744_v44, %v1626_v48  ;;  %v481_v49 = vadd.f32 %v480_v45, %v1612_v35  ;;  %v569_v50 = vpop.f32.mrf.mxu1 }
  0xf8   : > { %v843_v51 = vmax.f32 %v656_v43, 0.0  ;;  %v570_v52 = vadd.f32 %v569_v50, %v1615_v37 }
  0xf9   : > { %v844_v53 = vmax.f32 %v745_v47, 0.0  ;;  %v845_v54 = vmax.f32 %v481_v49, 0.0  ;;  %1300 = vmatmul.msk.bf16.gmra.mxu0 %vm392_vm0, %v1367_v42  ;;  %1316 = vmatmul.msk.bf16.gmra.mxu1 %vm392_vm0, %v1367_v42 }
  0xfa   : > { %v1010_v55 = vadd.f32 %v1009_v34, %v843_v51  ;;  %v846_v56 = vmax.f32 %v570_v52, 0.0  ;;  %1332 = vmatmul.msk.bf16.gmra.mxu2 %vm392_vm0, %v1367_v42 }
  0xfb   : > { %v1047_v57 = vadd.f32 %v1046_v38, %v844_v53  ;;  %v937_v58 = vadd.f32 %v936_v39, %v845_v54  ;;  %1348 = vmatmul.msk.bf16.gmra.mxu3 %vm392_vm0, %v1367_v42 }
  0xfc   : > { %v974_v59 = vadd.f32 %v973_v40, %v846_v56 }
  0xfd   : > { %v658_v60 = vpop.f32.mrf.mxu2 }
  0xfe   : > { %v659_v61 = vadd.f32 %v658_v60, %v1623_v46  ;;  %v747_v62 = vpop.f32.mrf.mxu3  ;;  %v482_v63 = vpop.f32.mrf.mxu0 }
  0xff   : > { %v748_v0 = vadd.f32 %v747_v62, %v1626_v48  ;;  %v483_v1 = vadd.f32 %v482_v63, %v1612_v35  ;;  %v571_v2 = vpop.f32.mrf.mxu1 }
 0x100   : > { %v847_v3 = vmax.f32 %v659_v61, 0.0  ;;  %v572_v4 = vadd.f32 %v571_v2, %v1615_v37 }
 0x101   : > { %v848_v5 = vmax.f32 %v748_v0, 0.0  ;;  %v849_v6 = vmax.f32 %v483_v1, 0.0 }
 0x102   : > { %v1011_v7 = vadd.f32 %v1010_v55, %v847_v3  ;;  %v850_v8 = vmax.f32 %v572_v4, 0.0 }
 0x103   : > { %v1048_v9 = vadd.f32 %v1047_v57, %v848_v5  ;;  %v938_v10 = vadd.f32 %v937_v58, %v849_v6 }
 0x104   : > { %v975_v11 = vadd.f32 %v974_v59, %v850_v8 }
 0x105   : > { %v660_v12 = vpop.f32.mrf.mxu2 }
 0x106   : > { %v661_v14 = vadd.f32 %v660_v12, %v1623_v46  ;;  %v749_v15 = vpop.f32.mrf.mxu3  ;;  %v485_v16 = vpop.f32.mrf.mxu0 }
 0x107   : > { %v750_v17 = vadd.f32 %v749_v15, %v1626_v48  ;;  %v486_v18 = vadd.f32 %v485_v16, %v1612_v35  ;;  %v574_v19 = vpop.f32.mrf.mxu1 }
 0x108   : > { %v851_v20 = vmax.f32 %v661_v14, 0.0  ;;  %v575_v21 = vadd.f32 %v574_v19, %v1615_v37 }
 0x109   : > { %v852_v22 = vmax.f32 %v750_v17, 0.0  ;;  %v853_v23 = vmax.f32 %v486_v18, 0.0  ;;  %1301 = vmatmul.msk.bf16.gmra.mxu0 %vm392_vm0, %v1368_v13  ;;  %1317 = vmatmul.msk.bf16.gmra.mxu1 %vm392_vm0, %v1368_v13 }
 0x10a   : > { %v1012_v24 = vadd.f32 %v1011_v7, %v851_v20  ;;  %v854_v25 = vmax.f32 %v575_v21, 0.0  ;;  %1333 = vmatmul.msk.bf16.gmra.mxu2 %vm392_vm0, %v1368_v13 }
 0x10b   : > { %v1049_v26 = vadd.f32 %v1048_v9, %v852_v22  ;;  %v939_v27 = vadd.f32 %v938_v10, %v853_v23  ;;  %1349 = vmatmul.msk.bf16.gmra.mxu3 %vm392_vm0, %v1368_v13 }
 0x10c   : > { %v976_v28 = vadd.f32 %v975_v11, %v854_v25 }
 0x10d   : > { %v663_v29 = vpop.f32.mrf.mxu2 }
 0x10e   : > { %v664_v30 = vadd.f32 %v663_v29, %v1623_v46  ;;  %v752_v31 = vpop.f32.mrf.mxu3  ;;  %v487_v32 = vpop.f32.mrf.mxu0 }
 0x10f   : > { %v753_v33 = vadd.f32 %v752_v31, %v1626_v48  ;;  %v488_v34 = vadd.f32 %v487_v32, %v1612_v35  ;;  %v576_v36 = vpop.f32.mrf.mxu1 }
 0x110   : > { %v855_v38 = vmax.f32 %v664_v30, 0.0  ;;  %v577_v39 = vadd.f32 %v576_v36, %v1615_v37 }
 0x111   : > { %v856_v40 = vmax.f32 %v753_v33, 0.0  ;;  %v857_v41 = vmax.f32 %v488_v34, 0.0 }
 0x112   : > { %v1013_v42 = vadd.f32 %v1012_v24, %v855_v38  ;;  %v858_v43 = vmax.f32 %v577_v39, 0.0 }
 0x113   : > { %v1050_v44 = vadd.f32 %v1049_v26, %v856_v40  ;;  %v940_v45 = vadd.f32 %v939_v27, %v857_v41 }
 0x114   : > { %v977_v47 = vadd.f32 %v976_v28, %v858_v43 }
 0x115   : > { %v665_v49 = vpop.f32.mrf.mxu2 }
 0x116   : > { %v666_v50 = vadd.f32 %v665_v49, %v1623_v46  ;;  %v754_v51 = vpop.f32.mrf.mxu3  ;;  %v490_v52 = vpop.f32.mrf.mxu0 }
 0x117   : > { %v755_v53 = vadd.f32 %v754_v51, %v1626_v48  ;;  %v491_v54 = vadd.f32 %v490_v52, %v1612_v35  ;;  %v579_v55 = vpop.f32.mrf.mxu1 }
 0x118   : > { %v859_v56 = vmax.f32 %v666_v50, 0.0  ;;  %v580_v57 = vadd.f32 %v579_v55, %v1615_v37 }
 0x119   : > { %v860_v58 = vmax.f32 %v755_v53, 0.0  ;;  %v861_v59 = vmax.f32 %v491_v54, 0.0 }
 0x11a   : > { %v1014_v60 = vadd.f32 %v1013_v42, %v859_v56  ;;  %v862_v61 = vmax.f32 %v580_v57, 0.0 }
 0x11b   : > { %v1051_v62 = vadd.f32 %v1050_v44, %v860_v58  ;;  %v941_v63 = vadd.f32 %v940_v45, %v861_v59 }
 0x11c   : > { %v978_v0 = vadd.f32 %v977_v47, %v862_v61 }
 0x11d   : > { %v668_v1 = vpop.f32.mrf.mxu2 }
 0x11e   : > { %v669_v2 = vadd.f32 %v668_v1, %v1623_v46  ;;  %v757_v3 = vpop.f32.mrf.mxu3  ;;  %v492_v4 = vpop.f32.mrf.mxu0 }
 0x11f   : > { %v758_v5 = vadd.f32 %v757_v3, %v1626_v48  ;;  %v493_v6 = vadd.f32 %v492_v4, %v1612_v35  ;;  %v581_v7 = vpop.f32.mrf.mxu1 }
 0x120   : > { %v863_v8 = vmax.f32 %v669_v2, 0.0  ;;  %v582_v9 = vadd.f32 %v581_v7, %v1615_v37 }
 0x121   : > { %v864_v10 = vmax.f32 %v758_v5, 0.0  ;;  %v865_v11 = vmax.f32 %v493_v6, 0.0 }
 0x122   : > { %v1015_v12 = vadd.f32 %v1014_v60, %v863_v8  ;;  %v866_v13 = vmax.f32 %v582_v9, 0.0 }
 0x123   : > { %v1052_v14 = vadd.f32 %v1051_v62, %v864_v10  ;;  %v942_v15 = vadd.f32 %v941_v63, %v865_v11 }
 0x124   : > { %v979_v16 = vadd.f32 %v978_v0, %v866_v13 }
 0x125   : > { %v670_v17 = vpop.f32.mrf.mxu2 }
 0x126   : > { %v671_v18 = vadd.f32 %v670_v17, %v1623_v46  ;;  %v759_v19 = vpop.f32.mrf.mxu3  ;;  %v495_v20 = vpop.f32.mrf.mxu0 }
 0x127   : > { %v760_v21 = vadd.f32 %v759_v19, %v1626_v48  ;;  %v496_v22 = vadd.f32 %v495_v20, %v1612_v35  ;;  %v584_v23 = vpop.f32.mrf.mxu1 }
 0x128   : > { %v867_v24 = vmax.f32 %v671_v18, 0.0  ;;  %v585_v25 = vadd.f32 %v584_v23, %v1615_v37 }
 0x129   : > { %v868_v26 = vmax.f32 %v760_v21, 0.0  ;;  %v869_v27 = vmax.f32 %v496_v22, 0.0 }
 0x12a   : > { %v1016_v28 = vadd.f32 %v1015_v12, %v867_v24  ;;  %v870_v29 = vmax.f32 %v585_v25, 0.0 }
 0x12b   : > { %v1053_v30 = vadd.f32 %v1052_v14, %v868_v26  ;;  %v943_v31 = vadd.f32 %v942_v15, %v869_v27 }
 0x12c   : > { %v980_v32 = vadd.f32 %v979_v16, %v870_v29 }
 0x12d   : > { %v673_v33 = vpop.f32.mrf.mxu2 }
 0x12e   : > { %v674_v34 = vadd.f32 %v673_v33, %v1623_v46  ;;  %v762_v36 = vpop.f32.mrf.mxu3  ;;  %v497_v38 = vpop.f32.mrf.mxu0 }
 0x12f   : > { %v763_v39 = vadd.f32 %v762_v36, %v1626_v48  ;;  %v498_v40 = vadd.f32 %v497_v38, %v1612_v35  ;;  %v586_v41 = vpop.f32.mrf.mxu1 }
 0x130   : > { %v871_v42 = vmax.f32 %v674_v34, 0.0  ;;  %v587_v43 = vadd.f32 %v586_v41, %v1615_v37 }
 0x131   : > { %v872_v44 = vmax.f32 %v763_v39, 0.0  ;;  %v873_v45 = vmax.f32 %v498_v40, 0.0 }
 0x132   : > { %v1017_v47 = vadd.f32 %v1016_v28, %v871_v42  ;;  %v874_v49 = vmax.f32 %v587_v43, 0.0 }
 0x133   : > { %v1054_v50 = vadd.f32 %v1053_v30, %v872_v44  ;;  %v944_v51 = vadd.f32 %v943_v31, %v873_v45 }
 0x134   : > { %v981_v52 = vadd.f32 %v980_v32, %v874_v49 }
 0x135   : > { %v675_v53 = vpop.f32.mrf.mxu2 }
 0x136   : > { %v676_v54 = vadd.f32 %v675_v53, %v1623_v46  ;;  %v764_v55 = vpop.f32.mrf.mxu3  ;;  %v500_v56 = vpop.f32.mrf.mxu0 }
 0x137   : > { %v765_v57 = vadd.f32 %v764_v55, %v1626_v48  ;;  %v501_v58 = vadd.f32 %v500_v56, %v1612_v35  ;;  %v589_v59 = vpop.f32.mrf.mxu1 }
 0x138   : > { %v875_v60 = vmax.f32 %v676_v54, 0.0  ;;  %v590_v61 = vadd.f32 %v589_v59, %v1615_v37 }
 0x139   : > { %v876_v62 = vmax.f32 %v765_v57, 0.0  ;;  %v877_v63 = vmax.f32 %v501_v58, 0.0 }
 0x13a   : > { %v1018_v0 = vadd.f32 %v1017_v47, %v875_v60  ;;  %v878_v1 = vmax.f32 %v590_v61, 0.0 }
 0x13b   : > { %v1055_v2 = vadd.f32 %v1054_v50, %v876_v62  ;;  %v945_v3 = vadd.f32 %v944_v51, %v877_v63 }
 0x13c   : > { %v982_v4 = vadd.f32 %v981_v52, %v878_v1 }
 0x13d   : > { %v678_v5 = vpop.f32.mrf.mxu2 }
 0x13e   : > { %v679_v6 = vadd.f32 %v678_v5, %v1623_v46  ;;  %v767_v7 = vpop.f32.mrf.mxu3  ;;  %v502_v8 = vpop.f32.mrf.mxu0 }
 0x13f   : > { %v768_v9 = vadd.f32 %v767_v7, %v1626_v48  ;;  %v591_v10 = vpop.f32.mrf.mxu1  ;;  %v503_v41 = vadd.f32 %v502_v8, %v1612_v35 }
 0x140   : > { %v879_v11 = vmax.f32 %v679_v6, 0.0  ;;  %v592_v42 = vadd.f32 %v591_v10, %v1615_v37 }
 0x141   : > { %v880_v12 = vmax.f32 %v768_v9, 0.0  ;;  %v881_v50 = vmax.f32 %v503_v41, 0.0 }
 0x142   : > { %v1019_v13 = vadd.f32 %v1018_v0, %v879_v11  ;;  %v882_v55 = vmax.f32 %v592_v42, 0.0 }
 0x143   : > { %v1056_v14 = vadd.f32 %v1055_v2, %v880_v12  ;;  %v946_v5 = vadd.f32 %v945_v3, %v881_v50 }
 0x144   : > { %v983_v8 = vadd.f32 %v982_v4, %v882_v55  ;;  %v217_v55 = vlaneseq }
 0x145   : > { %v680_v15 = vpop.f32.mrf.mxu2 }
 0x146   : > { %v769_v16 = vpop.f32.mrf.mxu3  ;;  %v505_v17 = vpop.f32.mrf.mxu0  ;;  %v681_v43 = vadd.f32 %v680_v15, %v1623_v46  ;;  %vm1793_vm1 = vcmp.lt.s32.totalorder %v217_v55, 512 }
 0x147   : > { %v594_v18 = vpop.f32.mrf.mxu1  ;;  %v770_v44 = vadd.f32 %v769_v16, %v1626_v48  ;;  %v506_v45 = vadd.f32 %v505_v17, %v1612_v35 }
 0x148   : > { %v595_v47 = vadd.f32 %v594_v18, %v1615_v37  ;;  %v883_v56 = vmax.f32 %v681_v43, 0.0 }
 0x149   : > { %v884_v60 = vmax.f32 %v770_v44, 0.0  ;;  %v885_v61 = vmax.f32 %v506_v45, 0.0 }
 0x14a   : > { %v886_v0 = vmax.f32 %v595_v47, 0.0  ;;  %v1020_v9 = vadd.f32 %v1019_v13, %v883_v56 }
 0x14b   : > { %v1057_v12 = vadd.f32 %v1056_v14, %v884_v60  ;;  %v947_v15 = vadd.f32 %v946_v5, %v885_v61 }
 0x14c   : > { %v984_v18 = vadd.f32 %v983_v8, %v886_v0  ;;  %v1472_v0 = vmov 0.0  }
 0x14d   : > { %v683_v19 = vpop.f32.mrf.mxu2  ;;  %221 = vst.msk [vmem:[#allocation2] sm:$0xf] %vm1793_vm1, %v1472_v0 }
 0x14e   : > { %v772_v20 = vpop.f32.mrf.mxu3  ;;  %v507_v21 = vpop.f32.mrf.mxu0  ;;  %v684_v51 = vadd.f32 %v683_v19, %v1623_v46 }
 0x14f   : > { %v596_v22 = vpop.f32.mrf.mxu1  ;;  %v773_v52 = vadd.f32 %v772_v20, %v1626_v48  ;;  %v508_v57 = vadd.f32 %v507_v21, %v1612_v35 }
 0x150   : > { %v597_v58 = vadd.f32 %v596_v22, %v1615_v37  ;;  %v887_v6 = vmax.f32 %v684_v51, 0.0 }
 0x151   : > { %v888_v7 = vmax.f32 %v773_v52, 0.0  ;;  %v889_v10 = vmax.f32 %v508_v57, 0.0 }
 0x152   : > { %v890_v11 = vmax.f32 %v597_v58, 0.0 }
 0x153   : > { %v948_v14 = vadd.f32 %v947_v15, %v889_v10 }
 0x155   : > { %v685_v23 = vpop.f32.mrf.mxu2 }
 0x156   : > { %v774_v24 = vpop.f32.mrf.mxu3  ;;  %v510_v25 = vpop.f32.mrf.mxu0  ;;  %v686_v62 = vadd.f32 %v685_v23, %v1623_v46  ;;  %v1021_v23 = vadd.f32 %v1020_v9, %v887_v6 }
 0x157   : > { %v599_v26 = vpop.f32.mrf.mxu1  ;;  %v775_v63 = vadd.f32 %v774_v24, %v1626_v48  ;;  %v511_v1 = vadd.f32 %v510_v25, %v1612_v35  ;;  %v1058_v24 = vadd.f32 %v1057_v12, %v888_v7 }
 0x158   : > { %v600_v2 = vadd.f32 %v599_v26, %v1615_v37  ;;  %v891_v16 = vmax.f32 %v686_v62, 0.0  ;;  %v985_v26 = vadd.f32 %v984_v18, %v890_v11 }
 0x159   : > { %v892_v17 = vmax.f32 %v775_v63, 0.0  ;;  %v893_v19 = vmax.f32 %v511_v1, 0.0 }
 0x15a   : > { %v894_v20 = vmax.f32 %v600_v2, 0.0  ;;  %v1022_v44 = vadd.f32 %v1021_v23, %v891_v16 }
 0x15b   : > { %v949_v45 = vadd.f32 %v948_v14, %v893_v19 }
 0x15c   : > { %v986_v47 = vadd.f32 %v985_v26, %v894_v20 }
 0x15d   : > { %v688_v27 = vpop.f32.mrf.mxu2 }
 0x15e   : > { %v777_v28 = vpop.f32.mrf.mxu3  ;;  %v512_v29 = vpop.f32.mrf.mxu0  ;;  %v689_v21 = vadd.f32 %v688_v27, %v1623_v46  ;;  %v1059_v27 = vadd.f32 %v1058_v24, %v892_v17 }
 0x15f   : > { %v601_v30 = vpop.f32.mrf.mxu1  ;;  %v778_v3 = vadd.f32 %v777_v28, %v1626_v48  ;;  %v513_v4 = vadd.f32 %v512_v29, %v1612_v35 }
 0x160   : > { %v602_v41 = vadd.f32 %v601_v30, %v1615_v37  ;;  %v895_v50 = vmax.f32 %v689_v21, 0.0 }
 0x161   : > { %v896_v28 = vmax.f32 %v778_v3, 0.0  ;;  %v897_v52 = vmax.f32 %v513_v4, 0.0 }
 0x162   : > { %v898_v56 = vmax.f32 %v602_v41, 0.0 }
 0x164   : > { %v987_v6 = vadd.f32 %v986_v47, %v898_v56 }
 0x165   : > { %v690_v31 = vpop.f32.mrf.mxu2 }
 0x166   : > { %v1743_v32 = vpop.f32.mrf.mxu3  ;;  %v515_v33 = vpop.f32.mrf.mxu0  ;;  %v691_v42 = vadd.f32 %v690_v31, %v1623_v46 }
 0x167   : > { %v1745_v34 = vpop.f32.mrf.mxu1  ;;  %v516_v51 = vadd.f32 %v515_v33, %v1612_v35  ;;  %v780_v30 = vadd.f32 %v1743_v32, %v1626_v48 }
 0x168   : > { %v605_v29 = vadd.f32 %v1745_v34, %v1615_v37  ;;  %v899_v57 = vmax.f32 %v691_v42, 0.0  ;;  %v1023_v34 = vadd.f32 %v1022_v44, %v895_v50 }
 0x169   : > { %v901_v61 = vmax.f32 %v516_v51, 0.0  ;;  %v900_v7 = vmax.f32 %v780_v30, 0.0 }
 0x16a   : > { %v902_v1 = vmax.f32 %v605_v29, 0.0  ;;  %v1024_v10 = vadd.f32 %v1023_v34, %v899_v57 }
 0x16c   : > { %v988_v19 = vadd.f32 %v987_v6, %v902_v1 }
 0x16d   : > { %v1747_v36 = vpop.f32.mrf.mxu2 }
 0x16e   : > { %v1749_v38 = vpop.f32.mrf.mxu3  ;;  %v1751_v39 = vpop.f32.mrf.mxu0  ;;  %v694_v58 = vadd.f32 %v1747_v36, %v1623_v46  ;;  %v1060_v36 = vadd.f32 %v1059_v27, %v896_v28 }
 0x16f   : > { %v1753_v40 = vpop.f32.mrf.mxu1  ;;  %v518_v31 = vadd.f32 %v1751_v39, %v1612_v35  ;;  %v783_v62 = vadd.f32 %v1749_v38, %v1626_v48  ;;  %v950_v39 = vadd.f32 %v949_v45, %v897_v52 }
 0x170   : > { %v607_v33 = vadd.f32 %v1753_v40, %v1615_v37  ;;  %v1061_v23 = vadd.f32 %v1060_v36, %v900_v7 }
 0x171   : > { %v905_v8 = vmax.f32 %v518_v31, 0.0  ;;  %v951_v15 = vadd.f32 %v950_v39, %v901_v61  ;;  %v904_v16 = vmax.f32 %v783_v62, 0.0 }
 0x172   : > { %v906_v11 = vmax.f32 %v607_v33, 0.0 }
 0x173   : > { %v952_v24 = vadd.f32 %v951_v15, %v905_v8  ;;  %v1062_v42 = vadd.f32 %v1061_v23, %v904_v16 }
 0x174   : > { %v989_v14 = vadd.f32 %v988_v19, %v906_v11 }
 0x175   : > { %v1761_v49 = vpop.f32.mrf.mxu2 }
 0x176   : > { %v1765_v53 = vpop.f32.mrf.mxu3  ;;  %v520_v54 = vpop.f32.mrf.mxu0 }
 0x177   : > { %v609_v59 = vpop.f32.mrf.mxu1  ;;  %v521_v32 = vadd.f32 %v520_v54, %v1612_v35  ;;  %v903_v54 = vmax.f32 %v694_v58, 0.0  ;;  %v785_v3 = vadd.f32 %v1765_v53, %v1626_v48 }
 0x178   : > { %v610_v40 = vadd.f32 %v609_v59, %v1615_v37  ;;  %v696_v59 = vadd.f32 %v1761_v49, %v1623_v46 }
 0x179   : > { %v909_v17 = vmax.f32 %v521_v32, 0.0  ;;  %v908_v52 = vmax.f32 %v785_v3, 0.0 }
 0x17a   : > { %v910_v20 = vmax.f32 %v610_v40, 0.0  ;;  %v907_v45 = vmax.f32 %v696_v59, 0.0 }
 0x17b   : > { %v1063_v36 = vadd.f32 %v1062_v42, %v908_v52 }
 0x17c   : > { %v990_v47 = vadd.f32 %v989_v14, %v910_v20 }
 0x17d   : > { %v1774_v22 = vpop.f32.mrf.mxu2 }
 0x17e   : > { %v1778_v13 = vpop.f32.mrf.mxu3  ;;  %v522_v25 = vpop.f32.mrf.mxu0  ;;  %v699_v26 = vadd.f32 %v1774_v22, %v1623_v46 }
 0x17f   : > { %v611_v43 = vpop.f32.mrf.mxu1  ;;  %v523_v9 = vadd.f32 %v522_v25, %v1612_v35  ;;  %v1025_v25 = vadd.f32 %v1024_v10, %v903_v54  ;;  %v788_v49 = vadd.f32 %v1778_v13, %v1626_v48 }
 0x180   : > { %v612_v12 = vadd.f32 %v611_v43, %v1615_v37  ;;  %v953_v43 = vadd.f32 %v952_v24, %v909_v17  ;;  %v911_v57 = vmax.f32 %v699_v26, 0.0 }
 0x181   : > { %v913_v4 = vmax.f32 %v523_v9, 0.0  ;;  %v912_v58 = vmax.f32 %v788_v49, 0.0  ;;  %v1026_v62 = vadd.f32 %v1025_v25, %v907_v45 }
 0x182   : > { %v914_v41 = vmax.f32 %v612_v12, 0.0 }
 0x183   : > { %v954_v29 = vadd.f32 %v953_v43, %v913_v4 }
 0x184   : > { %v991_v30 = vadd.f32 %v990_v47, %v914_v41 }
 0x185   : > { %v700_v63 = vpop.f32.mrf.mxu2 }
 0x186   : > { %v789_v2 = vpop.f32.mrf.mxu3  ;;  %v525_v5 = vpop.f32.mrf.mxu0  ;;  %v701_v50 = vadd.f32 %v700_v63, %v1623_v46 }
 0x187   : > { %v614_v38 = vpop.f32.mrf.mxu1  ;;  %v526_v18 = vadd.f32 %v525_v5, %v1612_v35  ;;  %v790_v55 = vadd.f32 %v789_v2, %v1626_v48  ;;  %v1064_v5 = vadd.f32 %v1063_v36, %v912_v58 }
 0x188   : > { %v615_v21 = vadd.f32 %v614_v38, %v1615_v37  ;;  %v915_v32 = vmax.f32 %v701_v50, 0.0 }
 0x189   : > { %v917_v44 = vmax.f32 %v526_v18, 0.0  ;;  %v916_v39 = vmax.f32 %v790_v55, 0.0  ;;  %v925_v55 = vld [vmem:[#allocation2] sm:$0xf] }
 0x18a   : > { %v918_v51 = vmax.f32 %v615_v21, 0.0 }
 0x18b   : > { %v955_v33 = vadd.f32 %v954_v29, %v917_v44  ;;  %v1065_v54 = vadd.f32 %v1064_v5, %v916_v39 }
 0x18c   : > { %v992_v63 = vadd.f32 %v991_v30, %v918_v51 }
 0x18d   : > { %v703_v27 = vpop.f32.mrf.mxu2 }
 0x18e   : > { %v792_v53 = vpop.f32.mrf.mxu3  ;;  %v527_v28 = vpop.f32.mrf.mxu0  ;;  %v704_v13 = vadd.f32 %v703_v27, %v1623_v46 }
 0x18f   : > { %v528_v22 = vadd.f32 %v527_v28, %v1612_v35  ;;  %v616_v56 = vpop.f32.mrf.mxu1  ;;  %v793_v34 = vadd.f32 %v792_v53, %v1626_v48  ;;  %v1027_v35 = vadd.f32 %v1026_v62, %v911_v57 }
 0x190   : > { %v617_v31 = vadd.f32 %v616_v56, %v1615_v37  ;;  %v919_v40 = vmax.f32 %v704_v13, 0.0 }
 0x191   : > { %v921_v61 = vmax.f32 %v528_v22, 0.0  ;;  %v920_v6 = vmax.f32 %v793_v34, 0.0  ;;  %v1028_v37 = vadd.f32 %v1027_v35, %v915_v32 }
 0x192   : > { %v922_v0 = vmax.f32 %v617_v31, 0.0 }
 0x193   : > { %v956_v1 = vadd.f32 %v955_v33, %v921_v61  ;;  %v1029_v15 = vadd.f32 %v1028_v37, %v919_v40  ;;  %v1066_v18 = vadd.f32 %v1065_v54, %v920_v6 }
 0x194   : > { %v993_v2 = vadd.f32 %v992_v63, %v922_v0 }
 0x195   : > { %v957_v7 = vrot.slane %v956_v1, 4  ;;  %v705_v8 = vpop.f32.mrf.mxu2 }
 0x196   : > { %v994_v9 = vrot.slane %v993_v2, 4  ;;  %v706_v38 = vadd.f32 %v705_v8, %v1623_v46  ;;  %v794_v10 = vpop.f32.mrf.mxu3 }
 0x197   : > { %v958_v11 = vadd.f32 %v957_v7, %v956_v1  ;;  %v795_v12 = vadd.f32 %v794_v10, %v1626_v48 }
 0x198   : > { %v995_v16 = vadd.f32 %v994_v9, %v993_v2  ;;  %v923_v17 = vmax.f32 %v706_v38, 0.0 }
 0x199   : > { %v959_v19 = vrot.slane %v958_v11, 2  ;;  %v924_v59 = vmax.f32 %v795_v12, 0.0 }
 0x19a   : > { %v996_v20 = vrot.slane %v995_v16, 2  ;;  %v1030_v21 = vadd.f32 %v1029_v15, %v923_v17 }
 0x19b   : > { %v960_v23 = vadd.f32 %v959_v19, %v958_v11  ;;  %v1067_v24 = vadd.f32 %v1066_v18, %v924_v59 }
 0x19c   : > { %v997_v3 = vadd.f32 %v996_v20, %v995_v16  ;;  %v1031_v4 = vrot.slane %v1030_v21, 4 }
 0x19d   : > { %v1068_v25 = vrot.slane %v1067_v24, 4  ;;  %v961_v14 = vrot.slane %v960_v23, 1 }
 0x19e   : > { %v998_v46 = vrot.slane %v997_v3, 1  ;;  %v1032_v26 = vadd.f32 %v1031_v4, %v1030_v21 }
 0x19f   : > { %v1069_v41 = vadd.f32 %v1068_v25, %v1067_v24  ;;  %v962_v49 = vadd.f32 %v961_v14, %v960_v23 }
 0x1a0   : > { %v999_v42 = vadd.f32 %v998_v46, %v997_v3  ;;  %v1033_v43 = vrot.slane %v1032_v26, 2 }
 0x1a1   : > { %v1070_v48 = vrot.slane %v1069_v41, 2 }
 0x1a2   : > { %v1078_v44 = vrot.slane %v999_v42, 7  ;;  %v1034_v27 = vadd.f32 %v1033_v43, %v1032_v26 }
 0x1a3   : > { %v1071_v45 = vadd.f32 %v1070_v48, %v1069_v41 }
 0x1a4   : > { %v1082_v47 = vsel %vm1081_vm2, %v962_v49, %v1078_v44  ;;  %v1035_v50 = vrot.slane %v1034_v27, 1 }
 0x1a5   : > { %v1072_v51 = vrot.slane %v1071_v45, 1 }
 0x1a6   : > { %v1036_v53 = vadd.f32 %v1035_v50, %v1034_v27 }
 0x1a7   : > { %v1073_v28 = vadd.f32 %v1072_v51, %v1071_v45 }
 0x1a8   : > { %v1079_v52 = vrot.slane %v1036_v53, 6 }
 0x1a9   : > { %v1080_v29 = vrot.slane %v1073_v28, 5 }
 0x1ab   : > { %v1084_v22 = vsel %vm1083_vm3, %v1079_v52, %v1080_v29 }
 0x1ac   : > { %v1086_v56 = vsel %vm1085_vm4, %v1082_v47, %v1084_v22 }
 0x1ad   : > { %v1088_v57 = vadd.f32 %v1086_v56, %v925_v55 }
 0x1af   : > { %1093 = vst.msk [vmem:[#allocation2] sm:$0xf] %vm1793_vm1, %v1088_v57 }
 0x1b6   : > { %v1097_v30 = vld [vmem:[#allocation2] sm:$0xf] }
 0x1b7   : > { %v1098_v13 = vmul.f32 0.00390625, %v1097_v30 }
 0x1b9   : > { %1099 = vst.msk [vmem:[%s211_s11] sm:$0xf] %vm1793_vm1, %v1098_v13 }
 0x1ba PF: > { %s14_s14 = sadd.s32 1, %s1469_s14   ;;  %s1846_s12 = smov %s1465_s13 }
 0x1bb   : > { %p11_p8 = scmp.ge.s32.totalorder %s14_s14, 6   ;;  %s1847_s13 = smov %s1849_s16 }
 0x1bd   :  { %13 = sbr.rel (!%p11_p8) target bundleno = 2 (0x2), region = 75 }
 0x1c2   :  { %1119 = vsyncpa [#allocation4], 1 }
 0x1c3   :  { %1121 = vsyncpa [#allocation4 + $0x1], 1 }

// kernel: mol_ddi_forward.4
= control target key start
LH: loop header
LB: loop body
LE: loop exit
PB: predicated region body
PF: predicated region fallthrough
CT: control target
= control target key end

     0   :  { %s4808_s0 = inlined_call_operand.vmem [shape: f32[16,32], index: 0, kind: input, shape index: {}]   ;;  %s4809_s1 = inlined_call_operand.vmem [shape: bf16[4,32,32], index: 1, kind: input, shape index: {}]   ;;  %s4810_s2 = inlined_call_operand.vmem [shape: f32[4,1,32], index: 2, kind: input, shape index: {}]   ;;  %s4811_s3 = inlined_call_operand.vmem [shape: bf16[4,32,32], index: 3, kind: input, shape index: {}]   ;;  %s4812_s4 = inlined_call_operand.vmem [shape: f32[4,1,32], index: 4, kind: input, shape index: {}]   ;;  %s4813_s5 = inlined_call_operand.vmem [shape: bf16[4,32,32], index: 5, kind: input, shape index: {}]   ;;  %s4814_s6 = inlined_call_operand.vmem [shape: f32[4,1,32], index: 6, kind: input, shape index: {}]   ;;  %s4815_s7 = inlined_call_operand.vmem [shape: f32[32,4], index: 7, kind: input, shape index: {}]   ;;  %s4816_s8 = inlined_call_operand.vmem [shape: f32[4,32], index: 8, kind: input, shape index: {}]   ;;  %s4817_s9 = inlined_call_operand.vmem [shape: bf16[4,32,32], index: 9, kind: input, shape index: {}]   ;;  %s4818_s10 = inlined_call_operand.vmem [shape: f32[4,1,32], index: 10, kind: input, shape index: {}]   ;;  %s4819_s11 = inlined_call_operand.vmem [shape: f32[4,1,32], index: 11, kind: input, shape index: {}]   ;;  %s4820_s12 = inlined_call_operand.vmem [shape: f32[4,1,32], index: 12, kind: input, shape index: {}]   ;;  %s4821_s13 = inlined_call_operand.vmem [shape: bf16[4,32,2048], index: 13, kind: input, shape index: {}]   ;;  %s4822_s14 = inlined_call_operand.vmem [shape: f32[4,1,2048], index: 14, kind: input, shape index: {}]   ;;  %s4823_s15 = inlined_call_operand.vmem [shape: bf16[4,2048,32], index: 15, kind: input, shape index: {}]   ;;  %s4824_s16 = inlined_call_operand.vmem [shape: f32[4,1,32], index: 16, kind: input, shape index: {}]   ;;  %s4825_s17 = inlined_call_operand.vmem [shape: f32[4,1,32], index: 17, kind: input, shape index: {}]   ;;  %s4826_s18 = inlined_call_operand.vmem [shape: f32[4,1,32], index: 18, kind: input, shape index: {}]   ;;  %s4827_s19 = inlined_call_operand.vmem [shape: f32[16,32], index: 19, kind: output, shape index: {}]  }
   0x1   :  { %4833 = sst [smem:[#allocation4_spill]] %s4808_s0  ;;  %s4333_s0 = smov 0  }
   0x2   :  { %4834 = sst [smem:[#allocation5_spill]] %s4809_s1 }
   0x3   :  { %4835 = sst [smem:[#allocation6_spill]] %s4810_s2 }
   0x4   :  { %4836 = sst [smem:[#allocation7_spill]] %s4811_s3 }
   0x5   :  { %4837 = sst [smem:[#allocation8_spill]] %s4813_s5 }
   0x6   :  { %4838 = sst [smem:[#allocation9_spill]] %s4815_s7 }
   0x7   :  { %4839 = sst [smem:[#allocation10_spill]] %s4816_s8 }
   0x8   :  { %4840 = sst [smem:[#allocation11_spill]] %s4817_s9 }
   0x9   :  { %4841 = sst [smem:[#allocation12_spill]] %s4819_s11 }
   0xa   :  { %4842 = sst [smem:[#allocation13_spill]] %s4820_s12 }
   0xb   :  { %4843 = sst [smem:[#allocation14_spill]] %s4821_s13 }
   0xc   :  { %4844 = sst [smem:[#allocation15_spill]] %s4822_s14 }
   0xd   :  { %4845 = sst [smem:[#allocation16_spill]] %s4823_s15 }
   0xe   :  { %4846 = sst [smem:[#allocation17_spill]] %s4825_s17 }
   0xf   :  { %4847 = sst [smem:[#allocation18_spill]] %s4826_s18 }
  0x10   :  { %4848 = sst [smem:[#allocation19_spill]] %s4827_s19 }
  0x11 LB: > { %4849 = sst [smem:[#allocation3_spill]] %s4230_s0  ;;  %s3286_s30 = sadd.s32 4294967295, %s4230_s0   ;;  %s4230_s0 = sphi %s4333_s0, %s29_s0  }
  0x12   : > { %p3289_p0 = scmp.ge.s32.totalorder %s4230_s0, 1  ;;  %p663_p1 = scmp.lt.s32.totalorder %s4230_s0, 5 }
  0x14   : > { %p664_p2 = pnand %p3289_p0, %p663_p1 }
  0x15   : > { %p770_p3 = scmp.lt.s32.totalorder (!%p664_p2), %s3286_s30, 3  ;;  %s4851_s3 = sld [smem:[#allocation5_spill]] (!%p664_p2) }
  0x16   : > { %667 = sbr.rel (%p664_p2) target bundleno = 1550 (0x60e), region = 96  ;;  %s4852_s29 = sld [smem:[#allocation7_spill]] (!%p664_p2) }
  0x17   : > { %s4853_s5 = sld [smem:[#allocation8_spill]] (!%p664_p2)  ;;  %p3303_p4 = scmp.ne.s32.totalorder (!%p664_p2), %s3286_s30, 0 }
  0x18   : > { %s4854_s9 = sld [smem:[#allocation11_spill]] (!%p664_p2) }
  0x19   : > { %s4857_s13 = sld [smem:[#allocation14_spill]] (!%p664_p2) }
  0x1a   : > { %s4858_s14 = sld [smem:[#allocation15_spill]] (!%p664_p2) }
  0x1b   : > { %s4341_s20 = scalar_select %p770_p3, %s3286_s30, 3 }
  0x1c   : > { %s4859_s17 = sld [smem:[#allocation16_spill]] }
  0x1d   : > { %s4010_s21 = sshll.u32 %s4341_s20, 4  ;;  %s4015_s27 = sshll.u32 %s4341_s20, 10 }
  0x1e   : > { %s774_s26 = scalar_lea.vmem %s4851_s3, %s4010_s21  ;;  %s782_s0 = scalar_lea.vmem %s4852_s29, %s4010_s21 }
  0x1f   : > { %s4361_s15 = scalar_lea.vmem %s4853_s5, %s4010_s21  ;;  %s4370_s3 = scalar_lea.vmem %s4854_s9, %s4010_s21 }
  0x20   : > { %s4014_s5 = sshll.u32 %s4341_s20, 8  ;;  %s4393_s9 = scalar_lea.vmem %s4858_s14, %s4010_s21 }
  0x21   : > { %s4388_s2 = scalar_lea.vmem %s4857_s13, %s4014_s5  ;;  %s824_s7 = scalar_lea.vmem %s4824_s16, %s4341_s20 }
  0x22   : > { %s4403_s18 = scalar_lea.vmem %s4859_s17, %s4015_s27  ;;  %s4860_s1 = sld [smem:[#allocation17_spill]] }
  0x23   : > { %s4861_s11 = sld [smem:[#allocation18_spill]] }
  0x24   : > { %s4862_s14 = sld [smem:[#allocation4_spill]] (!%p3303_p4) }
  0x25   : > { %835 = sbr.rel (%p3303_p4) target bundleno = 45 (0x2d), region = 100  ;;  %s4863_s8 = sld [smem:[#allocation19_spill]] (!%p3303_p4) }
  0x28   : > { %s827_s5 = scalar_lea.vmem %s4860_s1, %s4341_s20 }
  0x29   : > { %s830_s24 = scalar_lea.vmem %s4861_s11, %s4341_s20 }
  0x2a   : > { %v836_v0 = vld [vmem:[%s4862_s14] sm:$0xff]  ;;  %vm838_vm0 = vcmask 261120   ;;  %v837_v1 = vld [vmem:[%s4862_s14 + $0x8] sm:$0xff] }
  0x2b   : > { %839 = vst.msk [vmem:[%s4863_s8] sm:$0xff] %vm838_vm0, %v836_v0 }
  0x2c   : > { %840 = vst.msk [vmem:[%s4863_s8 + $0x8] sm:$0xff] %vm838_vm0, %v837_v1 }
  0x2d PF: > { %v4017_v2 = vld [vmem:[%s774_s26 + $0x8] sm:$0xff]  ;;  %v4016_v4 = vld [vmem:[%s774_s26] sm:$0xff]  ;;  %s4864_s30 = sld [smem:[#allocation19_spill]]  ;;  %vm864_vm1 = vcmask 261120   ;;  %s4868_s1 = scalar_lea.vmem %s4812_s4, %s4341_s20  ;;  %vm1019_vm2 = vcmask 1043456   ;;  %vm1015_vm3 = vcmask 31744  }
  0x2e   : > { %v4019_v3 = vld [vmem:[%s782_s0 + $0x8] sm:$0xff]  ;;  %v4018_v5 = vld [vmem:[%s782_s0] sm:$0xff]  ;;  %874 = vmatpush.bf16.msra.mxu0 %v4017_v2  ;;  %s4865_s25 = sld [smem:[#allocation9_spill]]  ;;  %s4870_s29 = scalar_lea.vmem %s4814_s6, %s4341_s20 }
  0x2f   : > { %908 = vmatpush.bf16.msra.mxu1 %v4019_v3  ;;  %s4866_s23 = sld [smem:[#allocation6_spill]]  ;;  %v4194_v14 = vld [vmem:[%s4868_s1] ss:$0 sm:$0xff]  ;;  %v4021_v27 = vld [vmem:[%s4361_s15 + $0x8] sm:$0xff]  ;;  %s4871_s19 = scalar_lea.vmem %s4818_s10, %s4341_s20 }
  0x30   : > { %942 = vmatpush.bf16.msra.mxu2 %v4021_v27  ;;  %v4020_v28 = vld [vmem:[%s4361_s15] sm:$0xff]  ;;  %s4869_s0 = sld [smem:[#allocation10_spill]]  ;;  %v4023_v61 = vld [vmem:[%s4370_s3 + $0x8] sm:$0xff]  ;;  %v4232_v27 = vmov 32.0  }
  0x31   : > { %v4022_v62 = vld [vmem:[%s4370_s3] sm:$0xff]  ;;  %s4872_s12 = sld [smem:[#allocation12_spill]] }
  0x32   : > { %875 = vmatpush.bf16.msra.mxu0 %v4016_v4  ;;  %v4195_v63 = vld [vmem:[%s4870_s29] ss:$0 sm:$0xff]  ;;  %s4874_s17 = sld [smem:[#allocation13_spill]] }
  0x33   : > { %v4428_v6 = vld [vmem:[%s4864_s30] sm:$0xff]  ;;  %v4433_v7 = vld [vmem:[%s4864_s30 + $0x8] sm:$0xff]  ;;  %909 = vmatpush.bf16.msra.mxu1 %v4018_v5 }
  0x34   : > { %v953_v8 = vld [vmem:[%s4865_s25 + $0x18] sm:$0xff]  ;;  %v843_v9 = vpack.c.bf16 %v4433_v7, %v4428_v6  ;;  %v952_v10 = vld [vmem:[%s4865_s25 + $0x10] sm:$0xff]  ;;  %v951_v11 = vld [vmem:[%s4865_s25 + $0x8] sm:$0xff]  ;;  %943 = vmatpush.bf16.msra.mxu2 %v4020_v28 }
  0x35   : > { %971 = vmatpush.msra.mxu3 %v953_v8  ;;  %v950_v12 = vld [vmem:[%s4865_s25] sm:$0xff]  ;;  %s4867_s11 = scalar_lea.vmem %s4866_s23, %s4341_s20 }
  0x36   : > { %3312 = vmatmul.msk.bf16.vlgmr.msra.gmra.mxu0 %vm864_vm1, %v843_v9  ;;  %3321 = vmatmul.msk.bf16.vlgmr.msra.gmra.mxu1 %vm864_vm1, %v843_v9  ;;  %v4193_v13 = vld [vmem:[%s4867_s11] ss:$0 sm:$0xff] }
  0x37   : > { %972 = vmatpush.msra.mxu3 %v952_v10  ;;  %3330 = vmatmul.msk.bf16.vlgmr.msra.gmra.mxu2 %vm864_vm1, %v843_v9  ;;  %v954_v30 = vld [vmem:[%s4869_s0] sm:$0xf]  ;;  %s4873_s23 = scalar_lea.vmem %s4872_s12, %s4341_s20 }
  0x38   : > { %3333 = vmatpush.msk.msrb.mxu0 %vm1019_vm2, %v954_v30  ;;  %3335 = vmatpush.msk.msrb.mxu1 %vm1019_vm2, %v954_v30  ;;  %s4875_s1 = scalar_lea.vmem %s4874_s17, %s4341_s20 }
  0x39   : > { %973 = vmatpush.msra.mxu3 %v951_v11  ;;  %1216 = vmatpush.bf16.msrb.mxu2 %v4023_v61  ;;  %v3362_v61 = vld [vmem:[%s4388_s2 + $0x8] sm:$0xf] }
  0x3a   : > { %3339 = vmatpush.msk.msra.mxu0 %vm1019_vm2, %v954_v30  ;;  %3341 = vmatpush.msk.msra.mxu1 %vm1019_vm2, %v954_v30 }
  0x3b   : > { %974 = vmatpush.msra.mxu3 %v950_v12 }
  0x3d   : > { %996 = vmatpush.msrb.mxu3 %v953_v8  ;;  %1217 = vmatpush.bf16.msrb.mxu2 %v4022_v62  ;;  %v4033_v62 = vld [vmem:[%s4388_s2 + $0x44] sm:$0xf0] }
  0x3f   : > { %997 = vmatpush.msrb.mxu3 %v952_v10 }
  0x41   : > { %998 = vmatpush.msrb.mxu3 %v951_v11 }
  0x43   : > { %999 = vmatpush.msrb.mxu3 %v950_v12 }
  0xb3   : > { %v877_v15 = vpop.f32.mrf.mxu0  ;;  %v911_v16 = vpop.f32.mrf.mxu1 }
  0xb4   : > { %v878_v17 = vadd.f32 %v4193_v13, %v877_v15  ;;  %v912_v18 = vadd.f32 %v4194_v14, %v911_v16 }
  0xb6   : > { %v955_v19 = vmul.f32 %v912_v18, %v878_v17 }
  0xb8   : > { %3331 = vmatmul.msk.f32.vlgmr.msra.gmra.mxu3 %vm864_vm1, %v955_v19 }
  0xb9   : > { %1088 = vmatpush.msra.mxu3 %v953_v8 }
  0xba   : > { %v945_v60 = vpop.f32.mrf.mxu2 }
  0xbb   : > { %v913_v20 = vpop.f32.mrf.mxu1  ;;  %1089 = vmatpush.msra.mxu3 %v952_v10  ;;  %v879_v23 = vpop.f32.mrf.mxu0  ;;  %v946_v1 = vadd.f32 %v4195_v63, %v945_v60  ;;  %v3356_v60 = vld [vmem:[%s4388_s2 + $0x40] sm:$0xf0] }
  0xbc   : > { %v914_v21 = vadd.f32 %v4194_v14, %v913_v20  ;;  %v880_v24 = vadd.f32 %v4193_v13, %v879_v23 }
  0xbd   : > { %1090 = vmatpush.msra.mxu3 %v951_v11 }
  0xbe   : > { %v980_v22 = vmul.f32 %v914_v21, %v878_v17  ;;  %v1072_v25 = vmul.f32 %v912_v18, %v880_v24  ;;  %v1097_v26 = vmul.f32 %v914_v21, %v880_v24  ;;  %v4196_v18 = vld [vmem:[%s4871_s19] ss:$0 sm:$0xff] }
  0xbf   : > { %1091 = vmatpush.msra.mxu3 %v950_v12 }
  0xc0   : > { %3332 = vmatmul.msk.f32.vlgmr.msrb.gmra.mxu3 %vm864_vm1, %v980_v22 }
  0xc1   : > { %1113 = vmatpush.msrb.mxu3 %v953_v8 }
  0xc2   : > { %v947_v0 = vpop.f32.mrf.mxu2 }
  0xc3   : > { %1114 = vmatpush.msrb.mxu3 %v952_v10  ;;  %v948_v2 = vadd.f32 %v4195_v63, %v947_v0 }
  0xc5   : > { %1115 = vmatpush.msrb.mxu3 %v951_v11 }
  0xc7   : > { %1116 = vmatpush.msrb.mxu3 %v950_v12 }
  0xc8   : > { %3337 = vmatmul.msk.f32.vlgmr.msra.gmra.mxu3 %vm864_vm1, %v1072_v25 }
  0xd0   : > { %3338 = vmatmul.msk.f32.vlgmr.msrb.gmra.mxu3 %vm864_vm1, %v1097_v26 }
 0x13b   : > { %v976_v29 = vpop.f32.mrf.mxu3 }
 0x13c   : > { %v979_v32 = vmul.f32 0.35355338, %v976_v29 }
 0x143   : > { %v1001_v31 = vpop.f32.mrf.mxu3 }
 0x144   : > { %v1004_v33 = vmul.f32 0.35355338, %v1001_v31 }
 0x146   : > { %v1005_v34 = vmax.f32 %v979_v32, %v1004_v33 }
 0x148   : > { %v1006_v35 = vsub.f32 %v979_v32, %v1005_v34  ;;  %v1009_v36 = vsub.f32 %v1004_v33, %v1005_v34 }
 0x14a   : > { %v1007_v37 = vmul.f32 1.442695, %v1006_v35  ;;  %v1010_v38 = vmul.f32 1.442695, %v1009_v36 }
 0x14b   : > { %v1093_v39 = vpop.f32.mrf.mxu3 }
 0x14c   : > { %4202 = vpow2.f32 %v1007_v37  ;;  %v1096_v44 = vmul.f32 0.35355338, %v1093_v39 }
 0x14d   : > { %4204 = vpow2.f32 %v1010_v38 }
 0x152   : > { %v4203_v40 = vpop.eup %4202 }
 0x153   : > { %v4205_v41 = vpop.eup %4204  ;;  %v1118_v42 = vpop.f32.mrf.mxu3 }
 0x154   : > { %v1012_v43 = vadd.f32 %v4205_v41, %v4203_v40  ;;  %v1121_v45 = vmul.f32 0.35355338, %v1118_v42  ;;  %v3418_v42 = vld [vmem:[%s4388_s2 + $0x80] sm:$0xf] }
 0x156   : > { %4206 = vrcp.f32 %v1012_v43  ;;  %v1122_v46 = vmax.f32 %v1096_v44, %v1121_v45  ;;  %v4048_v43 = vld [vmem:[%s4388_s2 + $0xbc] sm:$0xf0] }
 0x158   : > { %v1123_v47 = vsub.f32 %v1096_v44, %v1122_v46  ;;  %v1126_v48 = vsub.f32 %v1121_v45, %v1122_v46  ;;  %v4040_v44 = vld [vmem:[%s4388_s2 + $0x84] sm:$0xf]  ;;  %v3419_v45 = vor.u32 %v4048_v43, %v3418_v42 }
 0x159   : > { %v3420_v46 = vld [vmem:[%s4388_s2 + $0xc0] sm:$0xf0] }
 0x15a   : > { %v1124_v49 = vmul.f32 1.442695, %v1123_v47  ;;  %v1127_v50 = vmul.f32 1.442695, %v1126_v48  ;;  %v3426_v47 = vld [vmem:[%s4388_s2 + $0x88] sm:$0xf]  ;;  %1527 = vmatpush.bf16.msra.mxu3 %v3419_v45 }
 0x15b   : > { %v4049_v48 = vld [vmem:[%s4388_s2 + $0xc4] sm:$0xf0] }
 0x15c   : > { %v4207_v51 = vpop.eup %4206  ;;  %4208 = vpow2.f32 %v1124_v49  ;;  %v3423_v49 = vor.u32 %v4040_v44, %v3420_v46 }
 0x15d   : > { %4210 = vpow2.f32 %v1127_v50  ;;  %v1014_v52 = vmul.f32 %v4207_v51, %v4203_v40  ;;  %v1045_v53 = vmul.f32 %v4207_v51, %v4205_v41  ;;  %v3427_v50 = vor.u32 %v4049_v48, %v3426_v47  ;;  %v4041_v51 = vld [vmem:[%s4388_s2 + $0x8c] sm:$0xf]  ;;  %v4197_v47 = vld [vmem:[%s4873_s23] ss:$0 sm:$0xff] }
 0x15f   : > { %3334 = vmatmul.msk.f32.vlgmr.msrb.gmra.mxu0 %vm1015_vm3, %v1014_v52  ;;  %3336 = vmatmul.msk.f32.vlgmr.msrb.gmra.mxu1 %vm1015_vm3, %v1045_v53  ;;  %v3428_v52 = vld [vmem:[%s4388_s2 + $0xc8] sm:$0xf0] }
 0x160   : > { %1541 = vmatpush.bf16.msrb.mxu0 %v3423_v49  ;;  %1555 = vmatpush.bf16.msrb.mxu1 %v3427_v50 }
 0x162   : > { %v4209_v54 = vpop.eup %4208 }
 0x163   : > { %v4211_v55 = vpop.eup %4210 }
 0x164   : > { %v1129_v56 = vadd.f32 %v4211_v55, %v4209_v54 }
 0x166   : > { %4212 = vrcp.f32 %v1129_v56  ;;  %v3354_v56 = vld [vmem:[%s4388_s2] sm:$0xf] }
 0x167   : > { %4214 = vrcp.f32 %v4232_v27 }
 0x16c   : > { %v4213_v57 = vpop.eup %4212 }
 0x16d   : > { %v1157_v58 = vmul.f32 %v4213_v57, %v4211_v55  ;;  %v1131_v59 = vmul.f32 %v4213_v57, %v4209_v54  ;;  %v4215_v28 = vpop.eup %4214  ;;  %v3431_v54 = vor.u32 %v4041_v51, %v3428_v52  ;;  %v4032_v57 = vld [vmem:[%s4388_s2 + $0x3c] sm:$0xf0] }
 0x16e   : > { %v1233_v29 = vmul.f32 32.0, %v4215_v28  ;;  %vm1237_vm4 = vweird.f32 %v4215_v28  ;;  %v4198_v51 = vld [vmem:[%s4875_s1] ss:$0 sm:$0xff] }
 0x16f   : > { %3340 = vmatmul.msk.f32.vlgmr.msra.gmra.mxu0 %vm1015_vm3, %v1131_v59  ;;  %3342 = vmatmul.msk.f32.vlgmr.msra.gmra.mxu1 %vm1015_vm3, %v1157_v58  ;;  %v4024_v58 = vld [vmem:[%s4388_s2 + $0x4] sm:$0xf]  ;;  %v3355_v59 = vor.u32 %v4032_v57, %v3354_v56 }
 0x170   : > { %v1234_v30 = vsub.f32 1.0, %v1233_v29  ;;  %1569 = vmatpush.bf16.msra.mxu2 %v3431_v54  ;;  %v3359_v0 = vor.u32 %v4024_v58, %v3356_v60  ;;  %v3378_v29 = vld [vmem:[%s4388_s2 + $0x18] sm:$0xf]  ;;  %v4044_v56 = vld [vmem:[%s4388_s2 + $0xa4] sm:$0xf] }
 0x171   : > { %1528 = vmatpush.bf16.msra.mxu3 %v3355_v59  ;;  %v3452_v57 = vld [vmem:[%s4388_s2 + $0xe0] sm:$0xf0]  ;;  %v3458_v58 = vld [vmem:[%s4388_s2 + $0xa8] sm:$0xf] }
 0x172   : > { %v1235_v31 = vmul.f32 %v4215_v28, %v1234_v30  ;;  %1542 = vmatpush.bf16.msrb.mxu0 %v3359_v0  ;;  %v4035_v30 = vld [vmem:[%s4388_s2 + $0x54] sm:$0xf0] }
 0x174   : > { %v1236_v32 = vadd.f32 %v4215_v28, %v1235_v31 }
 0x1dc   : > { %v1040_v3 = vpop.f32.mrf.mxu0  ;;  %v1066_v4 = vpop.f32.mrf.mxu1 }
 0x1dd   : > { %v1043_v5 = vmul.f32 %v1040_v3, %v946_v1  ;;  %v1069_v8 = vmul.f32 %v1066_v4, %v948_v2  ;;  %v3364_v3 = vld [vmem:[%s4388_s2 + $0x48] sm:$0xf0] }
 0x1df   : > { %v1070_v9 = vadd.f32 %v1069_v8, %v1043_v5  ;;  %v3434_v8 = vld [vmem:[%s4388_s2 + $0x90] sm:$0xf] }
 0x1e1   : > { %1071 = vst.msk [vmem:[#allocation2] sm:$0xff] %vm864_vm1, %v1070_v9  ;;  %v4050_v9 = vld [vmem:[%s4388_s2 + $0xcc] sm:$0xf0] }
 0x1e8   : > { %v1184_v15 = vld [vmem:[#allocation2] sm:$0xff] }
 0x1ec   : > { %v1152_v10 = vpop.f32.mrf.mxu0  ;;  %v1178_v11 = vpop.f32.mrf.mxu1 }
 0x1ed   : > { %v1155_v12 = vmul.f32 %v1152_v10, %v946_v1  ;;  %v1181_v13 = vmul.f32 %v1178_v11, %v948_v2  ;;  %v3363_v1 = vor.u32 %v4033_v62, %v3362_v61  ;;  %v4025_v2 = vld [vmem:[%s4388_s2 + $0xc] sm:$0xf]  ;;  %v4042_v10 = vld [vmem:[%s4388_s2 + $0x94] sm:$0xf]  ;;  %v4053_v61 = vld [vmem:[%s4388_s2 + $0xe4] sm:$0xf0] }
 0x1ee   : > { %v3367_v4 = vor.u32 %v4025_v2, %v3364_v3  ;;  %v4045_v62 = vld [vmem:[%s4388_s2 + $0xac] sm:$0xf]  ;;  %v3386_v2 = vld [vmem:[%s4388_s2 + $0x20] sm:$0xf] }
 0x1ef   : > { %v1182_v14 = vadd.f32 %v1181_v13, %v1155_v12  ;;  %1556 = vmatpush.bf16.msrb.mxu1 %v3363_v1  ;;  %v3435_v12 = vor.u32 %v4050_v9, %v3434_v8  ;;  %v3436_v13 = vld [vmem:[%s4388_s2 + $0xd0] sm:$0xf0]  ;;  %v3455_v1 = vor.u32 %v4044_v56, %v3452_v57  ;;  %v4036_v3 = vld [vmem:[%s4388_s2 + $0x5c] sm:$0xf0]  ;;  %v4028_v8 = vld [vmem:[%s4388_s2 + $0x24] sm:$0xf] }
 0x1f0   : > { %1570 = vmatpush.bf16.msra.mxu2 %v3367_v4  ;;  %v3459_v4 = vor.u32 %v4053_v61, %v3458_v58  ;;  %v3388_v9 = vld [vmem:[%s4388_s2 + $0x60] sm:$0xf0]  ;;  %v4067_v58 = vld [vmem:[%s4403_s18 + $0x58] sm:$0xff] }
 0x1f1   : > { %1183 = vst.msk [vmem:[#allocation2 + $0x8] sm:$0xff] %vm864_vm1, %v1182_v14  ;;  %v3442_v14 = vld [vmem:[%s4388_s2 + $0x98] sm:$0xf]  ;;  %1583 = vmatpush.bf16.msrb.mxu3 %v3435_v12  ;;  %v4029_v12 = vld [vmem:[%s4388_s2 + $0x2c] sm:$0xf]  ;;  %v4060_v56 = vld [vmem:[%s4403_s18 + $0x20] sm:$0xff] }
 0x1f2   : > { %v4084_v57 = vld [vmem:[%s4403_s18 + $0xe0] sm:$0xff]  ;;  %v4075_v61 = vld [vmem:[%s4403_s18 + $0x98] sm:$0xff] }
 0x1f8   : > { %v1185_v16 = vld [vmem:[#allocation2 + $0x8] sm:$0xff] }
 0x1f9   : > { %v1186_v17 = vpack.c.bf16 %v1185_v16, %v1184_v15  ;;  %v4051_v15 = vld [vmem:[%s4388_s2 + $0xd4] sm:$0xf0]  ;;  %v3439_v16 = vor.u32 %v4042_v10, %v3436_v13  ;;  %v3394_v10 = vld [vmem:[%s4388_s2 + $0x28] sm:$0xf]  ;;  %v3396_v13 = vld [vmem:[%s4388_s2 + $0x68] sm:$0xf0] }
 0x1fb   : > { %3351 = vmatmul.msk.bf16.vlgmr.msrb.gmra.mxu2 %vm864_vm1, %v1186_v17  ;;  %v3443_v17 = vor.u32 %v4051_v15, %v3442_v14  ;;  %1597 = vmatpush.bf16.msra.mxu0 %v3439_v16  ;;  %v3387_v14 = vor.u32 %v4036_v3, %v3386_v2  ;;  %v3391_v15 = vor.u32 %v4028_v8, %v3388_v9  ;;  %v4058_v2 = vld [vmem:[%s4403_s18 + $0x10] sm:$0xff]  ;;  %v4081_v8 = vld [vmem:[%s4403_s18 + $0xc8] sm:$0xff]  ;;  %v4064_v9 = vld [vmem:[%s4403_s18 + $0x40] sm:$0xff] }
 0x1fc   : > { %v4082_v3 = vld [vmem:[%s4403_s18 + $0xd0] sm:$0xff] }
 0x1fd   : > { %1611 = vmatpush.bf16.msra.mxu1 %v3443_v17  ;;  %v3399_v17 = vor.u32 %v4029_v12, %v3396_v13  ;;  %v4111_v12 = vld [vmem:[%s4403_s18 + $0x1b8] sm:$0xff]  ;;  %v4056_v13 = vld [vmem:[%s4403_s18] sm:$0xff] }
 0x27e   : > { %v1219_v19 = vpop.f32.mrf.mxu2 }
 0x27f   : > { %v1220_v20 = vadd.f32 %v4196_v18, %v1219_v19  ;;  %v3444_v19 = vld [vmem:[%s4388_s2 + $0xd8] sm:$0xf0] }
 0x281   : > { %v1224_v21 = vadd.f32 %v1220_v20, %v4428_v6  ;;  %v4490_v6 = vsel %vm1237_vm4, %v4215_v28, %v1236_v32  ;;  %v3370_v20 = vld [vmem:[%s4388_s2 + $0x10] sm:$0xf]  ;;  %v3372_v28 = vld [vmem:[%s4388_s2 + $0x50] sm:$0xf0]  ;;  %v3379_v32 = vor.u32 %v4035_v30, %v3378_v29 }
 0x282   : > { %v4038_v29 = vld [vmem:[%s4388_s2 + $0x6c] sm:$0xf0] }
 0x283   : > { %v1226_v22 = vsel %vm864_vm1, %v1224_v21, 0.0  ;;  %1612 = vmatpush.bf16.msra.mxu1 %v3379_v32  ;;  %v4030_v32 = vld [vmem:[%s4388_s2 + $0x34] sm:$0xf] }
 0x284   : > { %1227 = vadd.xlane.f32.xlu0 %v1226_v22 }
 0x286   : > { %v1221_v23 = vpop.f32.mrf.mxu2 }
 0x287   : > { %v1222_v24 = vadd.f32 %v4196_v18, %v1221_v23  ;;  %v4043_v18 = vld [vmem:[%s4388_s2 + $0x9c] sm:$0xf] }
 0x288   : > { %v3447_v23 = vor.u32 %v4043_v18, %v3444_v19  ;;  %v3466_v18 = vld [vmem:[%s4388_s2 + $0xb0] sm:$0xf] }
 0x289   : > { %v1225_v25 = vadd.f32 %v1222_v24, %v4433_v7  ;;  %v4034_v24 = vld [vmem:[%s4388_s2 + $0x4c] sm:$0xf0] }
 0x28a   : > { %v3371_v27 = vor.u32 %v4034_v24, %v3370_v20  ;;  %1625 = vmatpush.bf16.msrb.mxu2 %v3447_v23  ;;  %v4054_v19 = vld [vmem:[%s4388_s2 + $0xec] sm:$0xf0]  ;;  %v4046_v20 = vld [vmem:[%s4388_s2 + $0xb4] sm:$0xf]  ;;  %v4055_v23 = vld [vmem:[%s4388_s2 + $0xf4] sm:$0xf0] }
 0x28b   : > { %v1229_v26 = vsel %vm864_vm1, %v1225_v25, 0.0  ;;  %v4047_v24 = vld [vmem:[%s4388_s2 + $0xbc] sm:$0xf] }
 0x28c   : > { %1230 = vadd.xlane.f32.xlu0 %v1229_v26  ;;  %1584 = vmatpush.bf16.msrb.mxu3 %v3371_v27 }
 0x2f7   : > { %v1228_v33 = vpop.xlane.xlu0 %1227 }
 0x2f8   : > { %v1239_v7 = vmul.f32 %v4490_v6, %v1228_v33  ;;  %v4027_v33 = vld [vmem:[%s4388_s2 + $0x1c] sm:$0xf] }
 0x2fa   : > { %v4493_v34 = vsub.f32 %v1224_v21, %v1239_v7  ;;  %v3380_v7 = vld [vmem:[%s4388_s2 + $0x58] sm:$0xf0] }
 0x2fc   : > { %v1243_v35 = vmul.f32 %v4493_v34, %v4493_v34 }
 0x2fe   : > { %v1245_v36 = vsel %vm864_vm1, %v1243_v35, 0.0 }
 0x2ff   : > { %1246 = vadd.xlane.f32.xlu1 %v1245_v36  ;;  %v1231_v37 = vpop.xlane.xlu0 %1230  ;;  %v3383_v36 = vor.u32 %v4027_v33, %v3380_v7  ;;  %v3404_v33 = vld [vmem:[%s4388_s2 + $0x70] sm:$0xf0]  ;;  %v3410_v7 = vld [vmem:[%s4388_s2 + $0x38] sm:$0xf] }
 0x300   : > { %v1240_v38 = vmul.f32 %v4490_v6, %v1231_v37 }
 0x301   : > { %1626 = vmatpush.bf16.msrb.mxu2 %v3383_v36  ;;  %v4031_v36 = vld [vmem:[%s4388_s2 + $0x3c] sm:$0xf] }
 0x302   : > { %v4499_v39 = vsub.f32 %v1225_v25, %v1240_v38  ;;  %v4026_v25 = vld [vmem:[%s4388_s2 + $0x14] sm:$0xf] }
 0x303   : > { %v3375_v31 = vor.u32 %v4026_v25, %v3372_v28  ;;  %v3476_v25 = vld [vmem:[%s4388_s2 + $0xf8] sm:$0xf0]  ;;  %v3402_v28 = vld [vmem:[%s4388_s2 + $0x30] sm:$0xf] }
 0x304   : > { %v1244_v40 = vmul.f32 %v4499_v39, %v4499_v39 }
 0x305   : > { %1598 = vmatpush.bf16.msra.mxu0 %v3375_v31  ;;  %v3479_v31 = vor.u32 %v4047_v24, %v3476_v25  ;;  %v4108_v24 = vld [vmem:[%s4403_s18 + $0x1a0] sm:$0xff]  ;;  %v4093_v25 = vld [vmem:[%s4403_s18 + $0x128] sm:$0xff] }
 0x306   : > { %v1248_v41 = vsel %vm864_vm1, %v1244_v40, 0.0 }
 0x307   : > { %1249 = vadd.xlane.f32.xlu1 %v1248_v41 }
 0x372   : > { %v1247_v53 = vpop.xlane.xlu1 %1246 }
 0x373   : > { %v1251_v55 = vmul.f32 %v1247_v53, %v4490_v6 }
 0x375   : > { %v1253_v63 = vadd.f32 1e-05, %v1251_v55  ;;  %v3450_v55 = vld [vmem:[%s4388_s2 + $0xa0] sm:$0xf] }
 0x377   : > { %4216 = vrsqrt.f32 %v1253_v63  ;;  %vm1261_vm6 = vweird.f32 %v1253_v63 }
 0x37a   : > { %v1250_v5 = vpop.xlane.xlu1 %1249 }
 0x37b   : > { %v1252_v11 = vmul.f32 %v1250_v5, %v4490_v6 }
 0x37d   : > { %v4217_v21 = vpop.eup %4216  ;;  %v1254_v22 = vadd.f32 1e-05, %v1252_v11  ;;  %v4037_v11 = vld [vmem:[%s4388_s2 + $0x64] sm:$0xf0] }
 0x37e   : > { %v1256_v26 = vmul.f32 %v4217_v21, %v1253_v63  ;;  %vm1262_vm5 = vweird.f32 %v4217_v21  ;;  %v3395_v16 = vor.u32 %v4037_v11, %v3394_v10  ;;  %v4072_v10 = vld [vmem:[%s4403_s18 + $0x80] sm:$0xff]  ;;  %v4103_v11 = vld [vmem:[%s4403_s18 + $0x178] sm:$0xff] }
 0x37f   : > { %4218 = vrsqrt.f32 %v1254_v22  ;;  %vm1263_vm7 = vmor %vm1261_vm6, %vm1262_vm5  ;;  %vm1271_vm9 = vweird.f32 %v1254_v22 }
 0x380   : > { %v1257_v35 = vmul.f32 %v4217_v21, %v1256_v26  ;;  %v3467_v26 = vor.u32 %v4054_v19, %v3466_v18  ;;  %v4110_v18 = vld [vmem:[%s4403_s18 + $0x1b0] sm:$0xff] }
 0x381   : > { %v4094_v19 = vld [vmem:[%s4403_s18 + $0x130] sm:$0xff] }
 0x382   : > { %v1258_v37 = vmul.f32 0.5, %v1257_v35  ;;  %v4039_v35 = vld [vmem:[%s4388_s2 + $0x74] sm:$0xf0] }
 0x384   : > { %v1259_v38 = vsub.f32 1.5, %v1258_v37  ;;  %v3412_v37 = vld [vmem:[%s4388_s2 + $0x78] sm:$0xf0] }
 0x385   : > { %v4219_v40 = vpop.eup %4218 }
 0x386   : > { %v1260_v41 = vmul.f32 %v4217_v21, %v1259_v38  ;;  %v1266_v42 = vmul.f32 %v4219_v40, %v1254_v22  ;;  %vm1272_vm8 = vweird.f32 %v4219_v40  ;;  %v3474_v22 = vld [vmem:[%s4388_s2 + $0xb8] sm:$0xf]  ;;  %v3403_v38 = vor.u32 %v4038_v29, %v3402_v28  ;;  %v4092_v29 = vld [vmem:[%s4403_s18 + $0x120] sm:$0xff] }
 0x387   : > { %vm1273_vm10 = vmor %vm1271_vm9, %vm1272_vm8  ;;  %v3475_v30 = vor.u32 %v4055_v23, %v3474_v22  ;;  %v4109_v22 = vld [vmem:[%s4403_s18 + $0x1a8] sm:$0xff]  ;;  %v4100_v23 = vld [vmem:[%s4403_s18 + $0x160] sm:$0xff] }
 0x388   : > { %v1267_v43 = vmul.f32 %v4219_v40, %v1266_v42  ;;  %v1264_v44 = vsel %vm1263_vm7, %v4217_v21, %v1260_v41  ;;  %v3468_v21 = vld [vmem:[%s4388_s2 + $0xf0] sm:$0xf0]  ;;  %v3411_v41 = vor.u32 %v4039_v35, %v3410_v7  ;;  %v3415_v42 = vor.u32 %v4031_v36, %v3412_v37  ;;  %v4107_v28 = vld [vmem:[%s4403_s18 + $0x198] sm:$0xff]  ;;  %v4097_v35 = vld [vmem:[%s4403_s18 + $0x148] sm:$0xff] }
 0x389   : > { %v1275_v48 = vmul.f32 %v1264_v44, %v4493_v34  ;;  %v4052_v34 = vld [vmem:[%s4388_s2 + $0xdc] sm:$0xf0]  ;;  %v3471_v27 = vor.u32 %v4046_v20, %v3468_v21  ;;  %v4079_v44 = vld [vmem:[%s4403_s18 + $0xb8] sm:$0xff]  ;;  %v4118_v20 = vld [vmem:[%s4403_s18 + $0x1f0] sm:$0xff] }
 0x38a   : > { %v1268_v45 = vmul.f32 0.5, %v1267_v43  ;;  %v3451_v0 = vor.u32 %v4052_v34, %v3450_v55  ;;  %v4071_v43 = vld [vmem:[%s4403_s18 + $0x78] sm:$0xff]  ;;  %v4068_v55 = vld [vmem:[%s4403_s18 + $0x60] sm:$0xff]  ;;  %v4101_v21 = vld [vmem:[%s4403_s18 + $0x168] sm:$0xff] }
 0x38b   : > { %v1281_v52 = vmul.f32 %v4197_v47, %v1275_v48  ;;  %v4078_v48 = vld [vmem:[%s4403_s18 + $0xb0] sm:$0xff]  ;;  %v4076_v34 = vld [vmem:[%s4403_s18 + $0xa0] sm:$0xff]  ;;  %v4115_v7 = vld [vmem:[%s4403_s18 + $0x1d8] sm:$0xff] }
 0x38c   : > { %v1269_v46 = vsub.f32 1.5, %v1268_v45  ;;  %v4063_v45 = vld [vmem:[%s4403_s18 + $0x38] sm:$0xff]  ;;  %v4105_v36 = vld [vmem:[%s4403_s18 + $0x188] sm:$0xff]  ;;  %v4090_v37 = vld [vmem:[%s4403_s18 + $0x110] sm:$0xff] }
 0x38d   : > { %v4555_v59 = vadd.f32 %v4198_v51, %v1281_v52  ;;  %v4077_v52 = vld [vmem:[%s4403_s18 + $0xa8] sm:$0xff] }
 0x38e   : > { %v1270_v49 = vmul.f32 %v4219_v40, %v1269_v46  ;;  %v4087_v46 = vld [vmem:[%s4403_s18 + $0xf8] sm:$0xff] }
 0x390   : > { %v1274_v50 = vsel %vm1273_vm10, %v4219_v40, %v1270_v49  ;;  %v3407_v40 = vor.u32 %v4030_v32, %v3404_v33  ;;  %v4062_v49 = vld [vmem:[%s4403_s18 + $0x30] sm:$0xff]  ;;  %v4091_v33 = vld [vmem:[%s4403_s18 + $0x118] sm:$0xff] }
 0x391   : > { %v1276_v53 = vmul.f32 %v1274_v50, %v4499_v39  ;;  %v3460_v39 = vld [vmem:[%s4388_s2 + $0xe8] sm:$0xf0]  ;;  %v4086_v50 = vld [vmem:[%s4403_s18 + $0xf0] sm:$0xff] }
 0x392   : > { %v3463_v5 = vor.u32 %v4045_v62, %v3460_v39  ;;  %v4059_v62 = vld [vmem:[%s4403_s18 + $0x18] sm:$0xff]  ;;  %v4106_v32 = vld [vmem:[%s4403_s18 + $0x190] sm:$0xff] }
 0x393   : > { %v1282_v54 = vmul.f32 %v4197_v47, %v1276_v53  ;;  %v4070_v47 = vld [vmem:[%s4403_s18 + $0x70] sm:$0xff]  ;;  %v4061_v53 = vld [vmem:[%s4403_s18 + $0x28] sm:$0xff]  ;;  %v4083_v39 = vld [vmem:[%s4403_s18 + $0xd8] sm:$0xff] }
 0x395   : > { %v4557_v60 = vadd.f32 %v4198_v51, %v1282_v54  ;;  %v4069_v51 = vld [vmem:[%s4403_s18 + $0x68] sm:$0xff] }
 0x396   : > { %v4085_v54 = vld [vmem:[%s4403_s18 + $0xe8] sm:$0xff] }
 0x397   : > { %v4564_v63 = vpack.c.bf16 %v4557_v60, %v4555_v59 }
 0x399   : > { %3480 = vmatmul.msk.bf16.vlgmr.msra.gmra.mxu3 %vm864_vm1, %v4564_v63  ;;  %3481 = vmatmul.msk.bf16.vlgmr.msrb.gmra.mxu0 %vm864_vm1, %v4564_v63 }
 0x39a   : > { %3482 = vmatmul.msk.bf16.vlgmr.msrb.gmra.mxu1 %vm864_vm1, %v4564_v63  ;;  %3483 = vmatmul.msk.bf16.vlgmr.msra.gmra.mxu2 %vm864_vm1, %v4564_v63 }
 0x39b   : > { %1639 = vmatpush.bf16.msra.mxu3 %v3451_v0  ;;  %1653 = vmatpush.bf16.msrb.mxu0 %v3455_v1  ;;  %v4066_v0 = vld [vmem:[%s4403_s18 + $0x50] sm:$0xff] }
 0x39c   : > { %1667 = vmatpush.bf16.msrb.mxu1 %v3459_v4  ;;  %1681 = vmatpush.bf16.msra.mxu2 %v3463_v5  ;;  %v4074_v1 = vld [vmem:[%s4403_s18 + $0x90] sm:$0xff]  ;;  %v4065_v4 = vld [vmem:[%s4403_s18 + $0x48] sm:$0xff] }
 0x39d   : > { %v4057_v5 = vld [vmem:[%s4403_s18 + $0x8] sm:$0xff] }
 0x39f   : > { %1640 = vmatpush.bf16.msra.mxu3 %v3387_v14  ;;  %1654 = vmatpush.bf16.msrb.mxu0 %v3391_v15  ;;  %v4080_v14 = vld [vmem:[%s4403_s18 + $0xc0] sm:$0xff]  ;;  %v4095_v15 = vld [vmem:[%s4403_s18 + $0x138] sm:$0xff] }
 0x3a0   : > { %1668 = vmatpush.bf16.msrb.mxu1 %v3395_v16  ;;  %1682 = vmatpush.bf16.msra.mxu2 %v3399_v17  ;;  %v4119_v16 = vld [vmem:[%s4403_s18 + $0x1f8] sm:$0xff]  ;;  %v4102_v17 = vld [vmem:[%s4403_s18 + $0x170] sm:$0xff] }
 0x3a9   : > { %3484 = vmatmul.msk.bf16.vlgmr.msrb.gmra.mxu3 %vm864_vm1, %v4564_v63  ;;  %3485 = vmatmul.msk.bf16.vlgmr.msra.gmra.mxu0 %vm864_vm1, %v4564_v63 }
 0x3aa   : > { %3486 = vmatmul.msk.bf16.vlgmr.msra.gmra.mxu1 %vm864_vm1, %v4564_v63  ;;  %3487 = vmatmul.msk.bf16.vlgmr.msrb.gmra.mxu2 %vm864_vm1, %v4564_v63 }
 0x3ab   : > { %1695 = vmatpush.bf16.msrb.mxu3 %v3467_v26  ;;  %1709 = vmatpush.bf16.msra.mxu0 %v3471_v27  ;;  %v4117_v26 = vld [vmem:[%s4403_s18 + $0x1e8] sm:$0xff]  ;;  %v4099_v27 = vld [vmem:[%s4403_s18 + $0x158] sm:$0xff] }
 0x3ac   : > { %1723 = vmatpush.bf16.msra.mxu1 %v3475_v30  ;;  %1737 = vmatpush.bf16.msrb.mxu2 %v3479_v31  ;;  %v4116_v30 = vld [vmem:[%s4403_s18 + $0x1e0] sm:$0xff]  ;;  %v4098_v31 = vld [vmem:[%s4403_s18 + $0x150] sm:$0xff] }
 0x3af   : > { %1696 = vmatpush.bf16.msrb.mxu3 %v3403_v38  ;;  %1710 = vmatpush.bf16.msra.mxu0 %v3407_v40  ;;  %v4114_v38 = vld [vmem:[%s4403_s18 + $0x1d0] sm:$0xff]  ;;  %v4096_v40 = vld [vmem:[%s4403_s18 + $0x140] sm:$0xff] }
 0x3b0   : > { %1724 = vmatpush.bf16.msra.mxu1 %v3411_v41  ;;  %1738 = vmatpush.bf16.msrb.mxu2 %v3415_v42  ;;  %v4104_v41 = vld [vmem:[%s4403_s18 + $0x180] sm:$0xff]  ;;  %v4089_v42 = vld [vmem:[%s4403_s18 + $0x108] sm:$0xff] }
 0x3b9   : > { %3488 = vmatmul.msk.bf16.vlgmr.msra.gmra.mxu3 %vm864_vm1, %v4564_v63  ;;  %3489 = vmatmul.msk.bf16.vlgmr.msrb.gmra.mxu0 %vm864_vm1, %v4564_v63 }
 0x3ba   : > { %3490 = vmatmul.msk.bf16.vlgmr.msrb.gmra.mxu1 %vm864_vm1, %v4564_v63  ;;  %3491 = vmatmul.msk.bf16.vlgmr.msra.gmra.mxu2 %vm864_vm1, %v4564_v63 }
 0x3bb   : > { %2835 = vmatpush.bf16.msrb.mxu0 %v4071_v43  ;;  %2849 = vmatpush.bf16.msrb.mxu1 %v4079_v44  ;;  %v4113_v43 = vld [vmem:[%s4403_s18 + $0x1c8] sm:$0xff]  ;;  %v4088_v44 = vld [vmem:[%s4403_s18 + $0x100] sm:$0xff] }
 0x3bc   : > { %2821 = vmatpush.bf16.msra.mxu3 %v4063_v45  ;;  %2863 = vmatpush.bf16.msra.mxu2 %v4087_v46  ;;  %v4112_v45 = vld [vmem:[%s4403_s18 + $0x1c0] sm:$0xff] }
 0x3bd   : > { %v4687_v46 = vld [vmem:[%s4393_s9] sm:$0xff] }
 0x3bf   : > { %2836 = vmatpush.bf16.msrb.mxu0 %v4070_v47  ;;  %2850 = vmatpush.bf16.msrb.mxu1 %v4078_v48 }
 0x3c0   : > { %2822 = vmatpush.bf16.msra.mxu3 %v4062_v49  ;;  %2864 = vmatpush.bf16.msra.mxu2 %v4086_v50  ;;  %v1327_v49 = vperm.slane %v4687_v46, 1  ;;  %v1328_v50 = vperm.slane %v4687_v46, 2 }
 0x3c3   : > { %2837 = vmatpush.bf16.msrb.mxu0 %v4069_v51  ;;  %2851 = vmatpush.bf16.msrb.mxu1 %v4077_v52 }
 0x3c4   : > { %2823 = vmatpush.bf16.msra.mxu3 %v4061_v53  ;;  %2865 = vmatpush.bf16.msra.mxu2 %v4085_v54 }
 0x3c7   : > { %2838 = vmatpush.bf16.msrb.mxu0 %v4068_v55  ;;  %2852 = vmatpush.bf16.msrb.mxu1 %v4076_v34  ;;  %v1326_v34 = vperm.slane %v4687_v46, 0 }
 0x3c8   : > { %2824 = vmatpush.bf16.msra.mxu3 %v4060_v56  ;;  %2866 = vmatpush.bf16.msra.mxu2 %v4084_v57 }
 0x3c9   : > { %3492 = vmatmul.msk.bf16.vlgmr.msrb.gmra.mxu3 %vm864_vm1, %v4564_v63  ;;  %3493 = vmatmul.msk.bf16.vlgmr.msra.gmra.mxu0 %vm864_vm1, %v4564_v63 }
 0x3ca   : > { %3494 = vmatmul.msk.bf16.vlgmr.msra.gmra.mxu1 %vm864_vm1, %v4564_v63  ;;  %3495 = vmatmul.msk.bf16.vlgmr.msrb.gmra.mxu2 %vm864_vm1, %v4564_v63  ;;  %v4073_v63 = vld [vmem:[%s4403_s18 + $0x88] sm:$0xff] }
 0x3cb   : > { %2839 = vmatpush.bf16.msrb.mxu0 %v4067_v58  ;;  %2853 = vmatpush.bf16.msrb.mxu1 %v4075_v61  ;;  %v1329_v58 = vperm.slane %v4687_v46, 3 }
 0x3cc   : > { %2825 = vmatpush.bf16.msra.mxu3 %v4059_v62  ;;  %2867 = vmatpush.bf16.msra.mxu2 %v4083_v39 }
 0x3cf   : > { %2840 = vmatpush.bf16.msrb.mxu0 %v4066_v0  ;;  %2854 = vmatpush.bf16.msrb.mxu1 %v4074_v1 }
 0x3d0   : > { %2826 = vmatpush.bf16.msra.mxu3 %v4058_v2  ;;  %2868 = vmatpush.bf16.msra.mxu2 %v4082_v3  ;;  %v4135_v2 = vld [vmem:[%s4403_s18 + $0x278] sm:$0xff] }
 0x3d3   : > { %2841 = vmatpush.bf16.msrb.mxu0 %v4065_v4  ;;  %2855 = vmatpush.bf16.msrb.mxu1 %v4073_v63  ;;  %v4143_v63 = vld [vmem:[%s4403_s18 + $0x2b8] sm:$0xff] }
 0x3d4   : > { %2827 = vmatpush.bf16.msra.mxu3 %v4057_v5  ;;  %2869 = vmatpush.bf16.msra.mxu2 %v4081_v8 }
 0x3d7   : > { %2842 = vmatpush.bf16.msrb.mxu0 %v4064_v9  ;;  %2856 = vmatpush.bf16.msrb.mxu1 %v4072_v10 }
 0x3d8   : > { %2828 = vmatpush.bf16.msra.mxu3 %v4056_v13  ;;  %2870 = vmatpush.bf16.msra.mxu2 %v4080_v14  ;;  %v4134_v14 = vld [vmem:[%s4403_s18 + $0x270] sm:$0xff] }
 0x3db   : > { %2891 = vmatpush.bf16.msra.mxu0 %v4103_v11  ;;  %2905 = vmatpush.bf16.msra.mxu1 %v4111_v12 }
 0x3dc   : > { %2877 = vmatpush.bf16.msrb.mxu3 %v4095_v15  ;;  %2919 = vmatpush.bf16.msrb.mxu2 %v4119_v16 }
 0x3df   : > { %2892 = vmatpush.bf16.msra.mxu0 %v4102_v17  ;;  %2906 = vmatpush.bf16.msra.mxu1 %v4110_v18  ;;  %v4142_v18 = vld [vmem:[%s4403_s18 + $0x2b0] sm:$0xff] }
 0x3e0   : > { %2878 = vmatpush.bf16.msrb.mxu3 %v4094_v19  ;;  %2920 = vmatpush.bf16.msrb.mxu2 %v4118_v20 }
 0x3e3   : > { %2893 = vmatpush.bf16.msra.mxu0 %v4101_v21  ;;  %2907 = vmatpush.bf16.msra.mxu1 %v4109_v22  ;;  %v4127_v21 = vld [vmem:[%s4403_s18 + $0x238] sm:$0xff] }
 0x3e4   : > { %2879 = vmatpush.bf16.msrb.mxu3 %v4093_v25  ;;  %2921 = vmatpush.bf16.msrb.mxu2 %v4117_v26  ;;  %v1332_v26 = vperm.slane %v4687_v46, 6 }
 0x3e7   : > { %2894 = vmatpush.bf16.msra.mxu0 %v4100_v23  ;;  %2908 = vmatpush.bf16.msra.mxu1 %v4108_v24  ;;  %v1331_v23 = vperm.slane %v4687_v46, 5  ;;  %v4151_v24 = vld [vmem:[%s4403_s18 + $0x2f8] sm:$0xff] }
 0x3e8   : > { %2880 = vmatpush.bf16.msrb.mxu3 %v4092_v29  ;;  %2922 = vmatpush.bf16.msrb.mxu2 %v4116_v30  ;;  %v4126_v30 = vld [vmem:[%s4403_s18 + $0x230] sm:$0xff] }
 0x3eb   : > { %2895 = vmatpush.bf16.msra.mxu0 %v4099_v27  ;;  %2909 = vmatpush.bf16.msra.mxu1 %v4107_v28  ;;  %v4133_v27 = vld [vmem:[%s4403_s18 + $0x268] sm:$0xff] }
 0x3ec   : > { %2881 = vmatpush.bf16.msrb.mxu3 %v4091_v33  ;;  %2923 = vmatpush.bf16.msrb.mxu2 %v4115_v7  ;;  %v4141_v28 = vld [vmem:[%s4403_s18 + $0x2a8] sm:$0xff]  ;;  %v4150_v33 = vld [vmem:[%s4403_s18 + $0x2f0] sm:$0xff] }
 0x3ef   : > { %2896 = vmatpush.bf16.msra.mxu0 %v4098_v31  ;;  %2910 = vmatpush.bf16.msra.mxu1 %v4106_v32 }
 0x3f0   : > { %2882 = vmatpush.bf16.msrb.mxu3 %v4090_v37  ;;  %2924 = vmatpush.bf16.msrb.mxu2 %v4114_v38  ;;  %v1330_v37 = vperm.slane %v4687_v46, 4 }
 0x3f3   : > { %2897 = vmatpush.bf16.msra.mxu0 %v4097_v35  ;;  %2911 = vmatpush.bf16.msra.mxu1 %v4105_v36  ;;  %v4132_v36 = vld [vmem:[%s4403_s18 + $0x260] sm:$0xff] }
 0x3f4   : > { %2883 = vmatpush.bf16.msrb.mxu3 %v4089_v42  ;;  %2925 = vmatpush.bf16.msrb.mxu2 %v4113_v43  ;;  %v1333_v42 = vperm.slane %v4687_v46, 7 }
 0x3f7   : > { %2898 = vmatpush.bf16.msra.mxu0 %v4096_v40  ;;  %2912 = vmatpush.bf16.msra.mxu1 %v4104_v41  ;;  %v4140_v41 = vld [vmem:[%s4403_s18 + $0x2a0] sm:$0xff] }
 0x3f8   : > { %2884 = vmatpush.bf16.msrb.mxu3 %v4088_v44  ;;  %2926 = vmatpush.bf16.msrb.mxu2 %v4112_v45  ;;  %v4125_v44 = vld [vmem:[%s4403_s18 + $0x228] sm:$0xff] }
 0x416   : > { %v1544_v47 = vpop.f32.mrf.mxu0 }
 0x417   : > { %v1558_v48 = vpop.f32.mrf.mxu1  ;;  %v1545_v52 = vadd.f32 %v1544_v47, %v1327_v49 }
 0x418   : > { %v1559_v54 = vadd.f32 %v1558_v48, %v1328_v50  ;;  %v4149_v48 = vld [vmem:[%s4403_s18 + $0x2e8] sm:$0xff] }
 0x419   : > { %v1746_v62 = vmax.f32 %v1545_v52, 0.0 }
 0x41a   : > { %v1747_v0 = vmax.f32 %v1559_v54, 0.0  ;;  %v4139_v54 = vld [vmem:[%s4403_s18 + $0x298] sm:$0xff] }
 0x41c   : > { %v1530_v51 = vpop.f32.mrf.mxu3 }
 0x41d   : > { %v1572_v53 = vpop.f32.mrf.mxu2  ;;  %v1531_v3 = vadd.f32 %v1530_v51, %v1326_v34  ;;  %v4131_v51 = vld [vmem:[%s4403_s18 + $0x258] sm:$0xff] }
 0x41e   : > { %v1546_v55 = vpop.f32.mrf.mxu0  ;;  %v1573_v5 = vadd.f32 %v1572_v53, %v1329_v58 }
 0x41f   : > { %v1547_v56 = vadd.f32 %v1546_v55, %v1327_v49  ;;  %v1560_v57 = vpop.f32.mrf.mxu1  ;;  %v1745_v15 = vmax.f32 %v1531_v3, 0.0 }
 0x420   : > { %v1561_v61 = vadd.f32 %v1560_v57, %v1328_v50  ;;  %v1748_v19 = vmax.f32 %v1573_v5, 0.0 }
 0x421   : > { %v1762_v39 = vmax.f32 %v1547_v56, 0.0  ;;  %v4124_v56 = vld [vmem:[%s4403_s18 + $0x220] sm:$0xff] }
 0x422   : > { %v1763_v1 = vmax.f32 %v1561_v61, 0.0  ;;  %v4148_v61 = vld [vmem:[%s4403_s18 + $0x2e0] sm:$0xff] }
 0x423   : > { %v1778_v4 = vpack.c.bf16 %v1762_v39, %v1746_v62  ;;  %v4716_v39 = vld [vmem:[%s4393_s9 + $0x8] sm:$0xff] }
 0x424   : > { %v1779_v8 = vpack.c.bf16 %v1763_v1, %v1747_v0  ;;  %v1532_v9 = vpop.f32.mrf.mxu3  ;;  %v4130_v1 = vld [vmem:[%s4403_s18 + $0x250] sm:$0xff] }
 0x425   : > { %v1533_v10 = vadd.f32 %v1532_v9, %v1326_v34  ;;  %v1574_v11 = vpop.f32.mrf.mxu2  ;;  %2843 = vmatmul.bf16.vlgmr.msrb.gmra.mxu0 %v1778_v4  ;;  %v4123_v9 = vld [vmem:[%s4403_s18 + $0x218] sm:$0xff] }
 0x426   : > { %v1575_v12 = vadd.f32 %v1574_v11, %v1329_v58  ;;  %2857 = vmatmul.bf16.vlgmr.msrb.gmra.mxu1 %v1779_v8  ;;  %2947 = vmatpush.bf16.msrb.mxu0 %v4135_v2  ;;  %v1600_v13 = vpop.f32.mrf.mxu0  ;;  %v1335_v11 = vperm.slane %v4716_v39, 1 }
 0x427   : > { %v1761_v16 = vmax.f32 %v1533_v10, 0.0  ;;  %2961 = vmatpush.bf16.msrb.mxu1 %v4143_v63  ;;  %v1614_v17 = vpop.f32.mrf.mxu1  ;;  %v1601_v31 = vadd.f32 %v1600_v13, %v1331_v23  ;;  %v4138_v63 = vld [vmem:[%s4403_s18 + $0x290] sm:$0xff] }
 0x428   : > { %v1764_v20 = vmax.f32 %v1575_v12, 0.0  ;;  %v1615_v7 = vadd.f32 %v1614_v17, %v1332_v26  ;;  %v4147_v12 = vld [vmem:[%s4403_s18 + $0x2d8] sm:$0xff] }
 0x429   : > { %v1777_v22 = vpack.c.bf16 %v1761_v16, %v1745_v15  ;;  %v1750_v45 = vmax.f32 %v1601_v31, 0.0  ;;  %v4129_v15 = vld [vmem:[%s4403_s18 + $0x248] sm:$0xff] }
 0x42a   : > { %v1780_v25 = vpack.c.bf16 %v1764_v20, %v1748_v19  ;;  %2948 = vmatpush.bf16.msrb.mxu0 %v4134_v14  ;;  %v1751_v49 = vmax.f32 %v1615_v7, 0.0  ;;  %v1336_v14 = vperm.slane %v4716_v39, 2  ;;  %v4137_v16 = vld [vmem:[%s4403_s18 + $0x288] sm:$0xff] }
 0x42b   : > { %2962 = vmatpush.bf16.msrb.mxu1 %v4142_v18  ;;  %2829 = vmatmul.bf16.vlgmr.msra.gmra.mxu3 %v1777_v22  ;;  %v4122_v18 = vld [vmem:[%s4403_s18 + $0x210] sm:$0xff] }
 0x42c   : > { %2871 = vmatmul.bf16.vlgmr.msra.gmra.mxu2 %v1780_v25  ;;  %2933 = vmatpush.bf16.msra.mxu3 %v4127_v21  ;;  %v1586_v29 = vpop.f32.mrf.mxu3  ;;  %v4146_v21 = vld [vmem:[%s4403_s18 + $0x2d0] sm:$0xff]  ;;  %v1334_v25 = vperm.slane %v4716_v39, 0 }
 0x42d   : > { %2975 = vmatpush.bf16.msra.mxu2 %v4151_v24  ;;  %v1628_v32 = vpop.f32.mrf.mxu2  ;;  %v1587_v52 = vadd.f32 %v1586_v29, %v1330_v37  ;;  %v4128_v24 = vld [vmem:[%s4403_s18 + $0x240] sm:$0xff]  ;;  %v4167_v29 = vld [vmem:[%s4403_s18 + $0x378] sm:$0xff] }
 0x42e   : > { %2949 = vmatpush.bf16.msrb.mxu0 %v4133_v27  ;;  %v1602_v35 = vpop.f32.mrf.mxu0  ;;  %v1629_v46 = vadd.f32 %v1628_v32, %v1333_v42  ;;  %v4175_v32 = vld [vmem:[%s4403_s18 + $0x3b8] sm:$0xff] }
 0x42f   : > { %2963 = vmatpush.bf16.msrb.mxu1 %v4141_v28  ;;  %v1603_v38 = vadd.f32 %v1602_v35, %v1331_v23  ;;  %v1616_v40 = vpop.f32.mrf.mxu1  ;;  %v1749_v2 = vmax.f32 %v1587_v52, 0.0  ;;  %v4136_v28 = vld [vmem:[%s4403_s18 + $0x280] sm:$0xff]  ;;  %v4159_v52 = vld [vmem:[%s4403_s18 + $0x338] sm:$0xff] }
 0x430   : > { %v1617_v43 = vadd.f32 %v1616_v40, %v1332_v26  ;;  %2934 = vmatpush.bf16.msra.mxu3 %v4126_v30  ;;  %v1752_v5 = vmax.f32 %v1629_v46, 0.0  ;;  %v1337_v30 = vperm.slane %v4716_v39, 3 }
 0x431   : > { %v1766_v47 = vmax.f32 %v1603_v38, 0.0  ;;  %2976 = vmatpush.bf16.msra.mxu2 %v4150_v33  ;;  %v4121_v33 = vld [vmem:[%s4403_s18 + $0x208] sm:$0xff] }
 0x432   : > { %v1767_v50 = vmax.f32 %v1617_v43, 0.0  ;;  %2950 = vmatpush.bf16.msrb.mxu0 %v4132_v36  ;;  %v4145_v36 = vld [vmem:[%s4403_s18 + $0x2c8] sm:$0xff] }
 0x433   : > { %v1782_v53 = vpack.c.bf16 %v1766_v47, %v1750_v45  ;;  %2964 = vmatpush.bf16.msrb.mxu1 %v4140_v41  ;;  %v4174_v47 = vld [vmem:[%s4403_s18 + $0x3b0] sm:$0xff] }
 0x434   : > { %v1783_v55 = vpack.c.bf16 %v1767_v50, %v1751_v49  ;;  %2935 = vmatpush.bf16.msra.mxu3 %v4125_v44  ;;  %v1588_v34 = vpop.f32.mrf.mxu3 }
 0x435   : > { %2977 = vmatpush.bf16.msra.mxu2 %v4149_v48  ;;  %v1589_v57 = vadd.f32 %v1588_v34, %v1330_v37  ;;  %v1630_v58 = vpop.f32.mrf.mxu2  ;;  %2899 = vmatmul.bf16.vlgmr.msra.gmra.mxu0 %v1782_v53  ;;  %v4120_v48 = vld [vmem:[%s4403_s18 + $0x200] sm:$0xff]  ;;  %v4165_v34 = vld [vmem:[%s4403_s18 + $0x368] sm:$0xff] }
 0x436   : > { %v1631_v62 = vadd.f32 %v1630_v58, %v1333_v42  ;;  %2913 = vmatmul.bf16.vlgmr.msra.gmra.mxu1 %v1783_v55  ;;  %2951 = vmatpush.bf16.msrb.mxu0 %v4131_v51  ;;  %v1656_v0 = vpop.f32.mrf.mxu0  ;;  %v4166_v42 = vld [vmem:[%s4403_s18 + $0x370] sm:$0xff]  ;;  %v4144_v51 = vld [vmem:[%s4403_s18 + $0x2c0] sm:$0xff]  ;;  %v4173_v58 = vld [vmem:[%s4403_s18 + $0x3a8] sm:$0xff] }
 0x437   : > { %v1765_v3 = vmax.f32 %v1589_v57, 0.0  ;;  %2965 = vmatpush.bf16.msrb.mxu1 %v4139_v54  ;;  %v1670_v4 = vpop.f32.mrf.mxu1  ;;  %v1657_v19 = vadd.f32 %v1656_v0, %v1335_v11  ;;  %v4183_v54 = vld [vmem:[%s4403_s18 + $0x3f8] sm:$0xff] }
 0x438   : > { %v1768_v8 = vmax.f32 %v1631_v62, 0.0  ;;  %2936 = vmatpush.bf16.msra.mxu3 %v4124_v56  ;;  %v1671_v22 = vadd.f32 %v1670_v4, %v1336_v14  ;;  %v4158_v62 = vld [vmem:[%s4403_s18 + $0x330] sm:$0xff] }
 0x439   : > { %v1781_v10 = vpack.c.bf16 %v1765_v3, %v1749_v2  ;;  %2978 = vmatpush.bf16.msra.mxu2 %v4148_v61  ;;  %v1754_v7 = vmax.f32 %v1657_v19, 0.0  ;;  %v4164_v3 = vld [vmem:[%s4403_s18 + $0x360] sm:$0xff]  ;;  %v1339_v19 = vperm.slane %v4716_v39, 5 }
 0x43a   : > { %v1784_v13 = vpack.c.bf16 %v1768_v8, %v1752_v5  ;;  %2952 = vmatpush.bf16.msrb.mxu0 %v4130_v1  ;;  %v1755_v37 = vmax.f32 %v1671_v22, 0.0  ;;  %v4182_v1 = vld [vmem:[%s4403_s18 + $0x3f0] sm:$0xff]  ;;  %v4157_v5 = vld [vmem:[%s4403_s18 + $0x328] sm:$0xff]  ;;  %v1340_v22 = vperm.slane %v4716_v39, 6 }
 0x43b   : > { %2966 = vmatpush.bf16.msrb.mxu1 %v4138_v63  ;;  %2885 = vmatmul.bf16.vlgmr.msrb.gmra.mxu3 %v1781_v10  ;;  %v4172_v63 = vld [vmem:[%s4403_s18 + $0x3a0] sm:$0xff]  ;;  %v4181_v8 = vld [vmem:[%s4403_s18 + $0x3e8] sm:$0xff]  ;;  %v4171_v10 = vld [vmem:[%s4403_s18 + $0x398] sm:$0xff] }
 0x43c   : > { %2927 = vmatmul.bf16.vlgmr.msrb.gmra.mxu2 %v1784_v13  ;;  %2937 = vmatpush.bf16.msra.mxu3 %v4123_v9  ;;  %v1642_v17 = vpop.f32.mrf.mxu3  ;;  %v4163_v9 = vld [vmem:[%s4403_s18 + $0x358] sm:$0xff] }
 0x43d   : > { %2979 = vmatpush.bf16.msra.mxu2 %v4147_v12  ;;  %v1684_v20 = vpop.f32.mrf.mxu2  ;;  %v1643_v40 = vadd.f32 %v1642_v17, %v1334_v25  ;;  %v4156_v12 = vld [vmem:[%s4403_s18 + $0x320] sm:$0xff] }
 0x43e   : > { %2953 = vmatpush.bf16.msrb.mxu0 %v4129_v15  ;;  %v1658_v23 = vpop.f32.mrf.mxu0  ;;  %v1685_v43 = vadd.f32 %v1684_v20, %v1337_v30  ;;  %v4162_v15 = vld [vmem:[%s4403_s18 + $0x350] sm:$0xff] }
 0x43f   : > { %2967 = vmatpush.bf16.msrb.mxu1 %v4137_v16  ;;  %v1659_v26 = vadd.f32 %v1658_v23, %v1335_v11  ;;  %v1672_v27 = vpop.f32.mrf.mxu1  ;;  %v1753_v46 = vmax.f32 %v1643_v40, 0.0  ;;  %v4170_v16 = vld [vmem:[%s4403_s18 + $0x390] sm:$0xff]  ;;  %v4161_v23 = vld [vmem:[%s4403_s18 + $0x348] sm:$0xff] }
 0x440   : > { %v1673_v31 = vadd.f32 %v1672_v27, %v1336_v14  ;;  %2938 = vmatpush.bf16.msra.mxu3 %v4122_v18  ;;  %v1756_v56 = vmax.f32 %v1685_v43, 0.0  ;;  %v4180_v14 = vld [vmem:[%s4403_s18 + $0x3e0] sm:$0xff]  ;;  %v4155_v18 = vld [vmem:[%s4403_s18 + $0x318] sm:$0xff]  ;;  %v4154_v27 = vld [vmem:[%s4403_s18 + $0x310] sm:$0xff] }
 0x441   : > { %v1770_v35 = vmax.f32 %v1659_v26, 0.0  ;;  %2980 = vmatpush.bf16.msra.mxu2 %v4146_v21  ;;  %v4179_v21 = vld [vmem:[%s4403_s18 + $0x3d8] sm:$0xff]  ;;  %v4153_v40 = vld [vmem:[%s4403_s18 + $0x308] sm:$0xff] }
 0x442   : > { %v1771_v38 = vmax.f32 %v1673_v31, 0.0  ;;  %2954 = vmatpush.bf16.msrb.mxu0 %v4128_v24  ;;  %v4177_v43 = vld [vmem:[%s4403_s18 + $0x3c8] sm:$0xff] }
 0x443   : > { %v1786_v41 = vpack.c.bf16 %v1770_v35, %v1754_v7  ;;  %2968 = vmatpush.bf16.msrb.mxu1 %v4136_v28 }
 0x444   : > { %v1787_v44 = vpack.c.bf16 %v1771_v38, %v1755_v37  ;;  %2939 = vmatpush.bf16.msra.mxu3 %v4121_v33  ;;  %v1644_v45 = vpop.f32.mrf.mxu3  ;;  %v1338_v33 = vperm.slane %v4716_v39, 4  ;;  %v1341_v37 = vperm.slane %v4716_v39, 7 }
 0x445   : > { %2981 = vmatpush.bf16.msra.mxu2 %v4145_v36  ;;  %v1645_v49 = vadd.f32 %v1644_v45, %v1334_v25  ;;  %v1686_v50 = vpop.f32.mrf.mxu2  ;;  %2955 = vmatmul.bf16.vlgmr.msrb.gmra.mxu0 %v1786_v41  ;;  %v4169_v25 = vld [vmem:[%s4403_s18 + $0x388] sm:$0xff]  ;;  %v4168_v36 = vld [vmem:[%s4403_s18 + $0x380] sm:$0xff] }
 0x446   : > { %3003 = vmatpush.bf16.msra.mxu0 %v4167_v29  ;;  %v1687_v53 = vadd.f32 %v1686_v50, %v1337_v30  ;;  %2969 = vmatmul.bf16.vlgmr.msrb.gmra.mxu1 %v1787_v44  ;;  %v1712_v2 = vpop.f32.mrf.mxu0  ;;  %v4178_v29 = vld [vmem:[%s4403_s18 + $0x3d0] sm:$0xff] }
 0x447   : > { %3017 = vmatpush.bf16.msra.mxu1 %v4175_v32  ;;  %v1769_v55 = vmax.f32 %v1645_v49, 0.0  ;;  %v1726_v4 = vpop.f32.mrf.mxu1  ;;  %v1713_v28 = vadd.f32 %v1712_v2, %v1339_v19  ;;  %v4160_v32 = vld [vmem:[%s4403_s18 + $0x340] sm:$0xff] }
 0x448   : > { %v1772_v57 = vmax.f32 %v1687_v53, 0.0  ;;  %2940 = vmatpush.bf16.msra.mxu3 %v4120_v48  ;;  %v1727_v30 = vadd.f32 %v1726_v4, %v1340_v22  ;;  %v4199_v2 = vld [vmem:[%s824_s7] ss:$0 sm:$0xff] }
 0x449   : > { %v1785_v61 = vpack.c.bf16 %v1769_v55, %v1753_v46  ;;  %2982 = vmatpush.bf16.msra.mxu2 %v4144_v51  ;;  %v1758_v41 = vmax.f32 %v1713_v28, 0.0  ;;  %v4152_v51 = vld [vmem:[%s4403_s18 + $0x300] sm:$0xff] }
 0x44a   : > { %3004 = vmatpush.bf16.msra.mxu0 %v4166_v42  ;;  %v1788_v0 = vpack.c.bf16 %v1772_v57, %v1756_v56  ;;  %v1759_v44 = vmax.f32 %v1727_v30, 0.0 }
 0x44b   : > { %3018 = vmatpush.bf16.msra.mxu1 %v4174_v47  ;;  %2941 = vmatmul.bf16.vlgmr.msra.gmra.mxu3 %v1785_v61 }
 0x44c   : > { %2989 = vmatpush.bf16.msrb.mxu3 %v4159_v52  ;;  %2983 = vmatmul.bf16.vlgmr.msra.gmra.mxu2 %v1788_v0  ;;  %v1698_v11 = vpop.f32.mrf.mxu3  ;;  %v4176_v52 = vld [vmem:[%s4403_s18 + $0x3c0] sm:$0xff] }
 0x44d   : > { %3031 = vmatpush.bf16.msrb.mxu2 %v4183_v54  ;;  %v1740_v13 = vpop.f32.mrf.mxu2  ;;  %v1699_v47 = vadd.f32 %v1698_v11, %v1338_v33 }
 0x44e   : > { %3005 = vmatpush.bf16.msra.mxu0 %v4165_v34  ;;  %v1714_v17 = vpop.f32.mrf.mxu0  ;;  %v1741_v49 = vadd.f32 %v1740_v13, %v1341_v37 }
 0x44f   : > { %3019 = vmatpush.bf16.msra.mxu1 %v4173_v58  ;;  %v1728_v20 = vpop.f32.mrf.mxu1  ;;  %v1715_v24 = vadd.f32 %v1714_v17, %v1339_v19  ;;  %v1757_v54 = vmax.f32 %v1699_v47, 0.0 }
 0x450   : > { %2990 = vmatpush.bf16.msrb.mxu3 %v4158_v62  ;;  %v1729_v26 = vadd.f32 %v1728_v20, %v1340_v22  ;;  %v1760_v46 = vmax.f32 %v1741_v49, 0.0 }
 0x451   : > { %3032 = vmatpush.bf16.msrb.mxu2 %v4182_v1  ;;  %v1774_v7 = vmax.f32 %v1715_v24, 0.0 }
 0x452   : > { %3006 = vmatpush.bf16.msra.mxu0 %v4164_v3  ;;  %v1775_v38 = vmax.f32 %v1729_v26, 0.0 }
 0x453   : > { %3020 = vmatpush.bf16.msra.mxu1 %v4172_v63  ;;  %v1790_v48 = vpack.c.bf16 %v1774_v7, %v1758_v41 }
 0x454   : > { %2991 = vmatpush.bf16.msrb.mxu3 %v4157_v5  ;;  %v1700_v31 = vpop.f32.mrf.mxu3  ;;  %v1791_v50 = vpack.c.bf16 %v1775_v38, %v1759_v44 }
 0x455   : > { %3033 = vmatpush.bf16.msrb.mxu2 %v4181_v8  ;;  %v1742_v35 = vpop.f32.mrf.mxu2  ;;  %v1701_v42 = vadd.f32 %v1700_v31, %v1338_v33 }
 0x456   : > { %3007 = vmatpush.bf16.msra.mxu0 %v4163_v9  ;;  %v1743_v45 = vadd.f32 %v1742_v35, %v1341_v37 }
 0x457   : > { %3021 = vmatpush.bf16.msra.mxu1 %v4171_v10  ;;  %v1773_v39 = vmax.f32 %v1701_v42, 0.0 }
 0x458   : > { %2992 = vmatpush.bf16.msrb.mxu3 %v4156_v12  ;;  %v1776_v53 = vmax.f32 %v1743_v45, 0.0 }
 0x459   : > { %3034 = vmatpush.bf16.msrb.mxu2 %v4180_v14  ;;  %v1789_v55 = vpack.c.bf16 %v1773_v39, %v1757_v54 }
 0x45a   : > { %3008 = vmatpush.bf16.msra.mxu0 %v4162_v15  ;;  %v1792_v34 = vpack.c.bf16 %v1776_v53, %v1760_v46 }
 0x45b   : > { %3022 = vmatpush.bf16.msra.mxu1 %v4170_v16 }
 0x45c   : > { %2993 = vmatpush.bf16.msrb.mxu3 %v4155_v18 }
 0x45d   : > { %3035 = vmatpush.bf16.msrb.mxu2 %v4179_v21 }
 0x45e   : > { %3009 = vmatpush.bf16.msra.mxu0 %v4161_v23 }
 0x45f   : > { %3023 = vmatpush.bf16.msra.mxu1 %v4169_v25 }
 0x460   : > { %2994 = vmatpush.bf16.msrb.mxu3 %v4154_v27 }
 0x461   : > { %3036 = vmatpush.bf16.msrb.mxu2 %v4178_v29 }
 0x462   : > { %3010 = vmatpush.bf16.msra.mxu0 %v4160_v32 }
 0x463   : > { %3024 = vmatpush.bf16.msra.mxu1 %v4168_v36 }
 0x464   : > { %2995 = vmatpush.bf16.msrb.mxu3 %v4153_v40 }
 0x465   : > { %3037 = vmatpush.bf16.msrb.mxu2 %v4177_v43  ;;  %3011 = vmatmul.bf16.vlgmr.msra.gmra.mxu0 %v1790_v48 }
 0x466   : > { %3025 = vmatmul.bf16.vlgmr.msra.gmra.mxu1 %v1791_v50 }
 0x468   : > { %2996 = vmatpush.bf16.msrb.mxu3 %v4152_v51 }
 0x469   : > { %3038 = vmatpush.bf16.msrb.mxu2 %v4176_v52 }
 0x46b   : > { %2997 = vmatmul.bf16.vlgmr.msrb.gmra.mxu3 %v1789_v55 }
 0x46c   : > { %3039 = vmatmul.bf16.vlgmr.msrb.gmra.mxu2 %v1792_v34 }
 0x4a2   : > { %v2844_v56 = vpop.f32.mrf.mxu0 }
 0x4a3   : > { %v2858_v58 = vpop.f32.mrf.mxu1 }
 0x4aa   : > { %v2846_v62 = vpop.f32.mrf.mxu0 }
 0x4ab   : > { %v2860_v1 = vpop.f32.mrf.mxu1 }
 0x4ae   : > { %v2830_v57 = vpop.f32.mrf.mxu3 }
 0x4af   : > { %v2872_v61 = vpop.f32.mrf.mxu2  ;;  %v2831_v4 = vadd.f32 %v4199_v2, %v2830_v57 }
 0x4b1   : > { %v2845_v8 = vadd.f32 %v2844_v56, %v2831_v4 }
 0x4b2   : > { %v2900_v63 = vpop.f32.mrf.mxu0 }
 0x4b3   : > { %v2914_v9 = vpop.f32.mrf.mxu1  ;;  %v2859_v11 = vadd.f32 %v2858_v58, %v2845_v8 }
 0x4b5   : > { %v2873_v13 = vadd.f32 %v2872_v61, %v2859_v11 }
 0x4b6   : > { %v2832_v0 = vpop.f32.mrf.mxu3 }
 0x4b7   : > { %v2874_v3 = vpop.f32.mrf.mxu2  ;;  %v2833_v12 = vadd.f32 %v4199_v2, %v2832_v0 }
 0x4b9   : > { %v2847_v14 = vadd.f32 %v2846_v62, %v2833_v12 }
 0x4ba   : > { %v2902_v15 = vpop.f32.mrf.mxu0 }
 0x4bb   : > { %v2916_v18 = vpop.f32.mrf.mxu1  ;;  %v2861_v19 = vadd.f32 %v2860_v1, %v2847_v14 }
 0x4bd   : > { %v2875_v22 = vadd.f32 %v2874_v3, %v2861_v19 }
 0x4be   : > { %v2886_v5 = vpop.f32.mrf.mxu3 }
 0x4bf   : > { %v2928_v10 = vpop.f32.mrf.mxu2  ;;  %v2887_v17 = vadd.f32 %v2886_v5, %v2873_v13 }
 0x4c1   : > { %v2901_v21 = vadd.f32 %v2900_v63, %v2887_v17 }
 0x4c2   : > { %v2956_v25 = vpop.f32.mrf.mxu0 }
 0x4c3   : > { %v2915_v23 = vadd.f32 %v2914_v9, %v2901_v21  ;;  %v2970_v27 = vpop.f32.mrf.mxu1 }
 0x4c5   : > { %v2929_v28 = vadd.f32 %v2928_v10, %v2915_v23 }
 0x4c6   : > { %v2888_v16 = vpop.f32.mrf.mxu3 }
 0x4c7   : > { %v2930_v20 = vpop.f32.mrf.mxu2  ;;  %v2889_v24 = vadd.f32 %v2888_v16, %v2875_v22 }
 0x4c9   : > { %v2903_v29 = vadd.f32 %v2902_v15, %v2889_v24 }
 0x4ca   : > { %v2958_v7 = vpop.f32.mrf.mxu0 }
 0x4cb   : > { %v2917_v32 = vadd.f32 %v2916_v18, %v2903_v29  ;;  %v2972_v37 = vpop.f32.mrf.mxu1 }
 0x4cd   : > { %v2931_v36 = vadd.f32 %v2930_v20, %v2917_v32 }
 0x4ce   : > { %v2942_v26 = vpop.f32.mrf.mxu3 }
 0x4cf   : > { %v2984_v30 = vpop.f32.mrf.mxu2  ;;  %v2943_v31 = vadd.f32 %v2942_v26, %v2929_v28  ;;  %v4200_v26 = vld [vmem:[%s827_s5] ss:$0 sm:$0xff] }
 0x4d0   : > { %v4201_v28 = vld [vmem:[%s830_s24] ss:$0 sm:$0xff] }
 0x4d1   : > { %v2957_v33 = vadd.f32 %v2956_v25, %v2943_v31 }
 0x4d3   : > { %v2971_v38 = vadd.f32 %v2970_v27, %v2957_v33 }
 0x4d5   : > { %v2985_v42 = vadd.f32 %v2984_v30, %v2971_v38 }
 0x4d6   : > { %v2944_v35 = vpop.f32.mrf.mxu3 }
 0x4d7   : > { %v2945_v40 = vadd.f32 %v2944_v35, %v2931_v36  ;;  %v2986_v41 = vpop.f32.mrf.mxu2 }
 0x4d9   : > { %v2959_v43 = vadd.f32 %v2958_v7, %v2945_v40 }
 0x4db   : > { %v2973_v49 = vadd.f32 %v2972_v37, %v2959_v43 }
 0x4dd   : > { %v2987_v52 = vadd.f32 %v2986_v41, %v2973_v49 }
 0x4e2   : > { %v3012_v44 = vpop.f32.mrf.mxu0 }
 0x4e3   : > { %v3026_v48 = vpop.f32.mrf.mxu1 }
 0x4ea   : > { %v3014_v34 = vpop.f32.mrf.mxu0 }
 0x4eb   : > { %v3028_v58 = vpop.f32.mrf.mxu1 }
 0x4ee   : > { %v2998_v45 = vpop.f32.mrf.mxu3 }
 0x4ef   : > { %v2999_v47 = vadd.f32 %v2998_v45, %v2985_v42  ;;  %v3040_v51 = vpop.f32.mrf.mxu2 }
 0x4f1   : > { %v3013_v50 = vadd.f32 %v3012_v44, %v2999_v47 }
 0x4f3   : > { %v3027_v39 = vadd.f32 %v3026_v48, %v3013_v50 }
 0x4f5   : > { %v3041_v53 = vadd.f32 %v3040_v51, %v3027_v39 }
 0x4f6   : > { %v3000_v54 = vpop.f32.mrf.mxu3 }
 0x4f7   : > { %v3001_v46 = vadd.f32 %v3000_v54, %v2987_v52  ;;  %v3045_v55 = vadd.f32 %v3041_v53, %v4555_v59  ;;  %v3042_v62 = vpop.f32.mrf.mxu2 }
 0x4f9   : > { %v3015_v56 = vadd.f32 %v3014_v34, %v3001_v46  ;;  %v3047_v57 = vsel %vm864_vm1, %v3045_v55, 0.0 }
 0x4fa   : > { %3048 = vadd.xlane.f32.xlu2 %v3047_v57 }
 0x4fb   : > { %v3029_v61 = vadd.f32 %v3028_v58, %v3015_v56 }
 0x4fd   : > { %v3043_v0 = vadd.f32 %v3042_v62, %v3029_v61 }
 0x4ff   : > { %v3046_v1 = vadd.f32 %v3043_v0, %v4557_v60 }
 0x501   : > { %v3050_v2 = vsel %vm864_vm1, %v3046_v1, 0.0 }
 0x502   : > { %3051 = vadd.xlane.f32.xlu2 %v3050_v2 }
 0x56d   : > { %v3049_v3 = vpop.xlane.xlu2 %3048 }
 0x56e   : > { %v3053_v4 = vmul.f32 %v3049_v3, %v4490_v6 }
 0x570   : > { %v3055_v63 = vsub.f32 %v3045_v55, %v3053_v4 }
 0x572   : > { %v3057_v5 = vmul.f32 %v3055_v63, %v3055_v63 }
 0x574   : > { %v3059_v59 = vsel %vm864_vm1, %v3057_v5, 0.0 }
 0x575   : > { %3060 = vadd.xlane.f32.xlu0 %v3059_v59  ;;  %v3052_v8 = vpop.xlane.xlu2 %3051 }
 0x576   : > { %v3054_v9 = vmul.f32 %v3052_v8, %v4490_v6 }
 0x578   : > { %v3056_v10 = vsub.f32 %v3046_v1, %v3054_v9 }
 0x57a   : > { %v3058_v11 = vmul.f32 %v3056_v10, %v3056_v10 }
 0x57c   : > { %v3062_v12 = vsel %vm864_vm1, %v3058_v11, 0.0 }
 0x57d   : > { %3063 = vadd.xlane.f32.xlu1 %v3062_v12 }
 0x5e8   : > { %v3061_v60 = vpop.xlane.xlu0 %3060 }
 0x5e9   : > { %v3065_v13 = vmul.f32 %v3061_v60, %v4490_v6 }
 0x5eb   : > { %v3067_v14 = vadd.f32 1e-05, %v3065_v13 }
 0x5ed   : > { %4220 = vrsqrt.f32 %v3067_v14  ;;  %vm3075_vm12 = vweird.f32 %v3067_v14 }
 0x5f0   : > { %v3064_v15 = vpop.xlane.xlu1 %3063 }
 0x5f1   : > { %v3066_v16 = vmul.f32 %v3064_v15, %v4490_v6 }
 0x5f3   : > { %v4221_v17 = vpop.eup %4220  ;;  %v3068_v18 = vadd.f32 1e-05, %v3066_v16 }
 0x5f4   : > { %v3070_v19 = vmul.f32 %v4221_v17, %v3067_v14  ;;  %vm3076_vm11 = vweird.f32 %v4221_v17 }
 0x5f5   : > { %4222 = vrsqrt.f32 %v3068_v18  ;;  %vm3077_vm13 = vmor %vm3075_vm12, %vm3076_vm11  ;;  %vm3085_vm15 = vweird.f32 %v3068_v18 }
 0x5f6   : > { %v3071_v20 = vmul.f32 %v4221_v17, %v3070_v19 }
 0x5f8   : > { %v3072_v21 = vmul.f32 0.5, %v3071_v20 }
 0x5fa   : > { %v3073_v22 = vsub.f32 1.5, %v3072_v21 }
 0x5fb   : > { %v4223_v23 = vpop.eup %4222 }
 0x5fc   : > { %v3074_v24 = vmul.f32 %v4221_v17, %v3073_v22  ;;  %v3080_v25 = vmul.f32 %v4223_v23, %v3068_v18  ;;  %vm3086_vm14 = vweird.f32 %v4223_v23 }
 0x5fd   : > { %vm3087_vm0 = vmor %vm3085_vm15, %vm3086_vm14 }
 0x5fe   : > { %v3078_v6 = vsel %vm3077_vm13, %v4221_v17, %v3074_v24  ;;  %v3081_v27 = vmul.f32 %v4223_v23, %v3080_v25 }
 0x5ff   : > { %v3089_v29 = vmul.f32 %v3078_v6, %v3055_v63 }
 0x600   : > { %v3082_v30 = vmul.f32 0.5, %v3081_v27 }
 0x601   : > { %v3095_v31 = vmul.f32 %v4200_v26, %v3089_v29 }
 0x602   : > { %v3083_v32 = vsub.f32 1.5, %v3082_v30 }
 0x603   : > { %v3101_v33 = vadd.f32 %v4201_v28, %v3095_v31 }
 0x604   : > { %v3084_v7 = vmul.f32 %v4223_v23, %v3083_v32 }
 0x605   : > { %3103 = vst.msk [vmem:[%s4864_s30] sm:$0xff] %vm864_vm1, %v3101_v33 }
 0x606   : > { %v3088_v35 = vsel %vm3087_vm0, %v4223_v23, %v3084_v7 }
 0x607   : > { %v3090_v36 = vmul.f32 %v3088_v35, %v3056_v10 }
 0x609   : > { %v3096_v37 = vmul.f32 %v4200_v26, %v3090_v36 }
 0x60b   : > { %v3102_v38 = vadd.f32 %v4201_v28, %v3096_v37 }
 0x60d   : > { %3104 = vst.msk [vmem:[%s4864_s30 + $0x8] sm:$0xff] %vm864_vm1, %v3102_v38 }
 0x60e PF: > { %s4878_s24 = sld [smem:[#allocation3_spill]] }
 0x614   : > { %s29_s0 = sadd.s32 1, %s4878_s24  }
 0x615   : > { %p26_p5 = scmp.ge.s32.totalorder %s29_s0, 6  }
 0x617   :  { %28 = sbr.rel (!%p26_p5) target bundleno = 17 (0x11), region = 171 }

// kernel: mol_ddi_forward.5
= control target key start
LH: loop header
LB: loop body
LE: loop exit
PB: predicated region body
PF: predicated region fallthrough
CT: control target
= control target key end

     0   :  { %s11501_s0 = inlined_call_operand.vmem [shape: f32[2,512], index: 0, kind: input, shape index: {}]   ;;  %s11502_s1 = inlined_call_operand.vmem [shape: f32[2,512], index: 1, kind: input, shape index: {}]   ;;  %s11503_s2 = inlined_call_operand.vmem [shape: f32[2,8,32], index: 2, kind: input, shape index: {}]   ;;  %s11504_s3 = inlined_call_operand.vmem [shape: f32[2,16,32], index: 3, kind: input, shape index: {}]   ;;  %s11505_s4 = inlined_call_operand.vmem [shape: bf16[512,512], index: 4, kind: input, shape index: {}]   ;;  %s11506_s5 = inlined_call_operand.vmem [shape: bf16[512,512], index: 5, kind: input, shape index: {}]   ;;  %s11507_s6 = inlined_call_operand.vmem [shape: bf16[32,512], index: 6, kind: input, shape index: {}]   ;;  %s11508_s7 = inlined_call_operand.vmem [shape: bf16[32,512], index: 7, kind: input, shape index: {}]   ;;  %s11509_s8 = inlined_call_operand.vmem [shape: f32[1,512], index: 8, kind: input, shape index: {}]   ;;  %s11510_s9 = inlined_call_operand.vmem [shape: bf16[512,512], index: 9, kind: input, shape index: {}]   ;;  %s11511_s10 = inlined_call_operand.vmem [shape: bf16[512,512], index: 10, kind: input, shape index: {}]   ;;  %s11512_s11 = inlined_call_operand.vmem [shape: bf16[32,512], index: 11, kind: input, shape index: {}]   ;;  %s11513_s12 = inlined_call_operand.vmem [shape: bf16[32,512], index: 12, kind: input, shape index: {}]   ;;  %s11514_s13 = inlined_call_operand.vmem [shape: f32[1,512], index: 13, kind: input, shape index: {}]   ;;  %s11515_s14 = inlined_call_operand.vmem [shape: bf16[512,5], index: 14, kind: input, shape index: {}]   ;;  %s11516_s15 = inlined_call_operand.vmem [shape: f32[1,5], index: 15, kind: input, shape index: {}]   ;;  %s11517_s16 = inlined_call_operand.hbm [shape: f32[2,5], index: 16, kind: output, shape index: {}]  }
   0x1   :  { %11518 = sst [smem:[#allocation5_spill]] %s11501_s0 }
   0x2   :  { %v4969_v0 = vld [vmem:[%s11506_s5 + $0xe0] sm:$0xf]  ;;  %v7333_v1 = vld [vmem:[%s11506_s5 + $0xec] sm:$0xf0]  ;;  %s11519_s21 = sld [smem:[#allocation5_spill]] }
   0x3   :  { %v5097_v2 = vld [vmem:[%s11506_s5 + $0x1e0] sm:$0xf]  ;;  %v4970_v3 = vor.u32 %v7333_v1, %v4969_v0  ;;  %v7365_v4 = vld [vmem:[%s11506_s5 + $0x1ec] sm:$0xf0] }
   0x4   :  { %v5225_v5 = vld [vmem:[%s11506_s5 + $0x2e0] sm:$0xf]  ;;  %v7397_v6 = vld [vmem:[%s11506_s5 + $0x2ec] sm:$0xf0]  ;;  %v5098_v7 = vor.u32 %v7365_v4, %v5097_v2 }
   0x5   :  { %v5226_v8 = vor.u32 %v7397_v6, %v5225_v5  ;;  %v5353_v9 = vld [vmem:[%s11506_s5 + $0x3e0] sm:$0xf]  ;;  %v7429_v10 = vld [vmem:[%s11506_s5 + $0x3ec] sm:$0xf0]  ;;  %1042 = vmatpush.bf16.msra.mxu0 %v4970_v3 }
   0x6   :  { %v4953_v11 = vld [vmem:[%s11506_s5 + $0xc0] sm:$0xf]  ;;  %v5354_v12 = vor.u32 %v7429_v10, %v5353_v9  ;;  %v7329_v13 = vld [vmem:[%s11506_s5 + $0xcc] sm:$0xf0]  ;;  %1055 = vmatpush.bf16.msra.mxu1 %v5098_v7 }
   0x7   :  { %v5081_v14 = vld [vmem:[%s11506_s5 + $0x1c0] sm:$0xf]  ;;  %v7361_v15 = vld [vmem:[%s11506_s5 + $0x1cc] sm:$0xf0]  ;;  %1068 = vmatpush.bf16.msra.mxu2 %v5226_v8  ;;  %v4954_v16 = vor.u32 %v7329_v13, %v4953_v11 }
   0x8   :  { %v5082_v17 = vor.u32 %v7361_v15, %v5081_v14  ;;  %v5209_v18 = vld [vmem:[%s11506_s5 + $0x2c0] sm:$0xf]  ;;  %v7393_v19 = vld [vmem:[%s11506_s5 + $0x2cc] sm:$0xf0]  ;;  %1081 = vmatpush.bf16.msra.mxu3 %v5354_v12 }
   0x9   :  { %v5337_v20 = vld [vmem:[%s11506_s5 + $0x3c0] sm:$0xf]  ;;  %v5210_v21 = vor.u32 %v7393_v19, %v5209_v18  ;;  %v7425_v22 = vld [vmem:[%s11506_s5 + $0x3cc] sm:$0xf0]  ;;  %1043 = vmatpush.bf16.msra.mxu0 %v4954_v16 }
   0xa   :  { %v4937_v23 = vld [vmem:[%s11506_s5 + $0xa0] sm:$0xf]  ;;  %v7325_v24 = vld [vmem:[%s11506_s5 + $0xac] sm:$0xf0]  ;;  %v5338_v25 = vor.u32 %v7425_v22, %v5337_v20  ;;  %1056 = vmatpush.bf16.msra.mxu1 %v5082_v17 }
   0xb   :  { %v5065_v26 = vld [vmem:[%s11506_s5 + $0x1a0] sm:$0xf]  ;;  %v7357_v27 = vld [vmem:[%s11506_s5 + $0x1ac] sm:$0xf0]  ;;  %v4938_v29 = vor.u32 %v7325_v24, %v4937_v23  ;;  %1069 = vmatpush.bf16.msra.mxu2 %v5210_v21 }
   0xc   :  { %v5193_v28 = vld [vmem:[%s11506_s5 + $0x2a0] sm:$0xf]  ;;  %v7389_v30 = vld [vmem:[%s11506_s5 + $0x2ac] sm:$0xf0]  ;;  %v5066_v33 = vor.u32 %v7357_v27, %v5065_v26  ;;  %1082 = vmatpush.bf16.msra.mxu3 %v5338_v25 }
   0xd   :  { %v5321_v31 = vld [vmem:[%s11506_s5 + $0x3a0] sm:$0xf]  ;;  %v7421_v32 = vld [vmem:[%s11506_s5 + $0x3ac] sm:$0xf0]  ;;  %v5194_v34 = vor.u32 %v7389_v30, %v5193_v28  ;;  %1044 = vmatpush.bf16.msra.mxu0 %v4938_v29  ;;  %v7331_v28 = vld [vmem:[%s11506_s5 + $0xe4] sm:$0xf] }
   0xe   :  { %v4921_v35 = vld [vmem:[%s11506_s5 + $0x80] sm:$0xf]  ;;  %v7321_v36 = vld [vmem:[%s11506_s5 + $0x8c] sm:$0xf0]  ;;  %v5322_v38 = vor.u32 %v7421_v32, %v5321_v31  ;;  %1057 = vmatpush.bf16.msra.mxu1 %v5066_v33  ;;  %v4971_v29 = vld [vmem:[%s11506_s5 + $0xf0] sm:$0xf0] }
   0xf   :  { %v5049_v37 = vld [vmem:[%s11506_s5 + $0x180] sm:$0xf]  ;;  %v7353_v39 = vld [vmem:[%s11506_s5 + $0x18c] sm:$0xf0]  ;;  %v4922_v44 = vor.u32 %v7321_v36, %v4921_v35  ;;  %1070 = vmatpush.bf16.msra.mxu2 %v5194_v34  ;;  %v7363_v30 = vld [vmem:[%s11506_s5 + $0x1e4] sm:$0xf] }
  0x10   :  { %v5177_v40 = vld [vmem:[%s11506_s5 + $0x280] sm:$0xf]  ;;  %v7385_v41 = vld [vmem:[%s11506_s5 + $0x28c] sm:$0xf0]  ;;  %v5050_v45 = vor.u32 %v7353_v39, %v5049_v37  ;;  %1083 = vmatpush.bf16.msra.mxu3 %v5322_v38  ;;  %v5099_v32 = vld [vmem:[%s11506_s5 + $0x1f0] sm:$0xf0] }
  0x11   :  { %v5305_v42 = vld [vmem:[%s11506_s5 + $0x380] sm:$0xf]  ;;  %v7417_v43 = vld [vmem:[%s11506_s5 + $0x38c] sm:$0xf0]  ;;  %v5178_v46 = vor.u32 %v7385_v41, %v5177_v40  ;;  %1045 = vmatpush.bf16.msra.mxu0 %v4922_v44  ;;  %v7395_v33 = vld [vmem:[%s11506_s5 + $0x2e4] sm:$0xf]  ;;  %v4974_v40 = vor.u32 %v7331_v28, %v4971_v29  ;;  %v5102_v41 = vor.u32 %v7363_v30, %v5099_v32 }
  0x12   :  { %v4905_v47 = vld [vmem:[%s11506_s5 + $0x60] sm:$0xf]  ;;  %v7317_v48 = vld [vmem:[%s11506_s5 + $0x6c] sm:$0xf0]  ;;  %v5306_v50 = vor.u32 %v7417_v43, %v5305_v42  ;;  %1058 = vmatpush.bf16.msra.mxu1 %v5050_v45  ;;  %v5227_v34 = vld [vmem:[%s11506_s5 + $0x2f0] sm:$0xf0] }
  0x13   :  { %v5033_v49 = vld [vmem:[%s11506_s5 + $0x160] sm:$0xf]  ;;  %v7349_v51 = vld [vmem:[%s11506_s5 + $0x16c] sm:$0xf0]  ;;  %v4906_v56 = vor.u32 %v7317_v48, %v4905_v47  ;;  %1071 = vmatpush.bf16.msra.mxu2 %v5178_v46  ;;  %v7427_v37 = vld [vmem:[%s11506_s5 + $0x3e4] sm:$0xf]  ;;  %v5230_v42 = vor.u32 %v7395_v33, %v5227_v34 }
  0x14   :  { %v5161_v52 = vld [vmem:[%s11506_s5 + $0x260] sm:$0xf]  ;;  %v7381_v53 = vld [vmem:[%s11506_s5 + $0x26c] sm:$0xf0]  ;;  %v5034_v57 = vor.u32 %v7349_v51, %v5033_v49  ;;  %1084 = vmatpush.bf16.msra.mxu3 %v5306_v50  ;;  %v5355_v38 = vld [vmem:[%s11506_s5 + $0x3f0] sm:$0xf0] }
  0x15   :  { %v5289_v54 = vld [vmem:[%s11506_s5 + $0x360] sm:$0xf]  ;;  %v7413_v55 = vld [vmem:[%s11506_s5 + $0x36c] sm:$0xf0]  ;;  %v5162_v58 = vor.u32 %v7381_v53, %v5161_v52  ;;  %1046 = vmatpush.bf16.msra.mxu0 %v4906_v56  ;;  %v7327_v43 = vld [vmem:[%s11506_s5 + $0xc4] sm:$0xf]  ;;  %v5358_v46 = vor.u32 %v7427_v37, %v5355_v38 }
  0x16   :  { %v4889_v59 = vld [vmem:[%s11506_s5 + $0x40] sm:$0xf]  ;;  %v7313_v60 = vld [vmem:[%s11506_s5 + $0x4c] sm:$0xf0]  ;;  %v5290_v62 = vor.u32 %v7413_v55, %v5289_v54  ;;  %1059 = vmatpush.bf16.msra.mxu1 %v5034_v57  ;;  %v4955_v44 = vld [vmem:[%s11506_s5 + $0xd0] sm:$0xf0] }
  0x17   :  { %v5017_v61 = vld [vmem:[%s11506_s5 + $0x140] sm:$0xf]  ;;  %v7345_v63 = vld [vmem:[%s11506_s5 + $0x14c] sm:$0xf0]  ;;  %v4890_v4 = vor.u32 %v7313_v60, %v4889_v59  ;;  %1072 = vmatpush.bf16.msra.mxu2 %v5162_v58  ;;  %v7359_v45 = vld [vmem:[%s11506_s5 + $0x1c4] sm:$0xf]  ;;  %v4958_v52 = vor.u32 %v7327_v43, %v4955_v44 }
  0x18   :  { %v5145_v0 = vld [vmem:[%s11506_s5 + $0x240] sm:$0xf]  ;;  %v7377_v1 = vld [vmem:[%s11506_s5 + $0x24c] sm:$0xf0]  ;;  %v5018_v5 = vor.u32 %v7345_v63, %v5017_v61  ;;  %1085 = vmatpush.bf16.msra.mxu3 %v5290_v62  ;;  %v5083_v47 = vld [vmem:[%s11506_s5 + $0x1d0] sm:$0xf0] }
  0x19   :  { %v5273_v2 = vld [vmem:[%s11506_s5 + $0x340] sm:$0xf]  ;;  %v7409_v3 = vld [vmem:[%s11506_s5 + $0x34c] sm:$0xf0]  ;;  %v5146_v6 = vor.u32 %v7377_v1, %v5145_v0  ;;  %1047 = vmatpush.bf16.msra.mxu0 %v4890_v4  ;;  %v7391_v48 = vld [vmem:[%s11506_s5 + $0x2c4] sm:$0xf]  ;;  %v5086_v53 = vor.u32 %v7359_v45, %v5083_v47 }
  0x1a   :  { %v4873_v7 = vld [vmem:[%s11506_s5 + $0x20] sm:$0xf]  ;;  %v7309_v8 = vld [vmem:[%s11506_s5 + $0x2c] sm:$0xf0]  ;;  %v5274_v10 = vor.u32 %v7409_v3, %v5273_v2  ;;  %1060 = vmatpush.bf16.msra.mxu1 %v5018_v5  ;;  %v5211_v49 = vld [vmem:[%s11506_s5 + $0x2d0] sm:$0xf0] }
  0x1b   :  { %v5001_v9 = vld [vmem:[%s11506_s5 + $0x120] sm:$0xf]  ;;  %v7341_v11 = vld [vmem:[%s11506_s5 + $0x12c] sm:$0xf0]  ;;  %v4874_v16 = vor.u32 %v7309_v8, %v4873_v7  ;;  %1073 = vmatpush.bf16.msra.mxu2 %v5146_v6  ;;  %v7423_v50 = vld [vmem:[%s11506_s5 + $0x3c4] sm:$0xf]  ;;  %v5214_v54 = vor.u32 %v7391_v48, %v5211_v49 }
  0x1c   :  { %v5129_v12 = vld [vmem:[%s11506_s5 + $0x220] sm:$0xf]  ;;  %v7373_v13 = vld [vmem:[%s11506_s5 + $0x22c] sm:$0xf0]  ;;  %v5002_v19 = vor.u32 %v7341_v11, %v5001_v9  ;;  %1086 = vmatpush.bf16.msra.mxu3 %v5274_v10  ;;  %v5339_v51 = vld [vmem:[%s11506_s5 + $0x3d0] sm:$0xf0] }
  0x1d   :  { %v5257_v14 = vld [vmem:[%s11506_s5 + $0x320] sm:$0xf]  ;;  %v7405_v15 = vld [vmem:[%s11506_s5 + $0x32c] sm:$0xf0]  ;;  %v5130_v20 = vor.u32 %v7373_v13, %v5129_v12  ;;  %1048 = vmatpush.bf16.msra.mxu0 %v4874_v16  ;;  %v7323_v55 = vld [vmem:[%s11506_s5 + $0xa4] sm:$0xf]  ;;  %v5342_v58 = vor.u32 %v7423_v50, %v5339_v51 }
  0x1e   :  { %v4857_v17 = vld [vmem:[%s11506_s5] sm:$0xf]  ;;  %v7305_v18 = vld [vmem:[%s11506_s5 + $0xc] sm:$0xf0]  ;;  %v5258_v24 = vor.u32 %v7405_v15, %v5257_v14  ;;  %1061 = vmatpush.bf16.msra.mxu1 %v5002_v19  ;;  %v4939_v56 = vld [vmem:[%s11506_s5 + $0xb0] sm:$0xf0] }
  0x1f   :  { %v4985_v21 = vld [vmem:[%s11506_s5 + $0x100] sm:$0xf]  ;;  %v7337_v22 = vld [vmem:[%s11506_s5 + $0x10c] sm:$0xf0]  ;;  %v4858_v31 = vor.u32 %v7305_v18, %v4857_v17  ;;  %1074 = vmatpush.bf16.msra.mxu2 %v5130_v20  ;;  %v7355_v57 = vld [vmem:[%s11506_s5 + $0x1a4] sm:$0xf]  ;;  %v4942_v0 = vor.u32 %v7323_v55, %v4939_v56 }
  0x20   :  { %v5113_v23 = vld [vmem:[%s11506_s5 + $0x200] sm:$0xf]  ;;  %v7369_v25 = vld [vmem:[%s11506_s5 + $0x20c] sm:$0xf0]  ;;  %v4986_v35 = vor.u32 %v7337_v22, %v4985_v21  ;;  %1087 = vmatpush.bf16.msra.mxu3 %v5258_v24  ;;  %v5067_v59 = vld [vmem:[%s11506_s5 + $0x1b0] sm:$0xf0] }
  0x21   :  { %v5241_v26 = vld [vmem:[%s11506_s5 + $0x300] sm:$0xf]  ;;  %v7401_v27 = vld [vmem:[%s11506_s5 + $0x30c] sm:$0xf0]  ;;  %v5114_v36 = vor.u32 %v7369_v25, %v5113_v23  ;;  %1049 = vmatpush.bf16.msra.mxu0 %v4858_v31  ;;  %v7387_v60 = vld [vmem:[%s11506_s5 + $0x2a4] sm:$0xf]  ;;  %v5070_v3 = vor.u32 %v7355_v57, %v5067_v59 }
  0x22   :  { %v5242_v39 = vor.u32 %v7401_v27, %v5241_v26  ;;  %1062 = vmatpush.bf16.msra.mxu1 %v4986_v35  ;;  %v5195_v61 = vld [vmem:[%s11506_s5 + $0x2b0] sm:$0xf0]  ;;  %v7419_v62 = vld [vmem:[%s11506_s5 + $0x3a4] sm:$0xf] }
  0x23   :  { %1075 = vmatpush.bf16.msra.mxu2 %v5114_v36  ;;  %v5323_v63 = vld [vmem:[%s11506_s5 + $0x3b0] sm:$0xf0]  ;;  %v7319_v1 = vld [vmem:[%s11506_s5 + $0x84] sm:$0xf]  ;;  %v5198_v4 = vor.u32 %v7387_v60, %v5195_v61 }
  0x24   :  { %1088 = vmatpush.bf16.msra.mxu3 %v5242_v39  ;;  %v116_v2 = vld [vmem:[%s11519_s21] sm:$0xff]  ;;  %v4923_v5 = vld [vmem:[%s11506_s5 + $0x90] sm:$0xf0]  ;;  %v5326_v7 = vor.u32 %v7419_v62, %v5323_v63 }
  0x25   :  { %1094 = vmatpush.bf16.msrb.mxu0 %v4974_v40  ;;  %v7351_v6 = vld [vmem:[%s11506_s5 + $0x184] sm:$0xf]  ;;  %118 = vst [vmem:[#allocation1] ss:$4 sm:$0xff] %v116_v2  ;;  %v5051_v8 = vld [vmem:[%s11506_s5 + $0x190] sm:$0xf0]  ;;  %v4926_v13 = vor.u32 %v7319_v1, %v4923_v5 }
  0x26   :  { %1107 = vmatpush.bf16.msrb.mxu1 %v5102_v41  ;;  %v7383_v9 = vld [vmem:[%s11506_s5 + $0x284] sm:$0xf]  ;;  %v5179_v10 = vld [vmem:[%s11506_s5 + $0x290] sm:$0xf0]  ;;  %v5054_v16 = vor.u32 %v7351_v6, %v5051_v8 }
  0x27   :  { %1120 = vmatpush.bf16.msrb.mxu2 %v5230_v42  ;;  %v7415_v11 = vld [vmem:[%s11506_s5 + $0x384] sm:$0xf]  ;;  %v5307_v12 = vld [vmem:[%s11506_s5 + $0x390] sm:$0xf0]  ;;  %v5182_v17 = vor.u32 %v7383_v9, %v5179_v10  ;;  %v4977_v10 = vld [vmem:[%s11506_s5 + $0xe8] sm:$0xf] }
  0x28   :  { %1133 = vmatpush.bf16.msrb.mxu3 %v5358_v46  ;;  %v7315_v14 = vld [vmem:[%s11506_s5 + $0x64] sm:$0xf]  ;;  %v4907_v15 = vld [vmem:[%s11506_s5 + $0x70] sm:$0xf0]  ;;  %v5310_v21 = vor.u32 %v7415_v11, %v5307_v12  ;;  %v7334_v11 = vld [vmem:[%s11506_s5 + $0xf4] sm:$0xf0] }
  0x29   :  { %1095 = vmatpush.bf16.msrb.mxu0 %v4958_v52  ;;  %v7347_v18 = vld [vmem:[%s11506_s5 + $0x164] sm:$0xf]  ;;  %v5035_v19 = vld [vmem:[%s11506_s5 + $0x170] sm:$0xf0]  ;;  %v4910_v28 = vor.u32 %v7315_v14, %v4907_v15  ;;  %v5105_v12 = vld [vmem:[%s11506_s5 + $0x1e8] sm:$0xf] }
  0x2a   :  { %1108 = vmatpush.bf16.msrb.mxu1 %v5086_v53  ;;  %v7379_v20 = vld [vmem:[%s11506_s5 + $0x264] sm:$0xf]  ;;  %v5163_v22 = vld [vmem:[%s11506_s5 + $0x270] sm:$0xf0]  ;;  %v5038_v33 = vor.u32 %v7347_v18, %v5035_v19  ;;  %v5233_v14 = vld [vmem:[%s11506_s5 + $0x2e8] sm:$0xf] }
  0x2b   :  { %1121 = vmatpush.bf16.msrb.mxu2 %v5214_v54  ;;  %v7411_v23 = vld [vmem:[%s11506_s5 + $0x364] sm:$0xf]  ;;  %v5291_v24 = vld [vmem:[%s11506_s5 + $0x370] sm:$0xf0]  ;;  %v5166_v34 = vor.u32 %v7379_v20, %v5163_v22  ;;  %v5361_v18 = vld [vmem:[%s11506_s5 + $0x3e8] sm:$0xf]  ;;  %v4978_v22 = vor.u32 %v7334_v11, %v4977_v10 }
  0x2c   :  { %1134 = vmatpush.bf16.msrb.mxu3 %v5342_v58  ;;  %v7311_v25 = vld [vmem:[%s11506_s5 + $0x44] sm:$0xf]  ;;  %v4891_v26 = vld [vmem:[%s11506_s5 + $0x50] sm:$0xf0]  ;;  %v5294_v37 = vor.u32 %v7411_v23, %v5291_v24  ;;  %v7430_v19 = vld [vmem:[%s11506_s5 + $0x3f4] sm:$0xf0] }
  0x2d   :  { %1096 = vmatpush.bf16.msrb.mxu0 %v4942_v0  ;;  %v131_v27 = vld [vmem:[%s11502_s1] sm:$0xff]  ;;  %v5019_v30 = vld [vmem:[%s11506_s5 + $0x150] sm:$0xf0]  ;;  %v8205_v32 = vld.sshfl [vmem:[#allocation1 + $0x8] sm:$0xff pattern:$0x73625140]  ;;  %v4894_v42 = vor.u32 %v7311_v25, %v4891_v26 }
  0x2e   :  { %1109 = vmatpush.bf16.msrb.mxu1 %v5070_v3  ;;  %v7343_v29 = vld [vmem:[%s11506_s5 + $0x144] sm:$0xf]  ;;  %v8207_v35 = vld.sshfl [vmem:[#allocation1 + $0x10] sm:$0xff pattern:$0x73625140] }
  0x2f   :  { %1122 = vmatpush.bf16.msrb.mxu2 %v5198_v4  ;;  %v8203_v31 = vld.sshfl [vmem:[#allocation1] sm:$0xff pattern:$0x73625140]  ;;  %v8209_v36 = vld.sshfl [vmem:[#allocation1 + $0x18] sm:$0xff pattern:$0x73625140]  ;;  %v5022_v43 = vor.u32 %v7343_v29, %v5019_v30 }
  0x30   :  { %1135 = vmatpush.bf16.msrb.mxu3 %v5326_v7  ;;  %v7375_v38 = vld [vmem:[%s11506_s5 + $0x244] sm:$0xf]  ;;  %v5147_v39 = vld [vmem:[%s11506_s5 + $0x250] sm:$0xf0]  ;;  %133 = vst [vmem:[#allocation1] ss:$4 sm:$0xff] %v131_v27  ;;  %v5362_v27 = vor.u32 %v7430_v19, %v5361_v18 }
  0x31   :  { %1097 = vmatpush.bf16.msrb.mxu0 %v4926_v13  ;;  %v7407_v40 = vld [vmem:[%s11506_s5 + $0x344] sm:$0xf]  ;;  %v5275_v41 = vld [vmem:[%s11506_s5 + $0x350] sm:$0xf0]  ;;  %v5150_v44 = vor.u32 %v7375_v38, %v5147_v39  ;;  %v7366_v13 = vld [vmem:[%s11506_s5 + $0x1f4] sm:$0xf0] }
  0x32   :  { %1110 = vmatpush.bf16.msrb.mxu1 %v5054_v16  ;;  %v7307_v45 = vld [vmem:[%s11506_s5 + $0x24] sm:$0xf]  ;;  %v4875_v46 = vld [vmem:[%s11506_s5 + $0x30] sm:$0xf0]  ;;  %v5278_v47 = vor.u32 %v7407_v40, %v5275_v41  ;;  %v5106_v23 = vor.u32 %v7366_v13, %v5105_v12  ;;  %v4961_v24 = vld [vmem:[%s11506_s5 + $0xc8] sm:$0xf] }
  0x33   :  { %1123 = vmatpush.bf16.msrb.mxu2 %v5182_v17  ;;  %v7339_v48 = vld [vmem:[%s11506_s5 + $0x124] sm:$0xf]  ;;  %v5003_v49 = vld [vmem:[%s11506_s5 + $0x130] sm:$0xf0]  ;;  %v4878_v60 = vor.u32 %v7307_v45, %v4875_v46  ;;  %v7398_v17 = vld [vmem:[%s11506_s5 + $0x2f4] sm:$0xf0] }
  0x34   :  { %1136 = vmatpush.bf16.msrb.mxu3 %v5310_v21  ;;  %v7371_v50 = vld [vmem:[%s11506_s5 + $0x224] sm:$0xf]  ;;  %v5131_v51 = vld [vmem:[%s11506_s5 + $0x230] sm:$0xf0]  ;;  %v5006_v61 = vor.u32 %v7339_v48, %v5003_v49  ;;  %v7330_v25 = vld [vmem:[%s11506_s5 + $0xd4] sm:$0xf0]  ;;  %v5234_v26 = vor.u32 %v7398_v17, %v5233_v14 }
  0x35   :  { %1098 = vmatpush.bf16.msrb.mxu0 %v4910_v28  ;;  %v7403_v52 = vld [vmem:[%s11506_s5 + $0x324] sm:$0xf]  ;;  %v5259_v53 = vld [vmem:[%s11506_s5 + $0x330] sm:$0xf0]  ;;  %v5134_v3 = vor.u32 %v7371_v50, %v5131_v51  ;;  %v5089_v28 = vld [vmem:[%s11506_s5 + $0x1c8] sm:$0xf]  ;;  %v4962_v38 = vor.u32 %v7330_v25, %v4961_v24 }
  0x36   :  { %1111 = vmatpush.bf16.msrb.mxu1 %v5038_v33  ;;  %v7303_v54 = vld [vmem:[%s11506_s5 + $0x4] sm:$0xf]  ;;  %v4859_v55 = vld [vmem:[%s11506_s5 + $0x10] sm:$0xf0]  ;;  %v5262_v4 = vor.u32 %v7403_v52, %v5259_v53  ;;  %v7362_v29 = vld [vmem:[%s11506_s5 + $0x1d4] sm:$0xf0] }
  0x37   :  { %1124 = vmatpush.bf16.msrb.mxu2 %v5166_v34  ;;  %v7335_v56 = vld [vmem:[%s11506_s5 + $0x104] sm:$0xf]  ;;  %v4987_v57 = vld [vmem:[%s11506_s5 + $0x110] sm:$0xf0]  ;;  %v4862_v15 = vor.u32 %v7303_v54, %v4859_v55  ;;  %v5217_v30 = vld [vmem:[%s11506_s5 + $0x2c8] sm:$0xf]  ;;  %v5090_v39 = vor.u32 %v7362_v29, %v5089_v28 }
  0x38   :  { %1137 = vmatpush.bf16.msrb.mxu3 %v5294_v37  ;;  %v136_v58 = vld.sshfl [vmem:[#allocation1 + $0x10] sm:$0xff pattern:$0x73625140]  ;;  %v137_v59 = vld.sshfl [vmem:[#allocation1 + $0x18] sm:$0xff pattern:$0x73625140]  ;;  %v4990_v16 = vor.u32 %v7335_v56, %v4987_v57 }
  0x39   :  { %1099 = vmatpush.bf16.msrb.mxu0 %v4894_v42  ;;  %v7367_v62 = vld [vmem:[%s11506_s5 + $0x204] sm:$0xf]  ;;  %v5115_v63 = vld [vmem:[%s11506_s5 + $0x210] sm:$0xf0]  ;;  %v8268_v1 = vpack.c.bf16 %v136_v58, %v136_v58  ;;  %v8270_v2 = vpack.c.bf16 %v137_v59, %v137_v59  ;;  %v7394_v33 = vld [vmem:[%s11506_s5 + $0x2d4] sm:$0xf0] }
  0x3a   :  { %1112 = vmatpush.bf16.msrb.mxu1 %v5022_v43  ;;  %v7399_v0 = vld [vmem:[%s11506_s5 + $0x304] sm:$0xf]  ;;  %v135_v6 = vld.sshfl [vmem:[#allocation1 + $0x8] sm:$0xff pattern:$0x73625140]  ;;  %v5118_v20 = vor.u32 %v7367_v62, %v5115_v63  ;;  %v5218_v42 = vor.u32 %v7394_v33, %v5217_v30 }
  0x3b   :  { %1125 = vmatpush.bf16.msrb.mxu2 %v5150_v44  ;;  %v134_v5 = vld.sshfl [vmem:[#allocation1] sm:$0xff pattern:$0x73625140]  ;;  %v5243_v7 = vld [vmem:[%s11506_s5 + $0x310] sm:$0xf0]  ;;  %v8277_v9 = vpack.c.bf16 %v135_v6, %v135_v6  ;;  %1089 = vmatmul.bf16.vlgmr.msra.gmra.mxu3 %v8270_v2 }
  0x3c   :  { %1138 = vmatpush.bf16.msrb.mxu3 %v5278_v47  ;;  %v8275_v8 = vpack.c.bf16 %v134_v5, %v134_v5  ;;  %1076 = vmatmul.bf16.vlgmr.msra.gmra.mxu2 %v8268_v1  ;;  %v5246_v21 = vor.u32 %v7399_v0, %v5243_v7  ;;  %v5345_v34 = vld [vmem:[%s11506_s5 + $0x3c8] sm:$0xf]  ;;  %v7426_v37 = vld [vmem:[%s11506_s5 + $0x3d4] sm:$0xf0] }
  0x3d   :  { %1100 = vmatpush.bf16.msrb.mxu0 %v4878_v60  ;;  %1063 = vmatmul.bf16.vlgmr.msra.gmra.mxu1 %v8277_v9  ;;  %v4945_v40 = vld [vmem:[%s11506_s5 + $0xa8] sm:$0xf]  ;;  %v7326_v41 = vld [vmem:[%s11506_s5 + $0xb4] sm:$0xf0]  ;;  %v5346_v43 = vor.u32 %v7426_v37, %v5345_v34 }
  0x3e   :  { %1113 = vmatpush.bf16.msrb.mxu1 %v5006_v61  ;;  %1050 = vmatmul.bf16.vlgmr.msra.gmra.mxu0 %v8275_v8  ;;  %v5073_v44 = vld [vmem:[%s11506_s5 + $0x1a8] sm:$0xf]  ;;  %v7358_v45 = vld [vmem:[%s11506_s5 + $0x1b4] sm:$0xf0]  ;;  %v4946_v50 = vor.u32 %v7326_v41, %v4945_v40 }
  0x3f   :  { %1126 = vmatpush.bf16.msrb.mxu2 %v5134_v3  ;;  %v5201_v46 = vld [vmem:[%s11506_s5 + $0x2a8] sm:$0xf]  ;;  %v7390_v47 = vld [vmem:[%s11506_s5 + $0x2b4] sm:$0xf0]  ;;  %v5074_v51 = vor.u32 %v7358_v45, %v5073_v44 }
  0x40   :  { %1139 = vmatpush.bf16.msrb.mxu3 %v5262_v4  ;;  %v5329_v48 = vld [vmem:[%s11506_s5 + $0x3a8] sm:$0xf]  ;;  %v7422_v49 = vld [vmem:[%s11506_s5 + $0x3b4] sm:$0xf0]  ;;  %v5202_v54 = vor.u32 %v7390_v47, %v5201_v46 }
  0x41   :  { %1101 = vmatpush.bf16.msrb.mxu0 %v4862_v15  ;;  %v4929_v52 = vld [vmem:[%s11506_s5 + $0x88] sm:$0xf]  ;;  %v7322_v53 = vld [vmem:[%s11506_s5 + $0x94] sm:$0xf0]  ;;  %v5330_v55 = vor.u32 %v7422_v49, %v5329_v48 }
  0x42   :  { %1114 = vmatpush.bf16.msrb.mxu1 %v4990_v16  ;;  %v5057_v56 = vld [vmem:[%s11506_s5 + $0x188] sm:$0xf]  ;;  %v7354_v57 = vld [vmem:[%s11506_s5 + $0x194] sm:$0xf0]  ;;  %v4930_v62 = vor.u32 %v7322_v53, %v4929_v52 }
  0x43   :  { %1127 = vmatpush.bf16.msrb.mxu2 %v5118_v20  ;;  %v5185_v58 = vld [vmem:[%s11506_s5 + $0x288] sm:$0xf]  ;;  %v7386_v59 = vld [vmem:[%s11506_s5 + $0x294] sm:$0xf0]  ;;  %v5058_v63 = vor.u32 %v7354_v57, %v5057_v56  ;;  %v7364_v56 = vld [vmem:[%s11506_s5 + $0x1ec] sm:$0xf] }
  0x44   :  { %1140 = vmatpush.bf16.msrb.mxu3 %v5246_v21  ;;  %v5313_v60 = vld [vmem:[%s11506_s5 + $0x388] sm:$0xf]  ;;  %v7418_v61 = vld [vmem:[%s11506_s5 + $0x394] sm:$0xf0]  ;;  %v5186_v4 = vor.u32 %v7386_v59, %v5185_v58  ;;  %v5107_v57 = vld [vmem:[%s11506_s5 + $0x1f8] sm:$0xf0] }
  0x45   :  { %1146 = vmatpush.bf16.msra.mxu0 %v4978_v22  ;;  %v4913_v0 = vld [vmem:[%s11506_s5 + $0x68] sm:$0xf]  ;;  %v7318_v3 = vld [vmem:[%s11506_s5 + $0x74] sm:$0xf0]  ;;  %v5314_v5 = vor.u32 %v7418_v61, %v5313_v60  ;;  %v7396_v58 = vld [vmem:[%s11506_s5 + $0x2ec] sm:$0xf] }
  0x46   :  { %1159 = vmatpush.bf16.msra.mxu1 %v5106_v23  ;;  %v5041_v6 = vld [vmem:[%s11506_s5 + $0x168] sm:$0xf]  ;;  %v7350_v7 = vld [vmem:[%s11506_s5 + $0x174] sm:$0xf0]  ;;  %v4914_v14 = vor.u32 %v7318_v3, %v4913_v0  ;;  %v5235_v61 = vld [vmem:[%s11506_s5 + $0x2f8] sm:$0xf0] }
  0x47   :  { %1172 = vmatpush.bf16.msra.mxu2 %v5234_v26  ;;  %v5169_v10 = vld [vmem:[%s11506_s5 + $0x268] sm:$0xf]  ;;  %v7382_v11 = vld [vmem:[%s11506_s5 + $0x274] sm:$0xf0]  ;;  %v5042_v15 = vor.u32 %v7350_v7, %v5041_v6  ;;  %v7328_v6 = vld [vmem:[%s11506_s5 + $0xcc] sm:$0xf] }
  0x48   :  { %1185 = vmatpush.bf16.msra.mxu3 %v5362_v27  ;;  %v5297_v12 = vld [vmem:[%s11506_s5 + $0x368] sm:$0xf]  ;;  %v7414_v13 = vld [vmem:[%s11506_s5 + $0x374] sm:$0xf0]  ;;  %v5170_v18 = vor.u32 %v7382_v11, %v5169_v10  ;;  %v4963_v7 = vld [vmem:[%s11506_s5 + $0xd8] sm:$0xf0]  ;;  %v5238_v10 = vor.u32 %v7396_v58, %v5235_v61 }
  0x49   :  { %1147 = vmatpush.bf16.msra.mxu0 %v4962_v38  ;;  %v4897_v16 = vld [vmem:[%s11506_s5 + $0x48] sm:$0xf]  ;;  %v7314_v17 = vld [vmem:[%s11506_s5 + $0x54] sm:$0xf0]  ;;  %v5298_v19 = vor.u32 %v7414_v13, %v5297_v12  ;;  %v7360_v12 = vld [vmem:[%s11506_s5 + $0x1cc] sm:$0xf] }
  0x4a   :  { %1160 = vmatpush.bf16.msra.mxu1 %v5090_v39  ;;  %v5025_v20 = vld [vmem:[%s11506_s5 + $0x148] sm:$0xf]  ;;  %v7346_v21 = vld [vmem:[%s11506_s5 + $0x154] sm:$0xf0]  ;;  %v4898_v26 = vor.u32 %v7314_v17, %v4897_v16  ;;  %v5091_v13 = vld [vmem:[%s11506_s5 + $0x1d8] sm:$0xf0] }
  0x4b   :  { %1173 = vmatpush.bf16.msra.mxu2 %v5218_v42  ;;  %1141 = vmatmul.bf16.vlgmr.msrb.gmra.mxu3 %v8270_v2  ;;  %v5153_v22 = vld [vmem:[%s11506_s5 + $0x248] sm:$0xf]  ;;  %v7378_v23 = vld [vmem:[%s11506_s5 + $0x254] sm:$0xf0]  ;;  %v5026_v27 = vor.u32 %v7346_v21, %v5025_v20  ;;  %v7424_v16 = vld [vmem:[%s11506_s5 + $0x3cc] sm:$0xf]  ;;  %v5094_v20 = vor.u32 %v7360_v12, %v5091_v13 }
  0x4c   :  { %1186 = vmatpush.bf16.msra.mxu3 %v5346_v43  ;;  %1128 = vmatmul.bf16.vlgmr.msrb.gmra.mxu2 %v8268_v1  ;;  %v5281_v24 = vld [vmem:[%s11506_s5 + $0x348] sm:$0xf]  ;;  %v7410_v25 = vld [vmem:[%s11506_s5 + $0x354] sm:$0xf0]  ;;  %v5154_v30 = vor.u32 %v7378_v23, %v5153_v22  ;;  %v5347_v17 = vld [vmem:[%s11506_s5 + $0x3d8] sm:$0xf0] }
  0x4d   :  { %1148 = vmatpush.bf16.msra.mxu0 %v4946_v50  ;;  %1115 = vmatmul.bf16.vlgmr.msrb.gmra.mxu1 %v8277_v9  ;;  %v4881_v28 = vld [vmem:[%s11506_s5 + $0x28] sm:$0xf]  ;;  %v7310_v29 = vld [vmem:[%s11506_s5 + $0x34] sm:$0xf0]  ;;  %v5282_v33 = vor.u32 %v7410_v25, %v5281_v24  ;;  %v4947_v21 = vld [vmem:[%s11506_s5 + $0xb8] sm:$0xf0]  ;;  %v5350_v25 = vor.u32 %v7424_v16, %v5347_v17 }
  0x4e   :  { %1161 = vmatpush.bf16.msra.mxu1 %v5074_v51  ;;  %1102 = vmatmul.bf16.vlgmr.msrb.gmra.mxu0 %v8275_v8  ;;  %v5009_v34 = vld [vmem:[%s11506_s5 + $0x128] sm:$0xf]  ;;  %v7342_v37 = vld [vmem:[%s11506_s5 + $0x134] sm:$0xf0]  ;;  %v4882_v43 = vor.u32 %v7310_v29, %v4881_v28  ;;  %v7356_v22 = vld [vmem:[%s11506_s5 + $0x1ac] sm:$0xf] }
  0x4f   :  { %1174 = vmatpush.bf16.msra.mxu2 %v5202_v54  ;;  %v5137_v38 = vld [vmem:[%s11506_s5 + $0x228] sm:$0xf]  ;;  %v7374_v39 = vld [vmem:[%s11506_s5 + $0x234] sm:$0xf0]  ;;  %v5010_v44 = vor.u32 %v7342_v37, %v5009_v34  ;;  %v7332_v54 = vld [vmem:[%s11506_s5 + $0xec] sm:$0xf] }
  0x50   :  { %1187 = vmatpush.bf16.msra.mxu3 %v5330_v55  ;;  %v5265_v40 = vld [vmem:[%s11506_s5 + $0x328] sm:$0xf]  ;;  %v7406_v41 = vld [vmem:[%s11506_s5 + $0x334] sm:$0xf0]  ;;  %v5138_v48 = vor.u32 %v7374_v39, %v5137_v38  ;;  %v4979_v55 = vld [vmem:[%s11506_s5 + $0xf8] sm:$0xf0] }
  0x51   :  { %1149 = vmatpush.bf16.msra.mxu0 %v4930_v62  ;;  %v4865_v42 = vld [vmem:[%s11506_s5 + $0x8] sm:$0xf]  ;;  %v7306_v45 = vld [vmem:[%s11506_s5 + $0x14] sm:$0xf0]  ;;  %v5266_v49 = vor.u32 %v7406_v41, %v5265_v40  ;;  %v7428_v62 = vld [vmem:[%s11506_s5 + $0x3ec] sm:$0xf] }
  0x52   :  { %1162 = vmatpush.bf16.msra.mxu1 %v5058_v63  ;;  %v4993_v46 = vld [vmem:[%s11506_s5 + $0x108] sm:$0xf]  ;;  %v7338_v47 = vld [vmem:[%s11506_s5 + $0x114] sm:$0xf0]  ;;  %v4866_v59 = vor.u32 %v7306_v45, %v4865_v42  ;;  %v5363_v63 = vld [vmem:[%s11506_s5 + $0x3f8] sm:$0xf0] }
  0x53   :  { %1175 = vmatpush.bf16.msra.mxu2 %v5186_v4  ;;  %v5121_v50 = vld [vmem:[%s11506_s5 + $0x208] sm:$0xf]  ;;  %v7370_v51 = vld [vmem:[%s11506_s5 + $0x214] sm:$0xf0]  ;;  %v4994_v60 = vor.u32 %v7338_v47, %v4993_v46  ;;  %v4982_v4 = vor.u32 %v7332_v54, %v4979_v55  ;;  %v5366_v11 = vor.u32 %v7428_v62, %v5363_v63  ;;  %v5075_v23 = vld [vmem:[%s11506_s5 + $0x1b8] sm:$0xf0] }
  0x54   :  { %1188 = vmatpush.bf16.msra.mxu3 %v5314_v5  ;;  %v5249_v52 = vld [vmem:[%s11506_s5 + $0x308] sm:$0xf]  ;;  %v7402_v53 = vld [vmem:[%s11506_s5 + $0x314] sm:$0xf0]  ;;  %v5122_v0 = vor.u32 %v7370_v51, %v5121_v50  ;;  %v5110_v5 = vor.u32 %v7364_v56, %v5107_v57  ;;  %v7420_v28 = vld [vmem:[%s11506_s5 + $0x3ac] sm:$0xf] }
  0x55   :  { %1150 = vmatpush.bf16.msra.mxu0 %v4914_v14  ;;  %v5250_v3 = vor.u32 %v7402_v53, %v5249_v52  ;;  %v7392_v14 = vld [vmem:[%s11506_s5 + $0x2cc] sm:$0xf]  ;;  %v5331_v29 = vld [vmem:[%s11506_s5 + $0x3b8] sm:$0xf0] }
  0x56   :  { %1163 = vmatpush.bf16.msra.mxu1 %v5042_v15  ;;  %v5219_v15 = vld [vmem:[%s11506_s5 + $0x2d8] sm:$0xf0] }
  0x57   :  { %1176 = vmatpush.bf16.msra.mxu2 %v5170_v18  ;;  %v7324_v18 = vld [vmem:[%s11506_s5 + $0xac] sm:$0xf]  ;;  %v5222_v24 = vor.u32 %v7392_v14, %v5219_v15 }
  0x58   :  { %1189 = vmatpush.bf16.msra.mxu3 %v5298_v19  ;;  %v4966_v19 = vor.u32 %v7328_v6, %v4963_v7 }
  0x59   :  { %1151 = vmatpush.bf16.msra.mxu0 %v4898_v26  ;;  %v7388_v26 = vld [vmem:[%s11506_s5 + $0x2ac] sm:$0xf] }
  0x5a   :  { %1164 = vmatpush.bf16.msra.mxu1 %v5026_v27  ;;  %v5203_v27 = vld [vmem:[%s11506_s5 + $0x2b8] sm:$0xf0] }
  0x5b   :  { %1177 = vmatpush.bf16.msra.mxu2 %v5154_v30 }
  0x5c   :  { %1190 = vmatpush.bf16.msra.mxu3 %v5282_v33 }
  0x5d   :  { %1152 = vmatpush.bf16.msra.mxu0 %v4882_v43 }
  0x5e   :  { %1165 = vmatpush.bf16.msra.mxu1 %v5010_v44 }
  0x5f   :  { %1178 = vmatpush.bf16.msra.mxu2 %v5138_v48 }
  0x60   :  { %1191 = vmatpush.bf16.msra.mxu3 %v5266_v49 }
  0x61   :  { %1153 = vmatpush.bf16.msra.mxu0 %v4866_v59 }
  0x62   :  { %1166 = vmatpush.bf16.msra.mxu1 %v4994_v60 }
  0x63   :  { %1179 = vmatpush.bf16.msra.mxu2 %v5122_v0 }
  0x64   :  { %1192 = vmatpush.bf16.msra.mxu3 %v5250_v3 }
  0x65   :  { %1198 = vmatpush.bf16.msrb.mxu0 %v4982_v4 }
  0x66   :  { %1211 = vmatpush.bf16.msrb.mxu1 %v5110_v5  ;;  %1180 = vmatmul.bf16.vlgmr.msra.gmra.mxu2 %v8268_v1 }
  0x67   :  { %1224 = vmatpush.bf16.msrb.mxu2 %v5238_v10  ;;  %1193 = vmatmul.bf16.vlgmr.msra.gmra.mxu3 %v8270_v2 }
  0x68   :  { %1237 = vmatpush.bf16.msrb.mxu3 %v5366_v11 }
  0x69   :  { %21 = vsyncpa [#allocation3], 0  ;;  %1154 = vmatmul.bf16.vlgmr.msra.gmra.mxu0 %v8275_v8  ;;  %1167 = vmatmul.bf16.vlgmr.msra.gmra.mxu1 %v8277_v9  ;;  %v4950_v30 = vor.u32 %v7324_v18, %v4947_v21  ;;  %v5078_v33 = vor.u32 %v7356_v22, %v5075_v23  ;;  %v7320_v34 = vld [vmem:[%s11506_s5 + $0x8c] sm:$0xf]  ;;  %v4931_v37 = vld [vmem:[%s11506_s5 + $0x98] sm:$0xf0]  ;;  %v5206_v38 = vor.u32 %v7388_v26, %v5203_v27 }
  0x6a   :  { %1199 = vmatpush.bf16.msrb.mxu0 %v4966_v19  ;;  %1212 = vmatpush.bf16.msrb.mxu1 %v5094_v20  ;;  %v5334_v39 = vor.u32 %v7420_v28, %v5331_v29  ;;  %v7352_v40 = vld [vmem:[%s11506_s5 + $0x18c] sm:$0xf]  ;;  %v5059_v41 = vld [vmem:[%s11506_s5 + $0x198] sm:$0xf0]  ;;  %v4934_v46 = vor.u32 %v7320_v34, %v4931_v37  ;;  %vm57_vm0 = vcmask 261120   ;;  %vm2110_vm2 = vcmask 1041409  }
  0x6b   :  { %1225 = vmatpush.bf16.msrb.mxu2 %v5222_v24  ;;  %v7384_v42 = vld [vmem:[%s11506_s5 + $0x28c] sm:$0xf]  ;;  %v5187_v43 = vld [vmem:[%s11506_s5 + $0x298] sm:$0xf0]  ;;  %v5062_v47 = vor.u32 %v7352_v40, %v5059_v41  ;;  %v5609_v40 = vld [vmem:[%s11505_s4 + $0x1e0] sm:$0xf] }
  0x6c   :  { %1238 = vmatpush.bf16.msrb.mxu3 %v5350_v25  ;;  %v7416_v44 = vld [vmem:[%s11506_s5 + $0x38c] sm:$0xf]  ;;  %v5315_v45 = vld [vmem:[%s11506_s5 + $0x398] sm:$0xf0]  ;;  %v5190_v50 = vor.u32 %v7384_v42, %v5187_v43  ;;  %v7237_v41 = vld [vmem:[%s11505_s4 + $0x1ec] sm:$0xf0] }
  0x6d   :  { %v7316_v48 = vld [vmem:[%s11506_s5 + $0x6c] sm:$0xf]  ;;  %v4915_v49 = vld [vmem:[%s11506_s5 + $0x78] sm:$0xf0]  ;;  %v5318_v51 = vor.u32 %v7416_v44, %v5315_v45  ;;  %v5737_v42 = vld [vmem:[%s11505_s4 + $0x2e0] sm:$0xf] }
  0x6e   :  { %1200 = vmatpush.bf16.msrb.mxu0 %v4950_v30  ;;  %1213 = vmatpush.bf16.msrb.mxu1 %v5078_v33  ;;  %v7348_v52 = vld [vmem:[%s11506_s5 + $0x16c] sm:$0xf]  ;;  %v5043_v53 = vld [vmem:[%s11506_s5 + $0x178] sm:$0xf0]  ;;  %v4918_v58 = vor.u32 %v7316_v48, %v4915_v49  ;;  %v7269_v45 = vld [vmem:[%s11505_s4 + $0x2ec] sm:$0xf0] }
  0x6f   :  { %1226 = vmatpush.bf16.msrb.mxu2 %v5206_v38  ;;  %v7380_v54 = vld [vmem:[%s11506_s5 + $0x26c] sm:$0xf]  ;;  %v5171_v55 = vld [vmem:[%s11506_s5 + $0x278] sm:$0xf0]  ;;  %v5046_v59 = vor.u32 %v7348_v52, %v5043_v53  ;;  %v5481_v38 = vld [vmem:[%s11505_s4 + $0xe0] sm:$0xf] }
  0x70   :  { %1239 = vmatpush.bf16.msrb.mxu3 %v5334_v39  ;;  %v7412_v56 = vld [vmem:[%s11506_s5 + $0x36c] sm:$0xf]  ;;  %v5299_v57 = vld [vmem:[%s11506_s5 + $0x378] sm:$0xf0]  ;;  %v5174_v62 = vor.u32 %v7380_v54, %v5171_v55  ;;  %v7205_v39 = vld [vmem:[%s11505_s4 + $0xec] sm:$0xf0]  ;;  %v5738_v54 = vor.u32 %v7269_v45, %v5737_v42 }
  0x71   :  { %v7312_v60 = vld [vmem:[%s11506_s5 + $0x4c] sm:$0xf]  ;;  %v4899_v61 = vld [vmem:[%s11506_s5 + $0x58] sm:$0xf0]  ;;  %v5302_v63 = vor.u32 %v7412_v56, %v5299_v57  ;;  %v5465_v52 = vld [vmem:[%s11505_s4 + $0xc0] sm:$0xf] }
  0x72   :  { %1201 = vmatpush.bf16.msrb.mxu0 %v4934_v46  ;;  %1214 = vmatpush.bf16.msrb.mxu1 %v5062_v47  ;;  %v7344_v0 = vld [vmem:[%s11506_s5 + $0x14c] sm:$0xf]  ;;  %v5027_v3 = vld [vmem:[%s11506_s5 + $0x158] sm:$0xf0]  ;;  %v4902_v10 = vor.u32 %v7312_v60, %v4899_v61  ;;  %v5865_v46 = vld [vmem:[%s11505_s4 + $0x3e0] sm:$0xf] }
  0x73   :  { %1227 = vmatpush.bf16.msrb.mxu2 %v5190_v50  ;;  %v7376_v4 = vld [vmem:[%s11506_s5 + $0x24c] sm:$0xf]  ;;  %v5155_v5 = vld [vmem:[%s11506_s5 + $0x258] sm:$0xf0]  ;;  %v5030_v11 = vor.u32 %v7344_v0, %v5027_v3  ;;  %v7301_v47 = vld [vmem:[%s11505_s4 + $0x3ec] sm:$0xf0]  ;;  %v5482_v50 = vor.u32 %v7205_v39, %v5481_v38 }
  0x74   :  { %1240 = vmatpush.bf16.msrb.mxu3 %v5318_v51  ;;  %v7408_v6 = vld [vmem:[%s11506_s5 + $0x34c] sm:$0xf]  ;;  %v5283_v7 = vld [vmem:[%s11506_s5 + $0x358] sm:$0xf0]  ;;  %v5158_v14 = vor.u32 %v7376_v4, %v5155_v5  ;;  %v5610_v51 = vor.u32 %v7237_v41, %v5609_v40  ;;  %v7201_v53 = vld [vmem:[%s11505_s4 + $0xcc] sm:$0xf0]  ;;  %v5866_v55 = vor.u32 %v7301_v47, %v5865_v46 }
  0x75   :  { %v7308_v12 = vld [vmem:[%s11506_s5 + $0x2c] sm:$0xf]  ;;  %v4883_v13 = vld [vmem:[%s11506_s5 + $0x38] sm:$0xf0]  ;;  %v5286_v15 = vor.u32 %v7408_v6, %v5283_v7  ;;  %v5593_v56 = vld [vmem:[%s11505_s4 + $0x1c0] sm:$0xf] }
  0x76   :  { %1202 = vmatpush.bf16.msrb.mxu0 %v4918_v58  ;;  %1215 = vmatpush.bf16.msrb.mxu1 %v5046_v59  ;;  %v7340_v16 = vld [vmem:[%s11506_s5 + $0x12c] sm:$0xf]  ;;  %v5011_v17 = vld [vmem:[%s11506_s5 + $0x138] sm:$0xf0]  ;;  %v4886_v23 = vor.u32 %v7308_v12, %v4883_v13  ;;  %v7233_v57 = vld [vmem:[%s11505_s4 + $0x1cc] sm:$0xf0] }
  0x77   :  { %1228 = vmatpush.bf16.msrb.mxu2 %v5174_v62  ;;  %v7372_v18 = vld [vmem:[%s11506_s5 + $0x22c] sm:$0xf]  ;;  %v5139_v19 = vld [vmem:[%s11506_s5 + $0x238] sm:$0xf0]  ;;  %v5014_v24 = vor.u32 %v7340_v16, %v5011_v17  ;;  %v5721_v58 = vld [vmem:[%s11505_s4 + $0x2c0] sm:$0xf]  ;;  %v5466_v62 = vor.u32 %v7201_v53, %v5465_v52 }
  0x78   :  { %1241 = vmatpush.bf16.msrb.mxu3 %v5302_v63  ;;  %v7404_v20 = vld [vmem:[%s11506_s5 + $0x32c] sm:$0xf]  ;;  %v5267_v21 = vld [vmem:[%s11506_s5 + $0x338] sm:$0xf0]  ;;  %v5142_v28 = vor.u32 %v7372_v18, %v5139_v19  ;;  %v7265_v59 = vld [vmem:[%s11505_s4 + $0x2cc] sm:$0xf0]  ;;  %v5594_v63 = vor.u32 %v7233_v57, %v5593_v56 }
  0x79   :  { %v7304_v22 = vld [vmem:[%s11506_s5 + $0xc] sm:$0xf]  ;;  %v4867_v25 = vld [vmem:[%s11506_s5 + $0x18] sm:$0xf0]  ;;  %v5270_v29 = vor.u32 %v7404_v20, %v5267_v21  ;;  %v5849_v60 = vld [vmem:[%s11505_s4 + $0x3c0] sm:$0xf]  ;;  %v5722_v4 = vor.u32 %v7265_v59, %v5721_v58 }
  0x7a   :  { %1203 = vmatpush.bf16.msrb.mxu0 %v4902_v10  ;;  %1216 = vmatpush.bf16.msrb.mxu1 %v5030_v11  ;;  %v7336_v26 = vld [vmem:[%s11506_s5 + $0x10c] sm:$0xf]  ;;  %v4995_v27 = vld [vmem:[%s11506_s5 + $0x118] sm:$0xf0]  ;;  %v4870_v43 = vor.u32 %v7304_v22, %v4867_v25  ;;  %v7297_v61 = vld [vmem:[%s11505_s4 + $0x3cc] sm:$0xf0] }
  0x7b   :  { %1229 = vmatpush.bf16.msrb.mxu2 %v5158_v14  ;;  %v7368_v30 = vld [vmem:[%s11506_s5 + $0x20c] sm:$0xf]  ;;  %v5123_v33 = vld [vmem:[%s11506_s5 + $0x218] sm:$0xf0]  ;;  %v4998_v44 = vor.u32 %v7336_v26, %v4995_v27  ;;  %v5449_v0 = vld [vmem:[%s11505_s4 + $0xa0] sm:$0xf]  ;;  %v5850_v5 = vor.u32 %v7297_v61, %v5849_v60 }
  0x7c   :  { %1242 = vmatpush.bf16.msrb.mxu3 %v5286_v15  ;;  %v7400_v34 = vld [vmem:[%s11506_s5 + $0x30c] sm:$0xf]  ;;  %v5251_v37 = vld [vmem:[%s11506_s5 + $0x318] sm:$0xf0]  ;;  %v5126_v48 = vor.u32 %v7368_v30, %v5123_v33  ;;  %v7197_v3 = vld [vmem:[%s11505_s4 + $0xac] sm:$0xf0] }
  0x7d   :  { %v5254_v49 = vor.u32 %v7400_v34, %v5251_v37  ;;  %v5577_v6 = vld [vmem:[%s11505_s4 + $0x1a0] sm:$0xf]  ;;  %v7229_v7 = vld [vmem:[%s11505_s4 + $0x1ac] sm:$0xf0]  ;;  %v5450_v14 = vor.u32 %v7197_v3, %v5449_v0  ;;  %vm4837_vm4 = vcmask 33792  }
  0x7e   :  { %1204 = vmatpush.bf16.msrb.mxu0 %v4886_v23  ;;  %1217 = vmatpush.bf16.msrb.mxu1 %v5014_v24  ;;  %v5705_v10 = vld [vmem:[%s11505_s4 + $0x2a0] sm:$0xf]  ;;  %v7261_v11 = vld [vmem:[%s11505_s4 + $0x2ac] sm:$0xf0]  ;;  %v5578_v15 = vor.u32 %v7229_v7, %v5577_v6 }
  0x7f   :  { %1230 = vmatpush.bf16.msrb.mxu2 %v5142_v28  ;;  %v5833_v12 = vld [vmem:[%s11505_s4 + $0x3a0] sm:$0xf]  ;;  %v7293_v13 = vld [vmem:[%s11505_s4 + $0x3ac] sm:$0xf0]  ;;  %v5706_v18 = vor.u32 %v7261_v11, %v5705_v10 }
  0x80   :  { %1243 = vmatpush.bf16.msrb.mxu3 %v5270_v29  ;;  %v5433_v16 = vld [vmem:[%s11505_s4 + $0x80] sm:$0xf]  ;;  %v7193_v17 = vld [vmem:[%s11505_s4 + $0x8c] sm:$0xf0]  ;;  %v5834_v19 = vor.u32 %v7293_v13, %v5833_v12 }
  0x81   :  { %v5561_v20 = vld [vmem:[%s11505_s4 + $0x180] sm:$0xf]  ;;  %v7225_v21 = vld [vmem:[%s11505_s4 + $0x18c] sm:$0xf0]  ;;  %v5434_v26 = vor.u32 %v7193_v17, %v5433_v16 }
  0x82   :  { %1205 = vmatpush.bf16.msrb.mxu0 %v4870_v43  ;;  %1218 = vmatpush.bf16.msrb.mxu1 %v4998_v44  ;;  %v5689_v22 = vld [vmem:[%s11505_s4 + $0x280] sm:$0xf]  ;;  %v7257_v23 = vld [vmem:[%s11505_s4 + $0x28c] sm:$0xf0]  ;;  %v5562_v27 = vor.u32 %v7225_v21, %v5561_v20  ;;  %v7235_v20 = vld [vmem:[%s11505_s4 + $0x1e4] sm:$0xf] }
  0x83   :  { %1231 = vmatpush.bf16.msrb.mxu2 %v5126_v48  ;;  %v5817_v24 = vld [vmem:[%s11505_s4 + $0x380] sm:$0xf]  ;;  %v7289_v25 = vld [vmem:[%s11505_s4 + $0x38c] sm:$0xf0]  ;;  %v5690_v30 = vor.u32 %v7257_v23, %v5689_v22  ;;  %v5611_v21 = vld [vmem:[%s11505_s4 + $0x1f0] sm:$0xf0] }
  0x84   :  { %1244 = vmatpush.bf16.msrb.mxu3 %v5254_v49  ;;  %v5417_v28 = vld [vmem:[%s11505_s4 + $0x60] sm:$0xf]  ;;  %v7189_v29 = vld [vmem:[%s11505_s4 + $0x6c] sm:$0xf0]  ;;  %v5818_v33 = vor.u32 %v7289_v25, %v5817_v24  ;;  %v7267_v22 = vld [vmem:[%s11505_s4 + $0x2e4] sm:$0xf] }
  0x85   :  { %1206 = vmatmul.bf16.vlgmr.msrb.gmra.mxu0 %v8275_v8  ;;  %1219 = vmatmul.bf16.vlgmr.msrb.gmra.mxu1 %v8277_v9  ;;  %v5545_v34 = vld [vmem:[%s11505_s4 + $0x160] sm:$0xf]  ;;  %v7221_v37 = vld [vmem:[%s11505_s4 + $0x16c] sm:$0xf0]  ;;  %v5418_v42 = vor.u32 %v7189_v29, %v5417_v28  ;;  %v5739_v25 = vld [vmem:[%s11505_s4 + $0x2f0] sm:$0xf0] }
  0x86   :  { %1890 = vmatpush.bf16.msra.mxu0 %v5482_v50  ;;  %1903 = vmatpush.bf16.msra.mxu1 %v5610_v51  ;;  %v5673_v38 = vld [vmem:[%s11505_s4 + $0x260] sm:$0xf]  ;;  %v7253_v39 = vld [vmem:[%s11505_s4 + $0x26c] sm:$0xf0]  ;;  %v5546_v43 = vor.u32 %v7221_v37, %v5545_v34  ;;  %v7199_v34 = vld [vmem:[%s11505_s4 + $0xc4] sm:$0xf] }
  0x87   :  { %1916 = vmatpush.bf16.msra.mxu2 %v5738_v54  ;;  %1245 = vmatmul.bf16.vlgmr.msrb.gmra.mxu3 %v8270_v2  ;;  %v5801_v40 = vld [vmem:[%s11505_s4 + $0x360] sm:$0xf]  ;;  %v7285_v41 = vld [vmem:[%s11505_s4 + $0x36c] sm:$0xf0]  ;;  %v5674_v46 = vor.u32 %v7253_v39, %v5673_v38  ;;  %v5467_v37 = vld [vmem:[%s11505_s4 + $0xd0] sm:$0xf0]  ;;  %v5742_v38 = vor.u32 %v7267_v22, %v5739_v25 }
  0x88   :  { %1929 = vmatpush.bf16.msra.mxu3 %v5866_v55  ;;  %1232 = vmatmul.bf16.vlgmr.msrb.gmra.mxu2 %v8268_v1  ;;  %v5401_v44 = vld [vmem:[%s11505_s4 + $0x40] sm:$0xf]  ;;  %v7185_v45 = vld [vmem:[%s11505_s4 + $0x4c] sm:$0xf0]  ;;  %v5802_v47 = vor.u32 %v7285_v41, %v5801_v40  ;;  %v7231_v40 = vld [vmem:[%s11505_s4 + $0x1c4] sm:$0xf] }
  0x89   :  { %v5529_v48 = vld [vmem:[%s11505_s4 + $0x140] sm:$0xf]  ;;  %v7217_v49 = vld [vmem:[%s11505_s4 + $0x14c] sm:$0xf0]  ;;  %v5402_v54 = vor.u32 %v7185_v45, %v5401_v44  ;;  %v5595_v41 = vld [vmem:[%s11505_s4 + $0x1d0] sm:$0xf0]  ;;  %v8916_v44 = vpack.c.bf16 %v8207_v35, %v8207_v35  ;;  %v8933_v35 = vpack.c.bf16 %v8209_v36, %v8209_v36 }
  0x8a   :  { %1891 = vmatpush.bf16.msra.mxu0 %v5466_v62  ;;  %1904 = vmatpush.bf16.msra.mxu1 %v5594_v63  ;;  %v5657_v50 = vld [vmem:[%s11505_s4 + $0x240] sm:$0xf]  ;;  %v7249_v51 = vld [vmem:[%s11505_s4 + $0x24c] sm:$0xf0]  ;;  %v5530_v55 = vor.u32 %v7217_v49, %v5529_v48  ;;  %v5723_v45 = vld [vmem:[%s11505_s4 + $0x2d0] sm:$0xf0]  ;;  %v5470_v48 = vor.u32 %v7199_v34, %v5467_v37  ;;  %v5598_v49 = vor.u32 %v7231_v40, %v5595_v41 }
  0x8b   :  { %1917 = vmatpush.bf16.msra.mxu2 %v5722_v4  ;;  %v5785_v52 = vld [vmem:[%s11505_s4 + $0x340] sm:$0xf]  ;;  %v7281_v53 = vld [vmem:[%s11505_s4 + $0x34c] sm:$0xf0]  ;;  %v5658_v58 = vor.u32 %v7249_v51, %v5657_v50  ;;  %v7195_v50 = vld [vmem:[%s11505_s4 + $0xa4] sm:$0xf] }
  0x8c   :  { %1930 = vmatpush.bf16.msra.mxu3 %v5850_v5  ;;  %v5385_v56 = vld [vmem:[%s11505_s4 + $0x20] sm:$0xf]  ;;  %v7181_v57 = vld [vmem:[%s11505_s4 + $0x2c] sm:$0xf0]  ;;  %v5786_v59 = vor.u32 %v7281_v53, %v5785_v52  ;;  %v5451_v51 = vld [vmem:[%s11505_s4 + $0xb0] sm:$0xf0] }
  0x8d   :  { %v5513_v60 = vld [vmem:[%s11505_s4 + $0x120] sm:$0xf]  ;;  %v7213_v61 = vld [vmem:[%s11505_s4 + $0x12c] sm:$0xf0]  ;;  %v5386_v5 = vor.u32 %v7181_v57, %v5385_v56  ;;  %v7227_v36 = vld [vmem:[%s11505_s4 + $0x1a4] sm:$0xf] }
  0x8e   :  { %1892 = vmatpush.bf16.msra.mxu0 %v5450_v14  ;;  %1905 = vmatpush.bf16.msra.mxu1 %v5578_v15  ;;  %v5641_v62 = vld [vmem:[%s11505_s4 + $0x220] sm:$0xf]  ;;  %v7245_v63 = vld [vmem:[%s11505_s4 + $0x22c] sm:$0xf0]  ;;  %v5514_v6 = vor.u32 %v7213_v61, %v5513_v60  ;;  %v5579_v53 = vld [vmem:[%s11505_s4 + $0x1b0] sm:$0xf0] }
  0x8f   :  { %1918 = vmatpush.bf16.msra.mxu2 %v5706_v18  ;;  %v5769_v0 = vld [vmem:[%s11505_s4 + $0x320] sm:$0xf]  ;;  %v7277_v3 = vld [vmem:[%s11505_s4 + $0x32c] sm:$0xf0]  ;;  %v5642_v12 = vor.u32 %v7245_v63, %v5641_v62  ;;  %v7203_v18 = vld [vmem:[%s11505_s4 + $0xe4] sm:$0xf] }
  0x90   :  { %1931 = vmatpush.bf16.msra.mxu3 %v5834_v19  ;;  %v5369_v4 = vld [vmem:[%s11505_s4] sm:$0xf]  ;;  %v7177_v7 = vld [vmem:[%s11505_s4 + $0xc] sm:$0xf0]  ;;  %v5770_v13 = vor.u32 %v7277_v3, %v5769_v0  ;;  %v5483_v19 = vld [vmem:[%s11505_s4 + $0xf0] sm:$0xf0] }
  0x91   :  { %v5497_v10 = vld [vmem:[%s11505_s4 + $0x100] sm:$0xf]  ;;  %v7209_v11 = vld [vmem:[%s11505_s4 + $0x10c] sm:$0xf0]  ;;  %v5370_v23 = vor.u32 %v7177_v7, %v5369_v4  ;;  %v7291_v56 = vld [vmem:[%s11505_s4 + $0x3a4] sm:$0xf] }
  0x92   :  { %1893 = vmatpush.bf16.msra.mxu0 %v5434_v26  ;;  %1906 = vmatpush.bf16.msra.mxu1 %v5562_v27  ;;  %v5625_v14 = vld [vmem:[%s11505_s4 + $0x200] sm:$0xf]  ;;  %v7241_v15 = vld [vmem:[%s11505_s4 + $0x20c] sm:$0xf0]  ;;  %v5498_v24 = vor.u32 %v7209_v11, %v5497_v10  ;;  %v7299_v26 = vld [vmem:[%s11505_s4 + $0x3e4] sm:$0xf] }
  0x93   :  { %1919 = vmatpush.bf16.msra.mxu2 %v5690_v30  ;;  %v5753_v16 = vld [vmem:[%s11505_s4 + $0x300] sm:$0xf]  ;;  %v7273_v17 = vld [vmem:[%s11505_s4 + $0x30c] sm:$0xf0]  ;;  %v5867_v27 = vld [vmem:[%s11505_s4 + $0x3f0] sm:$0xf0]  ;;  %v5626_v28 = vor.u32 %v7241_v15, %v5625_v14  ;;  %v5486_v30 = vor.u32 %v7203_v18, %v5483_v19 }
  0x94   :  { %1932 = vmatpush.bf16.msra.mxu3 %v5818_v33  ;;  %v5754_v29 = vor.u32 %v7273_v17, %v5753_v16  ;;  %v5614_v33 = vor.u32 %v7235_v20, %v5611_v21  ;;  %v5870_v39 = vor.u32 %v7299_v26, %v5867_v27  ;;  %v5835_v57 = vld [vmem:[%s11505_s4 + $0x3b0] sm:$0xf0]  ;;  %v7191_v60 = vld [vmem:[%s11505_s4 + $0x84] sm:$0xf] }
  0x95   :  { %v5435_v61 = vld [vmem:[%s11505_s4 + $0x90] sm:$0xf0]  ;;  %v5838_v63 = vor.u32 %v7291_v56, %v5835_v57  ;;  %v7223_v0 = vld [vmem:[%s11505_s4 + $0x184] sm:$0xf] }
  0x96   :  { %1894 = vmatpush.bf16.msra.mxu0 %v5418_v42  ;;  %1907 = vmatpush.bf16.msra.mxu1 %v5546_v43  ;;  %v7263_v42 = vld [vmem:[%s11505_s4 + $0x2c4] sm:$0xf]  ;;  %v8912_v43 = vpack.c.bf16 %v8203_v31, %v8203_v31  ;;  %v8929_v31 = vpack.c.bf16 %v8205_v32, %v8205_v32  ;;  %v5563_v3 = vld [vmem:[%s11505_s4 + $0x190] sm:$0xf0]  ;;  %v5438_v10 = vor.u32 %v7191_v60, %v5435_v61 }
  0x97   :  { %1920 = vmatpush.bf16.msra.mxu2 %v5674_v46  ;;  %v7295_v46 = vld [vmem:[%s11505_s4 + $0x3c4] sm:$0xf]  ;;  %v5726_v32 = vor.u32 %v7263_v42, %v5723_v45  ;;  %v5819_v7 = vld [vmem:[%s11505_s4 + $0x390] sm:$0xf0]  ;;  %v5566_v11 = vor.u32 %v7223_v0, %v5563_v3  ;;  %v5617_v0 = vld [vmem:[%s11505_s4 + $0x1e8] sm:$0xf] }
  0x98   :  { %1933 = vmatpush.bf16.msra.mxu3 %v5802_v47  ;;  %v5851_v47 = vld [vmem:[%s11505_s4 + $0x3d0] sm:$0xf0]  ;;  %v7255_v4 = vld [vmem:[%s11505_s4 + $0x284] sm:$0xf]  ;;  %v7238_v3 = vld [vmem:[%s11505_s4 + $0x1f4] sm:$0xf0] }
  0x99   :  { %v5854_v52 = vor.u32 %v7295_v46, %v5851_v47  ;;  %v7219_v16 = vld [vmem:[%s11505_s4 + $0x164] sm:$0xf]  ;;  %v5547_v17 = vld [vmem:[%s11505_s4 + $0x170] sm:$0xf0] }
  0x9a   :  { %1895 = vmatpush.bf16.msra.mxu0 %v5402_v54  ;;  %1908 = vmatpush.bf16.msra.mxu1 %v5530_v55  ;;  %v7259_v54 = vld [vmem:[%s11505_s4 + $0x2a4] sm:$0xf]  ;;  %v5707_v55 = vld [vmem:[%s11505_s4 + $0x2b0] sm:$0xf0] }
  0x9b   :  { %1921 = vmatpush.bf16.msra.mxu2 %v5658_v58  ;;  %v5454_v58 = vor.u32 %v7195_v50, %v5451_v51  ;;  %v5710_v62 = vor.u32 %v7259_v54, %v5707_v55  ;;  %v7251_v18 = vld [vmem:[%s11505_s4 + $0x264] sm:$0xf]  ;;  %v5675_v19 = vld [vmem:[%s11505_s4 + $0x270] sm:$0xf0] }
  0x9c   :  { %1934 = vmatpush.bf16.msra.mxu3 %v5786_v59  ;;  %v5582_v59 = vor.u32 %v7227_v36, %v5579_v53  ;;  %v7283_v20 = vld [vmem:[%s11505_s4 + $0x364] sm:$0xf]  ;;  %v5803_v21 = vld [vmem:[%s11505_s4 + $0x370] sm:$0xf0]  ;;  %v5678_v26 = vor.u32 %v7251_v18, %v5675_v19 }
  0x9d   :  { %v5403_v25 = vld [vmem:[%s11505_s4 + $0x50] sm:$0xf0]  ;;  %v5806_v27 = vor.u32 %v7283_v20, %v5803_v21  ;;  %v7279_v34 = vld [vmem:[%s11505_s4 + $0x344] sm:$0xf]  ;;  %v5601_v20 = vld [vmem:[%s11505_s4 + $0x1c8] sm:$0xf] }
  0x9e   :  { %1896 = vmatpush.bf16.msra.mxu0 %v5386_v5  ;;  %1909 = vmatpush.bf16.msra.mxu1 %v5514_v6  ;;  %v5691_v5 = vld [vmem:[%s11505_s4 + $0x290] sm:$0xf0]  ;;  %v7287_v6 = vld [vmem:[%s11505_s4 + $0x384] sm:$0xf]  ;;  %v7234_v21 = vld [vmem:[%s11505_s4 + $0x1d4] sm:$0xf0] }
  0x9f   :  { %1922 = vmatpush.bf16.msra.mxu2 %v5642_v12  ;;  %v7187_v12 = vld [vmem:[%s11505_s4 + $0x64] sm:$0xf]  ;;  %v5694_v14 = vor.u32 %v7255_v4, %v5691_v5  ;;  %v5822_v15 = vor.u32 %v7287_v6, %v5819_v7  ;;  %v5787_v37 = vld [vmem:[%s11505_s4 + $0x350] sm:$0xf0]  ;;  %v5745_v4 = vld [vmem:[%s11505_s4 + $0x2e8] sm:$0xf] }
  0xa0   :  { %1935 = vmatpush.bf16.msra.mxu3 %v5770_v13  ;;  %v5419_v13 = vld [vmem:[%s11505_s4 + $0x70] sm:$0xf0]  ;;  %v7179_v40 = vld [vmem:[%s11505_s4 + $0x24] sm:$0xf]  ;;  %v5790_v45 = vor.u32 %v7279_v34, %v5787_v37  ;;  %v7270_v7 = vld [vmem:[%s11505_s4 + $0x2f4] sm:$0xf0] }
  0xa1   :  { %v5422_v22 = vor.u32 %v7187_v12, %v5419_v13  ;;  %v5387_v41 = vld [vmem:[%s11505_s4 + $0x30] sm:$0xf0]  ;;  %v7211_v46 = vld [vmem:[%s11505_s4 + $0x124] sm:$0xf]  ;;  %v5746_v18 = vor.u32 %v7270_v7, %v5745_v4  ;;  %v5585_v34 = vld [vmem:[%s11505_s4 + $0x1a8] sm:$0xf] }
  0xa2   :  { %1897 = vmatpush.bf16.msra.mxu0 %v5370_v23  ;;  %1910 = vmatpush.bf16.msra.mxu1 %v5498_v24  ;;  %v5550_v23 = vor.u32 %v7219_v16, %v5547_v17  ;;  %v7183_v24 = vld [vmem:[%s11505_s4 + $0x44] sm:$0xf]  ;;  %v5515_v47 = vld [vmem:[%s11505_s4 + $0x130] sm:$0xf0]  ;;  %v5473_v16 = vld [vmem:[%s11505_s4 + $0xc8] sm:$0xf] }
  0xa3   :  { %1923 = vmatpush.bf16.msra.mxu2 %v5626_v28  ;;  %v7215_v28 = vld [vmem:[%s11505_s4 + $0x144] sm:$0xf]  ;;  %v5771_v51 = vld [vmem:[%s11505_s4 + $0x330] sm:$0xf0]  ;;  %v5518_v36 = vor.u32 %v7211_v46, %v5515_v47  ;;  %v7202_v17 = vld [vmem:[%s11505_s4 + $0xd4] sm:$0xf0] }
  0xa4   :  { %1936 = vmatpush.bf16.msra.mxu3 %v5754_v29  ;;  %v5531_v29 = vld [vmem:[%s11505_s4 + $0x150] sm:$0xf0]  ;;  %v7275_v50 = vld [vmem:[%s11505_s4 + $0x324] sm:$0xf]  ;;  %v7230_v37 = vld [vmem:[%s11505_s4 + $0x1b4] sm:$0xf0] }
  0xa5   :  { %1898 = vmatmul.bf16.vlgmr.msra.gmra.mxu0 %v8912_v43  ;;  %1911 = vmatmul.bf16.vlgmr.msra.gmra.mxu1 %v8929_v31  ;;  %v5371_v53 = vld [vmem:[%s11505_s4 + $0x10] sm:$0xf0]  ;;  %v7207_v54 = vld [vmem:[%s11505_s4 + $0x104] sm:$0xf]  ;;  %v5774_v57 = vor.u32 %v7275_v50, %v5771_v51  ;;  %v5586_v50 = vor.u32 %v7230_v37, %v5585_v34  ;;  %v5441_v51 = vld [vmem:[%s11505_s4 + $0x88] sm:$0xf] }
  0xa6   :  { %1942 = vmatpush.bf16.msrb.mxu0 %v5486_v30  ;;  %1955 = vmatpush.bf16.msrb.mxu1 %v5614_v33  ;;  %v7247_v30 = vld [vmem:[%s11505_s4 + $0x244] sm:$0xf]  ;;  %v5659_v33 = vld [vmem:[%s11505_s4 + $0x250] sm:$0xf0]  ;;  %v5681_v7 = vld [vmem:[%s11505_s4 + $0x268] sm:$0xf] }
  0xa7   :  { %1968 = vmatpush.bf16.msrb.mxu2 %v5742_v38  ;;  %1937 = vmatmul.bf16.vlgmr.msra.gmra.mxu3 %v8933_v35  ;;  %v5406_v38 = vor.u32 %v7183_v24, %v5403_v25  ;;  %v5662_v42 = vor.u32 %v7247_v30, %v5659_v33  ;;  %v5499_v55 = vld [vmem:[%s11505_s4 + $0x110] sm:$0xf0]  ;;  %v7271_v60 = vld [vmem:[%s11505_s4 + $0x304] sm:$0xf]  ;;  %v5857_v24 = vld [vmem:[%s11505_s4 + $0x3c8] sm:$0xf] }
  0xa8   :  { %1981 = vmatpush.bf16.msrb.mxu3 %v5870_v39  ;;  %1924 = vmatmul.bf16.vlgmr.msra.gmra.mxu2 %v8916_v44  ;;  %v5534_v39 = vor.u32 %v7215_v28, %v5531_v29  ;;  %v5755_v61 = vld [vmem:[%s11505_s4 + $0x310] sm:$0xf0]  ;;  %v5502_v6 = vor.u32 %v7207_v54, %v5499_v55  ;;  %v7298_v25 = vld [vmem:[%s11505_s4 + $0x3d4] sm:$0xf0]  ;;  %v5457_v28 = vld [vmem:[%s11505_s4 + $0xa8] sm:$0xf] }
  0xa9   :  { %v5758_v13 = vor.u32 %v7271_v60, %v5755_v61  ;;  %v7198_v29 = vld [vmem:[%s11505_s4 + $0xb4] sm:$0xf0]  ;;  %v5858_v33 = vor.u32 %v7298_v25, %v5857_v24  ;;  %v5569_v54 = vld [vmem:[%s11505_s4 + $0x188] sm:$0xf] }
  0xaa   :  { %1943 = vmatpush.bf16.msrb.mxu0 %v5470_v48  ;;  %1956 = vmatpush.bf16.msrb.mxu1 %v5598_v49  ;;  %v7243_v48 = vld [vmem:[%s11505_s4 + $0x224] sm:$0xf]  ;;  %v5643_v49 = vld [vmem:[%s11505_s4 + $0x230] sm:$0xf0]  ;;  %v7226_v55 = vld [vmem:[%s11505_s4 + $0x194] sm:$0xf0] }
  0xab   :  { %1969 = vmatpush.bf16.msrb.mxu2 %v5726_v32  ;;  %v7175_v32 = vld [vmem:[%s11505_s4 + $0x4] sm:$0xf]  ;;  %v5646_v56 = vor.u32 %v7243_v48, %v5643_v49  ;;  %v5458_v49 = vor.u32 %v7198_v29, %v5457_v28  ;;  %v7218_v24 = vld [vmem:[%s11505_s4 + $0x154] sm:$0xf0]  ;;  %v5665_v25 = vld [vmem:[%s11505_s4 + $0x248] sm:$0xf] }
  0xac   :  { %1982 = vmatpush.bf16.msrb.mxu3 %v5854_v52  ;;  %v5390_v52 = vor.u32 %v7179_v40, %v5387_v41  ;;  %v5374_v5 = vor.u32 %v7175_v32, %v5371_v53  ;;  %v7262_v41 = vld [vmem:[%s11505_s4 + $0x2b4] sm:$0xf0] }
  0xad   :  { %v7194_v32 = vld [vmem:[%s11505_s4 + $0x94] sm:$0xf0] }
  0xae   :  { %1944 = vmatpush.bf16.msrb.mxu0 %v5454_v58  ;;  %1957 = vmatpush.bf16.msrb.mxu1 %v5582_v59  ;;  %v7239_v58 = vld [vmem:[%s11505_s4 + $0x204] sm:$0xf]  ;;  %v5627_v59 = vld [vmem:[%s11505_s4 + $0x210] sm:$0xf0]  ;;  %v5442_v61 = vor.u32 %v7194_v32, %v5441_v51  ;;  %v7282_v28 = vld [vmem:[%s11505_s4 + $0x354] sm:$0xf0] }
  0xaf   :  { %1970 = vmatpush.bf16.msrb.mxu2 %v5710_v62  ;;  %v5489_v62 = vld [vmem:[%s11505_s4 + $0xe8] sm:$0xf]  ;;  %v5630_v12 = vor.u32 %v7239_v58, %v5627_v59  ;;  %v7290_v59 = vld [vmem:[%s11505_s4 + $0x394] sm:$0xf0] }
  0xb0   :  { %1983 = vmatpush.bf16.msrb.mxu3 %v5838_v63  ;;  %v7206_v63 = vld [vmem:[%s11505_s4 + $0xf4] sm:$0xf0]  ;;  %v5825_v58 = vld [vmem:[%s11505_s4 + $0x388] sm:$0xf] }
  0xb1   :  { %v5826_v4 = vor.u32 %v7290_v59, %v5825_v58  ;;  %v7182_v34 = vld [vmem:[%s11505_s4 + $0x34] sm:$0xf0]  ;;  %v5761_v58 = vld [vmem:[%s11505_s4 + $0x308] sm:$0xf] }
  0xb2   :  { %1945 = vmatpush.bf16.msrb.mxu0 %v5438_v10  ;;  %1958 = vmatpush.bf16.msrb.mxu1 %v5566_v11  ;;  %v5873_v10 = vld [vmem:[%s11505_s4 + $0x3e8] sm:$0xf]  ;;  %v7302_v11 = vld [vmem:[%s11505_s4 + $0x3f4] sm:$0xf0] }
  0xb3   :  { %1971 = vmatpush.bf16.msrb.mxu2 %v5694_v14  ;;  %v5490_v14 = vor.u32 %v7206_v63, %v5489_v62  ;;  %v5874_v19 = vor.u32 %v7302_v11, %v5873_v10  ;;  %v5570_v62 = vor.u32 %v7226_v55, %v5569_v54  ;;  %v5425_v63 = vld [vmem:[%s11505_s4 + $0x68] sm:$0xf]  ;;  %v7178_v32 = vld [vmem:[%s11505_s4 + $0x14] sm:$0xf0] }
  0xb4   :  { %1984 = vmatpush.bf16.msrb.mxu3 %v5822_v15  ;;  %v5618_v15 = vor.u32 %v7238_v3, %v5617_v0  ;;  %v7190_v0 = vld [vmem:[%s11505_s4 + $0x74] sm:$0xf0] }
  0xb6   :  { %1946 = vmatpush.bf16.msrb.mxu0 %v5422_v22  ;;  %1959 = vmatpush.bf16.msrb.mxu1 %v5550_v23  ;;  %v5729_v22 = vld [vmem:[%s11505_s4 + $0x2c8] sm:$0xf]  ;;  %v7266_v23 = vld [vmem:[%s11505_s4 + $0x2d4] sm:$0xf0] }
  0xb7   :  { %1972 = vmatpush.bf16.msrb.mxu2 %v5678_v26  ;;  %v5474_v26 = vor.u32 %v7202_v17, %v5473_v16  ;;  %v5730_v30 = vor.u32 %v7266_v23, %v5729_v22  ;;  %v5426_v17 = vor.u32 %v7190_v0, %v5425_v63  ;;  %v5537_v23 = vld [vmem:[%s11505_s4 + $0x148] sm:$0xf]  ;;  %v7204_v63 = vld [vmem:[%s11505_s4 + $0xec] sm:$0xf]  ;;  %v5491_v0 = vld [vmem:[%s11505_s4 + $0xf8] sm:$0xf0] }
  0xb8   :  { %1985 = vmatpush.bf16.msrb.mxu3 %v5806_v27  ;;  %v5602_v27 = vor.u32 %v7234_v21, %v5601_v20  ;;  %v7186_v20 = vld [vmem:[%s11505_s4 + $0x54] sm:$0xf0] }
  0xba   :  { %1947 = vmatpush.bf16.msrb.mxu0 %v5406_v38  ;;  %1960 = vmatpush.bf16.msrb.mxu1 %v5534_v39  ;;  %v5713_v38 = vld [vmem:[%s11505_s4 + $0x2a8] sm:$0xf]  ;;  %v1064_v40 = vpop.f32.mrf.mxu1 }
  0xbb   :  { %1973 = vmatpush.bf16.msrb.mxu2 %v5662_v42  ;;  %v1051_v39 = vpop.f32.mrf.mxu0  ;;  %v5841_v42 = vld [vmem:[%s11505_s4 + $0x3a8] sm:$0xf] }
  0xbc   :  { %1986 = vmatpush.bf16.msrb.mxu3 %v5790_v45  ;;  %v7294_v45 = vld [vmem:[%s11505_s4 + $0x3b4] sm:$0xf0]  ;;  %v1065_v46 = vadd.f32 %v1064_v40, %v1051_v39  ;;  %v5521_v39 = vld [vmem:[%s11505_s4 + $0x128] sm:$0xf] }
  0xbd   :  { %v7214_v40 = vld [vmem:[%s11505_s4 + $0x134] sm:$0xf0] }
  0xbe   :  { %1948 = vmatpush.bf16.msrb.mxu0 %v5390_v52  ;;  %1961 = vmatpush.bf16.msrb.mxu1 %v5518_v36  ;;  %v1090_v48 = vpop.f32.mrf.mxu3  ;;  %v5714_v52 = vor.u32 %v7262_v41, %v5713_v38  ;;  %v5842_v36 = vor.u32 %v7294_v45, %v5841_v42  ;;  %v5649_v41 = vld [vmem:[%s11505_s4 + $0x228] sm:$0xf]  ;;  %v7246_v42 = vld [vmem:[%s11505_s4 + $0x234] sm:$0xf0]  ;;  %v5522_v51 = vor.u32 %v7214_v40, %v5521_v39 }
  0xbf   :  { %1974 = vmatpush.bf16.msrb.mxu2 %v5646_v56  ;;  %v1077_v47 = vpop.f32.mrf.mxu2  ;;  %v5697_v56 = vld [vmem:[%s11505_s4 + $0x288] sm:$0xf]  ;;  %v5650_v54 = vor.u32 %v7246_v42, %v5649_v41  ;;  %v5459_v42 = vld [vmem:[%s11505_s4 + $0xb8] sm:$0xf0] }
  0xc0   :  { %1987 = vmatpush.bf16.msrb.mxu3 %v5774_v57  ;;  %v1078_v53 = vadd.f32 %v1077_v47, %v1065_v46  ;;  %v7258_v57 = vld [vmem:[%s11505_s4 + $0x294] sm:$0xf0]  ;;  %v5777_v45 = vld [vmem:[%s11505_s4 + $0x328] sm:$0xf] }
  0xc1   :  { %v5698_v3 = vor.u32 %v7258_v57, %v5697_v56  ;;  %v7278_v46 = vld [vmem:[%s11505_s4 + $0x334] sm:$0xf0]  ;;  %v5377_v47 = vld [vmem:[%s11505_s4 + $0x8] sm:$0xf] }
  0xc2   :  { %1949 = vmatpush.bf16.msrb.mxu0 %v5374_v5  ;;  %1962 = vmatpush.bf16.msrb.mxu1 %v5502_v6  ;;  %v9183_v60 = vadd.f32 %v1090_v48, %v1078_v53  ;;  %v5553_v5 = vld [vmem:[%s11505_s4 + $0x168] sm:$0xf]  ;;  %v7222_v6 = vld [vmem:[%s11505_s4 + $0x174] sm:$0xf0]  ;;  %v1066_v11 = vpop.f32.mrf.mxu1  ;;  %v5778_v55 = vor.u32 %v7278_v46, %v5777_v45 }
  0xc3   :  { %1975 = vmatpush.bf16.msrb.mxu2 %v5630_v12  ;;  %v1053_v10 = vpop.f32.mrf.mxu0  ;;  %v7254_v12 = vld [vmem:[%s11505_s4 + $0x274] sm:$0xf0]  ;;  %v5633_v56 = vld [vmem:[%s11505_s4 + $0x208] sm:$0xf]  ;;  %v5747_v11 = vld [vmem:[%s11505_s4 + $0x2f8] sm:$0xf0] }
  0xc4   :  { %1988 = vmatpush.bf16.msrb.mxu3 %v5758_v13  ;;  %v5809_v13 = vld [vmem:[%s11505_s4 + $0x368] sm:$0xf]  ;;  %v5682_v21 = vor.u32 %v7254_v12, %v5681_v7  ;;  %v7242_v57 = vld [vmem:[%s11505_s4 + $0x214] sm:$0xf0]  ;;  %v5378_v7 = vor.u32 %v7178_v32, %v5377_v47  ;;  %v7300_v12 = vld [vmem:[%s11505_s4 + $0x3ec] sm:$0xf] }
  0xc5   :  { %1950 = vmatmul.bf16.vlgmr.msrb.gmra.mxu0 %v8912_v43  ;;  %1963 = vmatmul.bf16.vlgmr.msrb.gmra.mxu1 %v8929_v31  ;;  %v5715_v32 = vld [vmem:[%s11505_s4 + $0x2b8] sm:$0xf0] }
  0xc6   :  { %1994 = vmatpush.bf16.msra.mxu0 %v5490_v14  ;;  %2007 = vmatpush.bf16.msra.mxu1 %v5618_v15  ;;  %v7286_v14 = vld [vmem:[%s11505_s4 + $0x374] sm:$0xf0]  ;;  %v1092_v16 = vpop.f32.mrf.mxu3 }
  0xc7   :  { %2020 = vmatpush.bf16.msra.mxu2 %v5746_v18  ;;  %1989 = vmatmul.bf16.vlgmr.msrb.gmra.mxu3 %v8933_v35  ;;  %v1079_v15 = vpop.f32.mrf.mxu2  ;;  %v5554_v18 = vor.u32 %v7222_v6, %v5553_v5  ;;  %v5810_v22 = vor.u32 %v7286_v14, %v5809_v13  ;;  %v5619_v5 = vld [vmem:[%s11505_s4 + $0x1f8] sm:$0xf0]  ;;  %v7268_v6 = vld [vmem:[%s11505_s4 + $0x2ec] sm:$0xf] }
  0xc8   :  { %2033 = vmatpush.bf16.msra.mxu3 %v5874_v19  ;;  %1976 = vmatmul.bf16.vlgmr.msrb.gmra.mxu2 %v8916_v44  ;;  %v5409_v19 = vld [vmem:[%s11505_s4 + $0x48] sm:$0xf]  ;;  %v5875_v13 = vld [vmem:[%s11505_s4 + $0x3f8] sm:$0xf0]  ;;  %v5634_v15 = vor.u32 %v7242_v57, %v5633_v56 }
  0xc9   :  { %v5410_v29 = vor.u32 %v7186_v20, %v5409_v19  ;;  %v5475_v20 = vld [vmem:[%s11505_s4 + $0xd8] sm:$0xf0] }
  0xca   :  { %1995 = vmatpush.bf16.msra.mxu0 %v5474_v26  ;;  %2008 = vmatpush.bf16.msra.mxu1 %v5602_v27  ;;  %v7250_v26 = vld [vmem:[%s11505_s4 + $0x254] sm:$0xf0]  ;;  %v5793_v27 = vld [vmem:[%s11505_s4 + $0x348] sm:$0xf] }
  0xcb   :  { %2021 = vmatpush.bf16.msra.mxu2 %v5730_v30  ;;  %v5538_v30 = vor.u32 %v7218_v24, %v5537_v23  ;;  %v5666_v37 = vor.u32 %v7250_v26, %v5665_v25  ;;  %v5794_v38 = vor.u32 %v7282_v28, %v5793_v27  ;;  %v1103_v48 = vpop.f32.mrf.mxu0  ;;  %v5750_v23 = vor.u32 %v7268_v6, %v5747_v11  ;;  %v7264_v25 = vld [vmem:[%s11505_s4 + $0x2cc] sm:$0xf]  ;;  %v55_v28 = vld [vmem:[%s11503_s2] sm:$0xff]  ;;  %v5827_v6 = vld [vmem:[%s11505_s4 + $0x398] sm:$0xf0] }
  0xcc   :  { %2034 = vmatpush.bf16.msra.mxu3 %v5858_v33  ;;  %v5393_v33 = vld [vmem:[%s11505_s4 + $0x28] sm:$0xf]  ;;  %v5878_v24 = vor.u32 %v7300_v12, %v5875_v13  ;;  %v58_v45 = vsel %vm57_vm0, %v55_v28, 0.0  ;;  %v7184_v28 = vld [vmem:[%s11505_s4 + $0x4c] sm:$0xf] }
  0xce   :  { %1996 = vmatpush.bf16.msra.mxu0 %v5458_v49  ;;  %2009 = vmatpush.bf16.msra.mxu1 %v5586_v50  ;;  %v1116_v49 = vpop.f32.mrf.mxu1  ;;  %v5394_v50 = vor.u32 %v7182_v34, %v5393_v33  ;;  %v7296_v33 = vld [vmem:[%s11505_s4 + $0x3cc] sm:$0xf]  ;;  %v5859_v34 = vld [vmem:[%s11505_s4 + $0x3d8] sm:$0xf0] }
  0xcf   :  { %2022 = vmatpush.bf16.msra.mxu2 %v5714_v52  ;;  %v5505_v52 = vld [vmem:[%s11505_s4 + $0x108] sm:$0xf]  ;;  %v1117_v53 = vadd.f32 %v1116_v49, %v1103_v48  ;;  %v1129_v59 = vpop.f32.mrf.mxu2  ;;  %v5862_v48 = vor.u32 %v7296_v33, %v5859_v34  ;;  %v7228_v49 = vld [vmem:[%s11505_s4 + $0x1ac] sm:$0xf] }
  0xd0   :  { %2035 = vmatpush.bf16.msra.mxu3 %v5842_v36  ;;  %v7210_v36 = vld [vmem:[%s11505_s4 + $0x114] sm:$0xf0] }
  0xd1   :  { %v5506_v10 = vor.u32 %v7210_v36, %v5505_v52  ;;  %v7292_v52 = vld [vmem:[%s11505_s4 + $0x3ac] sm:$0xf]  ;;  %v5843_v36 = vld [vmem:[%s11505_s4 + $0x3b8] sm:$0xf0] }
  0xd2   :  { %1997 = vmatpush.bf16.msra.mxu0 %v5442_v61  ;;  %2010 = vmatpush.bf16.msra.mxu1 %v5570_v62  ;;  %v1142_v61 = vpop.f32.mrf.mxu3  ;;  %v7274_v62 = vld [vmem:[%s11505_s4 + $0x314] sm:$0xf0] }
  0xd3   :  { %2023 = vmatpush.bf16.msra.mxu2 %v5698_v3  ;;  %v1130_v3 = vadd.f32 %v1129_v59, %v1117_v53  ;;  %v5762_v16 = vor.u32 %v7274_v62, %v5761_v58  ;;  %v1105_v26 = vpop.f32.mrf.mxu0  ;;  %v59_v53 = vrot.slane %v58_v45, 4  ;;  %v7192_v58 = vld [vmem:[%s11505_s4 + $0x8c] sm:$0xf]  ;;  %v5443_v59 = vld [vmem:[%s11505_s4 + $0x98] sm:$0xf0]  ;;  %v5846_v62 = vor.u32 %v7292_v52, %v5843_v36 }
  0xd4   :  { %2036 = vmatpush.bf16.msra.mxu3 %v5826_v4  ;;  %v7236_v4 = vld [vmem:[%s11505_s4 + $0x1ec] sm:$0xf]  ;;  %v5446_v13 = vor.u32 %v7192_v58, %v5443_v59  ;;  %v5811_v26 = vld [vmem:[%s11505_s4 + $0x378] sm:$0xf0] }
  0xd5   :  { %v9305_v14 = vadd.f32 %v1142_v61, %v1130_v3  ;;  %v5622_v19 = vor.u32 %v7236_v4, %v5619_v5  ;;  %v7256_v3 = vld [vmem:[%s11505_s4 + $0x28c] sm:$0xf]  ;;  %v5699_v4 = vld [vmem:[%s11505_s4 + $0x298] sm:$0xf0]  ;;  %v60_v11 = vadd.f32 %v59_v53, %v58_v45 }
  0xd6   :  { %1998 = vmatpush.bf16.msra.mxu0 %v5426_v17  ;;  %2011 = vmatpush.bf16.msra.mxu1 %v5554_v18  ;;  %v7200_v17 = vld [vmem:[%s11505_s4 + $0xcc] sm:$0xf]  ;;  %v5494_v18 = vor.u32 %v7204_v63, %v5491_v0  ;;  %v1118_v27 = vpop.f32.mrf.mxu1  ;;  %v5571_v0 = vld [vmem:[%s11505_s4 + $0x198] sm:$0xf0] }
  0xd7   :  { %2024 = vmatpush.bf16.msra.mxu2 %v5682_v21  ;;  %v7232_v21 = vld [vmem:[%s11505_s4 + $0x1cc] sm:$0xf]  ;;  %v1131_v39 = vpop.f32.mrf.mxu2  ;;  %v61_v33 = vrot.slane %v60_v11, 2  ;;  %v5539_v45 = vld [vmem:[%s11505_s4 + $0x158] sm:$0xf0] }
  0xd8   :  { %2037 = vmatpush.bf16.msra.mxu3 %v5810_v22  ;;  %v5603_v22 = vld [vmem:[%s11505_s4 + $0x1d8] sm:$0xf0]  ;;  %v7224_v63 = vld [vmem:[%s11505_s4 + $0x18c] sm:$0xf]  ;;  %v85_v39 = vld [vmem:[%s11504_s3 + $0x10] sm:$0xff] }
  0xd9   :  { %v5606_v41 = vor.u32 %v7232_v21, %v5603_v22  ;;  %v7288_v5 = vld [vmem:[%s11505_s4 + $0x38c] sm:$0xf]  ;;  %v5702_v22 = vor.u32 %v7256_v3, %v5699_v4  ;;  %v96_v53 = vsel %vm57_vm0, %v85_v39, 0.0  ;;  %v5395_v3 = vld [vmem:[%s11505_s4 + $0x38] sm:$0xf0] }
  0xda   :  { %1999 = vmatpush.bf16.msra.mxu0 %v5410_v29  ;;  %2012 = vmatpush.bf16.msra.mxu1 %v5538_v30  ;;  %v56_v29 = vld [vmem:[%s11503_s2 + $0x8] sm:$0xff]  ;;  %v5731_v30 = vld [vmem:[%s11505_s4 + $0x2d8] sm:$0xf0]  ;;  %v1144_v40 = vpop.f32.mrf.mxu3 }
  0xdb   :  { %2025 = vmatpush.bf16.msra.mxu2 %v5666_v37  ;;  %v5478_v37 = vor.u32 %v7200_v17, %v5475_v20  ;;  %v65_v46 = vsel %vm57_vm0, %v56_v29, 0.0  ;;  %v5734_v47 = vor.u32 %v7264_v25, %v5731_v30  ;;  %v5555_v17 = vld [vmem:[%s11505_s4 + $0x178] sm:$0xf0]  ;;  %v7284_v25 = vld [vmem:[%s11505_s4 + $0x36c] sm:$0xf] }
  0xdc   :  { %2038 = vmatpush.bf16.msra.mxu3 %v5794_v38  ;;  %v7196_v38 = vld [vmem:[%s11505_s4 + $0xac] sm:$0xf]  ;;  %v5411_v29 = vld [vmem:[%s11505_s4 + $0x58] sm:$0xf0] }
  0xdd   :  { %v5462_v56 = vor.u32 %v7196_v38, %v5459_v42  ;;  %v7216_v30 = vld [vmem:[%s11505_s4 + $0x14c] sm:$0xf]  ;;  %v5414_v59 = vor.u32 %v7184_v28, %v5411_v29  ;;  %v5507_v29 = vld [vmem:[%s11505_s4 + $0x118] sm:$0xf0] }
  0xde   :  { %2000 = vmatpush.bf16.msra.mxu0 %v5394_v50  ;;  %2013 = vmatpush.bf16.msra.mxu1 %v5522_v51  ;;  %v5587_v50 = vld [vmem:[%s11505_s4 + $0x1b8] sm:$0xf0]  ;;  %v7260_v51 = vld [vmem:[%s11505_s4 + $0x2ac] sm:$0xf] }
  0xdf   :  { %2026 = vmatpush.bf16.msra.mxu2 %v5650_v54  ;;  %v66_v54 = vrot.slane %v65_v46, 4  ;;  %v5590_v57 = vor.u32 %v7228_v49, %v5587_v50  ;;  %v5718_v61 = vor.u32 %v7260_v51, %v5715_v32  ;;  %v84_v38 = vld [vmem:[%s11504_s3 + $0x8] sm:$0xff]  ;;  %v5814_v49 = vor.u32 %v7284_v25, %v5811_v26  ;;  %v5667_v50 = vld [vmem:[%s11505_s4 + $0x258] sm:$0xf0] }
  0xe0   :  { %2039 = vmatpush.bf16.msra.mxu3 %v5778_v55  ;;  %v7785_v55 = vmov 8.0   ;;  %v88_v36 = vsel %vm57_vm0, %v84_v38, 0.0  ;;  %v7212_v4 = vld [vmem:[%s11505_s4 + $0x12c] sm:$0xf]  ;;  %v5379_v25 = vld [vmem:[%s11505_s4 + $0x18] sm:$0xf0] }
  0xe1   :  { %7755 = vrcp.f32 %v7785_v55  ;;  %v67_v12 = vadd.f32 %v66_v54, %v65_v46  ;;  %v7248_v46 = vld [vmem:[%s11505_s4 + $0x24c] sm:$0xf]  ;;  %v5795_v55 = vld [vmem:[%s11505_s4 + $0x358] sm:$0xf0] }
  0xe2   :  { %2001 = vmatpush.bf16.msra.mxu0 %v5378_v7  ;;  %2014 = vmatpush.bf16.msra.mxu1 %v5506_v10  ;;  %v7188_v7 = vld [vmem:[%s11505_s4 + $0x6c] sm:$0xf]  ;;  %v5427_v10 = vld [vmem:[%s11505_s4 + $0x78] sm:$0xf0] }
  0xe3   :  { %2027 = vmatpush.bf16.msra.mxu2 %v5634_v15  ;;  %v5574_v15 = vor.u32 %v7224_v63, %v5571_v0  ;;  %v68_v34 = vrot.slane %v67_v12, 2  ;;  %v5430_v40 = vor.u32 %v7188_v7, %v5427_v10  ;;  %v7280_v54 = vld [vmem:[%s11505_s4 + $0x34c] sm:$0xf]  ;;  %v62_v63 = vadd.f32 %v61_v33, %v60_v11 }
  0xe4   :  { %2040 = vmatpush.bf16.msra.mxu3 %v5762_v16  ;;  %v7220_v16 = vld [vmem:[%s11505_s4 + $0x16c] sm:$0xf] }
  0xe5   :  { %2002 = vmatmul.bf16.vlgmr.msra.gmra.mxu0 %v8912_v43  ;;  %2015 = vmatmul.bf16.vlgmr.msra.gmra.mxu1 %v8929_v31  ;;  %v69_v0 = vadd.f32 %v68_v34, %v67_v12  ;;  %v63_v26 = vrot.slane %v62_v63, 1  ;;  %v7208_v28 = vld [vmem:[%s11505_s4 + $0x10c] sm:$0xf] }
  0xe6   :  { %2046 = vmatpush.bf16.msrb.mxu0 %v5494_v18  ;;  %2059 = vmatpush.bf16.msrb.mxu1 %v5622_v19  ;;  %v7252_v18 = vld [vmem:[%s11505_s4 + $0x26c] sm:$0xf]  ;;  %v1155_v19 = vpop.f32.mrf.mxu0  ;;  %v1168_v20 = vpop.f32.mrf.mxu1 }
  0xe7   :  { %2072 = vmatpush.bf16.msrb.mxu2 %v5750_v23  ;;  %2041 = vmatmul.bf16.vlgmr.msra.gmra.mxu3 %v8933_v35  ;;  %v9406_v21 = vpop.eup %7755  ;;  %v5830_v23 = vor.u32 %v7288_v5, %v5827_v6  ;;  %v1169_v27 = vadd.f32 %v1168_v20, %v1155_v19  ;;  %v5523_v5 = vld [vmem:[%s11505_s4 + $0x138] sm:$0xf0] }
  0xe8   :  { %2085 = vmatpush.bf16.msrb.mxu3 %v5878_v24  ;;  %2028 = vmatmul.bf16.vlgmr.msra.gmra.mxu2 %v8916_v44  ;;  %v5683_v24 = vld [vmem:[%s11505_s4 + $0x278] sm:$0xf0]  ;;  %vm77_vm1 = vweird.f32 %v9406_v21 }
  0xe9   :  { %v5686_v42 = vor.u32 %v7252_v18, %v5683_v24  ;;  %v1181_v51 = vpop.f32.mrf.mxu2  ;;  %v7276_v18 = vld [vmem:[%s11505_s4 + $0x32c] sm:$0xf]  ;;  %v5779_v19 = vld [vmem:[%s11505_s4 + $0x338] sm:$0xf0] }
  0xea   :  { %2047 = vmatpush.bf16.msrb.mxu0 %v5478_v37  ;;  %2060 = vmatpush.bf16.msrb.mxu1 %v5606_v41  ;;  %v83_v37 = vld [vmem:[%s11504_s3] sm:$0xff]  ;;  %v5558_v41 = vor.u32 %v7220_v16, %v5555_v17  ;;  %v1194_v32 = vpop.f32.mrf.mxu3  ;;  %v7244_v16 = vld [vmem:[%s11505_s4 + $0x22c] sm:$0xf]  ;;  %v5651_v17 = vld [vmem:[%s11505_s4 + $0x238] sm:$0xf0]  ;;  %v5782_v39 = vor.u32 %v7276_v18, %v5779_v19 }
  0xeb   :  { %2073 = vmatpush.bf16.msrb.mxu2 %v5734_v47  ;;  %v73_v47 = vmul.f32 8.0, %v9406_v21  ;;  %v87_v52 = vsel %vm57_vm0, %v83_v37, 0.0  ;;  %v7176_v24 = vld [vmem:[%s11505_s4 + $0xc] sm:$0xf]  ;;  %v7786_v37 = vmov 16.0   ;;  %v5654_v38 = vor.u32 %v7244_v16, %v5651_v17 }
  0xec   :  { %2086 = vmatpush.bf16.msrb.mxu3 %v5862_v48  ;;  %v86_v48 = vld [vmem:[%s11504_s3 + $0x18] sm:$0xff]  ;;  %v89_v11 = vadd.f32 %v88_v36, %v87_v52  ;;  %7757 = vrcp.f32 %v7786_v37  ;;  %v5899_v52 = vld [vmem:[%s11507_s6 + $0x30] sm:$0xf0]  ;;  %v64_v36 = vadd.f32 %v63_v26, %v62_v63  ;;  %v7443_v16 = vld [vmem:[%s11508_s7 + $0x24] sm:$0xf] }
  0xed   :  { %v97_v58 = vsel %vm57_vm0, %v86_v48, 0.0  ;;  %v5897_v48 = vld [vmem:[%s11507_s6 + $0x20] sm:$0xf]  ;;  %v5907_v63 = vld [vmem:[%s11507_s6 + $0x38] sm:$0xf0] }
  0xee   :  { %2048 = vmatpush.bf16.msrb.mxu0 %v5462_v56  ;;  %2061 = vmatpush.bf16.msrb.mxu1 %v5590_v57  ;;  %v1182_v56 = vadd.f32 %v1181_v51, %v1169_v27  ;;  %v74_v57 = vsub.f32 1.0, %v73_v47  ;;  %v1157_v6 = vpop.f32.mrf.mxu0  ;;  %v1170_v7 = vpop.f32.mrf.mxu1  ;;  %v98_v12 = vadd.f32 %v97_v58, %v96_v53  ;;  %v70_v27 = vrot.slane %v69_v0, 1  ;;  %v5763_v47 = vld [vmem:[%s11505_s4 + $0x318] sm:$0xf0]  ;;  %v7437_v51 = vld [vmem:[%s11507_s6 + $0x2c] sm:$0xf0] }
  0xef   :  { %2074 = vmatpush.bf16.msrb.mxu2 %v5718_v61  ;;  %v5542_v61 = vor.u32 %v7216_v30, %v5539_v45  ;;  %v90_v33 = vrot.slane %v89_v11, 4  ;;  %v7431_v6 = vld [vmem:[%s11507_s6 + $0x4] sm:$0xf]  ;;  %v5883_v7 = vld [vmem:[%s11507_s6 + $0x10] sm:$0xf0] }
  0xf0   :  { %2087 = vmatpush.bf16.msrb.mxu3 %v5846_v62  ;;  %v7180_v62 = vld [vmem:[%s11505_s4 + $0x2c] sm:$0xf]  ;;  %v75_v10 = vmul.f32 %v9406_v21, %v74_v57  ;;  %v9483_v20 = vadd.f32 %v1194_v32, %v1182_v56  ;;  %v99_v34 = vrot.slane %v98_v12, 4  ;;  %v7435_v32 = vld [vmem:[%s11507_s6 + $0x24] sm:$0xf]  ;;  %v71_v53 = vadd.f32 %v70_v27, %v69_v0 }
  0xf1   :  { %v91_v56 = vadd.f32 %v90_v33, %v89_v11  ;;  %v7445_v11 = vld [vmem:[%s11508_s7 + $0x2c] sm:$0xf0]  ;;  %v5935_v17 = vld [vmem:[%s11508_s7 + $0x30] sm:$0xf0]  ;;  %v5891_v26 = vld [vmem:[%s11507_s6 + $0x18] sm:$0xf0] }
  0xf2   :  { %2049 = vmatpush.bf16.msrb.mxu0 %v5446_v13  ;;  %2062 = vmatpush.bf16.msrb.mxu1 %v5574_v15  ;;  %v5670_v13 = vor.u32 %v7248_v46, %v5667_v50  ;;  %v5798_v15 = vor.u32 %v7280_v54, %v5795_v55  ;;  %v76_v30 = vadd.f32 %v9406_v21, %v75_v10  ;;  %v1196_v45 = vpop.f32.mrf.mxu3  ;;  %v7272_v46 = vld [vmem:[%s11505_s4 + $0x30c] sm:$0xf]  ;;  %v5905_v54 = vld [vmem:[%s11507_s6 + $0x28] sm:$0xf]  ;;  %v9536_v0 = vpop.eup %7757  ;;  %v5933_v10 = vld [vmem:[%s11508_s7 + $0x20] sm:$0xf] }
  0xf3   :  { %2075 = vmatpush.bf16.msrb.mxu2 %v5702_v22  ;;  %v5398_v22 = vor.u32 %v7180_v62, %v5395_v3  ;;  %v5510_v50 = vor.u32 %v7208_v28, %v5507_v29  ;;  %v100_v57 = vadd.f32 %v99_v34, %v98_v12  ;;  %v7436_v62 = vld [vmem:[%s11507_s6 + $0x2c] sm:$0xf]  ;;  %v5902_v3 = vor.u32 %v7435_v32, %v5899_v52  ;;  %v7446_v33 = vld [vmem:[%s11508_s7 + $0x34] sm:$0xf0]  ;;  %v7441_v45 = vld [vmem:[%s11508_s7 + $0xc] sm:$0xf0] }
  0xf4   :  { %2088 = vmatpush.bf16.msrb.mxu3 %v5830_v23  ;;  %v5526_v23 = vor.u32 %v7212_v4, %v5523_v5  ;;  %v78_v55 = vsel %vm77_vm1, %v9406_v21, %v76_v30  ;;  %v5898_v21 = vor.u32 %v7437_v51, %v5897_v48  ;;  %v5881_v4 = vld [vmem:[%s11507_s6] sm:$0xf]  ;;  %v7433_v5 = vld [vmem:[%s11507_s6 + $0xc] sm:$0xf0]  ;;  %v92_v19 = vrot.slane %v91_v56, 2 }
  0xf5   :  { %v79_v12 = vmul.f32 %v78_v55, %v64_v36  ;;  %v80_v18 = vmul.f32 %v78_v55, %v71_v53  ;;  %v106_v27 = vmul.f32 16.0, %v9536_v0  ;;  %v5882_v28 = vor.u32 %v7433_v5, %v5881_v4  ;;  %v5941_v30 = vld [vmem:[%s11508_s7 + $0x28] sm:$0xf]  ;;  %v7444_v34 = vld [vmem:[%s11508_s7 + $0x2c] sm:$0xf] }
  0xf6   :  { %2050 = vmatpush.bf16.msrb.mxu0 %v5430_v40  ;;  %2063 = vmatpush.bf16.msrb.mxu1 %v5558_v41  ;;  %v7240_v40 = vld [vmem:[%s11505_s4 + $0x20c] sm:$0xf]  ;;  %v5635_v41 = vld [vmem:[%s11505_s4 + $0x218] sm:$0xf0]  ;;  %v5886_v29 = vor.u32 %v7431_v6, %v5883_v7  ;;  %v5934_v37 = vor.u32 %v7445_v11, %v5933_v10  ;;  %v5942_v36 = vor.u32 %v7446_v33, %v5941_v30  ;;  %vm110_vm3 = vweird.f32 %v9536_v0 }
  0xf7   :  { %2076 = vmatpush.bf16.msrb.mxu2 %v5686_v42  ;;  %v1183_v42 = vpop.f32.mrf.mxu2  ;;  %v5638_v58 = vor.u32 %v7240_v40, %v5635_v41  ;;  %v5917_v40 = vld [vmem:[%s11508_s7] sm:$0xf]  ;;  %v81_v41 = vpack.c.bf16 %v79_v12, %v79_v12  ;;  %v82_v48 = vpack.c.bf16 %v80_v18, %v80_v18 }
  0xf8   :  { %2089 = vmatpush.bf16.msrb.mxu3 %v5814_v49  ;;  %v5382_v49 = vor.u32 %v7176_v24, %v5379_v25  ;;  %v5910_v24 = vor.u32 %v7436_v62, %v5907_v63  ;;  %v7432_v25 = vld [vmem:[%s11507_s6 + $0xc] sm:$0xf]  ;;  %v107_v42 = vsub.f32 1.0, %v106_v27  ;;  %v5918_v55 = vor.u32 %v7441_v45, %v5917_v40  ;;  %v6193_v18 = vld [vmem:[%s11511_s10 + $0x1e0] sm:$0xf] }
  0xf9   :  { %v5894_v32 = vor.u32 %v7432_v25, %v5891_v26  ;;  %v2109_v62 = vunpack.c.l.b16 %v82_v48  ;;  %v7701_v25 = vld [vmem:[%s11511_s10 + $0x3ec] sm:$0xf0] }
  0xfa   :  { %2051 = vmatpush.bf16.msrb.mxu0 %v5414_v59  ;;  %2064 = vmatpush.bf16.msrb.mxu1 %v5542_v61  ;;  %v5766_v59 = vor.u32 %v7272_v46, %v5763_v47  ;;  %v7438_v61 = vld [vmem:[%s11507_s6 + $0x34] sm:$0xf0]  ;;  %v7439_v46 = vld [vmem:[%s11508_s7 + $0x4] sm:$0xf]  ;;  %v5919_v47 = vld [vmem:[%s11508_s7 + $0x10] sm:$0xf0]  ;;  %v108_v52 = vmul.f32 %v9536_v0, %v107_v42 }
  0xfb   :  { %2077 = vmatpush.bf16.msrb.mxu2 %v5670_v13  ;;  %v5889_v13 = vld [vmem:[%s11507_s6 + $0x8] sm:$0xf]  ;;  %v6177_v42 = vld [vmem:[%s11511_s10 + $0x1c0] sm:$0xf]  ;;  %v7633_v45 = vld [vmem:[%s11511_s10 + $0x1cc] sm:$0xf0] }
  0xfc   :  { %2090 = vmatpush.bf16.msrb.mxu3 %v5798_v15  ;;  %v7434_v15 = vld [vmem:[%s11507_s6 + $0x14] sm:$0xf0]  ;;  %v109_v4 = vadd.f32 %v9536_v0, %v108_v52 }
  0xfd   :  { %v5890_v51 = vor.u32 %v7434_v15, %v5889_v13  ;;  %v6065_v15 = vld [vmem:[%s11511_s10 + $0xe0] sm:$0xf] }
  0xfe   :  { %2052 = vmatpush.bf16.msrb.mxu0 %v5398_v22  ;;  %2065 = vmatpush.bf16.msrb.mxu1 %v5526_v23  ;;  %v101_v22 = vrot.slane %v100_v57, 2  ;;  %v5906_v23 = vor.u32 %v7438_v61, %v5905_v54  ;;  %v5925_v54 = vld [vmem:[%s11508_s7 + $0x8] sm:$0xf]  ;;  %v2108_v61 = vunpack.c.l.b16 %v81_v41 }
  0xff   :  { %2078 = vmatpush.bf16.msrb.mxu2 %v5654_v38  ;;  %v5938_v38 = vor.u32 %v7443_v16, %v5935_v17  ;;  %v7605_v16 = vld [vmem:[%s11511_s10 + $0xec] sm:$0xf0]  ;;  %v111_v17 = vsel %vm110_vm3, %v9536_v0, %v109_v4 }
 0x100   :  { %2091 = vmatpush.bf16.msrb.mxu3 %v5782_v39  ;;  %v5943_v39 = vld [vmem:[%s11508_s7 + $0x38] sm:$0xf0]  ;;  %v2111_v11 = vsel %vm2110_vm2, %v2109_v62, %v2108_v61  ;;  %v7669_v0 = vld [vmem:[%s11511_s10 + $0x2ec] sm:$0xf0]  ;;  %v6066_v33 = vor.u32 %v7605_v16, %v6065_v15  ;;  %v6289_v61 = vld [vmem:[%s11511_s10 + $0x2a0] sm:$0xf] }
 0x101   :  { %v5946_v53 = vor.u32 %v7444_v34, %v5943_v39  ;;  %v7661_v62 = vld [vmem:[%s11511_s10 + $0x2ac] sm:$0xf0]  ;;  %v6145_v16 = vld [vmem:[%s11511_s10 + $0x180] sm:$0xf] }
 0x102   :  { %2053 = vmatpush.bf16.msrb.mxu0 %v5382_v49  ;;  %2066 = vmatpush.bf16.msrb.mxu1 %v5510_v50  ;;  %v93_v49 = vadd.f32 %v92_v19, %v91_v56  ;;  %v102_v50 = vadd.f32 %v101_v22, %v100_v57  ;;  %v7442_v56 = vld [vmem:[%s11508_s7 + $0x14] sm:$0xf0]  ;;  %v7440_v57 = vld [vmem:[%s11508_s7 + $0xc] sm:$0xf]  ;;  %v1220_v7 = vpop.f32.mrf.mxu1  ;;  %v7637_v19 = vld [vmem:[%s11511_s10 + $0x1ec] sm:$0xf0] }
 0x103   :  { %2079 = vmatpush.bf16.msrb.mxu2 %v5638_v58  ;;  %v5922_v58 = vor.u32 %v7439_v46, %v5919_v47  ;;  %v5926_v5 = vor.u32 %v7442_v56, %v5925_v54  ;;  %v6321_v22 = vld [vmem:[%s11511_s10 + $0x2e0] sm:$0xf]  ;;  %v6194_v34 = vor.u32 %v7637_v19, %v6193_v18  ;;  %v7657_v19 = vld [vmem:[%s11511_s10 + $0x28c] sm:$0xf0] }
 0x104   :  { %2092 = vmatpush.bf16.msrb.mxu3 %v5766_v59  ;;  %v5927_v59 = vld [vmem:[%s11508_s7 + $0x18] sm:$0xf0]  ;;  %v94_v63 = vrot.slane %v93_v49, 1  ;;  %v6322_v40 = vor.u32 %v7669_v0, %v6321_v22  ;;  %v6305_v46 = vld [vmem:[%s11511_s10 + $0x2c0] sm:$0xf] }
 0x105   :  { %2054 = vmatmul.bf16.vlgmr.msrb.gmra.mxu0 %v8912_v43  ;;  %2067 = vmatmul.bf16.vlgmr.msrb.gmra.mxu1 %v8929_v31  ;;  %v5930_v6 = vor.u32 %v7440_v57, %v5927_v59  ;;  %v6033_v54 = vld [vmem:[%s11511_s10 + $0xa0] sm:$0xf]  ;;  %v7629_v59 = vld [vmem:[%s11511_s10 + $0x1ac] sm:$0xf0] }
 0x106   :  { %2162 = vmatpush.bf16.msra.mxu0 %v5898_v21  ;;  %2175 = vmatpush.bf16.msra.mxu1 %v5902_v3  ;;  %v103_v21 = vrot.slane %v102_v50, 1  ;;  %v1207_v3 = vpop.f32.mrf.mxu0  ;;  %v95_v12 = vadd.f32 %v94_v63, %v93_v49  ;;  %v7665_v49 = vld [vmem:[%s11511_s10 + $0x2cc] sm:$0xf0]  ;;  %v6161_v57 = vld [vmem:[%s11511_s10 + $0x1a0] sm:$0xf] }
 0x107   :  { %2080 = vmatmul.bf16.vlgmr.msrb.gmra.mxu2 %v8916_v44  ;;  %2093 = vmatmul.bf16.vlgmr.msrb.gmra.mxu3 %v8933_v35  ;;  %v1221_v10 = vadd.f32 %v1220_v7, %v1207_v3  ;;  %v6417_v63 = vld [vmem:[%s11511_s10 + $0x3a0] sm:$0xf]  ;;  %v7689_v0 = vld [vmem:[%s11511_s10 + $0x38c] sm:$0xf0] }
 0x108   :  { %2188 = vmatpush.bf16.msra.mxu2 %v5906_v23  ;;  %2201 = vmatpush.bf16.msra.mxu3 %v5910_v24  ;;  %v104_v13 = vadd.f32 %v103_v21, %v102_v50  ;;  %v9635_v23 = vpack.c.b16 %v2111_v11, %v2111_v11  ;;  %v6449_v24 = vld [vmem:[%s11511_s10 + $0x3e0] sm:$0xf]  ;;  %v7693_v21 = vld [vmem:[%s11511_s10 + $0x3ac] sm:$0xf0] }
 0x109   :  { %v6450_v41 = vor.u32 %v7701_v25, %v6449_v24  ;;  %v6433_v50 = vld [vmem:[%s11511_s10 + $0x3c0] sm:$0xf]  ;;  %v6418_v15 = vor.u32 %v7693_v21, %v6417_v63  ;;  %v7613_v63 = vld [vmem:[%s11511_s10 + $0x12c] sm:$0xf0] }
 0x10a   :  { %2163 = vmatpush.bf16.msra.mxu0 %v5882_v28  ;;  %2176 = vmatpush.bf16.msra.mxu1 %v5886_v29  ;;  %v1246_v28 = vpop.f32.mrf.mxu3  ;;  %v112_v29 = vmul.f32 %v111_v17, %v95_v12  ;;  %v113_v30 = vmul.f32 %v111_v17, %v104_v13  ;;  %v1222_v48 = vpop.f32.mrf.mxu1  ;;  %v6017_v11 = vld [vmem:[%s11511_s10 + $0x80] sm:$0xf]  ;;  %v7593_v12 = vld [vmem:[%s11511_s10 + $0x8c] sm:$0xf0]  ;;  %v6290_v13 = vor.u32 %v7661_v62, %v6289_v61 }
 0x10b   :  { %v1233_v26 = vpop.f32.mrf.mxu2  ;;  %v7625_v17 = vld [vmem:[%s11511_s10 + $0x18c] sm:$0xf0]  ;;  %v6273_v18 = vld [vmem:[%s11511_s10 + $0x280] sm:$0xf]  ;;  %v6018_v25 = vor.u32 %v7593_v12, %v6017_v11 }
 0x10c   :  { %2189 = vmatpush.bf16.msra.mxu2 %v5890_v51  ;;  %2202 = vmatpush.bf16.msra.mxu3 %v5894_v32  ;;  %v1234_v27 = vadd.f32 %v1233_v26, %v1221_v10  ;;  %v7697_v51 = vld [vmem:[%s11511_s10 + $0x3cc] sm:$0xf0]  ;;  %v114_v32 = vpack.c.bf16 %v112_v29, %v112_v29  ;;  %v115_v52 = vpack.c.bf16 %v113_v30, %v113_v30  ;;  %v6401_v22 = vld [vmem:[%s11511_s10 + $0x380] sm:$0xf] }
 0x10d   :  { %v6434_v56 = vor.u32 %v7697_v51, %v6433_v50  ;;  %v6162_v10 = vor.u32 %v7629_v59, %v6161_v57  ;;  %v6146_v26 = vor.u32 %v7625_v17, %v6145_v16  ;;  %v6274_v29 = vor.u32 %v7657_v19, %v6273_v18  ;;  %v7585_v48 = vld [vmem:[%s11511_s10 + $0x4c] sm:$0xf0]  ;;  %v6113_v51 = vld [vmem:[%s11511_s10 + $0x140] sm:$0xf] }
 0x10e   :  { %2275 = vmatpush.bf16.msrb.mxu0 %v5934_v37  ;;  %2288 = vmatpush.bf16.msrb.mxu1 %v5938_v38  ;;  %v6049_v37 = vld [vmem:[%s11511_s10 + $0xc0] sm:$0xf]  ;;  %v7601_v38 = vld [vmem:[%s11511_s10 + $0xcc] sm:$0xf0]  ;;  %v1209_v39 = vpop.f32.mrf.mxu0  ;;  %v9661_v47 = vadd.f32 %v1246_v28, %v1234_v27  ;;  %v2222_v4 = vunpack.c.l.b16 %v114_v32  ;;  %v6402_v30 = vor.u32 %v7689_v0, %v6401_v22 }
 0x10f   :  { %v6001_v27 = vld [vmem:[%s11511_s10 + $0x60] sm:$0xf]  ;;  %v7589_v28 = vld [vmem:[%s11511_s10 + $0x6c] sm:$0xf0] }
 0x110   :  { %2301 = vmatpush.bf16.msrb.mxu2 %v5942_v36  ;;  %2314 = vmatpush.bf16.msrb.mxu3 %v5946_v53  ;;  %v6050_v36 = vor.u32 %v7601_v38, %v6049_v37  ;;  %v6178_v53 = vor.u32 %v7633_v45, %v6177_v42  ;;  %v6257_v37 = vld [vmem:[%s11511_s10 + $0x260] sm:$0xf]  ;;  %v7653_v39 = vld [vmem:[%s11511_s10 + $0x26c] sm:$0xf0]  ;;  %v6002_v42 = vor.u32 %v7589_v28, %v6001_v27  ;;  %v6067_v27 = vld [vmem:[%s11511_s10 + $0xf0] sm:$0xf0] }
 0x111   :  { %v7617_v32 = vld [vmem:[%s11511_s10 + $0x14c] sm:$0xf0]  ;;  %v6097_v62 = vld [vmem:[%s11511_s10 + $0x120] sm:$0xf]  ;;  %v7635_v28 = vld [vmem:[%s11511_s10 + $0x1e4] sm:$0xf] }
 0x112   :  { %2276 = vmatpush.bf16.msrb.mxu0 %v5918_v55  ;;  %2289 = vmatpush.bf16.msrb.mxu1 %v5922_v58  ;;  %v7597_v55 = vld [vmem:[%s11511_s10 + $0xac] sm:$0xf0]  ;;  %v6306_v58 = vor.u32 %v7665_v49, %v6305_v46  ;;  %v5985_v46 = vld [vmem:[%s11511_s10 + $0x40] sm:$0xf]  ;;  %v6258_v49 = vor.u32 %v7653_v39, %v6257_v37  ;;  %v6323_v39 = vld [vmem:[%s11511_s10 + $0x2f0] sm:$0xf0] }
 0x113   :  { %v1235_v3 = vpop.f32.mrf.mxu2  ;;  %v6034_v7 = vor.u32 %v7597_v55, %v6033_v54  ;;  %v7681_v54 = vld [vmem:[%s11511_s10 + $0x34c] sm:$0xf0]  ;;  %v5986_v55 = vor.u32 %v7585_v48, %v5985_v46  ;;  %v6225_v21 = vld [vmem:[%s11511_s10 + $0x220] sm:$0xf] }
 0x114   :  { %2302 = vmatpush.bf16.msrb.mxu2 %v5926_v5  ;;  %2315 = vmatpush.bf16.msrb.mxu3 %v5930_v6  ;;  %v2223_v5 = vunpack.c.l.b16 %v115_v52  ;;  %v1248_v6 = vpop.f32.mrf.mxu3  ;;  %v6241_v52 = vld [vmem:[%s11511_s10 + $0x240] sm:$0xf]  ;;  %v7581_v57 = vld [vmem:[%s11511_s10 + $0x2c] sm:$0xf0] }
 0x115   :  { %5911 = vmatmul.msk.bf16.vlgmr.msra.gmra.mxu0 %vm57_vm0, %v9635_v23  ;;  %5912 = vmatmul.msk.bf16.vlgmr.msra.gmra.mxu1 %vm57_vm0, %v9635_v23  ;;  %v7677_v6 = vld [vmem:[%s11511_s10 + $0x32c] sm:$0xf0]  ;;  %v5953_v11 = vld [vmem:[%s11511_s10] sm:$0xf] }
 0x116   :  { %3239 = vmatpush.bf16.msra.mxu0 %v6066_v33  ;;  %3252 = vmatpush.bf16.msra.mxu1 %v6194_v34  ;;  %v2224_v24 = vsel %vm2110_vm2, %v2223_v5, %v2222_v4  ;;  %v6129_v33 = vld [vmem:[%s11511_s10 + $0x160] sm:$0xf]  ;;  %v7621_v34 = vld [vmem:[%s11511_s10 + $0x16c] sm:$0xf0] }
 0x117   :  { %5913 = vmatmul.msk.bf16.vlgmr.msra.gmra.mxu2 %vm57_vm0, %v9635_v23  ;;  %5914 = vmatmul.msk.bf16.vlgmr.msra.gmra.mxu3 %vm57_vm0, %v9635_v23  ;;  %v9744_v38 = vpack.c.b16 %v2224_v24, %v2224_v24  ;;  %v6130_v45 = vor.u32 %v7621_v34, %v6129_v33  ;;  %v7645_v4 = vld [vmem:[%s11511_s10 + $0x22c] sm:$0xf0]  ;;  %v6353_v5 = vld [vmem:[%s11511_s10 + $0x320] sm:$0xf] }
 0x118   :  { %3265 = vmatpush.bf16.msra.mxu2 %v6322_v40  ;;  %3278 = vmatpush.bf16.msra.mxu3 %v6450_v41  ;;  %v6385_v40 = vld [vmem:[%s11511_s10 + $0x360] sm:$0xf]  ;;  %v7685_v41 = vld [vmem:[%s11511_s10 + $0x36c] sm:$0xf0]  ;;  %v6226_v18 = vor.u32 %v7645_v4, %v6225_v21  ;;  %v6354_v19 = vor.u32 %v7677_v6, %v6353_v5  ;;  %v6035_v4 = vld [vmem:[%s11511_s10 + $0xb0] sm:$0xf0] }
 0x119   :  { %v6386_v50 = vor.u32 %v7685_v41, %v6385_v40  ;;  %v6081_v16 = vld [vmem:[%s11511_s10 + $0x100] sm:$0xf]  ;;  %v7641_v0 = vld [vmem:[%s11511_s10 + $0x20c] sm:$0xf0]  ;;  %v7699_v40 = vld [vmem:[%s11511_s10 + $0x3e4] sm:$0xf] }
 0x11a   :  { %3240 = vmatpush.bf16.msra.mxu0 %v6050_v36  ;;  %3253 = vmatpush.bf16.msra.mxu1 %v6178_v53  ;;  %v7649_v36 = vld [vmem:[%s11511_s10 + $0x24c] sm:$0xf0]  ;;  %v6369_v53 = vld [vmem:[%s11511_s10 + $0x340] sm:$0xf]  ;;  %v6451_v41 = vld [vmem:[%s11511_s10 + $0x3f0] sm:$0xf0] }
 0x11b   :  { %v6242_v59 = vor.u32 %v7649_v36, %v6241_v52  ;;  %v6370_v61 = vor.u32 %v7681_v54, %v6369_v53  ;;  %v6209_v22 = vld [vmem:[%s11511_s10 + $0x200] sm:$0xf]  ;;  %v6454_v53 = vor.u32 %v7699_v40, %v6451_v41 }
 0x11c   :  { %3266 = vmatpush.bf16.msra.mxu2 %v6306_v58  ;;  %3279 = vmatpush.bf16.msra.mxu3 %v6434_v56  ;;  %v6114_v58 = vor.u32 %v7617_v32, %v6113_v51  ;;  %v5969_v56 = vld [vmem:[%s11511_s10 + $0x20] sm:$0xf]  ;;  %v7599_v51 = vld [vmem:[%s11511_s10 + $0xc4] sm:$0xf]  ;;  %v6051_v32 = vld [vmem:[%s11511_s10 + $0xd0] sm:$0xf0] }
 0x11d   :  { %v5970_v12 = vor.u32 %v7581_v57, %v5969_v56  ;;  %v6337_v24 = vld [vmem:[%s11511_s10 + $0x300] sm:$0xf]  ;;  %v7663_v56 = vld [vmem:[%s11511_s10 + $0x2c4] sm:$0xf] }
 0x11e   :  { %3241 = vmatpush.bf16.msra.mxu0 %v6034_v7  ;;  %3254 = vmatpush.bf16.msra.mxu1 %v6162_v10 }
 0x120   :  { %3267 = vmatpush.bf16.msra.mxu2 %v6290_v13  ;;  %3280 = vmatpush.bf16.msra.mxu3 %v6418_v15  ;;  %v6098_v13 = vor.u32 %v7613_v63, %v6097_v62  ;;  %v7577_v15 = vld [vmem:[%s11511_s10 + $0xc] sm:$0xf0]  ;;  %v6435_v62 = vld [vmem:[%s11511_s10 + $0x3d0] sm:$0xf0]  ;;  %v6054_v63 = vor.u32 %v7599_v51, %v6051_v32 }
 0x121   :  { %v5954_v34 = vor.u32 %v7577_v15, %v5953_v11  ;;  %v7659_v11 = vld [vmem:[%s11511_s10 + $0x2a4] sm:$0xf]  ;;  %v6419_v15 = vld [vmem:[%s11511_s10 + $0x3b0] sm:$0xf0] }
 0x122   :  { %3242 = vmatpush.bf16.msra.mxu0 %v6018_v25  ;;  %3255 = vmatpush.bf16.msra.mxu1 %v6146_v26  ;;  %v1899_v3 = vpop.f32.mrf.mxu0  ;;  %v1912_v10 = vpop.f32.mrf.mxu1  ;;  %v7673_v25 = vld [vmem:[%s11511_s10 + $0x30c] sm:$0xf0]  ;;  %v7603_v26 = vld [vmem:[%s11511_s10 + $0xe4] sm:$0xf] }
 0x123   :  { %v1900_v7 = vadd.f32 %v1899_v3, %v9183_v60  ;;  %v7609_v60 = vld [vmem:[%s11511_s10 + $0x10c] sm:$0xf0]  ;;  %v6338_v46 = vor.u32 %v7673_v25, %v6337_v24  ;;  %v7595_v3 = vld [vmem:[%s11511_s10 + $0xa4] sm:$0xf] }
 0x124   :  { %3268 = vmatpush.bf16.msra.mxu2 %v6274_v29  ;;  %3281 = vmatpush.bf16.msra.mxu3 %v6402_v30  ;;  %v6195_v29 = vld [vmem:[%s11511_s10 + $0x1f0] sm:$0xf0]  ;;  %v7667_v30 = vld [vmem:[%s11511_s10 + $0x2e4] sm:$0xf]  ;;  %v6082_v37 = vor.u32 %v7609_v60, %v6081_v16 }
 0x125   :  { %5947 = vmatmul.msk.bf16.vlgmr.msrb.gmra.mxu0 %vm57_vm0, %v9744_v38  ;;  %5948 = vmatmul.msk.bf16.vlgmr.msrb.gmra.mxu1 %vm57_vm0, %v9744_v38  ;;  %v1913_v17 = vadd.f32 %v1912_v10, %v1900_v7  ;;  %v6326_v36 = vor.u32 %v7667_v30, %v6323_v39  ;;  %v7627_v7 = vld [vmem:[%s11511_s10 + $0x1a4] sm:$0xf]  ;;  %v6163_v10 = vld [vmem:[%s11511_s10 + $0x1b0] sm:$0xf0] }
 0x126   :  { %3243 = vmatpush.bf16.msra.mxu0 %v6002_v42  ;;  %3256 = vmatpush.bf16.msra.mxu1 %v6130_v45  ;;  %v6210_v45 = vor.u32 %v7641_v0, %v6209_v22  ;;  %v6019_v22 = vld [vmem:[%s11511_s10 + $0x90] sm:$0xf0]  ;;  %v7623_v25 = vld [vmem:[%s11511_s10 + $0x184] sm:$0xf] }
 0x127   :  { %5949 = vmatmul.msk.bf16.vlgmr.msrb.gmra.mxu2 %vm57_vm0, %v9744_v38  ;;  %5950 = vmatmul.msk.bf16.vlgmr.msrb.gmra.mxu3 %vm57_vm0, %v9744_v38  ;;  %v6403_v30 = vld [vmem:[%s11511_s10 + $0x390] sm:$0xf0] }
 0x128   :  { %3269 = vmatpush.bf16.msra.mxu2 %v6258_v49  ;;  %3282 = vmatpush.bf16.msra.mxu3 %v6386_v50  ;;  %v6070_v49 = vor.u32 %v7603_v26, %v6067_v27  ;;  %v6198_v50 = vor.u32 %v7635_v28, %v6195_v29  ;;  %v6147_v26 = vld [vmem:[%s11511_s10 + $0x190] sm:$0xf0]  ;;  %v7655_v27 = vld [vmem:[%s11511_s10 + $0x284] sm:$0xf] }
 0x129   :  { %v6275_v28 = vld [vmem:[%s11511_s10 + $0x290] sm:$0xf0]  ;;  %v7687_v29 = vld [vmem:[%s11511_s10 + $0x384] sm:$0xf] }
 0x12a   :  { %3244 = vmatpush.bf16.msra.mxu0 %v5986_v55  ;;  %3257 = vmatpush.bf16.msra.mxu1 %v6114_v58  ;;  %v1938_v48 = vpop.f32.mrf.mxu3  ;;  %v1901_v52 = vpop.f32.mrf.mxu0  ;;  %v7631_v55 = vld [vmem:[%s11511_s10 + $0x1c4] sm:$0xf]  ;;  %v6179_v58 = vld [vmem:[%s11511_s10 + $0x1d0] sm:$0xf0]  ;;  %v6278_v40 = vor.u32 %v7655_v27, %v6275_v28  ;;  %v6406_v41 = vor.u32 %v7687_v29, %v6403_v30 }
 0x12b   :  { %v1925_v33 = vpop.f32.mrf.mxu2  ;;  %v1914_v57 = vpop.f32.mrf.mxu1  ;;  %v6182_v21 = vor.u32 %v7631_v55, %v6179_v58  ;;  %v6003_v39 = vld [vmem:[%s11511_s10 + $0x70] sm:$0xf0]  ;;  %v7583_v52 = vld [vmem:[%s11511_s10 + $0x44] sm:$0xf] }
 0x12c   :  { %3270 = vmatpush.bf16.msra.mxu2 %v6242_v59  ;;  %3283 = vmatpush.bf16.msra.mxu3 %v6370_v61  ;;  %v1926_v42 = vadd.f32 %v1925_v33, %v1913_v17  ;;  %v6307_v59 = vld [vmem:[%s11511_s10 + $0x2d0] sm:$0xf0]  ;;  %v7695_v61 = vld [vmem:[%s11511_s10 + $0x3c4] sm:$0xf]  ;;  %v6038_v17 = vor.u32 %v7595_v3, %v6035_v4 }
 0x12d   :  { %v6310_v5 = vor.u32 %v7663_v56, %v6307_v59  ;;  %v6438_v6 = vor.u32 %v7695_v61, %v6435_v62  ;;  %v7615_v58 = vld [vmem:[%s11511_s10 + $0x144] sm:$0xf]  ;;  %v6115_v56 = vld [vmem:[%s11511_s10 + $0x150] sm:$0xf0] }
 0x12e   :  { %3245 = vmatpush.bf16.msra.mxu0 %v5970_v12  ;;  %3258 = vmatpush.bf16.msra.mxu1 %v6098_v13  ;;  %v9866_v54 = vadd.f32 %v1938_v48, %v1926_v42  ;;  %v6291_v12 = vld [vmem:[%s11511_s10 + $0x2b0] sm:$0xf0]  ;;  %v7691_v13 = vld [vmem:[%s11511_s10 + $0x3a4] sm:$0xf] }
 0x12f   :  { %v6294_v0 = vor.u32 %v7659_v11, %v6291_v12  ;;  %v6422_v24 = vor.u32 %v7691_v13, %v6419_v15  ;;  %v7619_v42 = vld [vmem:[%s11511_s10 + $0x164] sm:$0xf]  ;;  %v6259_v48 = vld [vmem:[%s11511_s10 + $0x270] sm:$0xf0] }
 0x130   :  { %3271 = vmatpush.bf16.msra.mxu2 %v6226_v18  ;;  %3284 = vmatpush.bf16.msra.mxu3 %v6354_v19  ;;  %v6166_v18 = vor.u32 %v7627_v7, %v6163_v10  ;;  %v7591_v19 = vld [vmem:[%s11511_s10 + $0x84] sm:$0xf]  ;;  %v6243_v59 = vld [vmem:[%s11511_s10 + $0x250] sm:$0xf0] }
 0x131   :  { %v6022_v33 = vor.u32 %v7591_v19, %v6019_v22  ;;  %v7647_v57 = vld [vmem:[%s11511_s10 + $0x244] sm:$0xf]  ;;  %v6371_v62 = vld [vmem:[%s11511_s10 + $0x350] sm:$0xf0] }
 0x132   :  { %3246 = vmatpush.bf16.msra.mxu0 %v5954_v34  ;;  %3259 = vmatpush.bf16.msra.mxu1 %v6082_v37  ;;  %v1940_v60 = vpop.f32.mrf.mxu3  ;;  %v6150_v34 = vor.u32 %v7623_v25, %v6147_v26  ;;  %v7587_v37 = vld [vmem:[%s11511_s10 + $0x64] sm:$0xf]  ;;  %v5971_v4 = vld [vmem:[%s11511_s10 + $0x30] sm:$0xf0] }
 0x133   :  { %v1927_v16 = vpop.f32.mrf.mxu2  ;;  %v6006_v51 = vor.u32 %v7587_v37, %v6003_v39  ;;  %v7679_v61 = vld [vmem:[%s11511_s10 + $0x344] sm:$0xf]  ;;  %v6099_v10 = vld [vmem:[%s11511_s10 + $0x130] sm:$0xf0]  ;;  %v7606_v37 = vld [vmem:[%s11511_s10 + $0xf4] sm:$0xf0] }
 0x134   :  { %3272 = vmatpush.bf16.msra.mxu2 %v6210_v45  ;;  %3285 = vmatpush.bf16.msra.mxu3 %v6338_v46  ;;  %v6131_v45 = vld [vmem:[%s11511_s10 + $0x170] sm:$0xf0]  ;;  %v7651_v46 = vld [vmem:[%s11511_s10 + $0x264] sm:$0xf]  ;;  %v6201_v39 = vld [vmem:[%s11511_s10 + $0x1e8] sm:$0xf] }
 0x135   :  { %3247 = vmatmul.bf16.vlgmr.msra.gmra.mxu0 %v8275_v8  ;;  %3260 = vmatmul.bf16.vlgmr.msra.gmra.mxu1 %v8277_v9  ;;  %v6134_v32 = vor.u32 %v7619_v42, %v6131_v45  ;;  %v7579_v3 = vld [vmem:[%s11511_s10 + $0x24] sm:$0xf]  ;;  %v6227_v13 = vld [vmem:[%s11511_s10 + $0x230] sm:$0xf0] }
 0x136   :  { %3291 = vmatpush.bf16.msrb.mxu0 %v6070_v49  ;;  %3304 = vmatpush.bf16.msrb.mxu1 %v6198_v50  ;;  %v7683_v49 = vld [vmem:[%s11511_s10 + $0x364] sm:$0xf]  ;;  %v6387_v50 = vld [vmem:[%s11511_s10 + $0x370] sm:$0xf0]  ;;  %v5974_v19 = vor.u32 %v7579_v3, %v5971_v4  ;;  %v6313_v3 = vld [vmem:[%s11511_s10 + $0x2c8] sm:$0xf] }
 0x137   :  { %3273 = vmatmul.bf16.vlgmr.msra.gmra.mxu2 %v8268_v1  ;;  %3286 = vmatmul.bf16.vlgmr.msra.gmra.mxu3 %v8270_v2  ;;  %v6390_v55 = vor.u32 %v7683_v49, %v6387_v50  ;;  %v7611_v7 = vld [vmem:[%s11511_s10 + $0x124] sm:$0xf]  ;;  %v6355_v16 = vld [vmem:[%s11511_s10 + $0x330] sm:$0xf0]  ;;  %v6457_v49 = vld [vmem:[%s11511_s10 + $0x3e8] sm:$0xf] }
 0x138   :  { %3317 = vmatpush.bf16.msrb.mxu2 %v6326_v36  ;;  %3330 = vmatpush.bf16.msrb.mxu3 %v6454_v53  ;;  %v5987_v36 = vld [vmem:[%s11511_s10 + $0x50] sm:$0xf0]  ;;  %v6262_v53 = vor.u32 %v7651_v46, %v6259_v48  ;;  %v7643_v11 = vld [vmem:[%s11511_s10 + $0x224] sm:$0xf]  ;;  %v6102_v22 = vor.u32 %v7611_v7, %v6099_v10  ;;  %v7670_v48 = vld [vmem:[%s11511_s10 + $0x2f4] sm:$0xf0] }
 0x139   :  { %v7675_v15 = vld [vmem:[%s11511_s10 + $0x324] sm:$0xf]  ;;  %v6230_v26 = vor.u32 %v7643_v11, %v6227_v13  ;;  %v6211_v29 = vld [vmem:[%s11511_s10 + $0x210] sm:$0xf0]  ;;  %v7702_v50 = vld [vmem:[%s11511_s10 + $0x3f4] sm:$0xf0] }
 0x13a   :  { %3292 = vmatpush.bf16.msrb.mxu0 %v6054_v63  ;;  %3305 = vmatpush.bf16.msrb.mxu1 %v6182_v21  ;;  %v5990_v63 = vor.u32 %v7583_v52, %v5987_v36  ;;  %v6118_v21 = vor.u32 %v7615_v58, %v6115_v56  ;;  %v6358_v27 = vor.u32 %v7675_v15, %v6355_v16  ;;  %v7639_v28 = vld [vmem:[%s11511_s10 + $0x204] sm:$0xf]  ;;  %v6057_v58 = vld [vmem:[%s11511_s10 + $0xc8] sm:$0xf]  ;;  %v7602_v56 = vld [vmem:[%s11511_s10 + $0xd4] sm:$0xf0] }
 0x13b   :  { %v7671_v30 = vld [vmem:[%s11511_s10 + $0x304] sm:$0xf]  ;;  %v7698_v7 = vld [vmem:[%s11511_s10 + $0x3d4] sm:$0xf0]  ;;  %v6058_v10 = vor.u32 %v7602_v56, %v6057_v58 }
 0x13c   :  { %3318 = vmatpush.bf16.msrb.mxu2 %v6310_v5  ;;  %3331 = vmatpush.bf16.msrb.mxu3 %v6438_v6  ;;  %v6246_v5 = vor.u32 %v7647_v57, %v6243_v59  ;;  %v6374_v6 = vor.u32 %v7679_v61, %v6371_v62  ;;  %v6458_v61 = vor.u32 %v7702_v50, %v6457_v49  ;;  %v7598_v13 = vld [vmem:[%s11511_s10 + $0xb4] sm:$0xf0] }
 0x13e   :  { %3293 = vmatpush.bf16.msrb.mxu0 %v6038_v17  ;;  %3306 = vmatpush.bf16.msrb.mxu1 %v6166_v18  ;;  %v7575_v18 = vld [vmem:[%s11511_s10 + $0x4] sm:$0xf] }
 0x140   :  { %3319 = vmatpush.bf16.msrb.mxu2 %v6294_v0  ;;  %3332 = vmatpush.bf16.msrb.mxu3 %v6422_v24  ;;  %v5955_v0 = vld [vmem:[%s11511_s10 + $0x10] sm:$0xf0]  ;;  %v7607_v24 = vld [vmem:[%s11511_s10 + $0x104] sm:$0xf] }
 0x141   :  { %v5958_v45 = vor.u32 %v7575_v18, %v5955_v0  ;;  %v6297_v18 = vld [vmem:[%s11511_s10 + $0x2a8] sm:$0xf]  ;;  %v7694_v0 = vld [vmem:[%s11511_s10 + $0x3b4] sm:$0xf0] }
 0x142   :  { %3294 = vmatpush.bf16.msrb.mxu0 %v6022_v33  ;;  %3307 = vmatpush.bf16.msrb.mxu1 %v6150_v34  ;;  %v1951_v12 = vpop.f32.mrf.mxu0  ;;  %v1964_v17 = vpop.f32.mrf.mxu1  ;;  %v6339_v33 = vld [vmem:[%s11511_s10 + $0x310] sm:$0xf0]  ;;  %v6073_v34 = vld [vmem:[%s11511_s10 + $0xe8] sm:$0xf] }
 0x143   :  { %v1952_v60 = vadd.f32 %v1951_v12, %v9305_v14  ;;  %v6083_v14 = vld [vmem:[%s11511_s10 + $0x110] sm:$0xf0]  ;;  %v6342_v52 = vor.u32 %v7671_v30, %v6339_v33  ;;  %v6041_v12 = vld [vmem:[%s11511_s10 + $0xa8] sm:$0xf] }
 0x144   :  { %3320 = vmatpush.bf16.msrb.mxu2 %v6278_v40  ;;  %3333 = vmatpush.bf16.msrb.mxu3 %v6406_v41  ;;  %v7638_v40 = vld [vmem:[%s11511_s10 + $0x1f4] sm:$0xf0]  ;;  %v6329_v41 = vld [vmem:[%s11511_s10 + $0x2e8] sm:$0xf]  ;;  %v6086_v46 = vor.u32 %v7607_v24, %v6083_v14 }
 0x145   :  { %v1965_v25 = vadd.f32 %v1964_v17, %v1952_v60  ;;  %v6330_v59 = vor.u32 %v7670_v48, %v6329_v41  ;;  %v6169_v60 = vld [vmem:[%s11511_s10 + $0x1a8] sm:$0xf]  ;;  %v7630_v17 = vld [vmem:[%s11511_s10 + $0x1b4] sm:$0xf0] }
 0x146   :  { %3295 = vmatpush.bf16.msrb.mxu0 %v6006_v51  ;;  %3308 = vmatpush.bf16.msrb.mxu1 %v6134_v32  ;;  %v6214_v32 = vor.u32 %v7639_v28, %v6211_v29  ;;  %v7594_v28 = vld [vmem:[%s11511_s10 + $0x94] sm:$0xf0]  ;;  %v6153_v33 = vld [vmem:[%s11511_s10 + $0x188] sm:$0xf] }
 0x147   :  { %v7690_v41 = vld [vmem:[%s11511_s10 + $0x394] sm:$0xf0] }
 0x148   :  { %3321 = vmatpush.bf16.msrb.mxu2 %v6262_v53  ;;  %3334 = vmatpush.bf16.msrb.mxu3 %v6390_v55  ;;  %v6074_v53 = vor.u32 %v7606_v37, %v6073_v34  ;;  %v6202_v55 = vor.u32 %v7638_v40, %v6201_v39  ;;  %v7626_v34 = vld [vmem:[%s11511_s10 + $0x194] sm:$0xf0]  ;;  %v6281_v37 = vld [vmem:[%s11511_s10 + $0x288] sm:$0xf] }
 0x149   :  { %v7658_v39 = vld [vmem:[%s11511_s10 + $0x294] sm:$0xf0]  ;;  %v6409_v40 = vld [vmem:[%s11511_s10 + $0x388] sm:$0xf] }
 0x14a   :  { %3296 = vmatpush.bf16.msrb.mxu0 %v5990_v63  ;;  %3309 = vmatpush.bf16.msrb.mxu1 %v6118_v21  ;;  %v1990_v36 = vpop.f32.mrf.mxu3  ;;  %v1953_v57 = vpop.f32.mrf.mxu0  ;;  %v6185_v63 = vld [vmem:[%s11511_s10 + $0x1c8] sm:$0xf]  ;;  %v7634_v21 = vld [vmem:[%s11511_s10 + $0x1d4] sm:$0xf0]  ;;  %v6282_v49 = vor.u32 %v7658_v39, %v6281_v37  ;;  %v6410_v50 = vor.u32 %v7690_v41, %v6409_v40 }
 0x14b   :  { %v1977_v42 = vpop.f32.mrf.mxu2  ;;  %v1966_v4 = vpop.f32.mrf.mxu1  ;;  %v6186_v11 = vor.u32 %v7634_v21, %v6185_v63  ;;  %v7590_v48 = vld [vmem:[%s11511_s10 + $0x74] sm:$0xf0]  ;;  %v5993_v57 = vld [vmem:[%s11511_s10 + $0x48] sm:$0xf] }
 0x14c   :  { %3322 = vmatpush.bf16.msrb.mxu2 %v6246_v5  ;;  %3335 = vmatpush.bf16.msrb.mxu3 %v6374_v6  ;;  %v1978_v51 = vadd.f32 %v1977_v42, %v1965_v25  ;;  %v7666_v5 = vld [vmem:[%s11511_s10 + $0x2d4] sm:$0xf0]  ;;  %v6441_v6 = vld [vmem:[%s11511_s10 + $0x3c8] sm:$0xf]  ;;  %v6042_v25 = vor.u32 %v7598_v13, %v6041_v12 }
 0x14d   :  { %v6314_v15 = vor.u32 %v7666_v5, %v6313_v3  ;;  %v6442_v16 = vor.u32 %v7698_v7, %v6441_v6  ;;  %v6121_v21 = vld [vmem:[%s11511_s10 + $0x148] sm:$0xf]  ;;  %v7618_v3 = vld [vmem:[%s11511_s10 + $0x154] sm:$0xf0] }
 0x14e   :  { %3297 = vmatpush.bf16.msrb.mxu0 %v5974_v19  ;;  %3310 = vmatpush.bf16.msrb.mxu1 %v6102_v22  ;;  %v10065_v62 = vadd.f32 %v1990_v36, %v1978_v51  ;;  %v7662_v19 = vld [vmem:[%s11511_s10 + $0x2b4] sm:$0xf0]  ;;  %v6425_v22 = vld [vmem:[%s11511_s10 + $0x3a8] sm:$0xf] }
 0x14f   :  { %v6298_v29 = vor.u32 %v7662_v19, %v6297_v18  ;;  %v6426_v30 = vor.u32 %v7694_v0, %v6425_v22  ;;  %v6137_v51 = vld [vmem:[%s11511_s10 + $0x168] sm:$0xf]  ;;  %v7654_v36 = vld [vmem:[%s11511_s10 + $0x274] sm:$0xf0] }
 0x150   :  { %3323 = vmatpush.bf16.msrb.mxu2 %v6230_v26  ;;  %3336 = vmatpush.bf16.msrb.mxu3 %v6358_v27  ;;  %v6170_v26 = vor.u32 %v7630_v17, %v6169_v60  ;;  %v6025_v27 = vld [vmem:[%s11511_s10 + $0x88] sm:$0xf]  ;;  %v7650_v5 = vld [vmem:[%s11511_s10 + $0x254] sm:$0xf0] }
 0x151   :  { %v6026_v42 = vor.u32 %v7594_v28, %v6025_v27  ;;  %v6249_v4 = vld [vmem:[%s11511_s10 + $0x248] sm:$0xf]  ;;  %v7682_v7 = vld [vmem:[%s11511_s10 + $0x354] sm:$0xf0] }
 0x152   :  { %3298 = vmatpush.bf16.msrb.mxu0 %v5958_v45  ;;  %3311 = vmatpush.bf16.msrb.mxu1 %v6086_v46  ;;  %v1992_v14 = vpop.f32.mrf.mxu3  ;;  %v6154_v45 = vor.u32 %v7626_v34, %v6153_v33  ;;  %v6009_v46 = vld [vmem:[%s11511_s10 + $0x68] sm:$0xf]  ;;  %v7582_v13 = vld [vmem:[%s11511_s10 + $0x34] sm:$0xf0] }
 0x153   :  { %v1979_v24 = vpop.f32.mrf.mxu2  ;;  %v6010_v58 = vor.u32 %v7590_v48, %v6009_v46  ;;  %v6377_v6 = vld [vmem:[%s11511_s10 + $0x348] sm:$0xf]  ;;  %v7614_v17 = vld [vmem:[%s11511_s10 + $0x134] sm:$0xf0]  ;;  %v6075_v46 = vld [vmem:[%s11511_s10 + $0xf8] sm:$0xf0] }
 0x154   :  { %3324 = vmatpush.bf16.msrb.mxu2 %v6214_v32  ;;  %3337 = vmatpush.bf16.msrb.mxu3 %v6342_v52  ;;  %v7622_v32 = vld [vmem:[%s11511_s10 + $0x174] sm:$0xf0]  ;;  %v6265_v52 = vld [vmem:[%s11511_s10 + $0x268] sm:$0xf]  ;;  %v7636_v48 = vld [vmem:[%s11511_s10 + $0x1ec] sm:$0xf] }
 0x155   :  { %3299 = vmatmul.bf16.vlgmr.msrb.gmra.mxu0 %v8275_v8  ;;  %3312 = vmatmul.bf16.vlgmr.msrb.gmra.mxu1 %v8277_v9  ;;  %v6138_v56 = vor.u32 %v7622_v32, %v6137_v51  ;;  %v5977_v12 = vld [vmem:[%s11511_s10 + $0x28] sm:$0xf]  ;;  %v7646_v22 = vld [vmem:[%s11511_s10 + $0x234] sm:$0xf0] }
 0x156   :  { %3343 = vmatpush.bf16.msra.mxu0 %v6074_v53  ;;  %3356 = vmatpush.bf16.msra.mxu1 %v6202_v55  ;;  %v6393_v53 = vld [vmem:[%s11511_s10 + $0x368] sm:$0xf]  ;;  %v7686_v55 = vld [vmem:[%s11511_s10 + $0x374] sm:$0xf0]  ;;  %v5978_v27 = vor.u32 %v7582_v13, %v5977_v12  ;;  %v7664_v12 = vld [vmem:[%s11511_s10 + $0x2cc] sm:$0xf] }
 0x157   :  { %3325 = vmatmul.bf16.vlgmr.msrb.gmra.mxu2 %v8268_v1  ;;  %3338 = vmatmul.bf16.vlgmr.msrb.gmra.mxu3 %v8270_v2  ;;  %v6394_v63 = vor.u32 %v7686_v55, %v6393_v53  ;;  %v6105_v60 = vld [vmem:[%s11511_s10 + $0x128] sm:$0xf]  ;;  %v7678_v24 = vld [vmem:[%s11511_s10 + $0x334] sm:$0xf0]  ;;  %v7700_v53 = vld [vmem:[%s11511_s10 + $0x3ec] sm:$0xf] }
 0x158   :  { %3369 = vmatpush.bf16.msra.mxu2 %v6330_v59  ;;  %3382 = vmatpush.bf16.msra.mxu3 %v6458_v61  ;;  %v7586_v59 = vld [vmem:[%s11511_s10 + $0x54] sm:$0xf0]  ;;  %v6266_v61 = vor.u32 %v7654_v36, %v6265_v52  ;;  %v6233_v18 = vld [vmem:[%s11511_s10 + $0x228] sm:$0xf]  ;;  %v6106_v28 = vor.u32 %v7614_v17, %v6105_v60  ;;  %v6331_v36 = vld [vmem:[%s11511_s10 + $0x2f8] sm:$0xf0] }
 0x159   :  { %v6361_v0 = vld [vmem:[%s11511_s10 + $0x328] sm:$0xf]  ;;  %v6234_v34 = vor.u32 %v7646_v22, %v6233_v18  ;;  %v7642_v40 = vld [vmem:[%s11511_s10 + $0x214] sm:$0xf0]  ;;  %v6459_v55 = vld [vmem:[%s11511_s10 + $0x3f8] sm:$0xf0] }
 0x15a   :  { %3344 = vmatpush.bf16.msra.mxu0 %v6058_v10  ;;  %3357 = vmatpush.bf16.msra.mxu1 %v6186_v11  ;;  %v5994_v10 = vor.u32 %v7586_v59, %v5993_v57  ;;  %v6122_v11 = vor.u32 %v7618_v3, %v6121_v21  ;;  %v6362_v37 = vor.u32 %v7678_v24, %v6361_v0  ;;  %v6217_v39 = vld [vmem:[%s11511_s10 + $0x208] sm:$0xf]  ;;  %v7600_v21 = vld [vmem:[%s11511_s10 + $0xcc] sm:$0xf]  ;;  %v6059_v3 = vld [vmem:[%s11511_s10 + $0xd8] sm:$0xf0] }
 0x15b   :  { %v6345_v41 = vld [vmem:[%s11511_s10 + $0x308] sm:$0xf]  ;;  %v6443_v60 = vld [vmem:[%s11511_s10 + $0x3d8] sm:$0xf0]  ;;  %v6062_v17 = vor.u32 %v7600_v21, %v6059_v3 }
 0x15c   :  { %3370 = vmatpush.bf16.msra.mxu2 %v6314_v15  ;;  %3383 = vmatpush.bf16.msra.mxu3 %v6442_v16  ;;  %v6250_v15 = vor.u32 %v7650_v5, %v6249_v4  ;;  %v6378_v16 = vor.u32 %v7682_v7, %v6377_v6  ;;  %v6462_v6 = vor.u32 %v7700_v53, %v6459_v55  ;;  %v6043_v22 = vld [vmem:[%s11511_s10 + $0xb8] sm:$0xf0] }
 0x15e   :  { %3345 = vmatpush.bf16.msra.mxu0 %v6042_v25  ;;  %3358 = vmatpush.bf16.msra.mxu1 %v6170_v26  ;;  %v5961_v26 = vld [vmem:[%s11511_s10 + $0x8] sm:$0xf] }
 0x160   :  { %3371 = vmatpush.bf16.msra.mxu2 %v6298_v29  ;;  %3384 = vmatpush.bf16.msra.mxu3 %v6426_v30  ;;  %v7578_v29 = vld [vmem:[%s11511_s10 + $0x14] sm:$0xf0]  ;;  %v6089_v30 = vld [vmem:[%s11511_s10 + $0x108] sm:$0xf] }
 0x161   :  { %v5962_v32 = vor.u32 %v7578_v29, %v5961_v26  ;;  %v7660_v26 = vld [vmem:[%s11511_s10 + $0x2ac] sm:$0xf]  ;;  %v6427_v29 = vld [vmem:[%s11511_s10 + $0x3b8] sm:$0xf0] }
 0x162   :  { %3346 = vmatpush.bf16.msra.mxu0 %v6026_v42  ;;  %3359 = vmatpush.bf16.msra.mxu1 %v6154_v45  ;;  %v2003_v19 = vpop.f32.mrf.mxu0  ;;  %v2016_v25 = vpop.f32.mrf.mxu1  ;;  %v7674_v42 = vld [vmem:[%s11511_s10 + $0x314] sm:$0xf0]  ;;  %v7604_v45 = vld [vmem:[%s11511_s10 + $0xec] sm:$0xf] }
 0x163   :  { %v2004_v14 = vadd.f32 %v2003_v19, %v9483_v20  ;;  %v7610_v20 = vld [vmem:[%s11511_s10 + $0x114] sm:$0xf0]  ;;  %v6346_v57 = vor.u32 %v7674_v42, %v6345_v41  ;;  %v7596_v19 = vld [vmem:[%s11511_s10 + $0xac] sm:$0xf] }
 0x164   :  { %3372 = vmatpush.bf16.msra.mxu2 %v6282_v49  ;;  %3385 = vmatpush.bf16.msra.mxu3 %v6410_v50  ;;  %v6203_v49 = vld [vmem:[%s11511_s10 + $0x1f8] sm:$0xf0]  ;;  %v7668_v50 = vld [vmem:[%s11511_s10 + $0x2ec] sm:$0xf]  ;;  %v6090_v52 = vor.u32 %v7610_v20, %v6089_v30 }
 0x165   :  { %v2017_v33 = vadd.f32 %v2016_v25, %v2004_v14  ;;  %v6334_v5 = vor.u32 %v7668_v50, %v6331_v36  ;;  %v7628_v14 = vld [vmem:[%s11511_s10 + $0x1ac] sm:$0xf]  ;;  %v6171_v25 = vld [vmem:[%s11511_s10 + $0x1b8] sm:$0xf0] }
 0x166   :  { %3347 = vmatpush.bf16.msra.mxu0 %v6010_v58  ;;  %3360 = vmatpush.bf16.msra.mxu1 %v6138_v56  ;;  %v6218_v56 = vor.u32 %v7642_v40, %v6217_v39  ;;  %v6027_v39 = vld [vmem:[%s11511_s10 + $0x98] sm:$0xf0]  ;;  %v7624_v42 = vld [vmem:[%s11511_s10 + $0x18c] sm:$0xf] }
 0x167   :  { %v6411_v50 = vld [vmem:[%s11511_s10 + $0x398] sm:$0xf0] }
 0x168   :  { %3373 = vmatpush.bf16.msra.mxu2 %v6266_v61  ;;  %3386 = vmatpush.bf16.msra.mxu3 %v6394_v63  ;;  %v6078_v61 = vor.u32 %v7604_v45, %v6075_v46  ;;  %v6206_v63 = vor.u32 %v7636_v48, %v6203_v49  ;;  %v6155_v45 = vld [vmem:[%s11511_s10 + $0x198] sm:$0xf0]  ;;  %v7656_v46 = vld [vmem:[%s11511_s10 + $0x28c] sm:$0xf] }
 0x169   :  { %v6283_v48 = vld [vmem:[%s11511_s10 + $0x298] sm:$0xf0]  ;;  %v7688_v49 = vld [vmem:[%s11511_s10 + $0x38c] sm:$0xf] }
 0x16a   :  { %3348 = vmatpush.bf16.msra.mxu0 %v5994_v10  ;;  %3361 = vmatpush.bf16.msra.mxu1 %v6122_v11  ;;  %v2042_v59 = vpop.f32.mrf.mxu3  ;;  %v2005_v4 = vpop.f32.mrf.mxu0  ;;  %v7632_v10 = vld [vmem:[%s11511_s10 + $0x1cc] sm:$0xf]  ;;  %v6187_v11 = vld [vmem:[%s11511_s10 + $0x1d8] sm:$0xf0]  ;;  %v6286_v53 = vor.u32 %v7656_v46, %v6283_v48  ;;  %v6414_v55 = vor.u32 %v7688_v49, %v6411_v50 }
 0x16b   :  { %v2029_v51 = vpop.f32.mrf.mxu2  ;;  %v2018_v13 = vpop.f32.mrf.mxu1  ;;  %v6190_v18 = vor.u32 %v7632_v10, %v6187_v11  ;;  %v6011_v36 = vld [vmem:[%s11511_s10 + $0x78] sm:$0xf0]  ;;  %v7584_v4 = vld [vmem:[%s11511_s10 + $0x4c] sm:$0xf] }
 0x16c   :  { %3374 = vmatpush.bf16.msra.mxu2 %v6250_v15  ;;  %3387 = vmatpush.bf16.msra.mxu3 %v6378_v16  ;;  %v2030_v58 = vadd.f32 %v2029_v51, %v2017_v33  ;;  %v6315_v15 = vld [vmem:[%s11511_s10 + $0x2d8] sm:$0xf0]  ;;  %v7696_v16 = vld [vmem:[%s11511_s10 + $0x3cc] sm:$0xf]  ;;  %v6046_v33 = vor.u32 %v7596_v19, %v6043_v22 }
 0x16d   :  { %v6318_v0 = vor.u32 %v7664_v12, %v6315_v15  ;;  %v6446_v24 = vor.u32 %v7696_v16, %v6443_v60  ;;  %v7616_v11 = vld [vmem:[%s11511_s10 + $0x14c] sm:$0xf]  ;;  %v6123_v12 = vld [vmem:[%s11511_s10 + $0x158] sm:$0xf0] }
 0x16e   :  { %3349 = vmatpush.bf16.msra.mxu0 %v5978_v27  ;;  %3362 = vmatpush.bf16.msra.mxu1 %v6106_v28  ;;  %v10264_v7 = vadd.f32 %v2042_v59, %v2030_v58  ;;  %v6299_v27 = vld [vmem:[%s11511_s10 + $0x2b8] sm:$0xf0]  ;;  %v7692_v28 = vld [vmem:[%s11511_s10 + $0x3ac] sm:$0xf] }
 0x16f   :  { %v6302_v40 = vor.u32 %v7660_v26, %v6299_v27  ;;  %v6430_v41 = vor.u32 %v7692_v28, %v6427_v29  ;;  %v7620_v58 = vld [vmem:[%s11511_s10 + $0x16c] sm:$0xf]  ;;  %v6267_v59 = vld [vmem:[%s11511_s10 + $0x278] sm:$0xf0] }
 0x170   :  { %3375 = vmatpush.bf16.msra.mxu2 %v6234_v34  ;;  %3388 = vmatpush.bf16.msra.mxu3 %v6362_v37  ;;  %v6174_v34 = vor.u32 %v7628_v14, %v6171_v25  ;;  %v7592_v37 = vld [vmem:[%s11511_s10 + $0x8c] sm:$0xf]  ;;  %v6251_v15 = vld [vmem:[%s11511_s10 + $0x258] sm:$0xf0] }
 0x171   :  { %v6030_v51 = vor.u32 %v7592_v37, %v6027_v39  ;;  %v7648_v13 = vld [vmem:[%s11511_s10 + $0x24c] sm:$0xf]  ;;  %v6379_v60 = vld [vmem:[%s11511_s10 + $0x358] sm:$0xf0] }
 0x172   :  { %3350 = vmatpush.bf16.msra.mxu0 %v5962_v32  ;;  %3363 = vmatpush.bf16.msra.mxu1 %v6090_v52  ;;  %v2044_v20 = vpop.f32.mrf.mxu3  ;;  %v6158_v32 = vor.u32 %v7624_v42, %v6155_v45  ;;  %v7588_v52 = vld [vmem:[%s11511_s10 + $0x6c] sm:$0xf]  ;;  %v5979_v22 = vld [vmem:[%s11511_s10 + $0x38] sm:$0xf0] }
 0x173   :  { %v2031_v30 = vpop.f32.mrf.mxu2  ;;  %v6014_v21 = vor.u32 %v7588_v52, %v6011_v36  ;;  %v7680_v16 = vld [vmem:[%s11511_s10 + $0x34c] sm:$0xf]  ;;  %v6107_v27 = vld [vmem:[%s11511_s10 + $0x138] sm:$0xf0]  ;;  %v7477_v52 = vld [vmem:[%s11510_s9 + $0xec] sm:$0xf0] }
 0x174   :  { %3376 = vmatpush.bf16.msra.mxu2 %v6218_v56  ;;  %3389 = vmatpush.bf16.msra.mxu3 %v6346_v57  ;;  %v6139_v56 = vld [vmem:[%s11511_s10 + $0x178] sm:$0xf0]  ;;  %v7652_v57 = vld [vmem:[%s11511_s10 + $0x26c] sm:$0xf]  ;;  %v6705_v36 = vld [vmem:[%s11510_s9 + $0x1e0] sm:$0xf] }
 0x175   :  { %3351 = vmatmul.bf16.vlgmr.msra.gmra.mxu0 %v8275_v8  ;;  %3364 = vmatmul.bf16.vlgmr.msra.gmra.mxu1 %v8277_v9  ;;  %v6142_v3 = vor.u32 %v7620_v58, %v6139_v56  ;;  %v7580_v19 = vld [vmem:[%s11511_s10 + $0x2c] sm:$0xf]  ;;  %v6235_v30 = vld [vmem:[%s11511_s10 + $0x238] sm:$0xf0] }
 0x176   :  { %3395 = vmatpush.bf16.msrb.mxu0 %v6078_v61  ;;  %3408 = vmatpush.bf16.msrb.mxu1 %v6206_v63  ;;  %v7684_v61 = vld [vmem:[%s11511_s10 + $0x36c] sm:$0xf]  ;;  %v6395_v63 = vld [vmem:[%s11511_s10 + $0x378] sm:$0xf0] }
 0x177   :  { %3377 = vmatmul.bf16.vlgmr.msra.gmra.mxu2 %v8268_v1  ;;  %3390 = vmatmul.bf16.vlgmr.msra.gmra.mxu3 %v8270_v2  ;;  %v6398_v10 = vor.u32 %v7684_v61, %v6395_v63  ;;  %v7612_v26 = vld [vmem:[%s11511_s10 + $0x12c] sm:$0xf]  ;;  %v6091_v42 = vld [vmem:[%s11511_s10 + $0x118] sm:$0xf0]  ;;  %v7541_v61 = vld [vmem:[%s11510_s9 + $0x2ec] sm:$0xf0] }
 0x178   :  { %3421 = vmatpush.bf16.msrb.mxu2 %v6334_v5  ;;  %3434 = vmatpush.bf16.msrb.mxu3 %v6462_v6  ;;  %v5995_v5 = vld [vmem:[%s11511_s10 + $0x58] sm:$0xf0]  ;;  %v6270_v6 = vor.u32 %v7652_v57, %v6267_v59  ;;  %v7644_v28 = vld [vmem:[%s11511_s10 + $0x22c] sm:$0xf]  ;;  %v6110_v39 = vor.u32 %v7612_v26, %v6107_v27  ;;  %v6961_v63 = vld [vmem:[%s11510_s9 + $0x3e0] sm:$0xf] }
 0x179   :  { %v7676_v20 = vld [vmem:[%s11511_s10 + $0x32c] sm:$0xf]  ;;  %v6238_v45 = vor.u32 %v7644_v28, %v6235_v30  ;;  %v6219_v49 = vld [vmem:[%s11511_s10 + $0x218] sm:$0xf0]  ;;  %v6545_v27 = vld [vmem:[%s11510_s9 + $0xa0] sm:$0xf] }
 0x17a   :  { %3396 = vmatpush.bf16.msrb.mxu0 %v6062_v17  ;;  %3409 = vmatpush.bf16.msrb.mxu1 %v6190_v18  ;;  %v5998_v17 = vor.u32 %v7584_v4, %v5995_v5  ;;  %v6126_v18 = vor.u32 %v7616_v11, %v6123_v12  ;;  %v7640_v48 = vld [vmem:[%s11511_s10 + $0x20c] sm:$0xf]  ;;  %v7469_v28 = vld [vmem:[%s11510_s9 + $0xac] sm:$0xf0] }
 0x17b   :  { %v7672_v50 = vld [vmem:[%s11511_s10 + $0x30c] sm:$0xf]  ;;  %v6222_v4 = vor.u32 %v7640_v48, %v6219_v49 }
 0x17c   :  { %3422 = vmatpush.bf16.msrb.mxu2 %v6318_v0  ;;  %3435 = vmatpush.bf16.msrb.mxu3 %v6446_v24  ;;  %v6254_v0 = vor.u32 %v7648_v13, %v6251_v15  ;;  %v6382_v24 = vor.u32 %v7680_v16, %v6379_v60  ;;  %v6561_v13 = vld [vmem:[%s11510_s9 + $0xc0] sm:$0xf]  ;;  %v7473_v15 = vld [vmem:[%s11510_s9 + $0xcc] sm:$0xf0] }
 0x17e   :  { %3397 = vmatpush.bf16.msrb.mxu0 %v6046_v33  ;;  %3410 = vmatpush.bf16.msrb.mxu1 %v6174_v34  ;;  %v6363_v33 = vld [vmem:[%s11511_s10 + $0x338] sm:$0xf0]  ;;  %v7576_v34 = vld [vmem:[%s11511_s10 + $0xc] sm:$0xf] }
 0x17f   :  { %v6366_v46 = vor.u32 %v7676_v20, %v6363_v33  ;;  %v6673_v20 = vld [vmem:[%s11510_s9 + $0x1a0] sm:$0xf]  ;;  %v7501_v33 = vld [vmem:[%s11510_s9 + $0x1ac] sm:$0xf0] }
 0x180   :  { %3423 = vmatpush.bf16.msrb.mxu2 %v6302_v40  ;;  %3436 = vmatpush.bf16.msrb.mxu3 %v6430_v41  ;;  %v5963_v40 = vld [vmem:[%s11511_s10 + $0x18] sm:$0xf0]  ;;  %v7608_v41 = vld [vmem:[%s11511_s10 + $0x10c] sm:$0xf]  ;;  %v6674_v48 = vor.u32 %v7501_v33, %v6673_v20 }
 0x181   :  { %v5966_v57 = vor.u32 %v7576_v34, %v5963_v40  ;;  %v6094_v59 = vor.u32 %v7608_v41, %v6091_v42  ;;  %v6801_v34 = vld [vmem:[%s11510_s9 + $0x2a0] sm:$0xf]  ;;  %v7565_v41 = vld [vmem:[%s11510_s9 + $0x3ac] sm:$0xf0]  ;;  %v6546_v42 = vor.u32 %v7469_v28, %v6545_v27 }
 0x182   :  { %3398 = vmatpush.bf16.msrb.mxu0 %v6030_v51  ;;  %3411 = vmatpush.bf16.msrb.mxu1 %v6158_v32  ;;  %v2055_v14 = vpop.f32.mrf.mxu0  ;;  %v2068_v25 = vpop.f32.mrf.mxu1  ;;  %v6347_v51 = vld [vmem:[%s11511_s10 + $0x318] sm:$0xf0]  ;;  %v6577_v32 = vld [vmem:[%s11510_s9 + $0xe0] sm:$0xf]  ;;  %s7787_s10 = smov [#allocation2]  }
 0x183   :  { %v2056_v29 = vadd.f32 %v2055_v14, %v9661_v47  ;;  %v5982_v47 = vor.u32 %v7580_v19, %v5979_v22  ;;  %v6350_v5 = vor.u32 %v7672_v50, %v6347_v51  ;;  %v6578_v11 = vor.u32 %v7477_v52, %v6577_v32  ;;  %v7505_v19 = vld [vmem:[%s11510_s9 + $0x1cc] sm:$0xf0]  ;;  %v6817_v22 = vld [vmem:[%s11510_s9 + $0x2c0] sm:$0xf]  ;;  %s4844_s27 = sshll.u32 %s7787_s10, 4  ;;  %s4845_s27 = int_to_ptr.vmem [resolvable:$true] %s4844_s27 }
 0x184   :  { %3424 = vmatpush.bf16.msrb.mxu2 %v6286_v53  ;;  %3437 = vmatpush.bf16.msrb.mxu3 %v6414_v55  ;;  %v7509_v53 = vld [vmem:[%s11510_s9 + $0x1ec] sm:$0xf0]  ;;  %v6833_v55 = vld [vmem:[%s11510_s9 + $0x2e0] sm:$0xf] }
 0x185   :  { %v2069_v37 = vadd.f32 %v2068_v25, %v2056_v29  ;;  %v6706_v12 = vor.u32 %v7509_v53, %v6705_v36  ;;  %v6834_v60 = vor.u32 %v7541_v61, %v6833_v55  ;;  %v7569_v14 = vld [vmem:[%s11510_s9 + $0x3cc] sm:$0xf0]  ;;  %v6562_v25 = vor.u32 %v7473_v15, %v6561_v13  ;;  %v6929_v40 = vld [vmem:[%s11510_s9 + $0x3a0] sm:$0xf] }
 0x186   :  { %3399 = vmatpush.bf16.msrb.mxu0 %v6014_v21  ;;  %3412 = vmatpush.bf16.msrb.mxu1 %v6142_v3  ;;  %v7573_v21 = vld [vmem:[%s11510_s9 + $0x3ec] sm:$0xf0]  ;;  %v6785_v51 = vld [vmem:[%s11510_s9 + $0x280] sm:$0xf] }
 0x187   :  { %v7529_v32 = vld [vmem:[%s11510_s9 + $0x28c] sm:$0xf0]  ;;  %v6913_v52 = vld [vmem:[%s11510_s9 + $0x380] sm:$0xf] }
 0x188   :  { %3425 = vmatpush.bf16.msrb.mxu2 %v6270_v6  ;;  %3438 = vmatpush.bf16.msrb.mxu3 %v6398_v10  ;;  %v7561_v36 = vld [vmem:[%s11510_s9 + $0x38c] sm:$0xf0]  ;;  %v6641_v61 = vld [vmem:[%s11510_s9 + $0x160] sm:$0xf] }
 0x18a   :  { %3400 = vmatpush.bf16.msrb.mxu0 %v5998_v17  ;;  %3413 = vmatpush.bf16.msrb.mxu1 %v6126_v18  ;;  %v2081_v58 = vpop.f32.mrf.mxu2  ;;  %v2094_v56 = vpop.f32.mrf.mxu3  ;;  %v6962_v17 = vor.u32 %v7573_v21, %v6961_v63  ;;  %v6689_v18 = vld [vmem:[%s11510_s9 + $0x1c0] sm:$0xf]  ;;  %v7493_v63 = vld [vmem:[%s11510_s9 + $0x16c] sm:$0xf0] }
 0x18b   :  { %v2082_v3 = vadd.f32 %v2081_v58, %v2069_v37  ;;  %v2057_v6 = vpop.f32.mrf.mxu0  ;;  %v2070_v10 = vpop.f32.mrf.mxu1  ;;  %v6690_v26 = vor.u32 %v7505_v19, %v6689_v18  ;;  %v6513_v58 = vld [vmem:[%s11510_s9 + $0x60] sm:$0xf]  ;;  %v7457_v19 = vld [vmem:[%s11510_s9 + $0x4c] sm:$0xf0] }
 0x18c   :  { %3426 = vmatpush.bf16.msrb.mxu2 %v6254_v0  ;;  %3439 = vmatpush.bf16.msrb.mxu3 %v6382_v24  ;;  %v7537_v0 = vld [vmem:[%s11510_s9 + $0x2cc] sm:$0xf0]  ;;  %v6945_v24 = vld [vmem:[%s11510_s9 + $0x3c0] sm:$0xf] }
 0x18d   :  { %v10463_v16 = vadd.f32 %v2094_v56, %v2082_v3  ;;  %v6818_v29 = vor.u32 %v7537_v0, %v6817_v22  ;;  %v6946_v30 = vor.u32 %v7569_v14, %v6945_v24  ;;  %v7461_v56 = vld [vmem:[%s11510_s9 + $0x6c] sm:$0xf0]  ;;  %v6769_v21 = vld [vmem:[%s11510_s9 + $0x260] sm:$0xf] }
 0x18e   :  { %3401 = vmatpush.bf16.msrb.mxu0 %v5982_v47  ;;  %3414 = vmatpush.bf16.msrb.mxu1 %v6110_v39  ;;  %v7533_v39 = vld [vmem:[%s11510_s9 + $0x2ac] sm:$0xf0]  ;;  %v6897_v6 = vld [vmem:[%s11510_s9 + $0x360] sm:$0xf] }
 0x18f   :  { %v7557_v10 = vld [vmem:[%s11510_s9 + $0x36c] sm:$0xf0]  ;;  %v6497_v18 = vld [vmem:[%s11510_s9 + $0x40] sm:$0xf] }
 0x190   :  { %3427 = vmatpush.bf16.msrb.mxu2 %v6238_v45  ;;  %3440 = vmatpush.bf16.msrb.mxu3 %v6366_v46  ;;  %v6898_v22 = vor.u32 %v7557_v10, %v6897_v6  ;;  %v7489_v0 = vld [vmem:[%s11510_s9 + $0x14c] sm:$0xf0]  ;;  %v6753_v24 = vld [vmem:[%s11510_s9 + $0x240] sm:$0xf]  ;;  %v6498_v27 = vor.u32 %v7457_v19, %v6497_v18  ;;  %v7471_v18 = vld [vmem:[%s11510_s9 + $0xc4] sm:$0xf] }
 0x191   :  { %v7521_v14 = vld [vmem:[%s11510_s9 + $0x24c] sm:$0xf0]  ;;  %v6563_v19 = vld [vmem:[%s11510_s9 + $0xd0] sm:$0xf0] }
 0x192   :  { %3402 = vmatpush.bf16.msrb.mxu0 %v5966_v57  ;;  %3415 = vmatpush.bf16.msrb.mxu1 %v6094_v59  ;;  %v2083_v37 = vpop.f32.mrf.mxu2  ;;  %v2096_v47 = vpop.f32.mrf.mxu3  ;;  %v6786_v57 = vor.u32 %v7529_v32, %v6785_v51  ;;  %v6914_v59 = vor.u32 %v7561_v36, %v6913_v52  ;;  %v6754_v20 = vor.u32 %v7521_v14, %v6753_v24  ;;  %v6593_v51 = vld [vmem:[%s11510_s9 + $0x100] sm:$0xf]  ;;  %v7481_v32 = vld [vmem:[%s11510_s9 + $0x10c] sm:$0xf0]  ;;  %v7503_v24 = vld [vmem:[%s11510_s9 + $0x1c4] sm:$0xf] }
 0x193   :  { %v2165_v45 = vpop.f32.mrf.mxu0  ;;  %v2178_v46 = vpop.f32.mrf.mxu1  ;;  %v7485_v37 = vld [vmem:[%s11510_s9 + $0x12c] sm:$0xf0]  ;;  %v6737_v47 = vld [vmem:[%s11510_s9 + $0x220] sm:$0xf]  ;;  %v6691_v14 = vld [vmem:[%s11510_s9 + $0x1d0] sm:$0xf0] }
 0x194   :  { %3428 = vmatpush.bf16.msrb.mxu2 %v6222_v4  ;;  %3441 = vmatpush.bf16.msrb.mxu3 %v6350_v5  ;;  %v10512_v49 = vadd.f32 %v2165_v45, %v9866_v54  ;;  %v10515_v50 = vadd.f32 %v2178_v46, %v10065_v62  ;;  %v6657_v54 = vld [vmem:[%s11510_s9 + $0x180] sm:$0xf]  ;;  %v7497_v62 = vld [vmem:[%s11510_s9 + $0x18c] sm:$0xf0] }
 0x195   :  { %3403 = vmatmul.bf16.vlgmr.msrb.gmra.mxu0 %v8275_v8  ;;  %3416 = vmatmul.bf16.vlgmr.msrb.gmra.mxu1 %v8277_v9  ;;  %v7465_v8 = vld [vmem:[%s11510_s9 + $0x8c] sm:$0xf0]  ;;  %v6930_v9 = vor.u32 %v7565_v41, %v6929_v40  ;;  %v6658_v55 = vor.u32 %v7497_v62, %v6657_v54 }
 0x196   :  { %4087 = vmatpush.bf16.msra.mxu0 %v6578_v11  ;;  %4100 = vmatpush.bf16.msra.mxu1 %v6706_v12  ;;  %v7525_v5 = vld [vmem:[%s11510_s9 + $0x26c] sm:$0xf0] }
 0x197   :  { %3429 = vmatmul.bf16.vlgmr.msrb.gmra.mxu2 %v8268_v1  ;;  %3442 = vmatmul.bf16.vlgmr.msrb.gmra.mxu3 %v8270_v2  ;;  %v6529_v1 = vld [vmem:[%s11510_s9 + $0x80] sm:$0xf]  ;;  %v6802_v2 = vor.u32 %v7533_v39, %v6801_v34  ;;  %v7517_v41 = vld [vmem:[%s11510_s9 + $0x22c] sm:$0xf0] }
 0x198   :  { %4113 = vmatpush.bf16.msra.mxu2 %v6834_v60  ;;  %4126 = vmatpush.bf16.msra.mxu3 %v6962_v17  ;;  %v6530_v53 = vor.u32 %v7465_v8, %v6529_v1  ;;  %v6514_v60 = vor.u32 %v7461_v56, %v6513_v58  ;;  %v6642_v17 = vor.u32 %v7493_v63, %v6641_v61  ;;  %v6609_v34 = vld [vmem:[%s11510_s9 + $0x120] sm:$0xf]  ;;  %v7549_v45 = vld [vmem:[%s11510_s9 + $0x32c] sm:$0xf0]  ;;  %v7475_v58 = vld [vmem:[%s11510_s9 + $0xe4] sm:$0xf] }
 0x199   :  { %v6465_v8 = vld [vmem:[%s11510_s9] sm:$0xf]  ;;  %v7449_v62 = vld [vmem:[%s11510_s9 + $0xc] sm:$0xf0]  ;;  %v6738_v52 = vor.u32 %v7517_v41, %v6737_v47  ;;  %v6579_v56 = vld [vmem:[%s11510_s9 + $0xf0] sm:$0xf0] }
 0x19a   :  { %4088 = vmatpush.bf16.msra.mxu0 %v6562_v25  ;;  %4101 = vmatpush.bf16.msra.mxu1 %v6690_v26  ;;  %v2191_v3 = vpop.f32.mrf.mxu2  ;;  %v2204_v4 = vpop.f32.mrf.mxu3  ;;  %v6881_v25 = vld [vmem:[%s11510_s9 + $0x340] sm:$0xf]  ;;  %v7553_v26 = vld [vmem:[%s11510_s9 + $0x34c] sm:$0xf0]  ;;  %v7539_v61 = vld [vmem:[%s11510_s9 + $0x2e4] sm:$0xf]  ;;  %v6466_v63 = vor.u32 %v7449_v62, %v6465_v8 }
 0x19b   :  { %v10566_v11 = vadd.f32 %v2191_v3, %v10264_v7  ;;  %v10569_v12 = vadd.f32 %v2204_v4, %v10463_v16  ;;  %v2167_v13 = vpop.f32.mrf.mxu0  ;;  %v2180_v15 = vpop.f32.mrf.mxu1  ;;  %v6770_v7 = vor.u32 %v7525_v5, %v6769_v21  ;;  %v6625_v16 = vld [vmem:[%s11510_s9 + $0x140] sm:$0xf]  ;;  %v6882_v33 = vor.u32 %v7553_v26, %v6881_v25  ;;  %v7513_v36 = vld [vmem:[%s11510_s9 + $0x20c] sm:$0xf0]  ;;  %v6835_v3 = vld [vmem:[%s11510_s9 + $0x2f0] sm:$0xf0] }
 0x19c   :  { %4114 = vmatpush.bf16.msra.mxu2 %v6818_v29  ;;  %4127 = vmatpush.bf16.msra.mxu3 %v6946_v30  ;;  %v6626_v28 = vor.u32 %v7489_v0, %v6625_v16  ;;  %v6481_v29 = vld [vmem:[%s11510_s9 + $0x20] sm:$0xf]  ;;  %v7453_v30 = vld [vmem:[%s11510_s9 + $0x2c] sm:$0xf0]  ;;  %v6594_v21 = vor.u32 %v7481_v32, %v6593_v51  ;;  %v7571_v4 = vld [vmem:[%s11510_s9 + $0x3e4] sm:$0xf]  ;;  %v6582_v13 = vor.u32 %v7475_v58, %v6579_v56 }
 0x19d   :  { %v6482_v46 = vor.u32 %v7453_v30, %v6481_v29  ;;  %v6963_v5 = vld [vmem:[%s11510_s9 + $0x3f0] sm:$0xf0]  ;;  %v7535_v25 = vld [vmem:[%s11510_s9 + $0x2c4] sm:$0xf]  ;;  %v6566_v29 = vor.u32 %v7471_v18, %v6563_v19  ;;  %v6694_v30 = vor.u32 %v7503_v24, %v6691_v14 }
 0x19e   :  { %4089 = vmatpush.bf16.msra.mxu0 %v6546_v42  ;;  %4102 = vmatpush.bf16.msra.mxu1 %v6674_v48  ;;  %v6865_v42 = vld [vmem:[%s11510_s9 + $0x320] sm:$0xf]  ;;  %v7499_v47 = vld [vmem:[%s11510_s9 + $0x1a4] sm:$0xf]  ;;  %v6803_v41 = vld [vmem:[%s11510_s9 + $0x2b0] sm:$0xf0] }
 0x19f   :  { %v6531_v8 = vld [vmem:[%s11510_s9 + $0x90] sm:$0xf0]  ;;  %v7455_v19 = vld [vmem:[%s11510_s9 + $0x44] sm:$0xf] }
 0x1a0   :  { %4115 = vmatpush.bf16.msra.mxu2 %v6802_v2  ;;  %4128 = vmatpush.bf16.msra.mxu3 %v6930_v9  ;;  %v6610_v2 = vor.u32 %v7485_v37, %v6609_v34  ;;  %v7487_v14 = vld [vmem:[%s11510_s9 + $0x144] sm:$0xf] }
 0x1a2   :  { %4090 = vmatpush.bf16.msra.mxu0 %v6530_v53  ;;  %4103 = vmatpush.bf16.msra.mxu1 %v6658_v55  ;;  %v2193_v39 = vpop.f32.mrf.mxu2  ;;  %v2206_v40 = vpop.f32.mrf.mxu3  ;;  %v6849_v53 = vld [vmem:[%s11510_s9 + $0x300] sm:$0xf]  ;;  %v7545_v55 = vld [vmem:[%s11510_s9 + $0x30c] sm:$0xf0] }
 0x1a3   :  { %v2278_v48 = vpop.f32.mrf.mxu0  ;;  %v2291_v1 = vpop.f32.mrf.mxu1  ;;  %v6850_v10 = vor.u32 %v7545_v55, %v6849_v53  ;;  %v6675_v39 = vld [vmem:[%s11510_s9 + $0x1b0] sm:$0xf0]  ;;  %v7531_v40 = vld [vmem:[%s11510_s9 + $0x2a4] sm:$0xf] }
 0x1a4   :  { %4116 = vmatpush.bf16.msra.mxu2 %v6786_v57  ;;  %4129 = vmatpush.bf16.msra.mxu3 %v6914_v59  ;;  %v10623_v9 = vadd.f32 %v2278_v48, %v10512_v49  ;;  %v10626_v54 = vadd.f32 %v2291_v1, %v10515_v50  ;;  %v6866_v49 = vor.u32 %v7549_v45, %v6865_v42  ;;  %v6721_v50 = vld [vmem:[%s11510_s9 + $0x200] sm:$0xf]  ;;  %v7507_v57 = vld [vmem:[%s11510_s9 + $0x1e4] sm:$0xf]  ;;  %v6707_v59 = vld [vmem:[%s11510_s9 + $0x1f0] sm:$0xf0] }
 0x1a5   :  { %v6722_v6 = vor.u32 %v7513_v36, %v6721_v50  ;;  %v6710_v15 = vor.u32 %v7507_v57, %v6707_v59  ;;  %v7563_v42 = vld [vmem:[%s11510_s9 + $0x3a4] sm:$0xf]  ;;  %v6931_v45 = vld [vmem:[%s11510_s9 + $0x3b0] sm:$0xf0]  ;;  %v6678_v48 = vor.u32 %v7499_v47, %v6675_v39  ;;  %v6806_v51 = vor.u32 %v7531_v40, %v6803_v41 }
 0x1a6   :  { %4091 = vmatpush.bf16.msra.mxu0 %v6514_v60  ;;  %4104 = vmatpush.bf16.msra.mxu1 %v6642_v17  ;;  %v7463_v1 = vld [vmem:[%s11510_s9 + $0x84] sm:$0xf]  ;;  %v6934_v32 = vor.u32 %v7563_v42, %v6931_v45  ;;  %v6787_v36 = vld [vmem:[%s11510_s9 + $0x290] sm:$0xf0] }
 0x1a7   :  { %v7527_v50 = vld [vmem:[%s11510_s9 + $0x284] sm:$0xf]  ;;  %v6915_v55 = vld [vmem:[%s11510_s9 + $0x390] sm:$0xf0]  ;;  %v6534_v58 = vor.u32 %v7463_v1, %v6531_v8 }
 0x1a8   :  { %4117 = vmatpush.bf16.msra.mxu2 %v6770_v7  ;;  %4130 = vmatpush.bf16.msra.mxu3 %v6898_v22  ;;  %v6838_v7 = vor.u32 %v7539_v61, %v6835_v3  ;;  %v6966_v22 = vor.u32 %v7571_v4, %v6963_v5  ;;  %v7559_v53 = vld [vmem:[%s11510_s9 + $0x384] sm:$0xf]  ;;  %v6515_v59 = vld [vmem:[%s11510_s9 + $0x70] sm:$0xf0] }
 0x1a9   :  { %v7459_v57 = vld [vmem:[%s11510_s9 + $0x64] sm:$0xf]  ;;  %v6918_v3 = vor.u32 %v7559_v53, %v6915_v55  ;;  %v6643_v5 = vld [vmem:[%s11510_s9 + $0x170] sm:$0xf0] }
 0x1aa   :  { %4092 = vmatpush.bf16.msra.mxu0 %v6498_v27  ;;  %4105 = vmatpush.bf16.msra.mxu1 %v6626_v28  ;;  %v2304_v60 = vpop.f32.mrf.mxu2  ;;  %v2317_v17 = vpop.f32.mrf.mxu3  ;;  %v6947_v28 = vld [vmem:[%s11510_s9 + $0x3d0] sm:$0xf0]  ;;  %v7491_v4 = vld [vmem:[%s11510_s9 + $0x164] sm:$0xf] }
 0x1ab   :  { %v10680_v16 = vadd.f32 %v2304_v60, %v10566_v11  ;;  %v10683_v0 = vadd.f32 %v2317_v17, %v10569_v12  ;;  %v2280_v26 = vpop.f32.mrf.mxu0  ;;  %v2293_v27 = vpop.f32.mrf.mxu1  ;;  %v6819_v11 = vld [vmem:[%s11510_s9 + $0x2d0] sm:$0xf0]  ;;  %v7567_v12 = vld [vmem:[%s11510_s9 + $0x3c4] sm:$0xf]  ;;  %v6518_v17 = vor.u32 %v7459_v57, %v6515_v59  ;;  %v6646_v18 = vor.u32 %v7491_v4, %v6643_v5  ;;  %v7510_v4 = vld [vmem:[%s11510_s9 + $0x1f4] sm:$0xf0] }
 0x1ac   :  { %4118 = vmatpush.bf16.msra.mxu2 %v6754_v20  ;;  %4131 = vmatpush.bf16.msra.mxu3 %v6882_v33  ;;  %v7467_v20 = vld [vmem:[%s11510_s9 + $0xa4] sm:$0xf]  ;;  %v6547_v33 = vld [vmem:[%s11510_s9 + $0xb0] sm:$0xf0]  ;;  %v6822_v34 = vor.u32 %v7535_v25, %v6819_v11  ;;  %v6950_v37 = vor.u32 %v7567_v12, %v6947_v28  ;;  %v6841_v5 = vld [vmem:[%s11510_s9 + $0x2e8] sm:$0xf] }
 0x1ad   :  { %v6899_v60 = vld [vmem:[%s11510_s9 + $0x370] sm:$0xf0]  ;;  %v7519_v26 = vld [vmem:[%s11510_s9 + $0x244] sm:$0xf] }
 0x1ae   :  { %4093 = vmatpush.bf16.msra.mxu0 %v6482_v46  ;;  %4106 = vmatpush.bf16.msra.mxu1 %v6610_v2  ;;  %v6550_v46 = vor.u32 %v7467_v20, %v6547_v33  ;;  %v6627_v25 = vld [vmem:[%s11510_s9 + $0x150] sm:$0xf0]  ;;  %v7551_v28 = vld [vmem:[%s11510_s9 + $0x344] sm:$0xf] }
 0x1af   :  { %v6755_v12 = vld [vmem:[%s11510_s9 + $0x250] sm:$0xf0]  ;;  %v6630_v33 = vor.u32 %v7487_v14, %v6627_v25  ;;  %v7483_v45 = vld [vmem:[%s11510_s9 + $0x124] sm:$0xf] }
 0x1b0   :  { %4119 = vmatpush.bf16.msra.mxu2 %v6738_v52  ;;  %4132 = vmatpush.bf16.msra.mxu3 %v6866_v49  ;;  %v7495_v52 = vld [vmem:[%s11510_s9 + $0x184] sm:$0xf]  ;;  %v6659_v49 = vld [vmem:[%s11510_s9 + $0x190] sm:$0xf0]  ;;  %v6758_v41 = vor.u32 %v7519_v26, %v6755_v12  ;;  %v6697_v26 = vld [vmem:[%s11510_s9 + $0x1c8] sm:$0xf] }
 0x1b1   :  { %v6662_v56 = vor.u32 %v7495_v52, %v6659_v49  ;;  %v6739_v1 = vld [vmem:[%s11510_s9 + $0x230] sm:$0xf0]  ;;  %v7547_v8 = vld [vmem:[%s11510_s9 + $0x324] sm:$0xf]  ;;  %v7538_v12 = vld [vmem:[%s11510_s9 + $0x2d4] sm:$0xf0] }
 0x1b2   :  { %4094 = vmatpush.bf16.msra.mxu0 %v6466_v63  ;;  %4107 = vmatpush.bf16.msra.mxu1 %v6594_v21  ;;  %v2306_v2 = vpop.f32.mrf.mxu2  ;;  %v2319_v62 = vpop.f32.mrf.mxu3  ;;  %v6790_v21 = vor.u32 %v7527_v50, %v6787_v36  ;;  %v6467_v52 = vld [vmem:[%s11510_s9 + $0x10] sm:$0xf0]  ;;  %v7479_v49 = vld [vmem:[%s11510_s9 + $0x104] sm:$0xf] }
 0x1b3   :  { %v3248_v61 = vpop.f32.mrf.mxu0  ;;  %v3261_v63 = vpop.f32.mrf.mxu1  ;;  %v6867_v2 = vld [vmem:[%s11510_s9 + $0x330] sm:$0xf0]  ;;  %v7447_v62 = vld [vmem:[%s11510_s9 + $0x4] sm:$0xf] }
 0x1b4   :  { %4120 = vmatpush.bf16.msra.mxu2 %v6722_v6  ;;  %4133 = vmatpush.bf16.msra.mxu3 %v6850_v10  ;;  %v7523_v6 = vld [vmem:[%s11510_s9 + $0x264] sm:$0xf]  ;;  %v3262_v10 = vadd.f32 %v3261_v63, %v3248_v61  ;;  %v6595_v50 = vld [vmem:[%s11510_s9 + $0x110] sm:$0xf0]  ;;  %v6870_v53 = vor.u32 %v7547_v8, %v6867_v2  ;;  %v6585_v63 = vld [vmem:[%s11510_s9 + $0xe8] sm:$0xf] }
 0x1b5   :  { %4095 = vmatmul.bf16.vlgmr.msra.gmra.mxu0 %v8912_v43  ;;  %4108 = vmatmul.bf16.vlgmr.msra.gmra.mxu1 %v8929_v31  ;;  %v7511_v55 = vld [vmem:[%s11510_s9 + $0x204] sm:$0xf]  ;;  %v6851_v61 = vld [vmem:[%s11510_s9 + $0x310] sm:$0xf0]  ;;  %v6537_v2 = vld [vmem:[%s11510_s9 + $0x88] sm:$0xf] }
 0x1b6   :  { %4139 = vmatpush.bf16.msrb.mxu0 %v6582_v13  ;;  %4152 = vmatpush.bf16.msrb.mxu1 %v6710_v15  ;;  %v6771_v13 = vld [vmem:[%s11510_s9 + $0x270] sm:$0xf0]  ;;  %v7555_v15 = vld [vmem:[%s11510_s9 + $0x364] sm:$0xf] }
 0x1b7   :  { %4121 = vmatmul.bf16.vlgmr.msra.gmra.mxu2 %v8916_v44  ;;  %4134 = vmatmul.bf16.vlgmr.msra.gmra.mxu3 %v8933_v35  ;;  %v6902_v24 = vor.u32 %v7555_v15, %v6899_v60  ;;  %v6969_v15 = vld [vmem:[%s11510_s9 + $0x3e8] sm:$0xf]  ;;  %v7574_v60 = vld [vmem:[%s11510_s9 + $0x3f4] sm:$0xf0] }
 0x1b8   :  { %4165 = vmatpush.bf16.msrb.mxu2 %v6838_v7  ;;  %4178 = vmatpush.bf16.msrb.mxu3 %v6966_v22  ;;  %v6499_v7 = vld [vmem:[%s11510_s9 + $0x50] sm:$0xf0]  ;;  %v6774_v22 = vor.u32 %v7523_v6, %v6771_v13  ;;  %v6470_v6 = vor.u32 %v7447_v62, %v6467_v52  ;;  %v7542_v13 = vld [vmem:[%s11510_s9 + $0x2f4] sm:$0xf0]  ;;  %v6970_v25 = vor.u32 %v7574_v60, %v6969_v15  ;;  %v6665_v52 = vld [vmem:[%s11510_s9 + $0x188] sm:$0xf] }
 0x1b9   :  { %v6502_v20 = vor.u32 %v7455_v19, %v6499_v7  ;;  %v6842_v14 = vor.u32 %v7542_v13, %v6841_v5  ;;  %v7466_v62 = vld [vmem:[%s11510_s9 + $0x94] sm:$0xf0]  ;;  %v6905_v15 = vld [vmem:[%s11510_s9 + $0x368] sm:$0xf] }
 0x1ba   :  { %4140 = vmatpush.bf16.msrb.mxu0 %v6566_v29  ;;  %4153 = vmatpush.bf16.msrb.mxu1 %v6694_v30  ;;  %v3274_v27 = vpop.f32.mrf.mxu2  ;;  %v3287_v11 = vpop.f32.mrf.mxu3  ;;  %v6883_v29 = vld [vmem:[%s11510_s9 + $0x350] sm:$0xf0]  ;;  %v7494_v5 = vld [vmem:[%s11510_s9 + $0x174] sm:$0xf0] }
 0x1bb   :  { %v3275_v30 = vadd.f32 %v3274_v27, %v3262_v10  ;;  %v3250_v47 = vpop.f32.mrf.mxu0  ;;  %v3263_v39 = vpop.f32.mrf.mxu1  ;;  %v6886_v42 = vor.u32 %v7551_v28, %v6883_v29  ;;  %v6598_v10 = vor.u32 %v7479_v49, %v6595_v50  ;;  %v7506_v27 = vld [vmem:[%s11510_s9 + $0x1d4] sm:$0xf0]  ;;  %v6953_v28 = vld [vmem:[%s11510_s9 + $0x3c8] sm:$0xf] }
 0x1bc   :  { %4166 = vmatpush.bf16.msrb.mxu2 %v6822_v34  ;;  %4179 = vmatpush.bf16.msrb.mxu3 %v6950_v37  ;;  %v7451_v34 = vld [vmem:[%s11510_s9 + $0x24] sm:$0xf]  ;;  %v6483_v37 = vld [vmem:[%s11510_s9 + $0x30] sm:$0xf0]  ;;  %v7570_v29 = vld [vmem:[%s11510_s9 + $0x3d4] sm:$0xf0] }
 0x1bd   :  { %v10809_v40 = vadd.f32 %v3287_v11, %v3275_v30  ;;  %v6825_v11 = vld [vmem:[%s11510_s9 + $0x2c8] sm:$0xf]  ;;  %v6954_v47 = vor.u32 %v7570_v29, %v6953_v28  ;;  %v7498_v49 = vld [vmem:[%s11510_s9 + $0x194] sm:$0xf0] }
 0x1be   :  { %4141 = vmatpush.bf16.msrb.mxu0 %v6550_v46  ;;  %4154 = vmatpush.bf16.msrb.mxu1 %v6678_v48  ;;  %v6611_v46 = vld [vmem:[%s11510_s9 + $0x130] sm:$0xf0]  ;;  %v7515_v48 = vld [vmem:[%s11510_s9 + $0x224] sm:$0xf]  ;;  %v6681_v39 = vld [vmem:[%s11510_s9 + $0x1a8] sm:$0xf] }
 0x1bf   :  { %v6742_v36 = vor.u32 %v7515_v48, %v6739_v1  ;;  %v7566_v48 = vld [vmem:[%s11510_s9 + $0x3b4] sm:$0xf0]  ;;  %v6793_v50 = vld [vmem:[%s11510_s9 + $0x288] sm:$0xf] }
 0x1c0   :  { %4167 = vmatpush.bf16.msrb.mxu2 %v6806_v51  ;;  %4180 = vmatpush.bf16.msrb.mxu3 %v6934_v32  ;;  %v6486_v51 = vor.u32 %v7451_v34, %v6483_v37  ;;  %v6614_v32 = vor.u32 %v7483_v45, %v6611_v46  ;;  %v7470_v34 = vld [vmem:[%s11510_s9 + $0xb4] sm:$0xf0]  ;;  %v6826_v37 = vor.u32 %v7538_v12, %v6825_v11  ;;  %v6937_v46 = vld [vmem:[%s11510_s9 + $0x3a8] sm:$0xf] }
 0x1c1   :  { %v7534_v45 = vld [vmem:[%s11510_s9 + $0x2b4] sm:$0xf0]  ;;  %v6889_v28 = vld [vmem:[%s11510_s9 + $0x348] sm:$0xf] }
 0x1c2   :  { %4142 = vmatpush.bf16.msrb.mxu0 %v6534_v58  ;;  %4155 = vmatpush.bf16.msrb.mxu1 %v6662_v56  ;;  %v6723_v58 = vld [vmem:[%s11510_s9 + $0x210] sm:$0xf0]  ;;  %v7543_v56 = vld [vmem:[%s11510_s9 + $0x304] sm:$0xf]  ;;  %v3276_v57 = vpop.f32.mrf.mxu2  ;;  %v3289_v59 = vpop.f32.mrf.mxu3  ;;  %v7526_v13 = vld [vmem:[%s11510_s9 + $0x274] sm:$0xf0] }
 0x1c3   :  { %v6521_v57 = vld [vmem:[%s11510_s9 + $0x68] sm:$0xf]  ;;  %v7462_v59 = vld [vmem:[%s11510_s9 + $0x74] sm:$0xf0] }
 0x1c4   :  { %4168 = vmatpush.bf16.msrb.mxu2 %v6790_v21  ;;  %4181 = vmatpush.bf16.msrb.mxu3 %v6918_v3  ;;  %v7478_v21 = vld [vmem:[%s11510_s9 + $0xf4] sm:$0xf0]  ;;  %v6713_v3 = vld [vmem:[%s11510_s9 + $0x1e8] sm:$0xf] }
 0x1c5   :  { %v6586_v19 = vor.u32 %v7478_v21, %v6585_v63  ;;  %v6714_v7 = vor.u32 %v7510_v4, %v6713_v3  ;;  %v6649_v4 = vld [vmem:[%s11510_s9 + $0x168] sm:$0xf]  ;;  %v7558_v60 = vld [vmem:[%s11510_s9 + $0x374] sm:$0xf0] }
 0x1c6   :  { %4143 = vmatpush.bf16.msrb.mxu0 %v6518_v17  ;;  %4156 = vmatpush.bf16.msrb.mxu1 %v6646_v18  ;;  %v6726_v17 = vor.u32 %v7511_v55, %v6723_v58  ;;  %v6854_v18 = vor.u32 %v7543_v56, %v6851_v61  ;;  %v7562_v55 = vld [vmem:[%s11510_s9 + $0x394] sm:$0xf0]  ;;  %v6538_v58 = vor.u32 %v7466_v62, %v6537_v2  ;;  %v6873_v2 = vld [vmem:[%s11510_s9 + $0x328] sm:$0xf] }
 0x1c7   :  { %v6666_v56 = vor.u32 %v7498_v49, %v6665_v52  ;;  %v7522_v12 = vld [vmem:[%s11510_s9 + $0x254] sm:$0xf0] }
 0x1c8   :  { %4169 = vmatpush.bf16.msrb.mxu2 %v6774_v22  ;;  %4182 = vmatpush.bf16.msrb.mxu3 %v6902_v24  ;;  %v6569_v22 = vld [vmem:[%s11510_s9 + $0xc8] sm:$0xf]  ;;  %v7474_v24 = vld [vmem:[%s11510_s9 + $0xd4] sm:$0xf0] }
 0x1c9   :  { %v6570_v30 = vor.u32 %v7474_v24, %v6569_v22  ;;  %v6906_v24 = vor.u32 %v7558_v60, %v6905_v15  ;;  %v7554_v29 = vld [vmem:[%s11510_s9 + $0x354] sm:$0xf0]  ;;  %v6843_v15 = vld [vmem:[%s11510_s9 + $0x2f8] sm:$0xf0]  ;;  %v7572_v60 = vld [vmem:[%s11510_s9 + $0x3ec] sm:$0xf] }
 0x1ca   :  { %4144 = vmatpush.bf16.msrb.mxu0 %v6502_v20  ;;  %4157 = vmatpush.bf16.msrb.mxu1 %v6630_v33  ;;  %v6698_v20 = vor.u32 %v7506_v27, %v6697_v26  ;;  %v6553_v33 = vld [vmem:[%s11510_s9 + $0xa8] sm:$0xf]  ;;  %v7550_v62 = vld [vmem:[%s11510_s9 + $0x334] sm:$0xf0] }
 0x1cb   :  { %v6554_v1 = vor.u32 %v7470_v34, %v6553_v33  ;;  %v6761_v26 = vld [vmem:[%s11510_s9 + $0x248] sm:$0xf]  ;;  %v7450_v49 = vld [vmem:[%s11510_s9 + $0x14] sm:$0xf0] }
 0x1cc   :  { %4170 = vmatpush.bf16.msrb.mxu2 %v6758_v41  ;;  %4183 = vmatpush.bf16.msrb.mxu3 %v6886_v42  ;;  %v7502_v41 = vld [vmem:[%s11510_s9 + $0x1b4] sm:$0xf0]  ;;  %v6809_v42 = vld [vmem:[%s11510_s9 + $0x2a8] sm:$0xf] }
 0x1cd   :  { %v6682_v8 = vor.u32 %v7502_v41, %v6681_v39  ;;  %v6489_v34 = vld [vmem:[%s11510_s9 + $0x28] sm:$0xf] }
 0x1ce   :  { %4145 = vmatpush.bf16.msrb.mxu0 %v6486_v51  ;;  %4158 = vmatpush.bf16.msrb.mxu1 %v6614_v32  ;;  %v6810_v51 = vor.u32 %v7534_v45, %v6809_v42  ;;  %v6938_v32 = vor.u32 %v7566_v48, %v6937_v46  ;;  %v6762_v42 = vor.u32 %v7522_v12, %v6761_v26  ;;  %v6617_v46 = vld [vmem:[%s11510_s9 + $0x128] sm:$0xf]  ;;  %v7486_v48 = vld [vmem:[%s11510_s9 + $0x134] sm:$0xf0]  ;;  %v7536_v12 = vld [vmem:[%s11510_s9 + $0x2cc] sm:$0xf] }
 0x1cf   :  { %v6890_v45 = vor.u32 %v7554_v29, %v6889_v28  ;;  %v6618_v52 = vor.u32 %v7486_v48, %v6617_v46  ;;  %v6827_v28 = vld [vmem:[%s11510_s9 + $0x2d8] sm:$0xf0]  ;;  %v7568_v29 = vld [vmem:[%s11510_s9 + $0x3cc] sm:$0xf] }
 0x1d0   :  { %4171 = vmatpush.bf16.msrb.mxu2 %v6742_v36  ;;  %4184 = vmatpush.bf16.msrb.mxu3 %v6870_v53  ;;  %v7530_v36 = vld [vmem:[%s11510_s9 + $0x294] sm:$0xf0]  ;;  %v6921_v53 = vld [vmem:[%s11510_s9 + $0x388] sm:$0xf]  ;;  %v7532_v46 = vld [vmem:[%s11510_s9 + $0x2ac] sm:$0xf] }
 0x1d1   :  { %v6794_v21 = vor.u32 %v7530_v36, %v6793_v50  ;;  %v6922_v3 = vor.u32 %v7562_v55, %v6921_v53  ;;  %v6601_v50 = vld [vmem:[%s11510_s9 + $0x108] sm:$0xf]  ;;  %v7482_v36 = vld [vmem:[%s11510_s9 + $0x114] sm:$0xf0]  ;;  %v6874_v55 = vor.u32 %v7550_v62, %v6873_v2  ;;  %v6811_v48 = vld [vmem:[%s11510_s9 + $0x2b8] sm:$0xf0] }
 0x1d2   :  { %4146 = vmatpush.bf16.msrb.mxu0 %v6470_v6  ;;  %4159 = vmatpush.bf16.msrb.mxu1 %v6598_v10  ;;  %v3300_v61 = vpop.f32.mrf.mxu0  ;;  %v3313_v63 = vpop.f32.mrf.mxu1  ;;  %v6777_v6 = vld [vmem:[%s11510_s9 + $0x268] sm:$0xf] }
 0x1d3   :  { %v3314_v10 = vadd.f32 %v3313_v63, %v3300_v61  ;;  %v6778_v22 = vor.u32 %v7526_v13, %v6777_v6  ;;  %v7546_v63 = vld [vmem:[%s11510_s9 + $0x314] sm:$0xf0]  ;;  %v7540_v6 = vld [vmem:[%s11510_s9 + $0x2ec] sm:$0xf]  ;;  %v6602_v13 = vor.u32 %v7482_v36, %v6601_v50  ;;  %v6667_v36 = vld [vmem:[%s11510_s9 + $0x198] sm:$0xf0] }
 0x1d4   :  { %4172 = vmatpush.bf16.msrb.mxu2 %v6726_v17  ;;  %4185 = vmatpush.bf16.msrb.mxu3 %v6854_v18  ;;  %v6522_v17 = vor.u32 %v7462_v59, %v6521_v57  ;;  %v6650_v18 = vor.u32 %v7494_v5, %v6649_v4  ;;  %v6857_v57 = vld [vmem:[%s11510_s9 + $0x308] sm:$0xf]  ;;  %v7508_v4 = vld [vmem:[%s11510_s9 + $0x1ec] sm:$0xf]  ;;  %v6715_v5 = vld [vmem:[%s11510_s9 + $0x1f8] sm:$0xf0] }
 0x1d5   :  { %4147 = vmatmul.bf16.vlgmr.msrb.gmra.mxu0 %v8912_v43  ;;  %4160 = vmatmul.bf16.vlgmr.msrb.gmra.mxu1 %v8929_v31  ;;  %v7496_v50 = vld [vmem:[%s11510_s9 + $0x18c] sm:$0xf] }
 0x1d6   :  { %4191 = vmatpush.bf16.msra.mxu0 %v6586_v19  ;;  %4204 = vmatpush.bf16.msra.mxu1 %v6714_v7  ;;  %v6505_v19 = vld [vmem:[%s11510_s9 + $0x48] sm:$0xf]  ;;  %v7458_v7 = vld [vmem:[%s11510_s9 + $0x54] sm:$0xf0] }
 0x1d7   :  { %4173 = vmatmul.bf16.vlgmr.msrb.gmra.mxu2 %v8916_v44  ;;  %4186 = vmatmul.bf16.vlgmr.msrb.gmra.mxu3 %v8933_v35 }
 0x1d8   :  { %4217 = vmatpush.bf16.msra.mxu2 %v6842_v14  ;;  %4230 = vmatpush.bf16.msra.mxu3 %v6970_v25  ;;  %v6633_v14 = vld [vmem:[%s11510_s9 + $0x148] sm:$0xf]  ;;  %v7490_v25 = vld [vmem:[%s11510_s9 + $0x154] sm:$0xf0] }
 0x1d9   :  { %v6634_v33 = vor.u32 %v7490_v25, %v6633_v14  ;;  %v6571_v14 = vld [vmem:[%s11510_s9 + $0xd8] sm:$0xf0]  ;;  %v6846_v25 = vor.u32 %v7540_v6, %v6843_v15  ;;  %v7492_v6 = vld [vmem:[%s11510_s9 + $0x16c] sm:$0xf] }
 0x1da   :  { %4192 = vmatpush.bf16.msra.mxu0 %v6570_v30  ;;  %4205 = vmatpush.bf16.msra.mxu1 %v6698_v20  ;;  %v3326_v27 = vpop.f32.mrf.mxu2  ;;  %v3339_v11 = vpop.f32.mrf.mxu3  ;;  %v6506_v20 = vor.u32 %v7458_v7, %v6505_v19  ;;  %v6858_v19 = vor.u32 %v7546_v63, %v6857_v57  ;;  %v6523_v63 = vld [vmem:[%s11510_s9 + $0x78] sm:$0xf0] }
 0x1db   :  { %v3327_v30 = vadd.f32 %v3326_v27, %v3314_v10  ;;  %v3315_v39 = vpop.f32.mrf.mxu1  ;;  %v7504_v27 = vld [vmem:[%s11510_s9 + $0x1cc] sm:$0xf] }
 0x1dc   :  { %4218 = vmatpush.bf16.msra.mxu2 %v6826_v37  ;;  %4231 = vmatpush.bf16.msra.mxu3 %v6954_v47  ;;  %v7454_v37 = vld [vmem:[%s11510_s9 + $0x34] sm:$0xf0]  ;;  %v3302_v47 = vpop.f32.mrf.mxu0 }
 0x1dd   :  { %v11007_v41 = vadd.f32 %v3339_v11, %v3327_v30  ;;  %v6699_v11 = vld [vmem:[%s11510_s9 + $0x1d8] sm:$0xf0]  ;;  %v6830_v47 = vor.u32 %v7536_v12, %v6827_v28 }
 0x1de   :  { %4193 = vmatpush.bf16.msra.mxu0 %v6554_v1  ;;  %4206 = vmatpush.bf16.msra.mxu1 %v6682_v8  ;;  %v6745_v1 = vld [vmem:[%s11510_s9 + $0x228] sm:$0xf]  ;;  %v7518_v8 = vld [vmem:[%s11510_s9 + $0x234] sm:$0xf0]  ;;  %v6955_v30 = vld [vmem:[%s11510_s9 + $0x3d8] sm:$0xf0] }
 0x1df   :  { %v6746_v53 = vor.u32 %v7518_v8, %v6745_v1  ;;  %v6958_v39 = vor.u32 %v7568_v29, %v6955_v30  ;;  %v7564_v1 = vld [vmem:[%s11510_s9 + $0x3ac] sm:$0xf]  ;;  %v6939_v8 = vld [vmem:[%s11510_s9 + $0x3b8] sm:$0xf0] }
 0x1e0   :  { %4219 = vmatpush.bf16.msra.mxu2 %v6810_v51  ;;  %4232 = vmatpush.bf16.msra.mxu3 %v6938_v32  ;;  %v6473_v51 = vld [vmem:[%s11510_s9 + $0x8] sm:$0xf]  ;;  %v6490_v32 = vor.u32 %v7454_v37, %v6489_v34  ;;  %v7468_v34 = vld [vmem:[%s11510_s9 + $0xac] sm:$0xf]  ;;  %v6555_v37 = vld [vmem:[%s11510_s9 + $0xb8] sm:$0xf0] }
 0x1e1   :  { %v6474_v10 = vor.u32 %v7450_v49, %v6473_v51  ;;  %v6558_v2 = vor.u32 %v7468_v34, %v6555_v37  ;;  %v7464_v51 = vld [vmem:[%s11510_s9 + $0x8c] sm:$0xf]  ;;  %v6942_v49 = vor.u32 %v7564_v1, %v6939_v8  ;;  %v6763_v29 = vld [vmem:[%s11510_s9 + $0x258] sm:$0xf0] }
 0x1e2   :  { %4194 = vmatpush.bf16.msra.mxu0 %v6538_v58  ;;  %4207 = vmatpush.bf16.msra.mxu1 %v6666_v56  ;;  %v6729_v58 = vld [vmem:[%s11510_s9 + $0x208] sm:$0xf]  ;;  %v7514_v56 = vld [vmem:[%s11510_s9 + $0x214] sm:$0xf0]  ;;  %v3328_v59 = vpop.f32.mrf.mxu2  ;;  %v3341_v61 = vpop.f32.mrf.mxu3  ;;  %v7552_v30 = vld [vmem:[%s11510_s9 + $0x34c] sm:$0xf] }
 0x1e3   :  { %v6670_v59 = vor.u32 %v7496_v50, %v6667_v36  ;;  %v7460_v61 = vld [vmem:[%s11510_s9 + $0x6c] sm:$0xf] }
 0x1e4   :  { %4220 = vmatpush.bf16.msra.mxu2 %v6794_v21  ;;  %4233 = vmatpush.bf16.msra.mxu3 %v6922_v3  ;;  %v7476_v21 = vld [vmem:[%s11510_s9 + $0xec] sm:$0xf]  ;;  %v6587_v3 = vld [vmem:[%s11510_s9 + $0xf8] sm:$0xf0] }
 0x1e5   :  { %v6590_v7 = vor.u32 %v7476_v21, %v6587_v3  ;;  %v7484_v8 = vld [vmem:[%s11510_s9 + $0x12c] sm:$0xf] }
 0x1e6   :  { %4195 = vmatpush.bf16.msra.mxu0 %v6522_v17  ;;  %4208 = vmatpush.bf16.msra.mxu1 %v6650_v18  ;;  %v6971_v17 = vld [vmem:[%s11510_s9 + $0x3f8] sm:$0xf0]  ;;  %v6730_v18 = vor.u32 %v7514_v56, %v6729_v58  ;;  %v7560_v58 = vld [vmem:[%s11510_s9 + $0x38c] sm:$0xf] }
 0x1e7   :  { %v6974_v26 = vor.u32 %v7572_v60, %v6971_v17  ;;  %v6923_v56 = vld [vmem:[%s11510_s9 + $0x398] sm:$0xf0]  ;;  %v7556_v17 = vld [vmem:[%s11510_s9 + $0x36c] sm:$0xf] }
 0x1e8   :  { %4221 = vmatpush.bf16.msra.mxu2 %v6778_v22  ;;  %4234 = vmatpush.bf16.msra.mxu3 %v6906_v24  ;;  %v6718_v22 = vor.u32 %v7508_v4, %v6715_v5  ;;  %v7472_v24 = vld [vmem:[%s11510_s9 + $0xcc] sm:$0xf]  ;;  %v6926_v5 = vor.u32 %v7560_v58, %v6923_v56  ;;  %v6779_v60 = vld [vmem:[%s11510_s9 + $0x278] sm:$0xf0] }
 0x1e9   :  { %v7448_v36 = vld [vmem:[%s11510_s9 + $0xc] sm:$0xf] }
 0x1ea   :  { %4196 = vmatpush.bf16.msra.mxu0 %v6506_v20  ;;  %4209 = vmatpush.bf16.msra.mxu1 %v6634_v33  ;;  %v6574_v20 = vor.u32 %v7472_v24, %v6571_v14  ;;  %v6702_v33 = vor.u32 %v7504_v27, %v6699_v11  ;;  %v6507_v24 = vld [vmem:[%s11510_s9 + $0x58] sm:$0xf0]  ;;  %v7520_v11 = vld [vmem:[%s11510_s9 + $0x24c] sm:$0xf] }
 0x1eb   :  { %v6635_v27 = vld [vmem:[%s11510_s9 + $0x158] sm:$0xf0] }
 0x1ec   :  { %4222 = vmatpush.bf16.msra.mxu2 %v6762_v42  ;;  %4235 = vmatpush.bf16.msra.mxu3 %v6890_v45  ;;  %v7500_v42 = vld [vmem:[%s11510_s9 + $0x1ac] sm:$0xf]  ;;  %v6683_v45 = vld [vmem:[%s11510_s9 + $0x1b8] sm:$0xf0] }
 0x1ed   :  { %v6686_v62 = vor.u32 %v7500_v42, %v6683_v45 }
 0x1ee   :  { %4197 = vmatpush.bf16.msra.mxu0 %v6490_v32  ;;  %4210 = vmatpush.bf16.msra.mxu1 %v6618_v52  ;;  %v6539_v32 = vld [vmem:[%s11510_s9 + $0x98] sm:$0xf0]  ;;  %v6814_v52 = vor.u32 %v7532_v46, %v6811_v48  ;;  %v6766_v48 = vor.u32 %v7520_v11, %v6763_v29  ;;  %v7704_v11 = vld [vmem:[%s11512_s11 + $0xc] sm:$0xf]  ;;  %v7718_v29 = vld [vmem:[%s11513_s12 + $0x34] sm:$0xf0] }
 0x1ef   :  { %v6542_v57 = vor.u32 %v7464_v51, %v6539_v32  ;;  %v6747_v51 = vld [vmem:[%s11510_s9 + $0x238] sm:$0xf0]  ;;  %v7548_v32 = vld [vmem:[%s11510_s9 + $0x32c] sm:$0xf] }
 0x1f0   :  { %4223 = vmatpush.bf16.msra.mxu2 %v6746_v53  ;;  %4236 = vmatpush.bf16.msra.mxu3 %v6874_v55  ;;  %v7528_v53 = vld [vmem:[%s11510_s9 + $0x28c] sm:$0xf]  ;;  %v6795_v55 = vld [vmem:[%s11510_s9 + $0x298] sm:$0xf0] }
 0x1f1   :  { %v6798_v4 = vor.u32 %v7528_v53, %v6795_v55  ;;  %v6475_v53 = vld [vmem:[%s11510_s9 + $0x18] sm:$0xf0]  ;;  %v7480_v55 = vld [vmem:[%s11510_s9 + $0x10c] sm:$0xf] }
 0x1f2   :  { %4198 = vmatpush.bf16.msra.mxu0 %v6474_v10  ;;  %4211 = vmatpush.bf16.msra.mxu1 %v6602_v13  ;;  %v3352_v21 = vpop.f32.mrf.mxu0  ;;  %v3365_v3 = vpop.f32.mrf.mxu1  ;;  %v6651_v10 = vld [vmem:[%s11510_s9 + $0x178] sm:$0xf0]  ;;  %v7524_v13 = vld [vmem:[%s11510_s9 + $0x26c] sm:$0xf] }
 0x1f3   :  { %v3366_v15 = vadd.f32 %v3365_v3, %v3352_v21  ;;  %v6782_v14 = vor.u32 %v7524_v13, %v6779_v60  ;;  %v7544_v3 = vld [vmem:[%s11510_s9 + $0x30c] sm:$0xf]  ;;  %v7003_v13 = vld [vmem:[%s11512_s11 + $0x38] sm:$0xf0] }
 0x1f4   :  { %4224 = vmatpush.bf16.msra.mxu2 %v6730_v18  ;;  %4237 = vmatpush.bf16.msra.mxu3 %v6858_v19  ;;  %v6907_v18 = vld [vmem:[%s11510_s9 + $0x378] sm:$0xf0]  ;;  %v6526_v19 = vor.u32 %v7460_v61, %v6523_v63 }
 0x1f5   :  { %4199 = vmatmul.bf16.vlgmr.msra.gmra.mxu0 %v8912_v43  ;;  %4212 = vmatmul.bf16.vlgmr.msra.gmra.mxu1 %v8929_v31  ;;  %v6731_v61 = vld [vmem:[%s11510_s9 + $0x218] sm:$0xf0] }
 0x1f6   :  { %4243 = vmatpush.bf16.msrb.mxu0 %v6590_v7  ;;  %4256 = vmatpush.bf16.msrb.mxu1 %v6718_v22  ;;  %v6654_v7 = vor.u32 %v7492_v6, %v6651_v10  ;;  %v7456_v22 = vld [vmem:[%s11510_s9 + $0x4c] sm:$0xf]  ;;  %v7710_v6 = vld [vmem:[%s11512_s11 + $0x34] sm:$0xf0] }
 0x1f7   :  { %4225 = vmatmul.bf16.vlgmr.msra.gmra.mxu2 %v8916_v44  ;;  %4238 = vmatmul.bf16.vlgmr.msra.gmra.mxu3 %v8933_v35  ;;  %v6510_v34 = vor.u32 %v7456_v22, %v6507_v24  ;;  %v7708_v10 = vld [vmem:[%s11512_s11 + $0x2c] sm:$0xf]  ;;  %v6993_v22 = vld [vmem:[%s11512_s11 + $0x20] sm:$0xf] }
 0x1f8   :  { %4269 = vmatpush.bf16.msrb.mxu2 %v6846_v25  ;;  %4282 = vmatpush.bf16.msrb.mxu3 %v6974_v26  ;;  %v6910_v25 = vor.u32 %v7556_v17, %v6907_v18  ;;  %v7488_v26 = vld [vmem:[%s11510_s9 + $0x14c] sm:$0xf] }
 0x1f9   :  { %v6638_v37 = vor.u32 %v7488_v26, %v6635_v27  ;;  %v7707_v26 = vld [vmem:[%s11512_s11 + $0x24] sm:$0xf]  ;;  %v6995_v27 = vld [vmem:[%s11512_s11 + $0x30] sm:$0xf0] }
 0x1fa   :  { %4244 = vmatpush.bf16.msrb.mxu0 %v6574_v20  ;;  %4257 = vmatpush.bf16.msrb.mxu1 %v6702_v33  ;;  %v3378_v12 = vpop.f32.mrf.mxu2  ;;  %v3391_v28 = vpop.f32.mrf.mxu3  ;;  %v6891_v20 = vld [vmem:[%s11510_s9 + $0x358] sm:$0xf0] }
 0x1fb   :  { %v3379_v33 = vadd.f32 %v3378_v12, %v3366_v15  ;;  %v3354_v42 = vpop.f32.mrf.mxu0  ;;  %v3367_v45 = vpop.f32.mrf.mxu1  ;;  %v6894_v1 = vor.u32 %v7552_v30, %v6891_v20  ;;  %v6478_v15 = vor.u32 %v7448_v36, %v6475_v53  ;;  %v6987_v12 = vld [vmem:[%s11512_s11 + $0x18] sm:$0xf0]  ;;  %v7716_v30 = vld [vmem:[%s11513_s12 + $0x2c] sm:$0xf]  ;;  %v7013_v53 = vld [vmem:[%s11513_s12] sm:$0xf] }
 0x1fc   :  { %4270 = vmatpush.bf16.msrb.mxu2 %v6830_v47  ;;  %4283 = vmatpush.bf16.msrb.mxu3 %v6958_v39  ;;  %v7452_v47 = vld [vmem:[%s11510_s9 + $0x2c] sm:$0xf]  ;;  %v6491_v39 = vld [vmem:[%s11510_s9 + $0x38] sm:$0xf0]  ;;  %v6990_v45 = vor.u32 %v7704_v11, %v6987_v12 }
 0x1fd   :  { %v11205_v46 = vadd.f32 %v3391_v28, %v3379_v33  ;;  %v7037_v28 = vld [vmem:[%s11513_s12 + $0x28] sm:$0xf]  ;;  %v7039_v20 = vld [vmem:[%s11513_s12 + $0x38] sm:$0xf0] }
 0x1fe   :  { %4245 = vmatpush.bf16.msrb.mxu0 %v6558_v2  ;;  %4258 = vmatpush.bf16.msrb.mxu1 %v6686_v62  ;;  %v6619_v2 = vld [vmem:[%s11510_s9 + $0x138] sm:$0xf0]  ;;  %v7516_v62 = vld [vmem:[%s11510_s9 + $0x22c] sm:$0xf] }
 0x1ff   :  { %v6622_v50 = vor.u32 %v7484_v8, %v6619_v2  ;;  %v6750_v58 = vor.u32 %v7516_v62, %v6747_v51  ;;  %v7029_v8 = vld [vmem:[%s11513_s12 + $0x20] sm:$0xf]  ;;  %v7038_v2 = vor.u32 %v7718_v29, %v7037_v28  ;;  %v7042_v62 = vor.u32 %v7716_v30, %v7039_v20  ;;  %v7717_v51 = vld [vmem:[%s11513_s12 + $0x2c] sm:$0xf0] }
 0x200   :  { %4271 = vmatpush.bf16.msrb.mxu2 %v6814_v52  ;;  %4284 = vmatpush.bf16.msrb.mxu3 %v6942_v49  ;;  %v6875_v52 = vld [vmem:[%s11510_s9 + $0x338] sm:$0xf0]  ;;  %v6494_v49 = vor.u32 %v7452_v47, %v6491_v39  ;;  %v7705_v47 = vld [vmem:[%s11512_s11 + $0xc] sm:$0xf0]  ;;  %v7703_v39 = vld [vmem:[%s11512_s11 + $0x4] sm:$0xf] }
 0x201   :  { %v6878_v56 = vor.u32 %v7548_v32, %v6875_v52  ;;  %v7715_v32 = vld [vmem:[%s11513_s12 + $0x24] sm:$0xf]  ;;  %v7031_v52 = vld [vmem:[%s11513_s12 + $0x30] sm:$0xf0] }
 0x202   :  { %4246 = vmatpush.bf16.msrb.mxu0 %v6542_v57  ;;  %4259 = vmatpush.bf16.msrb.mxu1 %v6670_v59  ;;  %v6603_v57 = vld [vmem:[%s11510_s9 + $0x118] sm:$0xf0]  ;;  %v7512_v59 = vld [vmem:[%s11510_s9 + $0x20c] sm:$0xf]  ;;  %v3380_v63 = vpop.f32.mrf.mxu2  ;;  %v3393_v21 = vpop.f32.mrf.mxu3 }
 0x203   :  { %v6606_v60 = vor.u32 %v7480_v55, %v6603_v57  ;;  %v6734_v17 = vor.u32 %v7512_v59, %v6731_v61  ;;  %v7711_v57 = vld [vmem:[%s11513_s12 + $0x4] sm:$0xf]  ;;  %v7015_v59 = vld [vmem:[%s11513_s12 + $0x10] sm:$0xf0] }
 0x204   :  { %4272 = vmatpush.bf16.msrb.mxu2 %v6798_v4  ;;  %4285 = vmatpush.bf16.msrb.mxu3 %v6926_v5  ;;  %v6859_v4 = vld [vmem:[%s11510_s9 + $0x318] sm:$0xf0]  ;;  %v7001_v5 = vld [vmem:[%s11512_s11 + $0x28] sm:$0xf]  ;;  %s4846_s9 = sshll.u32 %s11517_s16, 4  ;;  %s4847_s9 = int_to_ptr.hbm [resolvable:$true] %s4846_s9 }
 0x205   :  { %v6862_v18 = vor.u32 %v7544_v3, %v6859_v4  ;;  %v7002_v24 = vor.u32 %v7710_v6, %v7001_v5  ;;  %v7018_v3 = vor.u32 %v7711_v57, %v7015_v59  ;;  %v7740_v57 = vld [vmem:[%s11515_s14 + $0xa8] sm:$0xff] }
 0x206   :  { %4247 = vmatpush.bf16.msrb.mxu0 %v6526_v19  ;;  %4260 = vmatpush.bf16.msrb.mxu1 %v6654_v7  ;;  %v6985_v19 = vld [vmem:[%s11512_s11 + $0x8] sm:$0xf]  ;;  %v7706_v7 = vld [vmem:[%s11512_s11 + $0x14] sm:$0xf0] }
 0x207   :  { %v6986_v42 = vor.u32 %v7706_v7, %v6985_v19  ;;  %v7748_v59 = vld [vmem:[%s11515_s14 + $0xe8] sm:$0xff] }
 0x208   :  { %4273 = vmatpush.bf16.msrb.mxu2 %v6782_v14  ;;  %4286 = vmatpush.bf16.msrb.mxu3 %v6910_v25  ;;  %v7006_v14 = vor.u32 %v7708_v10, %v7003_v13  ;;  %v7709_v25 = vld [vmem:[%s11512_s11 + $0x2c] sm:$0xf0] }
 0x209   :  { %v6994_v33 = vor.u32 %v7709_v25, %v6993_v22 }
 0x20a   :  { %4248 = vmatpush.bf16.msrb.mxu0 %v6510_v34  ;;  %4261 = vmatpush.bf16.msrb.mxu1 %v6638_v37  ;;  %v6998_v34 = vor.u32 %v7707_v26, %v6995_v27  ;;  %v6977_v37 = vld [vmem:[%s11512_s11] sm:$0xf] }
 0x20c   :  { %4274 = vmatpush.bf16.msrb.mxu2 %v6766_v48  ;;  %4287 = vmatpush.bf16.msrb.mxu3 %v6894_v1  ;;  %v6979_v48 = vld [vmem:[%s11512_s11 + $0x10] sm:$0xf0]  ;;  %v7021_v1 = vld [vmem:[%s11513_s12 + $0x8] sm:$0xf] }
 0x20d   :  { %v6982_v36 = vor.u32 %v7703_v39, %v6979_v48 }
 0x20e   :  { %4249 = vmatpush.bf16.msrb.mxu0 %v6494_v49  ;;  %4262 = vmatpush.bf16.msrb.mxu1 %v6622_v50  ;;  %v7023_v49 = vld [vmem:[%s11513_s12 + $0x18] sm:$0xf0]  ;;  %v6978_v50 = vor.u32 %v7705_v47, %v6977_v37 }
 0x210   :  { %4275 = vmatpush.bf16.msrb.mxu2 %v6750_v58  ;;  %4288 = vmatpush.bf16.msrb.mxu3 %v6878_v56  ;;  %v7713_v56 = vld [vmem:[%s11513_s12 + $0xc] sm:$0xf0] }
 0x211   :  { %v7014_v21 = vor.u32 %v7713_v56, %v7013_v53  ;;  %v7731_v56 = vld [vmem:[%s11515_s14 + $0x60] sm:$0xff] }
 0x212   :  { %4250 = vmatpush.bf16.msrb.mxu0 %v6478_v15  ;;  %4263 = vmatpush.bf16.msrb.mxu1 %v6606_v60  ;;  %v3404_v61 = vpop.f32.mrf.mxu0  ;;  %v3417_v63 = vpop.f32.mrf.mxu1 }
 0x213   :  { %v3418_v4 = vadd.f32 %v3417_v63, %v3404_v61  ;;  %v7722_v61 = vld [vmem:[%s11515_s14 + $0x18] sm:$0xff] }
 0x214   :  { %4276 = vmatpush.bf16.msrb.mxu2 %v6734_v17  ;;  %4289 = vmatpush.bf16.msrb.mxu3 %v6862_v18  ;;  %v7730_v63 = vld [vmem:[%s11515_s14 + $0x58] sm:$0xff] }
 0x215   :  { %4251 = vmatmul.bf16.vlgmr.msrb.gmra.mxu0 %v8912_v43  ;;  %4264 = vmatmul.bf16.vlgmr.msrb.gmra.mxu1 %v8929_v31  ;;  %v7714_v43 = vld [vmem:[%s11513_s12 + $0x14] sm:$0xf0]  ;;  %v7712_v31 = vld [vmem:[%s11513_s12 + $0xc] sm:$0xf] }
 0x216   :  { %4349 = vmatpush.bf16.msra.mxu0 %v6994_v33  ;;  %4362 = vmatpush.bf16.msra.mxu1 %v6998_v34  ;;  %v7022_v55 = vor.u32 %v7714_v43, %v7021_v1  ;;  %v7026_v58 = vor.u32 %v7712_v31, %v7023_v49  ;;  %v7733_v43 = vld [vmem:[%s11515_s14 + $0x70] sm:$0xff]  ;;  %v7742_v31 = vld [vmem:[%s11515_s14 + $0xb8] sm:$0xff] }
 0x217   :  { %4277 = vmatmul.bf16.vlgmr.msrb.gmra.mxu2 %v8916_v44  ;;  %4290 = vmatmul.bf16.vlgmr.msrb.gmra.mxu3 %v8933_v35  ;;  %v7030_v44 = vor.u32 %v7717_v51, %v7029_v8  ;;  %v7034_v35 = vor.u32 %v7715_v32, %v7031_v52  ;;  %v7725_v52 = vld [vmem:[%s11515_s14 + $0x30] sm:$0xff]  ;;  %v7750_v49 = vld [vmem:[%s11515_s14 + $0xf8] sm:$0xff] }
 0x218   :  { %4375 = vmatpush.bf16.msra.mxu2 %v7002_v24  ;;  %4388 = vmatpush.bf16.msra.mxu3 %v7006_v14 }
 0x21a   :  { %4350 = vmatpush.bf16.msra.mxu0 %v6978_v50  ;;  %4363 = vmatpush.bf16.msra.mxu1 %v6982_v36  ;;  %v3430_v5 = vpop.f32.mrf.mxu2  ;;  %v3443_v10 = vpop.f32.mrf.mxu3  ;;  %v7724_v36 = vld [vmem:[%s11515_s14 + $0x28] sm:$0xff] }
 0x21b   :  { %v3431_v6 = vadd.f32 %v3430_v5, %v3418_v4  ;;  %v3406_v13 = vpop.f32.mrf.mxu0  ;;  %v3419_v60 = vpop.f32.mrf.mxu1  ;;  %v7721_v4 = vld [vmem:[%s11515_s14 + $0x10] sm:$0xff] }
 0x21c   :  { %4376 = vmatpush.bf16.msra.mxu2 %v6986_v42  ;;  %4389 = vmatpush.bf16.msra.mxu3 %v6990_v45  ;;  %v7729_v5 = vld [vmem:[%s11515_s14 + $0x50] sm:$0xff] }
 0x21d   :  { %v11349_v15 = vadd.f32 %v3443_v10, %v3431_v6  ;;  %v7738_v6 = vld [vmem:[%s11515_s14 + $0x98] sm:$0xff] }
 0x21e   :  { %4453 = vmatpush.bf16.msrb.mxu0 %v7030_v44  ;;  %4466 = vmatpush.bf16.msrb.mxu1 %v7034_v35  ;;  %v7732_v44 = vld [vmem:[%s11515_s14 + $0x68] sm:$0xff]  ;;  %v7741_v35 = vld [vmem:[%s11515_s14 + $0xb0] sm:$0xff]  ;;  %v7746_v10 = vld [vmem:[%s11515_s14 + $0xd8] sm:$0xff] }
 0x220   :  { %4479 = vmatpush.bf16.msrb.mxu2 %v7038_v2  ;;  %4492 = vmatpush.bf16.msrb.mxu3 %v7042_v62  ;;  %v7734_v2 = vld [vmem:[%s11515_s14 + $0x78] sm:$0xff] }
 0x222   :  { %4454 = vmatpush.bf16.msrb.mxu0 %v7014_v21  ;;  %4467 = vmatpush.bf16.msrb.mxu1 %v7018_v3  ;;  %v3432_v17 = vpop.f32.mrf.mxu2  ;;  %v3445_v18 = vpop.f32.mrf.mxu3  ;;  %v7739_v21 = vld [vmem:[%s11515_s14 + $0xa0] sm:$0xff] }
 0x223   :  { %v7747_v3 = vld [vmem:[%s11515_s14 + $0xe0] sm:$0xff]  ;;  %v7720_v17 = vld [vmem:[%s11515_s14 + $0x8] sm:$0xff] }
 0x224   :  { %4480 = vmatpush.bf16.msrb.mxu2 %v7022_v55  ;;  %4493 = vmatpush.bf16.msrb.mxu3 %v7026_v58  ;;  %v7749_v55 = vld [vmem:[%s11515_s14 + $0xf0] sm:$0xff]  ;;  %v7723_v58 = vld [vmem:[%s11515_s14 + $0x20] sm:$0xff]  ;;  %v7728_v18 = vld [vmem:[%s11515_s14 + $0x48] sm:$0xff] }
 0x225   :  { %7007 = vmatmul.msk.bf16.vlgmr.msra.gmra.mxu0 %vm57_vm0, %v9635_v23  ;;  %7008 = vmatmul.msk.bf16.vlgmr.msra.gmra.mxu1 %vm57_vm0, %v9635_v23 }
 0x226   :  { %4798 = vmatpush.bf16.msra.mxu1 %v7734_v2 }
 0x227   :  { %7009 = vmatmul.msk.bf16.vlgmr.msra.gmra.mxu2 %vm57_vm0, %v9635_v23  ;;  %7010 = vmatmul.msk.bf16.vlgmr.msra.gmra.mxu3 %vm57_vm0, %v9635_v23 }
 0x228   :  { %4811 = vmatpush.bf16.msra.mxu2 %v7742_v31  ;;  %4824 = vmatpush.bf16.msra.mxu3 %v7750_v49 }
 0x22a   :  { %4799 = vmatpush.bf16.msra.mxu1 %v7733_v43 }
 0x22c   :  { %4812 = vmatpush.bf16.msra.mxu2 %v7741_v35  ;;  %4825 = vmatpush.bf16.msra.mxu3 %v7749_v55 }
 0x22e   :  { %4800 = vmatpush.bf16.msra.mxu1 %v7732_v44 }
 0x230   :  { %4813 = vmatpush.bf16.msra.mxu2 %v7740_v57  ;;  %4826 = vmatpush.bf16.msra.mxu3 %v7748_v59 }
 0x232   :  { %v4096_v19 = vpop.f32.mrf.mxu0  ;;  %v4109_v22 = vpop.f32.mrf.mxu1  ;;  %4801 = vmatpush.bf16.msra.mxu1 %v7731_v56 }
 0x233   :  { %v4097_v7 = vadd.f32 %v4096_v19, %v10809_v40  ;;  %v7737_v19 = vld [vmem:[%s11515_s14 + $0x90] sm:$0xff] }
 0x234   :  { %4814 = vmatpush.bf16.msra.mxu2 %v7739_v21  ;;  %4827 = vmatpush.bf16.msra.mxu3 %v7747_v3 }
 0x235   :  { %7043 = vmatmul.msk.bf16.vlgmr.msrb.gmra.mxu0 %vm57_vm0, %v9744_v38  ;;  %7044 = vmatmul.msk.bf16.vlgmr.msrb.gmra.mxu1 %vm57_vm0, %v9744_v38  ;;  %v4110_v24 = vadd.f32 %v4109_v22, %v4097_v7  ;;  %v7745_v7 = vld [vmem:[%s11515_s14 + $0xd0] sm:$0xff]  ;;  %v7719_v22 = vld [vmem:[%s11515_s14] sm:$0xff] }
 0x236   :  { %4802 = vmatpush.bf16.msra.mxu1 %v7730_v63 }
 0x237   :  { %7045 = vmatmul.msk.bf16.vlgmr.msrb.gmra.mxu2 %vm57_vm0, %v9744_v38  ;;  %7046 = vmatmul.msk.bf16.vlgmr.msrb.gmra.mxu3 %vm57_vm0, %v9744_v38 }
 0x238   :  { %4815 = vmatpush.bf16.msra.mxu2 %v7738_v6  ;;  %4828 = vmatpush.bf16.msra.mxu3 %v7746_v10 }
 0x23a   :  { %v4122_v23 = vpop.f32.mrf.mxu2  ;;  %v4135_v25 = vpop.f32.mrf.mxu3  ;;  %4803 = vmatpush.bf16.msra.mxu1 %v7729_v5 }
 0x23b   :  { %v4123_v14 = vadd.f32 %v4122_v23, %v4110_v24  ;;  %v4098_v26 = vpop.f32.mrf.mxu0  ;;  %v4111_v11 = vpop.f32.mrf.mxu1  ;;  %v7727_v24 = vld [vmem:[%s11515_s14 + $0x40] sm:$0xff] }
 0x23c   :  { %4816 = vmatpush.bf16.msra.mxu2 %v7737_v19  ;;  %4829 = vmatpush.bf16.msra.mxu3 %v7745_v7  ;;  %v7744_v26 = vld [vmem:[%s11515_s14 + $0xc8] sm:$0xff] }
 0x23d   :  { %v11368_v27 = vadd.f32 %v4135_v25, %v4123_v14  ;;  %v7736_v25 = vld [vmem:[%s11515_s14 + $0x88] sm:$0xff] }
 0x23e   :  { %4804 = vmatpush.bf16.msra.mxu1 %v7728_v18 }
 0x240   :  { %4817 = vmatpush.bf16.msra.mxu2 %v7736_v25  ;;  %4830 = vmatpush.bf16.msra.mxu3 %v7744_v26 }
 0x242   :  { %v4124_v12 = vpop.f32.mrf.mxu2  ;;  %v4137_v28 = vpop.f32.mrf.mxu3  ;;  %4805 = vmatpush.bf16.msra.mxu1 %v7727_v24 }
 0x243   :  { %v7735_v28 = vld [vmem:[%s11515_s14 + $0x80] sm:$0xff] }
 0x244   :  { %4818 = vmatpush.bf16.msra.mxu2 %v7735_v28 }
 0x252   :  { %v4148_v29 = vpop.f32.mrf.mxu0  ;;  %v4161_v20 = vpop.f32.mrf.mxu1 }
 0x253   :  { %v4149_v30 = vadd.f32 %v4148_v29, %v11007_v41  ;;  %v7726_v41 = vld [vmem:[%s11515_s14 + $0x38] sm:$0xff]  ;;  %v7743_v29 = vld [vmem:[%s11515_s14 + $0xc0] sm:$0xff] }
 0x254   :  { %4785 = vmatpush.bf16.msra.mxu0 %v7726_v41  ;;  %4831 = vmatpush.bf16.msra.mxu3 %v7743_v29 }
 0x255   :  { %v4162_v33 = vadd.f32 %v4161_v20, %v4149_v30 }
 0x258   :  { %4786 = vmatpush.bf16.msra.mxu0 %v7725_v52 }
 0x25a   :  { %v4174_v38 = vpop.f32.mrf.mxu2  ;;  %v4187_v37 = vpop.f32.mrf.mxu3 }
 0x25b   :  { %v4175_v34 = vadd.f32 %v4174_v38, %v4162_v33  ;;  %v4150_v40 = vpop.f32.mrf.mxu0  ;;  %v4163_v39 = vpop.f32.mrf.mxu1 }
 0x25c   :  { %4787 = vmatpush.bf16.msra.mxu0 %v7724_v36 }
 0x25d   :  { %v11371_v47 = vadd.f32 %v4187_v37, %v4175_v34  ;;  %v2325_v34 = vld [vmem:[%s11509_s8] sm:$0xf] }
 0x25e   :  { %v2328_v41 = vperm.slane %v2325_v34, 1  ;;  %v2329_v56 = vperm.slane %v2325_v34, 2 }
 0x260   :  { %4788 = vmatpush.bf16.msra.mxu0 %v7723_v58  ;;  %v2336_v43 = vadd.f32 %v2328_v41, %v10626_v54  ;;  %v2337_v21 = vadd.f32 %v2329_v56, %v10680_v16 }
 0x262   :  { %v4176_v42 = vpop.f32.mrf.mxu2  ;;  %v4189_v45 = vpop.f32.mrf.mxu3 }
 0x263   :  { %v2327_v45 = vperm.slane %v2325_v34, 0 }
 0x264   :  { %4789 = vmatpush.bf16.msra.mxu0 %v7722_v61 }
 0x265   :  { %v2335_v52 = vadd.f32 %v2327_v45, %v10623_v9  ;;  %v2330_v9 = vperm.slane %v2325_v34, 3 }
 0x267   :  { %v2339_v59 = vmax.f32 %v2335_v52, 0.0  ;;  %v2338_v3 = vadd.f32 %v2330_v9, %v10683_v0 }
 0x268   :  { %4790 = vmatpush.bf16.msra.mxu0 %v7721_v4 }
 0x269   :  { %v2342_v16 = vmax.f32 %v2338_v3, 0.0 }
 0x26c   :  { %4791 = vmatpush.bf16.msra.mxu0 %v7720_v17 }
 0x270   :  { %4792 = vmatpush.bf16.msra.mxu0 %v7719_v22 }
 0x272   :  { %v11373_v48 = vpop.f32.mrf.mxu0  ;;  %v11375_v1 = vpop.f32.mrf.mxu1 }
 0x273   :  { %v4201_v2 = vadd.f32 %v11373_v48, %v11205_v46 }
 0x275   :  { %v4214_v31 = vadd.f32 %v11375_v1, %v4201_v2  ;;  %v2340_v1 = vmax.f32 %v2336_v43, 0.0 }
 0x27a   :  { %v11377_v8 = vpop.f32.mrf.mxu2  ;;  %v11385_v62 = vpop.f32.mrf.mxu3 }
 0x27b   :  { %v4202_v51 = vpop.f32.mrf.mxu0  ;;  %v4215_v32 = vpop.f32.mrf.mxu1 }
 0x27c   :  { %v4503_v32 = vld [vmem:[%s11514_s13] sm:$0xf] }
 0x27d   :  { %v4505_v46 = vperm.slane %v4503_v32, 0  ;;  %v4506_v48 = vperm.slane %v4503_v32, 1  ;;  %v4507_v10 = vperm.slane %v4503_v32, 2 }
 0x282   :  { %v4228_v50 = vpop.f32.mrf.mxu2  ;;  %v4241_v53 = vpop.f32.mrf.mxu3 }
 0x292   :  { %v4252_v13 = vpop.f32.mrf.mxu0  ;;  %v4265_v60 = vpop.f32.mrf.mxu1 }
 0x293   :  { %v4253_v51 = vadd.f32 %v4252_v13, %v11349_v15  ;;  %v4227_v15 = vadd.f32 %v11377_v8, %v4214_v31  ;;  %v4508_v13 = vperm.slane %v4503_v32, 3 }
 0x295   :  { %v4266_v49 = vadd.f32 %v4265_v60, %v4253_v51 }
 0x29a   :  { %v4278_v23 = vpop.f32.mrf.mxu2  ;;  %v4291_v14 = vpop.f32.mrf.mxu3 }
 0x29b   :  { %v4254_v11 = vpop.f32.mrf.mxu0  ;;  %v4267_v12 = vpop.f32.mrf.mxu1  ;;  %v4279_v53 = vadd.f32 %v4278_v23, %v4266_v49 }
 0x2a2   :  { %v4280_v30 = vpop.f32.mrf.mxu2  ;;  %v4293_v20 = vpop.f32.mrf.mxu3 }
 0x2a3   :  { %v4352_v33 = vpop.f32.mrf.mxu0  ;;  %v4365_v38 = vpop.f32.mrf.mxu1 }
 0x2a4   :  { %v4395_v50 = vadd.f32 %v4352_v33, %v11368_v27  ;;  %v4396_v36 = vadd.f32 %v4365_v38, %v11371_v47  ;;  %v4240_v27 = vadd.f32 %v11385_v62, %v4227_v15  ;;  %v4292_v47 = vadd.f32 %v4291_v14, %v4279_v53  ;;  %v7754_v33 = vld [vmem:[%s11516_s15] ss:$0 sm:$0xff] }
 0x2a5   :  { %v2341_v62 = vmax.f32 %v2337_v21, 0.0 }
 0x2aa   :  { %v4378_v37 = vpop.f32.mrf.mxu2  ;;  %v4391_v40 = vpop.f32.mrf.mxu3 }
 0x2ab   :  { %v4354_v39 = vpop.f32.mrf.mxu0  ;;  %v4367_v42 = vpop.f32.mrf.mxu1  ;;  %v4397_v5 = vadd.f32 %v4378_v37, %v4240_v27  ;;  %v4398_v6 = vadd.f32 %v4391_v40, %v4292_v47 }
 0x2b2   :  { %v4380_v44 = vpop.f32.mrf.mxu2  ;;  %v4393_v35 = vpop.f32.mrf.mxu3 }
 0x2b3   :  { %v4456_v55 = vpop.f32.mrf.mxu0  ;;  %v4469_v58 = vpop.f32.mrf.mxu1 }
 0x2b4   :  { %v4499_v57 = vadd.f32 %v4456_v55, %v4395_v50  ;;  %v4500_v54 = vadd.f32 %v4469_v58, %v4396_v36 }
 0x2b6   :  { %v4513_v61 = vadd.f32 %v4505_v46, %v4499_v57  ;;  %v4514_v63 = vadd.f32 %v4506_v48, %v4500_v54 }
 0x2b8   :  { %v4517_v4 = vadd.f32 %v4513_v61, %v2339_v59  ;;  %v4518_v8 = vadd.f32 %v4514_v63, %v2340_v1 }
 0x2ba   :  { %v4521_v60 = vpack.c.bf16 %v4517_v4, %v4517_v4  ;;  %v4522_v17 = vpack.c.bf16 %v4518_v8, %v4518_v8  ;;  %v4482_v18 = vpop.f32.mrf.mxu2  ;;  %v4495_v19 = vpop.f32.mrf.mxu3 }
 0x2bb   :  { %v4501_v7 = vadd.f32 %v4482_v18, %v4397_v5  ;;  %v4502_v22 = vadd.f32 %v4495_v19, %v4398_v6  ;;  %v4458_v24 = vpop.f32.mrf.mxu0  ;;  %v4471_v23 = vpop.f32.mrf.mxu1 }
 0x2bc   :  { %4793 = vmatmul.bf16.vlgmr.msra.gmra.mxu0 %v4521_v60  ;;  %4806 = vmatmul.bf16.vlgmr.msra.gmra.mxu1 %v4522_v17 }
 0x2bd   :  { %v4515_v14 = vadd.f32 %v4507_v10, %v4501_v7  ;;  %v4516_v0 = vadd.f32 %v4508_v13, %v4502_v22 }
 0x2bf   :  { %v4519_v25 = vadd.f32 %v4515_v14, %v2341_v62  ;;  %v4520_v26 = vadd.f32 %v4516_v0, %v2342_v16 }
 0x2c1   :  { %v4523_v11 = vpack.c.bf16 %v4519_v25, %v4519_v25  ;;  %v4524_v12 = vpack.c.bf16 %v4520_v26, %v4520_v26 }
 0x2c2   :  { %v4484_v28 = vpop.f32.mrf.mxu2  ;;  %v4497_v29 = vpop.f32.mrf.mxu3 }
 0x2c3   :  { %4819 = vmatmul.bf16.vlgmr.msra.gmra.mxu2 %v4523_v11  ;;  %4832 = vmatmul.bf16.vlgmr.msra.gmra.mxu3 %v4524_v12 }
 0x339   :  { %v4794_v30 = vpop.f32.mrf.mxu0  ;;  %v4807_v20 = vpop.f32.mrf.mxu1 }
 0x33a   :  { %v4795_v38 = vadd.f32 %v7754_v33, %v4794_v30 }
 0x33c   :  { %v4808_v40 = vadd.f32 %v4807_v20, %v4795_v38 }
 0x341   :  { %v4796_v34 = vpop.f32.mrf.mxu0  ;;  %v4809_v37 = vpop.f32.mrf.mxu1 }
 0x346   :  { %v4820_v39 = vpop.f32.mrf.mxu2  ;;  %v4833_v42 = vpop.f32.mrf.mxu3 }
 0x347   :  { %v4821_v45 = vadd.f32 %v4820_v39, %v4808_v40 }
 0x349   :  { %v4834_v41 = vadd.f32 %v4833_v42, %v4821_v45 }
 0x34b   :  { %4838 = vst.msk [vmem:[#allocation2] sm:$0x3] %vm4837_vm4, %v4834_v41 }
 0x34c   :  { %4849 = dma.vmem_to_hbm [thread:$0]  %s4845_s27, 32, %s4847_s9, [#allocation3]  }
 0x34e   :  { %v4822_v2 = vpop.f32.mrf.mxu2  ;;  %v4835_v51 = vpop.f32.mrf.mxu3 }
 0x34f   :  { %7783 = dma.done.wait [#allocation3], 32  }
 0x350   :  { %7784 = vsyncadd [#allocation3], 4294967264 }
 0x351   :  { %4854 = vsyncpa [#allocation3], 1 }

</bundles_post_ra>
